<compile_context>
chip_gen: v7x
topology: tpu7x:2x2x1
jax: 0.10.0
libtpu: 0.0.40
codegen_flags: <defaults>
</compile_context>

<pallas_src>
import functools

import jax
import jax.numpy as jnp
from jax.experimental import pallas as pl
from jax.experimental.pallas import tpu as pltpu


# ----------------------------------------------------------------------------
# 1-D bilinear interpolation matrix (align_corners=True), built in the wrapper.
# ----------------------------------------------------------------------------
def _interp_matrix(n_in: int, n_out: int) -> jnp.ndarray:
    if n_in == 1:
        return jnp.ones((n_out, 1), jnp.float32)
    i = jnp.arange(n_out, dtype=jnp.float32)
    src = i * (n_in - 1) / (n_out - 1)
    i0 = jnp.clip(jnp.floor(src).astype(jnp.int32), 0, n_in - 2)
    w1 = src - i0.astype(jnp.float32)
    w0 = 1.0 - w1
    m = (jax.nn.one_hot(i0, n_in, dtype=jnp.float32) * w0[:, None]
         + jax.nn.one_hot(i0 + 1, n_in, dtype=jnp.float32) * w1[:, None])
    return m


# ----------------------------------------------------------------------------
# Fused kernel: upsample + pad + concat + (conv3x3 + folded BN + ReLU) * 2
# ----------------------------------------------------------------------------
def _up_double_conv_kernel(
    x1_ref, x2_ref, mh_ref, mw_ref,
    w_skip_ref, w_up_ref, b1_ref, w2t_ref, b2_ref,
    o_ref,
    pad_skip, pad_up, pad_mid,
    *, H, W, hup, wup, off_y, off_x):
    f32 = jnp.float32

    # ---- bilinear upsample of x1 (align_corners=True), entirely in VMEM -----
    x1 = x1_ref[0]                                                 # (c1,hin,win)
    t = jnp.einsum("ih,chw->ciw", mh_ref[...], x1,
                   preferred_element_type=f32)
    up = jnp.einsum("jw,ciw->cij", mw_ref[...], t,
                    preferred_element_type=f32)                    # (c1,hup,wup)

    # ---- fused F.pad (size diff) + torch.cat + 3x3 halo pad ------------------
    # Re-zero every step: scratch persists across grid steps and a core may
    # start at program_id != 0 when the batch axis is core-sharded.
    pad_skip[...] = jnp.zeros_like(pad_skip)
    pad_up[...] = jnp.zeros_like(pad_up)
    pad_skip[1:H + 1, 1:W + 1, :] = (
        jnp.transpose(x2_ref[0], (1, 2, 0)).astype(pad_skip.dtype))
    pad_up[off_y:off_y + hup, off_x:off_x + wup, :] = (
        jnp.transpose(up, (1, 2, 0)).astype(pad_up.dtype))

    c_skip = pad_skip.shape[-1]
    c_up = pad_up.shape[-1]
    cmid = b1_ref.shape[1]
    cout = b2_ref.shape[0]

    # Hoist full weight slabs out of the tap loops (single VMEM load each).
    w_skip = w_skip_ref[...]                                       # (9,c2,cmid)
    w_up = w_up_ref[...]                                           # (9,c1,cmid)
    w2t = w2t_ref[...]                                             # (9,cout,cmid)

    # ---- conv1 (+folded BN) + ReLU: Cin contraction split into two groups ----
    # dx-major tap loop: the W (sublane) shift is done once per dx; the dy
    # slice only touches the untiled leading dim of the sliced value.
    acc1 = jnp.zeros((H * W, cmid), f32)
    for dx in range(3):
        col_s = pad_skip[:, dx:dx + W, :]                          # (H+2,W,c2)
        col_u = pad_up[:, dx:dx + W, :]                            # (H+2,W,c1)
        for dy in range(3):
            k = dy * 3 + dx
            t_skip = col_s[dy:dy + H].reshape(H * W, c_skip)
            t_up = col_u[dy:dy + H].reshape(H * W, c_up)
            acc1 = acc1 + jnp.dot(t_skip, w_skip[k],
                                  preferred_element_type=f32)
            acc1 = acc1 + jnp.dot(t_up, w_up[k],
                                  preferred_element_type=f32)
    y1 = jnp.maximum(acc1 + b1_ref[...], 0.0)                      # (H*W, cmid)

    # ---- conv2 (+folded BN) + ReLU, lane-dense (cout, H*W) output ------------
    pad_mid[...] = jnp.zeros_like(pad_mid)
    pad_mid[1:H + 1, 1:W + 1, :] = y1.reshape(H, W, cmid).astype(pad_mid.dtype)
    acc2 = jnp.zeros((cout, H * W), f32)
    dn = (((1,), (1,)), ((), ()))                                  # A @ B^T
    for dx in range(3):
        col = pad_mid[:, dx:dx + W, :]                             # (H+2,W,cmid)
        for dy in range(3):
            k = dy * 3 + dx
            tap = col[dy:dy + H].reshape(H * W, cmid)
            acc2 = acc2 + jax.lax.dot_general(w2t[k], tap, dn,
                                              preferred_element_type=f32)
    y2 = jnp.maximum(acc2 + b2_ref[...], 0.0)                      # (cout, H*W)
    o_ref[0] = y2.astype(o_ref.dtype)                              # lane-dense


# ----------------------------------------------------------------------------
# Parameters (deterministic synthetic init, BN scale folded into conv weights)
# ----------------------------------------------------------------------------
def make_up_params(key, in_channels, out_channels):
    eps = 1e-5
    mid = out_channels                      # DoubleConv default: mid = out
    c2 = in_channels // 2                   # skip-connection (x2) channels
    c1 = in_channels - c2                   # upsampled-path (x1) channels

    def conv_bn(k, cin, cout):
        kw, kb, kg, kbt = jax.random.split(k, 4)
        w = 0.1 * jax.random.normal(kw, (3, 3, cin, cout), jnp.float32)   # HWIO
        conv_b = 0.1 * jax.random.normal(kb, (cout,), jnp.float32)
        gamma = 1.0 + 0.1 * jax.random.normal(kg, (cout,), jnp.float32)
        beta = 0.1 * jax.random.normal(kbt, (cout,), jnp.float32)
        running_mean = jnp.zeros((cout,), jnp.float32)
        running_var = jnp.ones((cout,), jnp.float32)
        scale = gamma / jnp.sqrt(running_var + eps)
        bias = beta + (conv_b - running_mean) * scale
        w_fold = (w * scale[None, None, None, :]).astype(jnp.bfloat16)
        return w_fold, bias

    k1, k2 = jax.random.split(key)
    w1_fold, b1 = conv_bn(k1, in_channels, mid)
    w2_fold, b2 = conv_bn(k2, mid, out_channels)

    w1_taps = w1_fold.reshape(9, in_channels, mid)        # (tap, cin, cmid)
    return {
        "conv1": {
            "w_skip": w1_taps[:, :c2, :],                 # x2 channel group
            "w_up": w1_taps[:, c2:, :],                   # upsampled-x1 group
            "bias": b1.reshape(1, mid),
            "w_fold_hwio": w1_fold,                       # for the reference
        },
        "conv2": {
            "w_t": jnp.transpose(w2_fold, (0, 1, 3, 2)).reshape(
                9, out_channels, mid),                    # (tap, cout, cmid)
            "bias": b2.reshape(out_channels, 1),
            "w_fold_hwio": w2_fold,
        },
    }


# ----------------------------------------------------------------------------
# Up.forward  (inputs / outputs NCHW like PyTorch)
# ----------------------------------------------------------------------------
def up_forward(params, x1, x2):
    n, c1, hin, win = x1.shape
    n2, c2, H, W = x2.shape
    assert n2 == n
    hup, wup = 2 * hin, 2 * win
    diff_y, diff_x = H - hup, W - wup
    # TODO(synk): negative diff (crop) path of F.pad not supported here.
    assert diff_y >= 0 and diff_x >= 0
    cmid = params["conv1"]["bias"].shape[1]
    cout = params["conv2"]["bias"].shape[0]

    mh = _interp_matrix(hin, hup)
    mw = _interp_matrix(win, wup)

    kern = functools.partial(
        _up_double_conv_kernel, H=H, W=W, hup=hup, wup=wup,
        off_y=1 + diff_y // 2, off_x=1 + diff_x // 2)

    out_flat = pl.pallas_call(
        kern,
        out_shape=jax.ShapeDtypeStruct((n, cout, H * W), x2.dtype),
        grid=(n,),
        in_specs=[
            pl.BlockSpec((1, c1, hin, win), lambda i: (i, 0, 0, 0)),
            pl.BlockSpec((1, c2, H, W), lambda i: (i, 0, 0, 0)),
            pl.BlockSpec((hup, hin), lambda i: (0, 0)),
            pl.BlockSpec((wup, win), lambda i: (0, 0)),
            pl.BlockSpec((9, c2, cmid), lambda i: (0, 0, 0)),
            pl.BlockSpec((9, c1, cmid), lambda i: (0, 0, 0)),
            pl.BlockSpec((1, cmid), lambda i: (0, 0)),
            pl.BlockSpec((9, cout, cmid), lambda i: (0, 0, 0)),
            pl.BlockSpec((cout, 1), lambda i: (0, 0)),
        ],
        out_specs=pl.BlockSpec((1, cout, H * W), lambda i: (i, 0, 0)),
        scratch_shapes=[
            pltpu.VMEM((H + 2, W + 2, c2), jnp.bfloat16),    # skip group + halo
            pltpu.VMEM((H + 2, W + 2, c1), jnp.bfloat16),    # upsampled group
            pltpu.VMEM((H + 2, W + 2, cmid), jnp.bfloat16),  # conv1 -> conv2
        ],
        compiler_params=pltpu.CompilerParams(
            dimension_semantics=("parallel",),
            vmem_limit_bytes=32 * 1024 * 1024),
    )(x1, x2, mh, mw,
      params["conv1"]["w_skip"], params["conv1"]["w_up"],
      params["conv1"]["bias"],
      params["conv2"]["w_t"], params["conv2"]["bias"])

    # Free contiguous reshape of the lane-dense (n, cout, H*W) slab to NCHW.
    return out_flat.reshape(n, cout, H, W)


# ----------------------------------------------------------------------------
# Pure-JAX reference (mirrors the kernel's bf16 conv numerics)
# ----------------------------------------------------------------------------
def _ref_conv_bn_relu(x_nhwc, w_fold_hwio_bf16, bias):
    y = jax.lax.conv_general_dilated(
        x_nhwc.astype(jnp.bfloat16), w_fold_hwio_bf16,
        window_strides=(1, 1), padding="SAME",
        dimension_numbers=("NHWC", "HWIO", "NHWC"),
        preferred_element_type=jnp.float32)
    return jnp.maximum(y + bias.reshape(1, 1, 1, -1), 0.0)


def up_forward_ref(params, x1, x2):
    n, c1, hin, win = x1.shape
    H, W = x2.shape[2], x2.shape[3]
    hup, wup = 2 * hin, 2 * win
    mh = _interp_matrix(hin, hup)
    mw = _interp_matrix(win, wup)
    t = jnp.einsum("ih,nchw->nciw", mh, x1)
    x1u = jnp.einsum("jw,nciw->ncij", mw, t)
    dy, dx = H - hup, W - wup
    x1u = jnp.pad(x1u, ((0, 0), (0, 0),
                        (dy // 2, dy - dy // 2), (dx // 2, dx - dx // 2)))
    x = jnp.concatenate([x2, x1u], axis=1)
    x = jnp.transpose(x, (0, 2, 3, 1))                               # NHWC
    y = _ref_conv_bn_relu(x, params["conv1"]["w_fold_hwio"],
                          params["conv1"]["bias"])
    y = _ref_conv_bn_relu(y, params["conv2"]["w_fold_hwio"],
                          params["conv2"]["bias"])
    return jnp.transpose(y, (0, 3, 1, 2))                            # NCHW


if __name__ == "__main__":
    key = jax.random.PRNGKey(0)
    k_p, k_x1, k_x2 = jax.random.split(key, 3)

    batch = 2
    in_channels = 8          # channels after concat: 4 (x2) + 4 (upsampled x1)
    out_channels = 8
    h2 = w2 = 16

    # Up(x1, x2): x1 is the deeper (half-resolution) feature map.
    x1 = jax.random.normal(k_x1, (batch, in_channels // 2, h2 // 2, w2 // 2),
                           jnp.float32)
    x2 = jax.random.normal(k_x2, (batch, in_channels // 2, h2, w2), jnp.float32)

    params = make_up_params(k_p, in_channels, out_channels)

    out = jax.block_until_ready(up_forward(params, x1, x2))
    ref = jax.block_until_ready(up_forward_ref(params, x1, x2))

    assert out.shape == (batch, out_channels, h2, w2), out.shape
    err = float(jnp.max(jnp.abs(out - ref)))
    assert err < 2e-2, f"max |err| = {err}"      # bf16-matmul tolerance
    print("KERNEL_OK")
</pallas_src>

<mosaic_0001>
module attributes {stable_mosaic.version = 11 : i64} {
  func.func @_up_double_conv_kernel(%arg0: i32, %arg1: memref<1x4x8x8xf32, #tpu.memory_space<vmem>>, %arg2: memref<1x4x16x16xf32, #tpu.memory_space<vmem>>, %arg3: memref<16x8xf32, #tpu.memory_space<vmem>>, %arg4: memref<16x8xf32, #tpu.memory_space<vmem>>, %arg5: memref<9x4x8xbf16, #tpu.memory_space<vmem>>, %arg6: memref<9x4x8xbf16, #tpu.memory_space<vmem>>, %arg7: memref<1x8xf32, #tpu.memory_space<vmem>>, %arg8: memref<9x8x8xbf16, #tpu.memory_space<vmem>>, %arg9: memref<8x1xf32, #tpu.memory_space<vmem>>, %arg10: memref<1x8x256xf32, #tpu.memory_space<vmem>>, %arg11: memref<18x18x4xbf16, #tpu.memory_space<vmem>>, %arg12: memref<18x18x4xbf16, #tpu.memory_space<vmem>>, %arg13: memref<18x18x8xbf16, #tpu.memory_space<vmem>>) attributes {dimension_semantics = [#tpu.dimension_semantics<parallel>], iteration_bounds = array<i64: 2>, scalar_prefetch = 0 : i64, scratch_operands = 3 : i64, tpu.core_type = #tpu.core_type<tc>, window_params = [{transform_indices = @transform_0, window_bounds = array<i64: 1, 4, 8, 8>}, {transform_indices = @transform_1, window_bounds = array<i64: 1, 4, 16, 16>}, {pipeline_mode = #tpu.pipeline_mode<synchronous>, transform_indices = @transform_2, window_bounds = array<i64: 16, 8>}, {pipeline_mode = #tpu.pipeline_mode<synchronous>, transform_indices = @transform_3, window_bounds = array<i64: 16, 8>}, {pipeline_mode = #tpu.pipeline_mode<synchronous>, transform_indices = @transform_4, window_bounds = array<i64: 9, 4, 8>}, {pipeline_mode = #tpu.pipeline_mode<synchronous>, transform_indices = @transform_5, window_bounds = array<i64: 9, 4, 8>}, {pipeline_mode = #tpu.pipeline_mode<synchronous>, transform_indices = @transform_6, window_bounds = array<i64: 1, 8>}, {pipeline_mode = #tpu.pipeline_mode<synchronous>, transform_indices = @transform_7, window_bounds = array<i64: 9, 8, 8>}, {pipeline_mode = #tpu.pipeline_mode<synchronous>, transform_indices = @transform_8, window_bounds = array<i64: 8, 1>}, {transform_indices = @transform_9, window_bounds = array<i64: 1, 8, 256>}]} {
    %c0 = arith.constant 0 : index
    %c0_0 = arith.constant 0 : index
    %c0_1 = arith.constant 0 : index
    %c0_2 = arith.constant 0 : index
    %0 = vector.load %arg1[%c0, %c0_0, %c0_1, %c0_2] : memref<1x4x8x8xf32, #tpu.memory_space<vmem>>, vector<1x4x8x8xf32>
    %1 = vector.shape_cast %0 : vector<1x4x8x8xf32> to vector<4x8x8xf32>
    %c0_3 = arith.constant 0 : index
    %c0_4 = arith.constant 0 : index
    %2 = vector.load %arg3[%c0_3, %c0_4] : memref<16x8xf32, #tpu.memory_space<vmem>>, vector<16x8xf32>
    "tpu.trace_start"() <{level = 10 : i32, message = "ih,chw->ciw"}> : () -> ()
    %cst = arith.constant dense<0.000000e+00> : vector<4x8x16xf32>
    %3 = tpu.matmul %1, %2, %cst {dimension_numbers = #tpu.dot_dimension_numbers<[1], [1], [0, 2], [0], [0, 0, 0, 2, 1, 0], [], []>} : vector<4x8x8xf32>, vector<16x8xf32>, vector<4x8x16xf32> -> vector<4x8x16xf32>
    %4 = tpu.transpose %3, [0, 2, 1] : vector<4x8x16xf32> -> vector<4x16x8xf32>
    "tpu.trace_stop"() : () -> ()
    %c0_5 = arith.constant 0 : index
    %c0_6 = arith.constant 0 : index
    %5 = vector.load %arg4[%c0_5, %c0_6] : memref<16x8xf32, #tpu.memory_space<vmem>>, vector<16x8xf32>
    "tpu.trace_start"() <{level = 10 : i32, message = "jw,ciw->cij"}> : () -> ()
    %cst_7 = arith.constant dense<0.000000e+00> : vector<4x16x16xf32>
    %6 = tpu.matmul %4, %5, %cst_7 {dimension_numbers = #tpu.dot_dimension_numbers<[2], [1], [0, 1], [0], [0, 0, 0, 1, 1, 0], [], []>} : vector<4x16x8xf32>, vector<16x8xf32>, vector<4x16x16xf32> -> vector<4x16x16xf32>
    %cst_8 = arith.constant 0.000000e+00 : bf16
    "tpu.trace_stop"() : () -> ()
    %7 = vector.broadcast %cst_8 : bf16 to vector<18x18x4xbf16>
    %c0_9 = arith.constant 0 : index
    %c0_10 = arith.constant 0 : index
    %c0_11 = arith.constant 0 : index
    %8 = vector.load %arg11[%c0_9, %c0_10, %c0_11] : memref<18x18x4xbf16, #tpu.memory_space<vmem>>, vector<18x18x4xbf16>
    tpu.vector_store %arg11[%c0_9, %c0_10, %c0_11], %7 {strides = array<i32>} : memref<18x18x4xbf16, #tpu.memory_space<vmem>>, vector<18x18x4xbf16>,
    %cst_12 = arith.constant 0.000000e+00 : bf16
    %9 = vector.broadcast %cst_12 : bf16 to vector<18x18x4xbf16>
    %c0_13 = arith.constant 0 : index
    %c0_14 = arith.constant 0 : index
    %c0_15 = arith.constant 0 : index
    %10 = vector.load %arg12[%c0_13, %c0_14, %c0_15] : memref<18x18x4xbf16, #tpu.memory_space<vmem>>, vector<18x18x4xbf16>
    tpu.vector_store %arg12[%c0_13, %c0_14, %c0_15], %9 {strides = array<i32>} : memref<18x18x4xbf16, #tpu.memory_space<vmem>>, vector<18x18x4xbf16>,
    %c0_16 = arith.constant 0 : index
    %c0_17 = arith.constant 0 : index
    %c0_18 = arith.constant 0 : index
    %c0_19 = arith.constant 0 : index
    %11 = vector.load %arg2[%c0_16, %c0_17, %c0_18, %c0_19] : memref<1x4x16x16xf32, #tpu.memory_space<vmem>>, vector<1x4x16x16xf32>
    %12 = vector.shape_cast %11 : vector<1x4x16x16xf32> to vector<4x16x16xf32>
    %13 = tpu.transpose %12, [1, 2, 0] : vector<4x16x16xf32> -> vector<16x16x4xf32>
    %14 = arith.truncf %13 : vector<16x16x4xf32> to vector<16x16x4xbf16>
    %c1 = arith.constant 1 : index
    %c1_20 = arith.constant 1 : index
    %c0_21 = arith.constant 0 : index
    %15 = vector.load %arg11[%c1, %c1_20, %c0_21] : memref<18x18x4xbf16, #tpu.memory_space<vmem>>, vector<16x16x4xbf16>
    tpu.vector_store %arg11[%c1, %c1_20, %c0_21], %14 {strides = array<i32>} : memref<18x18x4xbf16, #tpu.memory_space<vmem>>, vector<16x16x4xbf16>,
    %16 = tpu.transpose %6, [1, 2, 0] : vector<4x16x16xf32> -> vector<16x16x4xf32>
    %17 = arith.truncf %16 : vector<16x16x4xf32> to vector<16x16x4xbf16>
    %c1_22 = arith.constant 1 : index
    %c1_23 = arith.constant 1 : index
    %c0_24 = arith.constant 0 : index
    %18 = vector.load %arg12[%c1_22, %c1_23, %c0_24] : memref<18x18x4xbf16, #tpu.memory_space<vmem>>, vector<16x16x4xbf16>
    tpu.vector_store %arg12[%c1_22, %c1_23, %c0_24], %17 {strides = array<i32>} : memref<18x18x4xbf16, #tpu.memory_space<vmem>>, vector<16x16x4xbf16>,
    %c0_25 = arith.constant 0 : index
    %c0_26 = arith.constant 0 : index
    %c0_27 = arith.constant 0 : index
    %19 = vector.load %arg5[%c0_25, %c0_26, %c0_27] : memref<9x4x8xbf16, #tpu.memory_space<vmem>>, vector<9x4x8xbf16>
    %c0_28 = arith.constant 0 : index
    %c0_29 = arith.constant 0 : index
    %c0_30 = arith.constant 0 : index
    %20 = vector.load %arg6[%c0_28, %c0_29, %c0_30] : memref<9x4x8xbf16, #tpu.memory_space<vmem>>, vector<9x4x8xbf16>
    %c0_31 = arith.constant 0 : index
    %c0_32 = arith.constant 0 : index
    %c0_33 = arith.constant 0 : index
    %21 = vector.load %arg8[%c0_31, %c0_32, %c0_33] : memref<9x8x8xbf16, #tpu.memory_space<vmem>>, vector<9x8x8xbf16>
    %cst_34 = arith.constant 0.000000e+00 : f32
    %22 = vector.broadcast %cst_34 : f32 to vector<256x8xf32>
    %c0_35 = arith.constant 0 : index
    %c0_36 = arith.constant 0 : index
    %c0_37 = arith.constant 0 : index
    %23 = vector.load %arg11[%c0_35, %c0_36, %c0_37] : memref<18x18x4xbf16, #tpu.memory_space<vmem>>, vector<18x16x4xbf16>
    %c0_38 = arith.constant 0 : index
    %c0_39 = arith.constant 0 : index
    %c0_40 = arith.constant 0 : index
    %24 = vector.load %arg12[%c0_38, %c0_39, %c0_40] : memref<18x18x4xbf16, #tpu.memory_space<vmem>>, vector<18x16x4xbf16>
    %25 = vector.extract_strided_slice %23 {offsets = [0, 0, 0], sizes = [16, 16, 4], strides = [1, 1, 1]} : vector<18x16x4xbf16> to vector<16x16x4xbf16>
    %26 = vector.shape_cast %25 : vector<16x16x4xbf16> to vector<256x4xbf16>
    %27 = vector.extract_strided_slice %24 {offsets = [0, 0, 0], sizes = [16, 16, 4], strides = [1, 1, 1]} : vector<18x16x4xbf16> to vector<16x16x4xbf16>
    %28 = vector.shape_cast %27 : vector<16x16x4xbf16> to vector<256x4xbf16>
    %29 = vector.extract_strided_slice %19 {offsets = [0, 0, 0], sizes = [1, 4, 8], strides = [1, 1, 1]} : vector<9x4x8xbf16> to vector<1x4x8xbf16>
    %30 = vector.shape_cast %29 : vector<1x4x8xbf16> to vector<4x8xbf16>
    %cst_41 = arith.constant dense<0.000000e+00> : vector<256x8xf32>
    %31 = tpu.matmul %26, %30, %cst_41 {dimension_numbers = #tpu.dot_dimension_numbers<[1], [0], [0], [1], [0, 0, 1, 1], [], []>} : vector<256x4xbf16>, vector<4x8xbf16>, vector<256x8xf32> -> vector<256x8xf32>
    %32 = arith.addf %22, %31 : vector<256x8xf32>
    %33 = vector.extract_strided_slice %20 {offsets = [0, 0, 0], sizes = [1, 4, 8], strides = [1, 1, 1]} : vector<9x4x8xbf16> to vector<1x4x8xbf16>
    %34 = vector.shape_cast %33 : vector<1x4x8xbf16> to vector<4x8xbf16>
    %cst_42 = arith.constant dense<0.000000e+00> : vector<256x8xf32>
    %35 = tpu.matmul %28, %34, %cst_42 {dimension_numbers = #tpu.dot_dimension_numbers<[1], [0], [0], [1], [0, 0, 1, 1], [], []>} : vector<256x4xbf16>, vector<4x8xbf16>, vector<256x8xf32> -> vector<256x8xf32>
    %36 = arith.addf %32, %35 : vector<256x8xf32>
    %37 = vector.extract_strided_slice %23 {offsets = [1, 0, 0], sizes = [16, 16, 4], strides = [1, 1, 1]} : vector<18x16x4xbf16> to vector<16x16x4xbf16>
    %38 = vector.shape_cast %37 : vector<16x16x4xbf16> to vector<256x4xbf16>
    %39 = vector.extract_strided_slice %24 {offsets = [1, 0, 0], sizes = [16, 16, 4], strides = [1, 1, 1]} : vector<18x16x4xbf16> to vector<16x16x4xbf16>
    %40 = vector.shape_cast %39 : vector<16x16x4xbf16> to vector<256x4xbf16>
    %41 = vector.extract_strided_slice %19 {offsets = [3, 0, 0], sizes = [1, 4, 8], strides = [1, 1, 1]} : vector<9x4x8xbf16> to vector<1x4x8xbf16>
    %42 = vector.shape_cast %41 : vector<1x4x8xbf16> to vector<4x8xbf16>
    %cst_43 = arith.constant dense<0.000000e+00> : vector<256x8xf32>
    %43 = tpu.matmul %38, %42, %cst_43 {dimension_numbers = #tpu.dot_dimension_numbers<[1], [0], [0], [1], [0, 0, 1, 1], [], []>} : vector<256x4xbf16>, vector<4x8xbf16>, vector<256x8xf32> -> vector<256x8xf32>
    %44 = arith.addf %36, %43 : vector<256x8xf32>
    %45 = vector.extract_strided_slice %20 {offsets = [3, 0, 0], sizes = [1, 4, 8], strides = [1, 1, 1]} : vector<9x4x8xbf16> to vector<1x4x8xbf16>
    %46 = vector.shape_cast %45 : vector<1x4x8xbf16> to vector<4x8xbf16>
    %cst_44 = arith.constant dense<0.000000e+00> : vector<256x8xf32>
    %47 = tpu.matmul %40, %46, %cst_44 {dimension_numbers = #tpu.dot_dimension_numbers<[1], [0], [0], [1], [0, 0, 1, 1], [], []>} : vector<256x4xbf16>, vector<4x8xbf16>, vector<256x8xf32> -> vector<256x8xf32>
    %48 = arith.addf %44, %47 : vector<256x8xf32>
    %49 = vector.extract_strided_slice %23 {offsets = [2, 0, 0], sizes = [16, 16, 4], strides = [1, 1, 1]} : vector<18x16x4xbf16> to vector<16x16x4xbf16>
    %50 = vector.shape_cast %49 : vector<16x16x4xbf16> to vector<256x4xbf16>
    %51 = vector.extract_strided_slice %24 {offsets = [2, 0, 0], sizes = [16, 16, 4], strides = [1, 1, 1]} : vector<18x16x4xbf16> to vector<16x16x4xbf16>
    %52 = vector.shape_cast %51 : vector<16x16x4xbf16> to vector<256x4xbf16>
    %53 = vector.extract_strided_slice %19 {offsets = [6, 0, 0], sizes = [1, 4, 8], strides = [1, 1, 1]} : vector<9x4x8xbf16> to vector<1x4x8xbf16>
    %54 = vector.shape_cast %53 : vector<1x4x8xbf16> to vector<4x8xbf16>
    %cst_45 = arith.constant dense<0.000000e+00> : vector<256x8xf32>
    %55 = tpu.matmul %50, %54, %cst_45 {dimension_numbers = #tpu.dot_dimension_numbers<[1], [0], [0], [1], [0, 0, 1, 1], [], []>} : vector<256x4xbf16>, vector<4x8xbf16>, vector<256x8xf32> -> vector<256x8xf32>
    %56 = arith.addf %48, %55 : vector<256x8xf32>
    %57 = vector.extract_strided_slice %20 {offsets = [6, 0, 0], sizes = [1, 4, 8], strides = [1, 1, 1]} : vector<9x4x8xbf16> to vector<1x4x8xbf16>
    %58 = vector.shape_cast %57 : vector<1x4x8xbf16> to vector<4x8xbf16>
    %cst_46 = arith.constant dense<0.000000e+00> : vector<256x8xf32>
    %59 = tpu.matmul %52, %58, %cst_46 {dimension_numbers = #tpu.dot_dimension_numbers<[1], [0], [0], [1], [0, 0, 1, 1], [], []>} : vector<256x4xbf16>, vector<4x8xbf16>, vector<256x8xf32> -> vector<256x8xf32>
    %60 = arith.addf %56, %59 : vector<256x8xf32>
    %c0_47 = arith.constant 0 : index
    %c1_48 = arith.constant 1 : index
    %c0_49 = arith.constant 0 : index
    %61 = vector.load %arg11[%c0_47, %c1_48, %c0_49] : memref<18x18x4xbf16, #tpu.memory_space<vmem>>, vector<18x16x4xbf16>
    %c0_50 = arith.constant 0 : index
    %c1_51 = arith.constant 1 : index
    %c0_52 = arith.constant 0 : index
    %62 = vector.load %arg12[%c0_50, %c1_51, %c0_52] : memref<18x18x4xbf16, #tpu.memory_space<vmem>>, vector<18x16x4xbf16>
    %63 = vector.extract_strided_slice %61 {offsets = [0, 0, 0], sizes = [16, 16, 4], strides = [1, 1, 1]} : vector<18x16x4xbf16> to vector<16x16x4xbf16>
    %64 = vector.shape_cast %63 : vector<16x16x4xbf16> to vector<256x4xbf16>
    %65 = vector.extract_strided_slice %62 {offsets = [0, 0, 0], sizes = [16, 16, 4], strides = [1, 1, 1]} : vector<18x16x4xbf16> to vector<16x16x4xbf16>
    %66 = vector.shape_cast %65 : vector<16x16x4xbf16> to vector<256x4xbf16>
    %67 = vector.extract_strided_slice %19 {offsets = [1, 0, 0], sizes = [1, 4, 8], strides = [1, 1, 1]} : vector<9x4x8xbf16> to vector<1x4x8xbf16>
    %68 = vector.shape_cast %67 : vector<1x4x8xbf16> to vector<4x8xbf16>
    %cst_53 = arith.constant dense<0.000000e+00> : vector<256x8xf32>
    %69 = tpu.matmul %64, %68, %cst_53 {dimension_numbers = #tpu.dot_dimension_numbers<[1], [0], [0], [1], [0, 0, 1, 1], [], []>} : vector<256x4xbf16>, vector<4x8xbf16>, vector<256x8xf32> -> vector<256x8xf32>
    %70 = arith.addf %60, %69 : vector<256x8xf32>
    %71 = vector.extract_strided_slice %20 {offsets = [1, 0, 0], sizes = [1, 4, 8], strides = [1, 1, 1]} : vector<9x4x8xbf16> to vector<1x4x8xbf16>
    %72 = vector.shape_cast %71 : vector<1x4x8xbf16> to vector<4x8xbf16>
    %cst_54 = arith.constant dense<0.000000e+00> : vector<256x8xf32>
    %73 = tpu.matmul %66, %72, %cst_54 {dimension_numbers = #tpu.dot_dimension_numbers<[1], [0], [0], [1], [0, 0, 1, 1], [], []>} : vector<256x4xbf16>, vector<4x8xbf16>, vector<256x8xf32> -> vector<256x8xf32>
    %74 = arith.addf %70, %73 : vector<256x8xf32>
    %75 = vector.extract_strided_slice %61 {offsets = [1, 0, 0], sizes = [16, 16, 4], strides = [1, 1, 1]} : vector<18x16x4xbf16> to vector<16x16x4xbf16>
    %76 = vector.shape_cast %75 : vector<16x16x4xbf16> to vector<256x4xbf16>
    %77 = vector.extract_strided_slice %62 {offsets = [1, 0, 0], sizes = [16, 16, 4], strides = [1, 1, 1]} : vector<18x16x4xbf16> to vector<16x16x4xbf16>
    %78 = vector.shape_cast %77 : vector<16x16x4xbf16> to vector<256x4xbf16>
    %79 = vector.extract_strided_slice %19 {offsets = [4, 0, 0], sizes = [1, 4, 8], strides = [1, 1, 1]} : vector<9x4x8xbf16> to vector<1x4x8xbf16>
    %80 = vector.shape_cast %79 : vector<1x4x8xbf16> to vector<4x8xbf16>
    %cst_55 = arith.constant dense<0.000000e+00> : vector<256x8xf32>
    %81 = tpu.matmul %76, %80, %cst_55 {dimension_numbers = #tpu.dot_dimension_numbers<[1], [0], [0], [1], [0, 0, 1, 1], [], []>} : vector<256x4xbf16>, vector<4x8xbf16>, vector<256x8xf32> -> vector<256x8xf32>
    %82 = arith.addf %74, %81 : vector<256x8xf32>
    %83 = vector.extract_strided_slice %20 {offsets = [4, 0, 0], sizes = [1, 4, 8], strides = [1, 1, 1]} : vector<9x4x8xbf16> to vector<1x4x8xbf16>
    %84 = vector.shape_cast %83 : vector<1x4x8xbf16> to vector<4x8xbf16>
    %cst_56 = arith.constant dense<0.000000e+00> : vector<256x8xf32>
    %85 = tpu.matmul %78, %84, %cst_56 {dimension_numbers = #tpu.dot_dimension_numbers<[1], [0], [0], [1], [0, 0, 1, 1], [], []>} : vector<256x4xbf16>, vector<4x8xbf16>, vector<256x8xf32> -> vector<256x8xf32>
    %86 = arith.addf %82, %85 : vector<256x8xf32>
    %87 = vector.extract_strided_slice %61 {offsets = [2, 0, 0], sizes = [16, 16, 4], strides = [1, 1, 1]} : vector<18x16x4xbf16> to vector<16x16x4xbf16>
    %88 = vector.shape_cast %87 : vector<16x16x4xbf16> to vector<256x4xbf16>
    %89 = vector.extract_strided_slice %62 {offsets = [2, 0, 0], sizes = [16, 16, 4], strides = [1, 1, 1]} : vector<18x16x4xbf16> to vector<16x16x4xbf16>
    %90 = vector.shape_cast %89 : vector<16x16x4xbf16> to vector<256x4xbf16>
    %91 = vector.extract_strided_slice %19 {offsets = [7, 0, 0], sizes = [1, 4, 8], strides = [1, 1, 1]} : vector<9x4x8xbf16> to vector<1x4x8xbf16>
    %92 = vector.shape_cast %91 : vector<1x4x8xbf16> to vector<4x8xbf16>
    %cst_57 = arith.constant dense<0.000000e+00> : vector<256x8xf32>
    %93 = tpu.matmul %88, %92, %cst_57 {dimension_numbers = #tpu.dot_dimension_numbers<[1], [0], [0], [1], [0, 0, 1, 1], [], []>} : vector<256x4xbf16>, vector<4x8xbf16>, vector<256x8xf32> -> vector<256x8xf32>
    %94 = arith.addf %86, %93 : vector<256x8xf32>
    %95 = vector.extract_strided_slice %20 {offsets = [7, 0, 0], sizes = [1, 4, 8], strides = [1, 1, 1]} : vector<9x4x8xbf16> to vector<1x4x8xbf16>
    %96 = vector.shape_cast %95 : vector<1x4x8xbf16> to vector<4x8xbf16>
    %cst_58 = arith.constant dense<0.000000e+00> : vector<256x8xf32>
    %97 = tpu.matmul %90, %96, %cst_58 {dimension_numbers = #tpu.dot_dimension_numbers<[1], [0], [0], [1], [0, 0, 1, 1], [], []>} : vector<256x4xbf16>, vector<4x8xbf16>, vector<256x8xf32> -> vector<256x8xf32>
    %98 = arith.addf %94, %97 : vector<256x8xf32>
    %c0_59 = arith.constant 0 : index
    %c2 = arith.constant 2 : index
    %c0_60 = arith.constant 0 : index
    %99 = vector.load %arg11[%c0_59, %c2, %c0_60] : memref<18x18x4xbf16, #tpu.memory_space<vmem>>, vector<18x16x4xbf16>
    %c0_61 = arith.constant 0 : index
    %c2_62 = arith.constant 2 : index
    %c0_63 = arith.constant 0 : index
    %100 = vector.load %arg12[%c0_61, %c2_62, %c0_63] : memref<18x18x4xbf16, #tpu.memory_space<vmem>>, vector<18x16x4xbf16>
    %101 = vector.extract_strided_slice %99 {offsets = [0, 0, 0], sizes = [16, 16, 4], strides = [1, 1, 1]} : vector<18x16x4xbf16> to vector<16x16x4xbf16>
    %102 = vector.shape_cast %101 : vector<16x16x4xbf16> to vector<256x4xbf16>
    %103 = vector.extract_strided_slice %100 {offsets = [0, 0, 0], sizes = [16, 16, 4], strides = [1, 1, 1]} : vector<18x16x4xbf16> to vector<16x16x4xbf16>
    %104 = vector.shape_cast %103 : vector<16x16x4xbf16> to vector<256x4xbf16>
    %105 = vector.extract_strided_slice %19 {offsets = [2, 0, 0], sizes = [1, 4, 8], strides = [1, 1, 1]} : vector<9x4x8xbf16> to vector<1x4x8xbf16>
    %106 = vector.shape_cast %105 : vector<1x4x8xbf16> to vector<4x8xbf16>
    %cst_64 = arith.constant dense<0.000000e+00> : vector<256x8xf32>
    %107 = tpu.matmul %102, %106, %cst_64 {dimension_numbers = #tpu.dot_dimension_numbers<[1], [0], [0], [1], [0, 0, 1, 1], [], []>} : vector<256x4xbf16>, vector<4x8xbf16>, vector<256x8xf32> -> vector<256x8xf32>
    %108 = arith.addf %98, %107 : vector<256x8xf32>
    %109 = vector.extract_strided_slice %20 {offsets = [2, 0, 0], sizes = [1, 4, 8], strides = [1, 1, 1]} : vector<9x4x8xbf16> to vector<1x4x8xbf16>
    %110 = vector.shape_cast %109 : vector<1x4x8xbf16> to vector<4x8xbf16>
    %cst_65 = arith.constant dense<0.000000e+00> : vector<256x8xf32>
    %111 = tpu.matmul %104, %110, %cst_65 {dimension_numbers = #tpu.dot_dimension_numbers<[1], [0], [0], [1], [0, 0, 1, 1], [], []>} : vector<256x4xbf16>, vector<4x8xbf16>, vector<256x8xf32> -> vector<256x8xf32>
    %112 = arith.addf %108, %111 : vector<256x8xf32>
    %113 = vector.extract_strided_slice %99 {offsets = [1, 0, 0], sizes = [16, 16, 4], strides = [1, 1, 1]} : vector<18x16x4xbf16> to vector<16x16x4xbf16>
    %114 = vector.shape_cast %113 : vector<16x16x4xbf16> to vector<256x4xbf16>
    %115 = vector.extract_strided_slice %100 {offsets = [1, 0, 0], sizes = [16, 16, 4], strides = [1, 1, 1]} : vector<18x16x4xbf16> to vector<16x16x4xbf16>
    %116 = vector.shape_cast %115 : vector<16x16x4xbf16> to vector<256x4xbf16>
    %117 = vector.extract_strided_slice %19 {offsets = [5, 0, 0], sizes = [1, 4, 8], strides = [1, 1, 1]} : vector<9x4x8xbf16> to vector<1x4x8xbf16>
    %118 = vector.shape_cast %117 : vector<1x4x8xbf16> to vector<4x8xbf16>
    %cst_66 = arith.constant dense<0.000000e+00> : vector<256x8xf32>
    %119 = tpu.matmul %114, %118, %cst_66 {dimension_numbers = #tpu.dot_dimension_numbers<[1], [0], [0], [1], [0, 0, 1, 1], [], []>} : vector<256x4xbf16>, vector<4x8xbf16>, vector<256x8xf32> -> vector<256x8xf32>
    %120 = arith.addf %112, %119 : vector<256x8xf32>
    %121 = vector.extract_strided_slice %20 {offsets = [5, 0, 0], sizes = [1, 4, 8], strides = [1, 1, 1]} : vector<9x4x8xbf16> to vector<1x4x8xbf16>
    %122 = vector.shape_cast %121 : vector<1x4x8xbf16> to vector<4x8xbf16>
    %cst_67 = arith.constant dense<0.000000e+00> : vector<256x8xf32>
    %123 = tpu.matmul %116, %122, %cst_67 {dimension_numbers = #tpu.dot_dimension_numbers<[1], [0], [0], [1], [0, 0, 1, 1], [], []>} : vector<256x4xbf16>, vector<4x8xbf16>, vector<256x8xf32> -> vector<256x8xf32>
    %124 = arith.addf %120, %123 : vector<256x8xf32>
    %125 = vector.extract_strided_slice %99 {offsets = [2, 0, 0], sizes = [16, 16, 4], strides = [1, 1, 1]} : vector<18x16x4xbf16> to vector<16x16x4xbf16>
    %126 = vector.shape_cast %125 : vector<16x16x4xbf16> to vector<256x4xbf16>
    %127 = vector.extract_strided_slice %100 {offsets = [2, 0, 0], sizes = [16, 16, 4], strides = [1, 1, 1]} : vector<18x16x4xbf16> to vector<16x16x4xbf16>
    %128 = vector.shape_cast %127 : vector<16x16x4xbf16> to vector<256x4xbf16>
    %129 = vector.extract_strided_slice %19 {offsets = [8, 0, 0], sizes = [1, 4, 8], strides = [1, 1, 1]} : vector<9x4x8xbf16> to vector<1x4x8xbf16>
    %130 = vector.shape_cast %129 : vector<1x4x8xbf16> to vector<4x8xbf16>
    %cst_68 = arith.constant dense<0.000000e+00> : vector<256x8xf32>
    %131 = tpu.matmul %126, %130, %cst_68 {dimension_numbers = #tpu.dot_dimension_numbers<[1], [0], [0], [1], [0, 0, 1, 1], [], []>} : vector<256x4xbf16>, vector<4x8xbf16>, vector<256x8xf32> -> vector<256x8xf32>
    %132 = arith.addf %124, %131 : vector<256x8xf32>
    %133 = vector.extract_strided_slice %20 {offsets = [8, 0, 0], sizes = [1, 4, 8], strides = [1, 1, 1]} : vector<9x4x8xbf16> to vector<1x4x8xbf16>
    %134 = vector.shape_cast %133 : vector<1x4x8xbf16> to vector<4x8xbf16>
    %cst_69 = arith.constant dense<0.000000e+00> : vector<256x8xf32>
    %135 = tpu.matmul %128, %134, %cst_69 {dimension_numbers = #tpu.dot_dimension_numbers<[1], [0], [0], [1], [0, 0, 1, 1], [], []>} : vector<256x4xbf16>, vector<4x8xbf16>, vector<256x8xf32> -> vector<256x8xf32>
    %136 = arith.addf %132, %135 : vector<256x8xf32>
    %c0_70 = arith.constant 0 : index
    %c0_71 = arith.constant 0 : index
    %137 = vector.load %arg7[%c0_70, %c0_71] : memref<1x8xf32, #tpu.memory_space<vmem>>, vector<1x8xf32>
    %138 = vector.broadcast %137 : vector<1x8xf32> to vector<256x8xf32>
    %139 = arith.addf %136, %138 : vector<256x8xf32>
    %cst_72 = arith.constant 0.000000e+00 : f32
    %140 = vector.broadcast %cst_72 : f32 to vector<256x8xf32>
    %141 = arith.maximumf %139, %140 : vector<256x8xf32>
    %cst_73 = arith.constant 0.000000e+00 : bf16
    %142 = vector.broadcast %cst_73 : bf16 to vector<18x18x8xbf16>
    %c0_74 = arith.constant 0 : index
    %c0_75 = arith.constant 0 : index
    %c0_76 = arith.constant 0 : index
    %143 = vector.load %arg13[%c0_74, %c0_75, %c0_76] : memref<18x18x8xbf16, #tpu.memory_space<vmem>>, vector<18x18x8xbf16>
    tpu.vector_store %arg13[%c0_74, %c0_75, %c0_76], %142 {strides = array<i32>} : memref<18x18x8xbf16, #tpu.memory_space<vmem>>, vector<18x18x8xbf16>,
    %144 = vector.shape_cast %141 : vector<256x8xf32> to vector<16x16x8xf32>
    %145 = arith.truncf %144 : vector<16x16x8xf32> to vector<16x16x8xbf16>
    %c1_77 = arith.constant 1 : index
    %c1_78 = arith.constant 1 : index
    %c0_79 = arith.constant 0 : index
    %146 = vector.load %arg13[%c1_77, %c1_78, %c0_79] : memref<18x18x8xbf16, #tpu.memory_space<vmem>>, vector<16x16x8xbf16>
    tpu.vector_store %arg13[%c1_77, %c1_78, %c0_79], %145 {strides = array<i32>} : memref<18x18x8xbf16, #tpu.memory_space<vmem>>, vector<16x16x8xbf16>,
    %cst_80 = arith.constant 0.000000e+00 : f32
    %147 = vector.broadcast %cst_80 : f32 to vector<8x256xf32>
    %c0_81 = arith.constant 0 : index
    %c0_82 = arith.constant 0 : index
    %c0_83 = arith.constant 0 : index
    %148 = vector.load %arg13[%c0_81, %c0_82, %c0_83] : memref<18x18x8xbf16, #tpu.memory_space<vmem>>, vector<18x16x8xbf16>
    %149 = vector.extract_strided_slice %148 {offsets = [0, 0, 0], sizes = [16, 16, 8], strides = [1, 1, 1]} : vector<18x16x8xbf16> to vector<16x16x8xbf16>
    %150 = vector.shape_cast %149 : vector<16x16x8xbf16> to vector<256x8xbf16>
    %151 = vector.extract_strided_slice %21 {offsets = [0, 0, 0], sizes = [1, 8, 8], strides = [1, 1, 1]} : vector<9x8x8xbf16> to vector<1x8x8xbf16>
    %152 = vector.shape_cast %151 : vector<1x8x8xbf16> to vector<8x8xbf16>
    %cst_84 = arith.constant dense<0.000000e+00> : vector<8x256xf32>
    %153 = tpu.matmul %152, %150, %cst_84 {dimension_numbers = #tpu.dot_dimension_numbers<[1], [1], [0], [0], [0, 0, 1, 0], [], []>} : vector<8x8xbf16>, vector<256x8xbf16>, vector<8x256xf32> -> vector<8x256xf32>
    %154 = arith.addf %147, %153 : vector<8x256xf32>
    %155 = vector.extract_strided_slice %148 {offsets = [1, 0, 0], sizes = [16, 16, 8], strides = [1, 1, 1]} : vector<18x16x8xbf16> to vector<16x16x8xbf16>
    %156 = vector.shape_cast %155 : vector<16x16x8xbf16> to vector<256x8xbf16>
    %157 = vector.extract_strided_slice %21 {offsets = [3, 0, 0], sizes = [1, 8, 8], strides = [1, 1, 1]} : vector<9x8x8xbf16> to vector<1x8x8xbf16>
    %158 = vector.shape_cast %157 : vector<1x8x8xbf16> to vector<8x8xbf16>
    %cst_85 = arith.constant dense<0.000000e+00> : vector<8x256xf32>
    %159 = tpu.matmul %158, %156, %cst_85 {dimension_numbers = #tpu.dot_dimension_numbers<[1], [1], [0], [0], [0, 0, 1, 0], [], []>} : vector<8x8xbf16>, vector<256x8xbf16>, vector<8x256xf32> -> vector<8x256xf32>
    %160 = arith.addf %154, %159 : vector<8x256xf32>
    %161 = vector.extract_strided_slice %148 {offsets = [2, 0, 0], sizes = [16, 16, 8], strides = [1, 1, 1]} : vector<18x16x8xbf16> to vector<16x16x8xbf16>
    %162 = vector.shape_cast %161 : vector<16x16x8xbf16> to vector<256x8xbf16>
    %163 = vector.extract_strided_slice %21 {offsets = [6, 0, 0], sizes = [1, 8, 8], strides = [1, 1, 1]} : vector<9x8x8xbf16> to vector<1x8x8xbf16>
    %164 = vector.shape_cast %163 : vector<1x8x8xbf16> to vector<8x8xbf16>
    %cst_86 = arith.constant dense<0.000000e+00> : vector<8x256xf32>
    %165 = tpu.matmul %164, %162, %cst_86 {dimension_numbers = #tpu.dot_dimension_numbers<[1], [1], [0], [0], [0, 0, 1, 0], [], []>} : vector<8x8xbf16>, vector<256x8xbf16>, vector<8x256xf32> -> vector<8x256xf32>
    %166 = arith.addf %160, %165 : vector<8x256xf32>
    %c0_87 = arith.constant 0 : index
    %c1_88 = arith.constant 1 : index
    %c0_89 = arith.constant 0 : index
    %167 = vector.load %arg13[%c0_87, %c1_88, %c0_89] : memref<18x18x8xbf16, #tpu.memory_space<vmem>>, vector<18x16x8xbf16>
    %168 = vector.extract_strided_slice %167 {offsets = [0, 0, 0], sizes = [16, 16, 8], strides = [1, 1, 1]} : vector<18x16x8xbf16> to vector<16x16x8xbf16>
    %169 = vector.shape_cast %168 : vector<16x16x8xbf16> to vector<256x8xbf16>
    %170 = vector.extract_strided_slice %21 {offsets = [1, 0, 0], sizes = [1, 8, 8], strides = [1, 1, 1]} : vector<9x8x8xbf16> to vector<1x8x8xbf16>
    %171 = vector.shape_cast %170 : vector<1x8x8xbf16> to vector<8x8xbf16>
    %cst_90 = arith.constant dense<0.000000e+00> : vector<8x256xf32>
    %172 = tpu.matmul %171, %169, %cst_90 {dimension_numbers = #tpu.dot_dimension_numbers<[1], [1], [0], [0], [0, 0, 1, 0], [], []>} : vector<8x8xbf16>, vector<256x8xbf16>, vector<8x256xf32> -> vector<8x256xf32>
    %173 = arith.addf %166, %172 : vector<8x256xf32>
    %174 = vector.extract_strided_slice %167 {offsets = [1, 0, 0], sizes = [16, 16, 8], strides = [1, 1, 1]} : vector<18x16x8xbf16> to vector<16x16x8xbf16>
    %175 = vector.shape_cast %174 : vector<16x16x8xbf16> to vector<256x8xbf16>
    %176 = vector.extract_strided_slice %21 {offsets = [4, 0, 0], sizes = [1, 8, 8], strides = [1, 1, 1]} : vector<9x8x8xbf16> to vector<1x8x8xbf16>
    %177 = vector.shape_cast %176 : vector<1x8x8xbf16> to vector<8x8xbf16>
    %cst_91 = arith.constant dense<0.000000e+00> : vector<8x256xf32>
    %178 = tpu.matmul %177, %175, %cst_91 {dimension_numbers = #tpu.dot_dimension_numbers<[1], [1], [0], [0], [0, 0, 1, 0], [], []>} : vector<8x8xbf16>, vector<256x8xbf16>, vector<8x256xf32> -> vector<8x256xf32>
    %179 = arith.addf %173, %178 : vector<8x256xf32>
    %180 = vector.extract_strided_slice %167 {offsets = [2, 0, 0], sizes = [16, 16, 8], strides = [1, 1, 1]} : vector<18x16x8xbf16> to vector<16x16x8xbf16>
    %181 = vector.shape_cast %180 : vector<16x16x8xbf16> to vector<256x8xbf16>
    %182 = vector.extract_strided_slice %21 {offsets = [7, 0, 0], sizes = [1, 8, 8], strides = [1, 1, 1]} : vector<9x8x8xbf16> to vector<1x8x8xbf16>
    %183 = vector.shape_cast %182 : vector<1x8x8xbf16> to vector<8x8xbf16>
    %cst_92 = arith.constant dense<0.000000e+00> : vector<8x256xf32>
    %184 = tpu.matmul %183, %181, %cst_92 {dimension_numbers = #tpu.dot_dimension_numbers<[1], [1], [0], [0], [0, 0, 1, 0], [], []>} : vector<8x8xbf16>, vector<256x8xbf16>, vector<8x256xf32> -> vector<8x256xf32>
    %185 = arith.addf %179, %184 : vector<8x256xf32>
    %c0_93 = arith.constant 0 : index
    %c2_94 = arith.constant 2 : index
    %c0_95 = arith.constant 0 : index
    %186 = vector.load %arg13[%c0_93, %c2_94, %c0_95] : memref<18x18x8xbf16, #tpu.memory_space<vmem>>, vector<18x16x8xbf16>
    %187 = vector.extract_strided_slice %186 {offsets = [0, 0, 0], sizes = [16, 16, 8], strides = [1, 1, 1]} : vector<18x16x8xbf16> to vector<16x16x8xbf16>
    %188 = vector.shape_cast %187 : vector<16x16x8xbf16> to vector<256x8xbf16>
    %189 = vector.extract_strided_slice %21 {offsets = [2, 0, 0], sizes = [1, 8, 8], strides = [1, 1, 1]} : vector<9x8x8xbf16> to vector<1x8x8xbf16>
    %190 = vector.shape_cast %189 : vector<1x8x8xbf16> to vector<8x8xbf16>
    %cst_96 = arith.constant dense<0.000000e+00> : vector<8x256xf32>
    %191 = tpu.matmul %190, %188, %cst_96 {dimension_numbers = #tpu.dot_dimension_numbers<[1], [1], [0], [0], [0, 0, 1, 0], [], []>} : vector<8x8xbf16>, vector<256x8xbf16>, vector<8x256xf32> -> vector<8x256xf32>
    %192 = arith.addf %185, %191 : vector<8x256xf32>
    %193 = vector.extract_strided_slice %186 {offsets = [1, 0, 0], sizes = [16, 16, 8], strides = [1, 1, 1]} : vector<18x16x8xbf16> to vector<16x16x8xbf16>
    %194 = vector.shape_cast %193 : vector<16x16x8xbf16> to vector<256x8xbf16>
    %195 = vector.extract_strided_slice %21 {offsets = [5, 0, 0], sizes = [1, 8, 8], strides = [1, 1, 1]} : vector<9x8x8xbf16> to vector<1x8x8xbf16>
    %196 = vector.shape_cast %195 : vector<1x8x8xbf16> to vector<8x8xbf16>
    %cst_97 = arith.constant dense<0.000000e+00> : vector<8x256xf32>
    %197 = tpu.matmul %196, %194, %cst_97 {dimension_numbers = #tpu.dot_dimension_numbers<[1], [1], [0], [0], [0, 0, 1, 0], [], []>} : vector<8x8xbf16>, vector<256x8xbf16>, vector<8x256xf32> -> vector<8x256xf32>
    %198 = arith.addf %192, %197 : vector<8x256xf32>
    %199 = vector.extract_strided_slice %186 {offsets = [2, 0, 0], sizes = [16, 16, 8], strides = [1, 1, 1]} : vector<18x16x8xbf16> to vector<16x16x8xbf16>
    %200 = vector.shape_cast %199 : vector<16x16x8xbf16> to vector<256x8xbf16>
    %201 = vector.extract_strided_slice %21 {offsets = [8, 0, 0], sizes = [1, 8, 8], strides = [1, 1, 1]} : vector<9x8x8xbf16> to vector<1x8x8xbf16>
    %202 = vector.shape_cast %201 : vector<1x8x8xbf16> to vector<8x8xbf16>
    %cst_98 = arith.constant dense<0.000000e+00> : vector<8x256xf32>
    %203 = tpu.matmul %202, %200, %cst_98 {dimension_numbers = #tpu.dot_dimension_numbers<[1], [1], [0], [0], [0, 0, 1, 0], [], []>} : vector<8x8xbf16>, vector<256x8xbf16>, vector<8x256xf32> -> vector<8x256xf32>
    %204 = arith.addf %198, %203 : vector<8x256xf32>
    %c0_99 = arith.constant 0 : index
    %c0_100 = arith.constant 0 : index
    %205 = vector.load %arg9[%c0_99, %c0_100] : memref<8x1xf32, #tpu.memory_space<vmem>>, vector<8x1xf32>
    %206 = vector.broadcast %205 : vector<8x1xf32> to vector<8x256xf32>
    %207 = arith.addf %204, %206 : vector<8x256xf32>
    %cst_101 = arith.constant 0.000000e+00 : f32
    %208 = vector.broadcast %cst_101 : f32 to vector<8x256xf32>
    %209 = arith.maximumf %207, %208 : vector<8x256xf32>
    %c0_102 = arith.constant 0 : index
    %c0_103 = arith.constant 0 : index
    %c0_104 = arith.constant 0 : index
    %210 = vector.load %arg10[%c0_102, %c0_103, %c0_104] : memref<1x8x256xf32, #tpu.memory_space<vmem>>, vector<1x8x256xf32>
    %211 = vector.shape_cast %210 : vector<1x8x256xf32> to vector<8x256xf32>
    %212 = vector.shape_cast %209 : vector<8x256xf32> to vector<1x8x256xf32>
    tpu.vector_store %arg10[%c0_102, %c0_103, %c0_104], %212 {strides = array<i32>} : memref<1x8x256xf32, #tpu.memory_space<vmem>>, vector<1x8x256xf32>,
    return
  }
  func.func @transform_0(%arg0: i32) -> (i32, i32, i32, i32) {
    %c0_i32 = arith.constant 0 : i32
    %c0_i32_0 = arith.constant 0 : i32
    %c0_i32_1 = arith.constant 0 : i32
    %c0_i32_2 = arith.constant 0 : i32
    return %arg0, %c0_i32, %c0_i32_0, %c0_i32_1 : i32, i32, i32, i32
  }
  func.func @transform_1(%arg0: i32) -> (i32, i32, i32, i32) {
    %c0_i32 = arith.constant 0 : i32
    %c0_i32_0 = arith.constant 0 : i32
    %c0_i32_1 = arith.constant 0 : i32
    %c0_i32_2 = arith.constant 0 : i32
    return %arg0, %c0_i32, %c0_i32_0, %c0_i32_1 : i32, i32, i32, i32
  }
  func.func @transform_2(%arg0: i32) -> (i32, i32) {
    %c0_i32 = arith.constant 0 : i32
    %c0_i32_0 = arith.constant 0 : i32
    %c0_i32_1 = arith.constant 0 : i32
    return %c0_i32, %c0_i32_0 : i32, i32
  }
  func.func @transform_3(%arg0: i32) -> (i32, i32) {
    %c0_i32 = arith.constant 0 : i32
    %c0_i32_0 = arith.constant 0 : i32
    %c0_i32_1 = arith.constant 0 : i32
    return %c0_i32, %c0_i32_0 : i32, i32
  }
  func.func @transform_4(%arg0: i32) -> (i32, i32, i32) {
    %c0_i32 = arith.constant 0 : i32
    %c0_i32_0 = arith.constant 0 : i32
    %c0_i32_1 = arith.constant 0 : i32
    %c0_i32_2 = arith.constant 0 : i32
    return %c0_i32, %c0_i32_0, %c0_i32_1 : i32, i32, i32
  }
  func.func @transform_5(%arg0: i32) -> (i32, i32, i32) {
    %c0_i32 = arith.constant 0 : i32
    %c0_i32_0 = arith.constant 0 : i32
    %c0_i32_1 = arith.constant 0 : i32
    %c0_i32_2 = arith.constant 0 : i32
    return %c0_i32, %c0_i32_0, %c0_i32_1 : i32, i32, i32
  }
  func.func @transform_6(%arg0: i32) -> (i32, i32) {
    %c0_i32 = arith.constant 0 : i32
    %c0_i32_0 = arith.constant 0 : i32
    %c0_i32_1 = arith.constant 0 : i32
    return %c0_i32, %c0_i32_0 : i32, i32
  }
  func.func @transform_7(%arg0: i32) -> (i32, i32, i32) {
    %c0_i32 = arith.constant 0 : i32
    %c0_i32_0 = arith.constant 0 : i32
    %c0_i32_1 = arith.constant 0 : i32
    %c0_i32_2 = arith.constant 0 : i32
    return %c0_i32, %c0_i32_0, %c0_i32_1 : i32, i32, i32
  }
  func.func @transform_8(%arg0: i32) -> (i32, i32) {
    %c0_i32 = arith.constant 0 : i32
    %c0_i32_0 = arith.constant 0 : i32
    %c0_i32_1 = arith.constant 0 : i32
    return %c0_i32, %c0_i32_0 : i32, i32
  }
  func.func @transform_9(%arg0: i32) -> (i32, i32, i32) {
    %c0_i32 = arith.constant 0 : i32
    %c0_i32_0 = arith.constant 0 : i32
    %c0_i32_1 = arith.constant 0 : i32
    return %arg0, %c0_i32, %c0_i32_0 : i32, i32, i32
  }
}

</mosaic_0001>

<bundles_post_ra>
// kernel: tpu_custom_call.1
= control target key start
LH: loop header
LB: loop body
LE: loop exit
PB: predicated region body
PF: predicated region fallthrough
CT: control target
= control target key end

     0   :  { %14 = vsyncpa [#allocation6], 0  ;;  %s19364_s0 = inlined_call_operand.vmem [shape: f32[2,4,8,8], index: 0, kind: input, shape index: {}]   ;;  %s19365_s1 = inlined_call_operand.vmem [shape: f32[2,4,16,16], index: 1, kind: input, shape index: {}]   ;;  %s19366_s2 = inlined_call_operand.vmem [shape: f32[16,8], index: 2, kind: input, shape index: {}]   ;;  %s19367_s3 = inlined_call_operand.vmem [shape: f32[16,8], index: 3, kind: input, shape index: {}]   ;;  %s19368_s4 = inlined_call_operand.vmem [shape: bf16[9,4,8], index: 4, kind: input, shape index: {}]   ;;  %s19369_s5 = inlined_call_operand.vmem [shape: bf16[9,4,8], index: 5, kind: input, shape index: {}]   ;;  %s19370_s6 = inlined_call_operand.vmem [shape: f32[1,8], index: 6, kind: input, shape index: {}]   ;;  %s19371_s7 = inlined_call_operand.vmem [shape: bf16[9,8,8], index: 7, kind: input, shape index: {}]   ;;  %s19372_s8 = inlined_call_operand.vmem [shape: f32[8,1], index: 8, kind: input, shape index: {}]   ;;  %s19373_s9 = inlined_call_operand.hbm [shape: f32[2,8,256], index: 9, kind: output, shape index: {}]  }
   0x1   :  { %16 = vsyncpa [#allocation6 + $0x1], 0  ;;  %s15379_s30 = smov 0   ;;  %s15381_s10 = smov 0  }
   0x2   :  { %s15383_s11 = smov 0   ;;  %s15385_s12 = smov 0  }
   0x3 LB: > { %s15400_s13 = sadd.s32 4294967295, %s15322_s12   ;;  %s12586_s14 = sadd.s32 4294967294, %s15322_s12   ;;  %s15322_s12 = sphi %s15385_s12, %s19711_s12   ;;  %s15318_s11 = sphi %s15383_s11, %s19710_s11   ;;  %s15314_s10 = sphi %s15381_s10, %s19709_s10   ;;  %s15310_s30 = sphi %s15379_s30, %s19708_s30  }
   0x4   : > { %s15404_s15 = sadd.s32 1, %s15322_s12   ;;  %s228_s16 = sadd.s32 1, %s15318_s11 }
   0x5   : > { %s225_s17 = ssub.s32 %s15322_s12, %s15404_s15  ;;  %p238_p0 = scmp.ne.s32.totalorder %s15318_s11, %s15314_s10 }
   0x6   : > { %p226_p1 = scmp.eq.s32.totalorder %s225_s17, 0  ;;  %p239_p2 = scmp.eq.s32.totalorder %s15400_s13, 1 }
   0x7   : > { %p244_p3 = scmp.ne.s32.totalorder %s15314_s10, %s15310_s30  ;;  %p245_p4 = scmp.eq.s32.totalorder %s12586_s14, 1 }
   0x8   : > { %s15415_s18 = scalar_select %p226_p1, %s15318_s11, %s228_s16  }
   0x9   : > { %p15417_p5 = por %p239_p2, %p238_p0  ;;  %p15421_p6 = por %p245_p4, %p244_p3 }
   0xa   : > { %p12589_p7 = scmp.ge.s32.totalorder %s15322_s12, 1  ;;  %p300_p8 = scmp.lt.s32.totalorder %s15322_s12, 3 }
   0xc   : > { %p301_p9 = pnand %p12589_p7, %p300_p8 }
   0xe   : > { %304 = sbr.rel (%p301_p9) target bundleno = 3199 (0xc7f), region = 56 }
  0x15   : > { %p341_p10 = scmp.lt.s32.totalorder %s15400_s13, 1  ;;  %v356_v0 = vld [vmem:[%s19366_s2] sm:$0xff]  ;;  %v357_v1 = vld [vmem:[%s19366_s2 + $0x8] sm:$0xff]  ;;  %vm486_vm0 = vcmask 64512   ;;  %v15324_v41 = vmov 1983009808   ;;  %v1106_v43 = vlaneseq }
  0x16   : > { %v14447_v2 = vpack.c.bf16 %v357_v1, %v356_v0  ;;  %vm15436_vm1 = vmpackc.low %vm486_vm0, %vm486_vm0  ;;  %v718_v12 = vld [vmem:[%s19367_s3] sm:$0xff]  ;;  %v719_v13 = vld [vmem:[%s19367_s3 + $0x8] sm:$0xff]  ;;  %v1104_v42 = vunpack.c.l.s4 %v15324_v41  ;;  %v15325_v47 = vmov 1934713408   ;;  %vm855_vm2 = vcmask 27648   ;;  %s338_s28 = sand.u32 1, %s15314_s10  }
  0x17   : > { %s15441_s25 = scalar_select %p341_p10, %s15400_s13, 1  ;;  %v14453_v14 = vpack.c.bf16 %v719_v13, %v718_v12  ;;  %v1107_v46 = vshrl.u32 %v1106_v43, 7  ;;  %v1136_v48 = vunpack.c.l.s4 %v15325_v47  ;;  %vm858_vm3 = vcmask 24576  }
  0x18   : > { %14449 = vmatprep.subr.msk.bf16.mxu0 %vm15436_vm1, %v14447_v2  ;;  %v1105_v45 = vunpack.c.0.s8 %v1104_v42  ;;  %vm4907_vm4 = vcmask 1041408   ;;  %vm4858_vm5 = vcmask 31744   ;;  %vm2714_vm6 = vsmask.f32 7938  ;;  %s13324_s14 = sshll.u32 %s15400_s13, 8  ;;  %s12501_s24 = scalar_lea.sflag [#allocation6], %s338_s28 }
  0x19   : > { %s13226_s26 = sshll.u32 %s15441_s25, 5  ;;  %14452 = vmatpush3.bf16.xpose.msk.msra.mxu0 %vm15436_vm1, %v14447_v2  ;;  %14459 = vmatprep.subr.msk.bf16.mxu1 %vm15436_vm1, %v14453_v14  ;;  %s13227_s22 = sshll.u32 %s15441_s25, 6  ;;  %v1137_v53 = vunpack.c.0.s8 %v1136_v48  ;;  %v19376_v2 = vmov 0.0   ;;  %v4688_v48 = vld [vmem:[%s19369_s5] sm:$0x3]  ;;  %vm15839_vm7 = vmand %vm855_vm2, %vm2714_vm6  ;;  %vm8631_vm12 = vcmask 1042432  }
  0x1a   : > { %s345_s29 = scalar_lea.vmem %s19364_s0, %s13226_s26  ;;  %14455 = vmatprep.subr.msk.bf16.mxu0 %vm15436_vm1, %v14453_v14  ;;  %14460 = vmatpush3.bf16.xpose.msk.msra.mxu1 %vm15436_vm1, %v14453_v14  ;;  %s15481_s26 = scalar_lea.vmem %s19365_s1, %s13227_s22  ;;  %v15487_v51 = vsub.s32 %v1105_v45, %v1107_v46  ;;  %vm2389_vm8 = vsmask.f32 256  ;;  %vm2390_vm9 = vsmask.f32 4368  ;;  %vm8632_vm13 = vcmask 1046532  }
  0x1b   : > { %v352_v4 = vld [vmem:[%s345_s29] sm:$0xff]  ;;  %v354_v5 = vld [vmem:[%s345_s29 + $0x10] sm:$0xff]  ;;  %v353_v6 = vld [vmem:[%s345_s29 + $0x8] sm:$0xff]  ;;  %v15491_v59 = vsub.s32 %v1137_v53, %v1107_v46  ;;  %15005 = vmatprep.subr.msk.bf16.mxu1 %vm4907_vm4, %v4688_v48  ;;  %vm6288_vm15 = vsmask.f32 3328  ;;  %s19322_s23 = scalar_lea.hbm %s19373_s9, %s13324_s14  ;;  %s15328_s13 = smov [#allocation5]  }
  0x1c   : > { %358 = vxpose.xlu0.b32.start.end [1/1] (short) (narrow) %v352_v4, 8  ;;  %422 = vxpose.xlu1.b32.start.end [1/1] (short) (narrow) %v354_v5, 8  ;;  %v355_v7 = vld [vmem:[%s345_s29 + $0x18] sm:$0xff]  ;;  %v965_v35 = vld [vmem:[%s15481_s26] sm:$0xff]  ;;  %v966_v36 = vld [vmem:[%s15481_s26 + $0x8] sm:$0xff]  ;;  %s12590_s29 = sshll.u32 %s338_s28, 4 }
  0x1d   : > { %v967_v37 = vld [vmem:[%s15481_s26 + $0x10] sm:$0xff]  ;;  %v968_v38 = vld [vmem:[%s15481_s26 + $0x18] sm:$0xff]  ;;  %vm16062_vm10 = vmor %vm2389_vm8, %vm2390_vm9  ;;  %s340_s16 = scalar_lea.vmem [#allocation5], %s12590_s29  ;;  %s15264_s25 = sshll.u32 %s15328_s13, 4  ;;  %s15265_s25 = int_to_ptr.vmem [resolvable:$false] %s15264_s25 }
  0x1e   : > { %vm16068_vm11 = vmand %vm858_vm3, %vm2389_vm8  ;;  %s12515_s17 = sshll.u32 %s340_s16, 4  ;;  %s15266_s27 = scalar_lea.vmem %s15265_s25, 512  ;;  %s19324_s17 = int_to_ptr.vmem [resolvable:$true] %s12515_s17 }
  0x1f   : > { %vm16300_vm14 = vmor %vm8631_vm12, %vm8632_vm13  ;;  %p15267_p0 = scmp.lt.s32.totalorder %s19324_s17, %s15265_s25 }
  0x20   : > { %390 = vxpose.xlu0.b32.start.end [1/1] (short) (narrow) %v353_v6, 8  ;;  %454 = vxpose.xlu1.b32.start.end [1/1] (short) (narrow) %v355_v7, 8 }
  0x9c   : > { %v374_v8 = vpop.trf.xlu0  ;;  %v438_v9 = vpop.trf.xlu1 }
  0x9d   : > { %13813 = vmatprep.mubr.msk.f32.mxu0 %vm486_vm0, %v374_v8 }
  0xa0   : > { %v406_v10 = vpop.trf.xlu0  ;;  %v470_v11 = vpop.trf.xlu1 }
  0xa1   : > { %13814 = vmatmul.mubr.msk.f32.vlgmr.msra.gmra.mrb[0].mxu0 %vm486_vm0, %v406_v10 }
  0xa2   : > { %13816 = vmatprep.mubr.msk.f32.mxu0 %vm486_vm0, %v438_v9  ;;  %14458 = vmatpush3.bf16.xpose.msk.msra.mxu0 %vm15436_vm1, %v14453_v14  ;;  %vm6289_vm1 = vsmask.f32 7440 }
  0xa5   : > { %13817 = vmatmul.mubr.msk.f32.gmra.mrb[2].mxu0 %vm486_vm0, %v470_v11 }
 0x174   : > { %v13815_v15 = vpop.f32.mrb[0].mxu0 }
 0x175   : > { %v571_v16 = vpop.f32.mrb[1].mxu0 }
 0x176   : > { %590 = vxpose.xlu0.b32.start.end [1/1] (short) (narrow) %v571_v16, 16 }
 0x178   : > { %v13818_v17 = vpop.f32.mrb[2].mxu0 }
 0x179   : > { %v581_v18 = vpop.f32.mrb[3].mxu0 }
 0x17a   : > { %654 = vxpose.xlu1.b32.start.end [1/1] (short) (narrow) %v581_v18, 16 }
 0x17b   : > { %622 = vxpose.xlu0.b32.start.end [1/1] (short) (narrow) %v13815_v15, 16 }
 0x17f   : > { %686 = vxpose.xlu1.b32.start.end [1/1] (short) (narrow) %v13818_v17, 16 }
 0x1f6   : > { %v606_v19 = vpop.trf.xlu0 }
 0x1f7   : > { %13823 = vmatprep.mubr.msk.f32.mxu0 %vm486_vm0, %v606_v19 }
 0x1fa   : > { %v607_v20 = vpop.trf.xlu0  ;;  %v670_v21 = vpop.trf.xlu1 }
 0x1fb   : > { %13824 = vmatmul.mubr.msk.f32.vlgmr.msra.gmra.mrb[4].mxu0 %vm486_vm0, %v607_v20  ;;  %13829 = vmatprep.mubr.msk.f32.mxu1 %vm486_vm0, %v670_v21 }
 0x1fe   : > { %v638_v22 = vpop.trf.xlu0  ;;  %v671_v23 = vpop.trf.xlu1 }
 0x1ff   : > { %13826 = vmatprep.mubr.msk.f32.mxu0 %vm486_vm0, %v638_v22  ;;  %13830 = vmatmul.mubr.msk.f32.vlgmr.msra.gmra.mrb[0].mxu1 %vm486_vm0, %v671_v23 }
 0x202   : > { %v639_v24 = vpop.trf.xlu0  ;;  %v702_v25 = vpop.trf.xlu1 }
 0x203   : > { %13827 = vmatmul.mubr.msk.f32.gmra.mrb[6].mxu0 %vm486_vm0, %v639_v24  ;;  %13832 = vmatprep.mubr.msk.f32.mxu1 %vm486_vm0, %v702_v25 }
 0x206   : > { %v703_v26 = vpop.trf.xlu1 }
 0x207   : > { %13833 = vmatmul.mubr.msk.f32.gmra.mrb[2].mxu1 %vm486_vm0, %v703_v26 }
 0x2ce   : > { %v13825_v27 = vpop.f32.mrb[4].mxu0 }
 0x2cf   : > { %v816_v28 = vpop.f32.mrb[5].mxu0 }
 0x2d0   : > { %2830 = vxpose.xlu0.b32.start [1/2] (short) (narrow) %v816_v28, 16 }
 0x2d2   : > { %v13831_v29 = vpop.f32.mrb[0].mxu1 }
 0x2d3   : > { %v836_v30 = vpop.f32.mrb[1].mxu1 }
 0x2d4   : > { %2831 = vxpose.xlu0.b32.end [2/2] (short) (narrow) %v13825_v27, 16 }
 0x2d6   : > { %v13828_v31 = vpop.f32.mrb[6].mxu0 }
 0x2d7   : > { %v826_v32 = vpop.f32.mrb[7].mxu0 }
 0x2d8   : > { %2894 = vxpose.xlu0.b32.start [1/2] (short) (narrow) %v836_v30, 16  ;;  %2862 = vxpose.xlu1.b32.start [1/2] (short) (narrow) %v826_v32, 16 }
 0x2da   : > { %v13834_v33 = vpop.f32.mrb[2].mxu1 }
 0x2db   : > { %v846_v34 = vpop.f32.mrb[3].mxu1 }
 0x2dc   : > { %2895 = vxpose.xlu0.b32.end [2/2] (short) (narrow) %v13831_v29, 16  ;;  %2863 = vxpose.xlu1.b32.end [2/2] (short) (narrow) %v13828_v31, 16  ;;  %v19374_v31 = vmov 0  }
 0x2dd   : > { %914 = vst.msk [vmem:[#allocation3 + $0xc] sm:$0xf] %vm855_vm2, %v19374_v31  ;;  %917 = vst.msk [vmem:[#allocation3 + $0x18] sm:$0xf] %vm855_vm2, %v19374_v31 }
 0x2de   : > { %920 = vst.msk [vmem:[#allocation3 + $0x24] sm:$0xf] %vm855_vm2, %v19374_v31  ;;  %923 = vst.msk [vmem:[#allocation3 + $0x30] sm:$0xf] %vm855_vm2, %v19374_v31 }
 0x2df   : > { %926 = vst.msk [vmem:[#allocation3 + $0x3c] sm:$0xf] %vm855_vm2, %v19374_v31  ;;  %929 = vst.msk [vmem:[#allocation3 + $0x48] sm:$0xf] %vm855_vm2, %v19374_v31 }
 0x2e0   : > { %2926 = vxpose.xlu1.b32.start [1/2] (short) (narrow) %v846_v34, 16  ;;  %973 = vxpose.xlu0.b32.start [1/2] (short) (narrow) %v965_v35, 16  ;;  %932 = vst.msk [vmem:[#allocation3 + $0x54] sm:$0xf] %vm855_vm2, %v19374_v31  ;;  %935 = vst.msk [vmem:[#allocation3 + $0x60] sm:$0xf] %vm855_vm2, %v19374_v31 }
 0x2e1   : > { %856 = vst.msk [vmem:[#allocation2] sm:$0xf] %vm855_vm2, %v19374_v31  ;;  %857 = vst.msk [vmem:[#allocation2 + $0x4] sm:$0xf] %vm855_vm2, %v19374_v31  ;;  %v969_v35 = vld [vmem:[%s15481_s26 + $0x20] sm:$0xff] }
 0x2e2   : > { %860 = vst.msk [vmem:[#allocation2 + $0xc] sm:$0xf] %vm855_vm2, %v19374_v31  ;;  %861 = vst.msk [vmem:[#allocation2 + $0x10] sm:$0xf] %vm855_vm2, %v19374_v31 }
 0x2e3   : > { %863 = vst.msk [vmem:[#allocation2 + $0x18] sm:$0xf] %vm855_vm2, %v19374_v31  ;;  %864 = vst.msk [vmem:[#allocation2 + $0x1c] sm:$0xf] %vm855_vm2, %v19374_v31 }
 0x2e4   : > { %2927 = vxpose.xlu1.b32.end [2/2] (short) (narrow) %v13834_v33, 16  ;;  %974 = vxpose.xlu0.b32.end [2/2] (short) (narrow) %v966_v36, 16  ;;  %866 = vst.msk [vmem:[#allocation2 + $0x24] sm:$0xf] %vm855_vm2, %v19374_v31  ;;  %867 = vst.msk [vmem:[#allocation2 + $0x28] sm:$0xf] %vm855_vm2, %v19374_v31 }
 0x2e5   : > { %869 = vst.msk [vmem:[#allocation2 + $0x30] sm:$0xf] %vm855_vm2, %v19374_v31  ;;  %870 = vst.msk [vmem:[#allocation2 + $0x34] sm:$0xf] %vm855_vm2, %v19374_v31  ;;  %v971_v36 = vld [vmem:[%s15481_s26 + $0x30] sm:$0xff] }
 0x2e6   : > { %872 = vst.msk [vmem:[#allocation2 + $0x3c] sm:$0xf] %vm855_vm2, %v19374_v31  ;;  %873 = vst.msk [vmem:[#allocation2 + $0x40] sm:$0xf] %vm855_vm2, %v19374_v31 }
 0x2e7   : > { %875 = vst.msk [vmem:[#allocation2 + $0x48] sm:$0xf] %vm855_vm2, %v19374_v31  ;;  %876 = vst.msk [vmem:[#allocation2 + $0x4c] sm:$0xf] %vm855_vm2, %v19374_v31 }
 0x2e8   : > { %1005 = vxpose.xlu1.b32.start [1/2] (short) (narrow) %v967_v37, 16  ;;  %878 = vst.msk [vmem:[#allocation2 + $0x54] sm:$0xf] %vm855_vm2, %v19374_v31  ;;  %879 = vst.msk [vmem:[#allocation2 + $0x58] sm:$0xf] %vm855_vm2, %v19374_v31  ;;  %v970_v37 = vld [vmem:[%s15481_s26 + $0x28] sm:$0xff] }
 0x2e9   : > { %881 = vst.msk [vmem:[#allocation2 + $0x60] sm:$0xf] %vm855_vm2, %v19374_v31  ;;  %882 = vst.msk [vmem:[#allocation2 + $0x64] sm:$0xf] %vm855_vm2, %v19374_v31 }
 0x2ea   : > { %884 = vst.msk [vmem:[#allocation2 + $0x6c] sm:$0xf] %vm855_vm2, %v19374_v31  ;;  %885 = vst.msk [vmem:[#allocation2 + $0x70] sm:$0xf] %vm855_vm2, %v19374_v31 }
 0x2eb   : > { %887 = vst.msk [vmem:[#allocation2 + $0x78] sm:$0xf] %vm855_vm2, %v19374_v31  ;;  %888 = vst.msk [vmem:[#allocation2 + $0x7c] sm:$0xf] %vm855_vm2, %v19374_v31 }
 0x2ec   : > { %1006 = vxpose.xlu1.b32.end [2/2] (short) (narrow) %v968_v38, 16  ;;  %890 = vst.msk [vmem:[#allocation2 + $0x84] sm:$0xf] %vm855_vm2, %v19374_v31  ;;  %891 = vst.msk [vmem:[#allocation2 + $0x88] sm:$0xf] %vm855_vm2, %v19374_v31  ;;  %v972_v38 = vld [vmem:[%s15481_s26 + $0x38] sm:$0xff] }
 0x2ed   : > { %893 = vst.msk [vmem:[#allocation2 + $0x90] sm:$0xf] %vm855_vm2, %v19374_v31  ;;  %894 = vst.msk [vmem:[#allocation2 + $0x94] sm:$0xf] %vm855_vm2, %v19374_v31  ;;  %s15260_s26 = scalar_lea.vmem %s19324_s17, 256 }
 0x2ee   : > { %896 = vst.msk [vmem:[#allocation2 + $0x9c] sm:$0xf] %vm855_vm2, %v19374_v31  ;;  %897 = vst.msk [vmem:[#allocation2 + $0xa0] sm:$0xf] %vm855_vm2, %v19374_v31  ;;  %p15261_p11 = scmp.ne.s32.totalorder %s19324_s17, %s15260_s26  ;;  %p15268_p1 = scmp.lt.s32.totalorder %s15266_s27, %s15260_s26 }
 0x2ef   : > { %899 = vst.msk [vmem:[#allocation2 + $0xa8] sm:$0xf] %vm855_vm2, %v19374_v31  ;;  %900 = vst.msk [vmem:[#allocation2 + $0xac] sm:$0xf] %vm855_vm2, %v19374_v31 }
 0x2f0   : > { %902 = vst.msk [vmem:[#allocation2 + $0xb4] sm:$0xf] %vm855_vm2, %v19374_v31  ;;  %903 = vst.msk [vmem:[#allocation2 + $0xb8] sm:$0xf] %vm855_vm2, %v19374_v31  ;;  %p15262_p12 = pnand %p15261_p11, %p15417_p5  ;;  %p15269_p2 = por %p15268_p1, %p15267_p0 }
 0x2f1   : > { %905 = vst.msk [vmem:[#allocation2 + $0xc0] sm:$0xf] %vm855_vm2, %v19374_v31  ;;  %906 = vst.msk [vmem:[#allocation2 + $0xc4] sm:$0xf] %vm855_vm2, %v19374_v31 }
 0x2f2   : > { %908 = vst.msk [vmem:[#allocation2 + $0xcc] sm:$0xf] %vm855_vm2, %v19374_v31  ;;  %909 = vst.msk [vmem:[#allocation2 + $0xd0] sm:$0xf] %vm855_vm2, %v19374_v31  ;;  %p15263_p13 = pneg %p15262_p12 }
 0x2f3   : > { %911 = vst.msk [vmem:[#allocation3] sm:$0xf] %vm855_vm2, %v19374_v31  ;;  %912 = vst.msk [vmem:[#allocation3 + $0x4] sm:$0xf] %vm855_vm2, %v19374_v31 }
 0x2f4   : > { %915 = vst.msk [vmem:[#allocation3 + $0x10] sm:$0xf] %vm855_vm2, %v19374_v31  ;;  %918 = vst.msk [vmem:[#allocation3 + $0x1c] sm:$0xf] %vm855_vm2, %v19374_v31  ;;  %p15270_p3 = pnand %p15269_p2, %p15263_p13 }
 0x2f5   : > { %921 = vst.msk [vmem:[#allocation3 + $0x28] sm:$0xf] %vm855_vm2, %v19374_v31  ;;  %924 = vst.msk [vmem:[#allocation3 + $0x34] sm:$0xf] %vm855_vm2, %v19374_v31 }
 0x2f6   : > { %927 = vst.msk [vmem:[#allocation3 + $0x40] sm:$0xf] %vm855_vm2, %v19374_v31  ;;  %930 = vst.msk [vmem:[#allocation3 + $0x4c] sm:$0xf] %vm855_vm2, %v19374_v31 }
 0x2f7   : > { %933 = vst.msk [vmem:[#allocation3 + $0x58] sm:$0xf] %vm855_vm2, %v19374_v31  ;;  %936 = vst.msk [vmem:[#allocation3 + $0x64] sm:$0xf] %vm855_vm2, %v19374_v31 }
 0x2f8   : > { %938 = vst.msk [vmem:[#allocation3 + $0x6c] sm:$0xf] %vm855_vm2, %v19374_v31  ;;  %939 = vst.msk [vmem:[#allocation3 + $0x70] sm:$0xf] %vm855_vm2, %v19374_v31 }
 0x2f9   : > { %941 = vst.msk [vmem:[#allocation3 + $0x78] sm:$0xf] %vm855_vm2, %v19374_v31  ;;  %942 = vst.msk [vmem:[#allocation3 + $0x7c] sm:$0xf] %vm855_vm2, %v19374_v31 }
 0x2fa   : > { %944 = vst.msk [vmem:[#allocation3 + $0x84] sm:$0xf] %vm855_vm2, %v19374_v31  ;;  %945 = vst.msk [vmem:[#allocation3 + $0x88] sm:$0xf] %vm855_vm2, %v19374_v31  ;;  %v15139_v53 = vld [vmem:[#allocation3] sm:$0xff]  }
 0x2fb   : > { %947 = vst.msk [vmem:[#allocation3 + $0x90] sm:$0xf] %vm855_vm2, %v19374_v31  ;;  %948 = vst.msk [vmem:[#allocation3 + $0x94] sm:$0xf] %vm855_vm2, %v19374_v31  ;;  %13837 = vmatprep.mubr.msk.bf16.mxu1 %vm4858_vm5, %v15139_v53 }
 0x2fc   : > { %950 = vst.msk [vmem:[#allocation3 + $0x9c] sm:$0xf] %vm855_vm2, %v19374_v31  ;;  %951 = vst.msk [vmem:[#allocation3 + $0xa0] sm:$0xf] %vm855_vm2, %v19374_v31 }
 0x2fd   : > { %953 = vst.msk [vmem:[#allocation3 + $0xa8] sm:$0xf] %vm855_vm2, %v19374_v31  ;;  %954 = vst.msk [vmem:[#allocation3 + $0xac] sm:$0xf] %vm855_vm2, %v19374_v31 }
 0x2fe   : > { %956 = vst.msk [vmem:[#allocation3 + $0xb4] sm:$0xf] %vm855_vm2, %v19374_v31  ;;  %957 = vst.msk [vmem:[#allocation3 + $0xb8] sm:$0xf] %vm855_vm2, %v19374_v31 }
 0x2ff   : > { %959 = vst.msk [vmem:[#allocation3 + $0xc0] sm:$0xf] %vm855_vm2, %v19374_v31  ;;  %960 = vst.msk [vmem:[#allocation3 + $0xc4] sm:$0xf] %vm855_vm2, %v19374_v31 }
 0x300   : > { %962 = vst.msk [vmem:[#allocation3 + $0xcc] sm:$0xf] %vm855_vm2, %v19374_v31  ;;  %963 = vst.msk [vmem:[#allocation3 + $0xd0] sm:$0xf] %vm855_vm2, %v19374_v31 }
 0x301   : > { %916 = vst.msk [vmem:[#allocation3 + $0x14] sm:$0x1] %vm858_vm3, %v19374_v31  ;;  %919 = vst.msk [vmem:[#allocation3 + $0x20] sm:$0x1] %vm858_vm3, %v19374_v31 }
 0x302   : > { %922 = vst.msk [vmem:[#allocation3 + $0x2c] sm:$0x1] %vm858_vm3, %v19374_v31  ;;  %925 = vst.msk [vmem:[#allocation3 + $0x38] sm:$0x1] %vm858_vm3, %v19374_v31 }
 0x303   : > { %928 = vst.msk [vmem:[#allocation3 + $0x44] sm:$0x1] %vm858_vm3, %v19374_v31  ;;  %931 = vst.msk [vmem:[#allocation3 + $0x50] sm:$0x1] %vm858_vm3, %v19374_v31 }
 0x304   : > { %934 = vst.msk [vmem:[#allocation3 + $0x5c] sm:$0x1] %vm858_vm3, %v19374_v31  ;;  %937 = vst.msk [vmem:[#allocation3 + $0x68] sm:$0x1] %vm858_vm3, %v19374_v31 }
 0x305   : > { %859 = vst.msk [vmem:[#allocation2 + $0x8] sm:$0x1] %vm858_vm3, %v19374_v31  ;;  %862 = vst.msk [vmem:[#allocation2 + $0x14] sm:$0x1] %vm858_vm3, %v19374_v31 }
 0x306   : > { %865 = vst.msk [vmem:[#allocation2 + $0x20] sm:$0x1] %vm858_vm3, %v19374_v31  ;;  %868 = vst.msk [vmem:[#allocation2 + $0x2c] sm:$0x1] %vm858_vm3, %v19374_v31 }
 0x307   : > { %871 = vst.msk [vmem:[#allocation2 + $0x38] sm:$0x1] %vm858_vm3, %v19374_v31  ;;  %874 = vst.msk [vmem:[#allocation2 + $0x44] sm:$0x1] %vm858_vm3, %v19374_v31 }
 0x308   : > { %877 = vst.msk [vmem:[#allocation2 + $0x50] sm:$0x1] %vm858_vm3, %v19374_v31  ;;  %880 = vst.msk [vmem:[#allocation2 + $0x5c] sm:$0x1] %vm858_vm3, %v19374_v31 }
 0x309   : > { %883 = vst.msk [vmem:[#allocation2 + $0x68] sm:$0x1] %vm858_vm3, %v19374_v31  ;;  %886 = vst.msk [vmem:[#allocation2 + $0x74] sm:$0x1] %vm858_vm3, %v19374_v31 }
 0x30a   : > { %889 = vst.msk [vmem:[#allocation2 + $0x80] sm:$0x1] %vm858_vm3, %v19374_v31  ;;  %892 = vst.msk [vmem:[#allocation2 + $0x8c] sm:$0x1] %vm858_vm3, %v19374_v31 }
 0x30b   : > { %895 = vst.msk [vmem:[#allocation2 + $0x98] sm:$0x1] %vm858_vm3, %v19374_v31  ;;  %898 = vst.msk [vmem:[#allocation2 + $0xa4] sm:$0x1] %vm858_vm3, %v19374_v31 }
 0x30c   : > { %901 = vst.msk [vmem:[#allocation2 + $0xb0] sm:$0x1] %vm858_vm3, %v19374_v31  ;;  %904 = vst.msk [vmem:[#allocation2 + $0xbc] sm:$0x1] %vm858_vm3, %v19374_v31 }
 0x30d   : > { %907 = vst.msk [vmem:[#allocation2 + $0xc8] sm:$0x1] %vm858_vm3, %v19374_v31  ;;  %910 = vst.msk [vmem:[#allocation2 + $0xd4] sm:$0x1] %vm858_vm3, %v19374_v31 }
 0x30e   : > { %913 = vst.msk [vmem:[#allocation3 + $0x8] sm:$0x1] %vm858_vm3, %v19374_v31  ;;  %940 = vst.msk [vmem:[#allocation3 + $0x74] sm:$0x1] %vm858_vm3, %v19374_v31 }
 0x30f   : > { %943 = vst.msk [vmem:[#allocation3 + $0x80] sm:$0x1] %vm858_vm3, %v19374_v31  ;;  %946 = vst.msk [vmem:[#allocation3 + $0x8c] sm:$0x1] %vm858_vm3, %v19374_v31 }
 0x310   : > { %949 = vst.msk [vmem:[#allocation3 + $0x98] sm:$0x1] %vm858_vm3, %v19374_v31  ;;  %952 = vst.msk [vmem:[#allocation3 + $0xa4] sm:$0x1] %vm858_vm3, %v19374_v31 }
 0x311   : > { %955 = vst.msk [vmem:[#allocation3 + $0xb0] sm:$0x1] %vm858_vm3, %v19374_v31  ;;  %958 = vst.msk [vmem:[#allocation3 + $0xbc] sm:$0x1] %vm858_vm3, %v19374_v31 }
 0x312   : > { %961 = vst.msk [vmem:[#allocation3 + $0xc8] sm:$0x1] %vm858_vm3, %v19374_v31  ;;  %964 = vst.msk [vmem:[#allocation3 + $0xd4] sm:$0x1] %vm858_vm3, %v19374_v31  ;;  %v4651_v31 = vld [vmem:[#allocation3 + $0x9c] sm:$0xf] }
 0x313   : > { %vm16401_vm3 = vmor %vm6288_vm15, %vm6289_vm1 }
 0x350   : > { %v2846_v39 = vpop.trf.xlu0 }
 0x354   : > { %v2847_v40 = vpop.trf.xlu0 }
 0x358   : > { %v2878_v44 = vpop.trf.xlu1  ;;  %v2910_v49 = vpop.trf.xlu0 }
 0x359   : > { %v2958_v52 = vcombine.low %v2846_v39, %v2910_v49  ;;  %v2959_v60 = vcombine.high %v2846_v39, %v2910_v49  ;;  %v4694_v49 = vld [vmem:[%s19369_s5 + $0xc] sm:$0x3] }
 0x35a   : > { %15010 = vmatprep.subr.msk.bf16.mxu0 %vm4907_vm4, %v4694_v49 }
 0x35b   : > { %v2966_v56 = vrot.slane %v2958_v52, %v15487_v51  ;;  %v2973_v1 = vrot.slane %v2959_v60, %v15487_v51 }
 0x35c   : > { %v2879_v50 = vpop.trf.xlu1  ;;  %v2911_v7 = vpop.trf.xlu0 }
 0x35d   : > { %v3026_v10 = vcombine.low %v2847_v40, %v2911_v7  ;;  %v3027_v20 = vcombine.high %v2847_v40, %v2911_v7 }
 0x35f   : > { %v3034_v14 = vrot.slane %v3026_v10, %v15487_v51  ;;  %v15510_v24 = vrot.slane %v3027_v20, %v15487_v51 }
 0x360   : > { %v2942_v54 = vpop.trf.xlu1  ;;  %v15750_v39 = vpop.trf.xlu0 }
 0x361   : > { %v2974_v55 = vcombine.low %v2878_v44, %v2942_v54  ;;  %v2975_v57 = vcombine.high %v2878_v44, %v2942_v54 }
 0x363   : > { %v2982_v58 = vrot.slane %v2974_v55, %v15487_v51  ;;  %v2989_v63 = vrot.slane %v2975_v57, %v15487_v51  ;;  %v5985_v55 = vsel %vm4907_vm4, %v4694_v49, 0 }
 0x364   : > { %v2943_v4 = vpop.trf.xlu1  ;;  %v15754_v41 = vpop.trf.xlu0  ;;  %14006 = vmatpush3.bf16.msra.mxu0 %v5985_v55 }
 0x365   : > { %v2990_v61 = vcombine.low %v2966_v56, %v2982_v58  ;;  %v2991_v62 = vcombine.high %v2966_v56, %v2982_v58  ;;  %v3006_v6 = vcombine.low %v2973_v1, %v2989_v63  ;;  %v3042_v8 = vcombine.low %v2879_v50, %v2943_v4 }
 0x366   : > { %v3007_v12 = vcombine.high %v2973_v1, %v2989_v63  ;;  %v3043_v18 = vcombine.high %v2879_v50, %v2943_v4  ;;  %v4909_v50 = vsel %vm4907_vm4, %v4688_v48, 0 }
 0x367   : > { %v2998_v0 = vrot.slane %v2990_v61, %v15491_v59  ;;  %v3005_v5 = vrot.slane %v2991_v62, %v15491_v59  ;;  %v3014_v11 = vrot.slane %v3006_v6, %v15491_v59  ;;  %v3050_v13 = vrot.slane %v3042_v8, %v15487_v51  ;;  %13836 = vmatpush3.bf16.msra.mxu1 %v4909_v50 }
 0x368   : > { %v3021_v16 = vrot.slane %v3007_v12, %v15491_v59  ;;  %v15507_v23 = vrot.slane %v3043_v18, %v15487_v51  ;;  %v15752_v40 = vpop.trf.xlu1 }
 0x369   : > { %3094 = vxpose.xlu0.b32.start.end [1/1] (short) (narrow) %v2998_v0, 16  ;;  %v3022_v3 = vcombine.high %v2998_v0, %v19376_v2  ;;  %v3023_v9 = vcombine.high %v3005_v5, %v19376_v2  ;;  %v3024_v15 = vcombine.high %v3014_v11, %v19376_v2  ;;  %v3058_v17 = vcombine.low %v3034_v14, %v3050_v13 }
 0x36a   : > { %v3025_v19 = vcombine.high %v3021_v16, %v19376_v2  ;;  %v3059_v22 = vcombine.high %v3034_v14, %v3050_v13  ;;  %v3074_v27 = vcombine.low %v15510_v24, %v15507_v23  ;;  %v3075_v30 = vcombine.high %v15510_v24, %v15507_v23 }
 0x36b   : > { %3126 = vxpose.xlu1.b32.start.end [1/1] (short) (narrow) %v3022_v3, 16  ;;  %v3066_v21 = vrot.slane %v3058_v17, %v15491_v59 }
 0x36c   : > { %v3073_v26 = vrot.slane %v3059_v22, %v15491_v59  ;;  %v15518_v29 = vrot.slane %v3074_v27, %v15491_v59  ;;  %v3089_v33 = vrot.slane %v3075_v30, %v15491_v59  ;;  %v15756_v42 = vpop.trf.xlu1 }
 0x36d   : > { %v3090_v25 = vcombine.high %v3066_v21, %v19376_v2 }
 0x36e   : > { %3158 = vxpose.xlu0.b32.start.end [1/1] (short) (narrow) %v3005_v5, 16  ;;  %v3091_v28 = vcombine.high %v3073_v26, %v19376_v2  ;;  %v3092_v32 = vcombine.high %v15518_v29, %v19376_v2  ;;  %v3093_v34 = vcombine.high %v3089_v33, %v19376_v2  ;;  %v4658_v2 = vld [vmem:[#allocation3 + $0xa8] sm:$0xf] }
 0x370   : > { %3190 = vxpose.xlu1.b32.start.end [1/1] (short) (narrow) %v3023_v9, 16 }
 0x373   : > { %3222 = vxpose.xlu0.b32.start.end [1/1] (short) (narrow) %v3014_v11, 16 }
 0x375   : > { %3254 = vxpose.xlu1.b32.start.end [1/1] (short) (narrow) %v3024_v15, 16 }
 0x378   : > { %3286 = vxpose.xlu0.b32.start.end [1/1] (short) (narrow) %v3021_v16, 16 }
 0x37a   : > { %3318 = vxpose.xlu1.b32.start.end [1/1] (short) (narrow) %v3025_v19, 16 }
 0x37d   : > { %3350 = vxpose.xlu0.b32.start.end [1/1] (short) (narrow) %v3066_v21, 16 }
 0x37f   : > { %3382 = vxpose.xlu1.b32.start.end [1/1] (short) (narrow) %v3090_v25, 16 }
 0x382   : > { %3414 = vxpose.xlu0.b32.start.end [1/1] (short) (narrow) %v3073_v26, 16 }
 0x384   : > { %3446 = vxpose.xlu1.b32.start.end [1/1] (short) (narrow) %v3091_v28, 16 }
 0x387   : > { %3478 = vxpose.xlu0.b32.start.end [1/1] (short) (narrow) %v15518_v29, 16 }
 0x389   : > { %3510 = vxpose.xlu1.b32.start.end [1/1] (short) (narrow) %v3092_v32, 16 }
 0x38c   : > { %3542 = vxpose.xlu0.b32.start.end [1/1] (short) (narrow) %v3089_v33, 16 }
 0x38e   : > { %3574 = vxpose.xlu1.b32.start.end [1/1] (short) (narrow) %v3093_v34, 16 }
 0x391   : > { %1037 = vxpose.xlu0.b32.start [1/2] (short) (narrow) %v969_v35, 16 }
 0x393   : > { %1069 = vxpose.xlu1.b32.start [1/2] (short) (narrow) %v971_v36, 16 }
 0x395   : > { %1038 = vxpose.xlu0.b32.end [2/2] (short) (narrow) %v970_v37, 16 }
 0x397   : > { %1070 = vxpose.xlu1.b32.end [2/2] (short) (narrow) %v972_v38, 16 }
 0x3e9   : > { %v3110_v43 = vpop.trf.xlu0 }
 0x3eb   : > { %v3142_v44 = vpop.trf.xlu1 }
 0x3ed   : > { %v3111_v45 = vpop.trf.xlu0 }
 0x3ef   : > { %v3143_v46 = vpop.trf.xlu1 }
 0x3f1   : > { %v3174_v47 = vpop.trf.xlu0 }
 0x3f2   : > { %v3606_v61 = vcombine.low %v3110_v43, %v3174_v47  ;;  %v3607_v62 = vcombine.high %v3110_v43, %v3174_v47 }
 0x3f3   : > { %v3206_v52 = vpop.trf.xlu1 }
 0x3f4   : > { %v3622_v57 = vcombine.low %v3142_v44, %v3206_v52  ;;  %v3623_v58 = vcombine.high %v3142_v44, %v3206_v52  ;;  %v3614_v7 = vrot.slane %v3606_v61, %v15487_v51  ;;  %v3621_v8 = vrot.slane %v3607_v62, %v15487_v51 }
 0x3f5   : > { %v3175_v54 = vpop.trf.xlu0 }
 0x3f6   : > { %v3630_v1 = vrot.slane %v3622_v57, %v15487_v51  ;;  %v3637_v3 = vrot.slane %v3623_v58, %v15487_v51  ;;  %v3878_v4 = vcombine.low %v3111_v45, %v3175_v54  ;;  %v3879_v9 = vcombine.high %v3111_v45, %v3175_v54 }
 0x3f7   : > { %v3207_v56 = vpop.trf.xlu1 }
 0x3f8   : > { %v3894_v63 = vcombine.low %v3143_v46, %v3207_v56  ;;  %v3895_v5 = vcombine.high %v3143_v46, %v3207_v56  ;;  %v3670_v12 = vcombine.low %v3614_v7, %v3630_v1  ;;  %v3671_v13 = vcombine.high %v3614_v7, %v3630_v1 }
 0x3f9   : > { %v3238_v60 = vpop.trf.xlu0  ;;  %v3686_v14 = vcombine.low %v3621_v8, %v3637_v3  ;;  %v3886_v15 = vrot.slane %v3878_v4, %v15487_v51  ;;  %v3687_v20 = vcombine.high %v3621_v8, %v3637_v3  ;;  %v3893_v21 = vrot.slane %v3879_v9, %v15487_v51 }
 0x3fa   : > { %v3902_v10 = vrot.slane %v3894_v63, %v15487_v51  ;;  %v3909_v16 = vrot.slane %v3895_v5, %v15487_v51  ;;  %v3678_v24 = vrot.slane %v3670_v12, %v15491_v59  ;;  %v3685_v25 = vrot.slane %v3671_v13, %v15491_v59 }
 0x3fb   : > { %v3270_v0 = vpop.trf.xlu1  ;;  %v3694_v28 = vrot.slane %v3686_v14, %v15491_v59  ;;  %v3701_v38 = vrot.slane %v3687_v20, %v15491_v59 }
 0x3fc   : > { %v3942_v22 = vcombine.low %v3886_v15, %v3902_v10  ;;  %v3943_v29 = vcombine.high %v3886_v15, %v3902_v10  ;;  %v3958_v30 = vcombine.low %v3893_v21, %v3909_v16  ;;  %v3959_v32 = vcombine.high %v3893_v21, %v3909_v16 }
 0x3fd   : > { %v3239_v6 = vpop.trf.xlu0 }
 0x3fe   : > { %v15788_v43 = vrot.slane %v3942_v22, %v15491_v59  ;;  %v15791_v52 = vrot.slane %v3943_v29, %v15491_v59  ;;  %v15794_v53 = vrot.slane %v3958_v30, %v15491_v59  ;;  %v15797_v54 = vrot.slane %v3959_v32, %v15491_v59 }
 0x3ff   : > { %v15774_v11 = vpop.trf.xlu1 }
 0x401   : > { %v3302_v17 = vpop.trf.xlu0 }
 0x402   : > { %v3638_v18 = vcombine.low %v3238_v60, %v3302_v17  ;;  %v3639_v19 = vcombine.high %v3238_v60, %v3302_v17 }
 0x403   : > { %v3334_v23 = vpop.trf.xlu1 }
 0x404   : > { %v3654_v26 = vcombine.low %v3270_v0, %v3334_v23  ;;  %v3655_v27 = vcombine.high %v3270_v0, %v3334_v23  ;;  %v3646_v34 = vrot.slane %v3638_v18, %v15487_v51  ;;  %v3653_v35 = vrot.slane %v3639_v19, %v15487_v51 }
 0x405   : > { %v3303_v33 = vpop.trf.xlu0 }
 0x406   : > { %v3662_v36 = vrot.slane %v3654_v26, %v15487_v51  ;;  %v3669_v37 = vrot.slane %v3655_v27, %v15487_v51  ;;  %v3910_v44 = vcombine.low %v3239_v6, %v3303_v33  ;;  %v3911_v45 = vcombine.high %v3239_v6, %v3303_v33 }
 0x407   : > { %v3335_v46 = vpop.trf.xlu1 }
 0x408   : > { %v3702_v47 = vcombine.low %v3646_v34, %v3662_v36  ;;  %v3703_v48 = vcombine.high %v3646_v34, %v3662_v36  ;;  %v3718_v49 = vcombine.low %v3653_v35, %v3669_v37  ;;  %v3719_v50 = vcombine.high %v3653_v35, %v3669_v37 }
 0x409   : > { %v3926_v55 = vcombine.low %v15774_v11, %v3335_v46  ;;  %v15805_v61 = vrot.slane %v3910_v44, %v15487_v51  ;;  %v15808_v62 = vrot.slane %v3911_v45, %v15487_v51  ;;  %v3927_v63 = vcombine.high %v15774_v11, %v3335_v46  ;;  %v15814_v1 = vpop.trf.xlu0  ;;  %v4567_v45 = vld [vmem:[#allocation3 + $0xc] sm:$0xf]  ;;  %v4574_v46 = vld [vmem:[#allocation3 + $0x18] sm:$0xf] }
 0x40a   : > { %v3710_v56 = vrot.slane %v3702_v47, %v15491_v59  ;;  %v3717_v57 = vrot.slane %v3703_v48, %v15491_v59  ;;  %v3726_v58 = vrot.slane %v3718_v49, %v15491_v59  ;;  %v3733_v60 = vrot.slane %v3719_v50, %v15491_v59 }
 0x40b   : > { %v15812_v0 = vrot.slane %v3926_v55, %v15487_v51  ;;  %v15816_v3 = vpop.trf.xlu1  ;;  %v15821_v19 = vrot.slane %v3927_v63, %v15487_v51  ;;  %v4581_v55 = vld [vmem:[#allocation3 + $0x24] sm:$0xf]  ;;  %v4588_v63 = vld [vmem:[#allocation3 + $0x30] sm:$0xf] }
 0x40c   : > { %v3734_v4 = vcombine.low %v3678_v24, %v3710_v56  ;;  %v3735_v5 = vcombine.high %v3678_v24, %v3710_v56  ;;  %v3736_v6 = vcombine.low %v3685_v25, %v3717_v57  ;;  %v3737_v7 = vcombine.high %v3685_v25, %v3717_v57 }
 0x40d   : > { %v3738_v8 = vcombine.low %v3694_v28, %v3726_v58  ;;  %v3739_v9 = vcombine.high %v3694_v28, %v3726_v58  ;;  %v3740_v10 = vcombine.low %v3701_v38, %v3733_v60  ;;  %v3741_v12 = vcombine.high %v3701_v38, %v3733_v60  ;;  %v15825_v28 = vpop.trf.xlu0 }
 0x40e   : > { %v13260_v13 = vpack.c.bf16 %v3734_v4, %v3734_v4  ;;  %v13262_v14 = vpack.c.bf16 %v3735_v5, %v3735_v5  ;;  %v13264_v15 = vpack.c.bf16 %v3736_v6, %v3736_v6  ;;  %v13266_v16 = vpack.c.bf16 %v3737_v7, %v3737_v7 }
 0x40f   : > { %v13268_v11 = vpack.c.bf16 %v3738_v8, %v3738_v8  ;;  %v13270_v17 = vpack.c.bf16 %v3739_v9, %v3739_v9  ;;  %v15818_v18 = vpack.c.bf16 %v3740_v10, %v3740_v10  ;;  %v15823_v20 = vpack.c.bf16 %v3741_v12, %v3741_v12  ;;  %v15827_v29 = vpop.trf.xlu1  ;;  %v4595_v8 = vld [vmem:[#allocation3 + $0x3c] sm:$0xf]  ;;  %v4602_v9 = vld [vmem:[#allocation3 + $0x48] sm:$0xf] }
 0x410   : > { %v4247_v21 = vshrl.u32 %v13260_v13, 16  ;;  %v4250_v22 = vshll.u32 %v13260_v13, 16  ;;  %v4264_v23 = vshrl.u32 %v13262_v14, 16  ;;  %v4267_v24 = vshll.u32 %v13262_v14, 16 }
 0x411   : > { %v4281_v25 = vshrl.u32 %v13264_v15, 16  ;;  %v4284_v26 = vshll.u32 %v13264_v15, 16  ;;  %v4298_v27 = vshrl.u32 %v13266_v16, 16  ;;  %v4301_v33 = vshll.u32 %v13266_v16, 16  ;;  %v3430_v15 = vpop.trf.xlu0 }
 0x412   : > { %v15829_v30 = vrot.slane %v4247_v21, 7  ;;  %v15831_v32 = vrot.slane %v4264_v23, 7  ;;  %v4315_v34 = vshrl.u32 %v13268_v11, 16  ;;  %v4318_v37 = vshll.u32 %v13268_v11, 16 }
 0x413   : > { %v15833_v35 = vrot.slane %v4281_v25, 7  ;;  %v15835_v36 = vrot.slane %v4298_v27, 7  ;;  %v4332_v38 = vshrl.u32 %v13270_v17, 16  ;;  %v4335_v50 = vshll.u32 %v13270_v17, 16  ;;  %v15862_v16 = vpop.trf.xlu1  ;;  %v4616_v27 = vld [vmem:[#allocation3 + $0x60] sm:$0xf] }
 0x414   : > { %v4252_v47 = vor.u32 %v4250_v22, %v15829_v30  ;;  %v4253_v48 = vrot.slane %v15829_v30, 4  ;;  %v4269_v49 = vor.u32 %v4267_v24, %v15831_v32  ;;  %v4270_v56 = vrot.slane %v15831_v32, 4  ;;  %v4592_v32 = vld [vmem:[#allocation3 + $0x38] sm:$0x1] }
 0x415   : > { %v4286_v57 = vor.u32 %v4284_v26, %v15833_v35  ;;  %v4287_v58 = vrot.slane %v15833_v35, 4  ;;  %v4303_v60 = vor.u32 %v4301_v33, %v15835_v36  ;;  %v4304_v4 = vrot.slane %v15835_v36, 4  ;;  %v4609_v26 = vld [vmem:[#allocation3 + $0x54] sm:$0xf]  ;;  %v4606_v36 = vld [vmem:[#allocation3 + $0x50] sm:$0x1] }
 0x416   : > { %v15851_v5 = vrot.slane %v4315_v34, 7  ;;  %v15853_v6 = vrot.slane %v4332_v38, 7  ;;  %v4349_v7 = vshrl.u32 %v15818_v18, 16  ;;  %v4352_v10 = vshll.u32 %v15818_v18, 16 }
 0x417   : > { %v4366_v12 = vshrl.u32 %v15823_v20, 16  ;;  %v4568_v13 = vsel %vm15839_vm7, %v4252_v47, %v4567_v45  ;;  %v4575_v14 = vsel %vm15839_vm7, %v4269_v49, %v4574_v46  ;;  %v4369_v22 = vshll.u32 %v15823_v20, 16 }
 0x418   : > { %v4320_v11 = vor.u32 %v4318_v37, %v15851_v5  ;;  %v4321_v17 = vrot.slane %v15851_v5, 4  ;;  %v4337_v21 = vor.u32 %v4335_v50, %v15853_v6  ;;  %4569 = vst [vmem:[#allocation3 + $0xc] sm:$0xf] %v4568_v13  ;;  %4576 = vst [vmem:[#allocation3 + $0x18] sm:$0xf] %v4575_v14  ;;  %v15868_v18 = vrot.slane %v4349_v7, 7  ;;  %v15900_v7 = vpop.trf.xlu0 }
 0x419   : > { %v15870_v23 = vrot.slane %v4366_v12, 7  ;;  %v4582_v24 = vsel %vm15839_vm7, %v4286_v57, %v4581_v55  ;;  %v4589_v25 = vsel %vm15839_vm7, %v4303_v60, %v4588_v63  ;;  %v3974_v34 = vcombine.low %v15805_v61, %v15812_v0 }
 0x41a   : > { %4583 = vst [vmem:[#allocation3 + $0x24] sm:$0xf] %v4582_v24  ;;  %4590 = vst [vmem:[#allocation3 + $0x30] sm:$0xf] %v4589_v25  ;;  %v4596_v33 = vsel %vm15839_vm7, %v4320_v11, %v4595_v8  ;;  %v4603_v20 = vsel %vm15839_vm7, %v4337_v21, %v4602_v9  ;;  %v3975_v37 = vcombine.high %v15805_v61, %v15812_v0  ;;  %v15902_v8 = vpop.trf.xlu1 }
 0x41b   : > { %v4354_v45 = vor.u32 %v4352_v10, %v15868_v18  ;;  %v4371_v47 = vor.u32 %v4369_v22, %v15870_v23  ;;  %4597 = vst [vmem:[#allocation3 + $0x3c] sm:$0xf] %v4596_v33  ;;  %4604 = vst [vmem:[#allocation3 + $0x48] sm:$0xf] %v4603_v20  ;;  %v3982_v49 = vrot.slane %v3974_v34, %v15491_v59 }
 0x41c   : > { %v3989_v50 = vrot.slane %v3975_v37, %v15491_v59  ;;  %v3990_v55 = vcombine.low %v15808_v62, %v15821_v19  ;;  %v3991_v61 = vcombine.high %v15808_v62, %v15821_v19  ;;  %v3742_v60 = vcombine.low %v15814_v1, %v3430_v15 }
 0x41d   : > { %v4610_v0 = vsel %vm15839_vm7, %v4354_v45, %v4609_v26  ;;  %v4617_v57 = vsel %vm15839_vm7, %v4371_v47, %v4616_v27  ;;  %v3743_v63 = vcombine.high %v15814_v1, %v3430_v15  ;;  %v4006_v19 = vcombine.low %v15788_v43, %v3982_v49  ;;  %v15925_v47 = vpop.trf.xlu0 }
 0x41e   : > { %4611 = vst [vmem:[#allocation3 + $0x54] sm:$0xf] %v4610_v0  ;;  %4618 = vst [vmem:[#allocation3 + $0x60] sm:$0xf] %v4617_v57  ;;  %v3998_v9 = vrot.slane %v3990_v55, %v15491_v59  ;;  %v4005_v62 = vrot.slane %v3991_v61, %v15491_v59  ;;  %v4007_v10 = vcombine.high %v15788_v43, %v3982_v49  ;;  %v15927_v49 = vpop.trf.xlu1 }
 0x41f   : > { %v4008_v13 = vcombine.low %v15791_v52, %v3989_v50  ;;  %v4009_v1 = vcombine.high %v15791_v52, %v3989_v50  ;;  %v15912_v14 = vrot.slane %v3742_v60, %v15487_v51  ;;  %v13276_v24 = vpack.c.bf16 %v4006_v19, %v4006_v19 }
 0x420   : > { %v4010_v15 = vcombine.low %v15794_v53, %v3998_v9  ;;  %v4011_v11 = vcombine.high %v15794_v53, %v3998_v9  ;;  %v4012_v21 = vcombine.low %v15797_v54, %v4005_v62  ;;  %v4013_v22 = vcombine.high %v15797_v54, %v4005_v62 }
 0x421   : > { %v13278_v25 = vpack.c.bf16 %v4007_v10, %v4007_v10  ;;  %v13280_v43 = vpack.c.bf16 %v4008_v13, %v4008_v13  ;;  %v13282_v26 = vpack.c.bf16 %v4009_v1, %v4009_v1  ;;  %v15921_v52 = vrot.slane %v3743_v63, %v15487_v51  ;;  %v4623_v13 = vld [vmem:[#allocation3 + $0x6c] sm:$0xf]  ;;  %v4630_v1 = vld [vmem:[#allocation3 + $0x78] sm:$0xf] }
 0x422   : > { %v13284_v27 = vpack.c.bf16 %v4010_v15, %v4010_v15  ;;  %v13286_v33 = vpack.c.bf16 %v4011_v11, %v4011_v11  ;;  %v15918_v20 = vpack.c.bf16 %v4012_v21, %v4012_v21  ;;  %v15923_v34 = vpack.c.bf16 %v4013_v22, %v4013_v22 }
 0x423   : > { %v4383_v37 = vshrl.u32 %v13276_v24, 16  ;;  %v4386_v45 = vshll.u32 %v13276_v24, 16  ;;  %v4400_v53 = vshrl.u32 %v13278_v25, 16  ;;  %v4403_v54 = vshll.u32 %v13278_v25, 16  ;;  %v4637_v24 = vld [vmem:[#allocation3 + $0x84] sm:$0xf] }
 0x424   : > { %v4417_v50 = vshrl.u32 %v13280_v43, 16  ;;  %v4420_v55 = vshll.u32 %v13280_v43, 16  ;;  %v4434_v61 = vshrl.u32 %v13282_v26, 16  ;;  %v4437_v60 = vshll.u32 %v13282_v26, 16 }
 0x425   : > { %v15929_v0 = vrot.slane %v4383_v37, 7  ;;  %v15931_v57 = vrot.slane %v4400_v53, 7  ;;  %v4451_v63 = vshrl.u32 %v13284_v27, 16  ;;  %v4454_v19 = vshll.u32 %v13284_v27, 16  ;;  %v4644_v27 = vld [vmem:[#allocation3 + $0x90] sm:$0xf] }
 0x426   : > { %v15933_v9 = vrot.slane %v4417_v50, 7  ;;  %v15935_v62 = vrot.slane %v4434_v61, 7  ;;  %v4468_v10 = vshrl.u32 %v13286_v33, 16  ;;  %v4471_v22 = vshll.u32 %v13286_v33, 16  ;;  %v15952_v33 = vpop.trf.xlu1 }
 0x427   : > { %v4388_v15 = vor.u32 %v4386_v45, %v15929_v0  ;;  %v4405_v21 = vor.u32 %v4403_v54, %v15931_v57  ;;  %v15945_v50 = vrot.slane %v4451_v63, 7  ;;  %v4485_v61 = vshrl.u32 %v15918_v20, 16  ;;  %v15950_v54 = vpop.trf.xlu0 }
 0x428   : > { %v4422_v43 = vor.u32 %v4420_v55, %v15933_v9  ;;  %v4439_v37 = vor.u32 %v4437_v60, %v15935_v62  ;;  %v15947_v45 = vrot.slane %v4468_v10, 7  ;;  %v4488_v55 = vshll.u32 %v15918_v20, 16 }
 0x429   : > { %v4502_v26 = vshrl.u32 %v15923_v34, 16  ;;  %v4624_v60 = vsel %vm15839_vm7, %v4388_v15, %v4623_v13  ;;  %v4631_v63 = vsel %vm15839_vm7, %v4405_v21, %v4630_v1  ;;  %v4456_v10 = vor.u32 %v4454_v19, %v15945_v50  ;;  %v4665_v15 = vld [vmem:[#allocation3 + $0xb4] sm:$0xf]  ;;  %v4672_v19 = vld [vmem:[#allocation3 + $0xc0] sm:$0xf] }
 0x42a   : > { %v4473_v25 = vor.u32 %v4471_v22, %v15947_v45  ;;  %v4505_v11 = vshll.u32 %v15923_v34, 16  ;;  %4625 = vst [vmem:[#allocation3 + $0x6c] sm:$0xf] %v4624_v60  ;;  %4632 = vst [vmem:[#allocation3 + $0x78] sm:$0xf] %v4631_v63  ;;  %v15964_v12 = vrot.slane %v4485_v61, 7  ;;  %v4638_v13 = vsel %vm15839_vm7, %v4422_v43, %v4637_v24  ;;  %v3590_v61 = vpop.trf.xlu1 }
 0x42b   : > { %v15966_v20 = vrot.slane %v4502_v26, 7  ;;  %v4645_v1 = vsel %vm15839_vm7, %v4439_v37, %v4644_v27  ;;  %4639 = vst [vmem:[#allocation3 + $0x84] sm:$0xf] %v4638_v13  ;;  %v4652_v21 = vsel %vm15839_vm7, %v4456_v10, %v4651_v31  ;;  %v3758_v22 = vcombine.low %v15816_v3, %v15862_v16 }
 0x42c   : > { %4646 = vst [vmem:[#allocation3 + $0x90] sm:$0xf] %v4645_v1  ;;  %v4659_v34 = vsel %vm15839_vm7, %v4473_v25, %v4658_v2  ;;  %v3759_v26 = vcombine.high %v15816_v3, %v15862_v16  ;;  %v4490_v43 = vor.u32 %v4488_v55, %v15964_v12  ;;  %4653 = vst [vmem:[#allocation3 + $0x9c] sm:$0xf] %v4652_v21  ;;  %v3558_v16 = vpop.trf.xlu0 }
 0x42d   : > { %v4507_v27 = vor.u32 %v4505_v11, %v15966_v20  ;;  %4660 = vst [vmem:[#allocation3 + $0xa8] sm:$0xf] %v4659_v34  ;;  %v3766_v31 = vrot.slane %v3758_v22, %v15487_v51  ;;  %v4014_v25 = vcombine.low %v15825_v28, %v15900_v7  ;;  %v4015_v3 = vcombine.high %v15825_v28, %v15900_v7 }
 0x42e   : > { %v3773_v2 = vrot.slane %v3759_v26, %v15487_v51  ;;  %v4666_v55 = vsel %vm15839_vm7, %v4490_v43, %v4665_v15  ;;  %v4030_v60 = vcombine.low %v15827_v29, %v15902_v8  ;;  %v4031_v63 = vcombine.high %v15827_v29, %v15902_v8 }
 0x42f   : > { %v4673_v11 = vsel %vm15839_vm7, %v4507_v27, %v4672_v19  ;;  %4667 = vst [vmem:[#allocation3 + $0xb4] sm:$0xf] %v4666_v55  ;;  %v3806_v10 = vcombine.low %v15912_v14, %v3766_v31  ;;  %v3807_v28 = vcombine.high %v15912_v14, %v3766_v31  ;;  %v4022_v1 = vrot.slane %v4014_v25, %v15487_v51  ;;  %v3591_v55 = vpop.trf.xlu1 }
 0x430   : > { %4674 = vst [vmem:[#allocation3 + $0xc0] sm:$0xf] %v4673_v11  ;;  %v3822_v7 = vcombine.low %v15921_v52, %v3773_v2  ;;  %v3823_v13 = vcombine.high %v15921_v52, %v3773_v2  ;;  %v4029_v15 = vrot.slane %v4015_v3, %v15487_v51  ;;  %v4038_v19 = vrot.slane %v4030_v60, %v15487_v51  ;;  %v3559_v3 = vpop.trf.xlu0 }
 0x431   : > { %v4045_v21 = vrot.slane %v4031_v63, %v15487_v51  ;;  %v3814_v29 = vrot.slane %v3806_v10, %v15491_v59  ;;  %v3821_v8 = vrot.slane %v3807_v28, %v15491_v59  ;;  %v3774_v27 = vcombine.low %v15925_v47, %v3558_v16 }
 0x432   : > { %v3830_v34 = vrot.slane %v3822_v7, %v15491_v59  ;;  %v3837_v14 = vrot.slane %v3823_v13, %v15491_v59  ;;  %v4078_v22 = vcombine.low %v4022_v1, %v4038_v19  ;;  %v4079_v26 = vcombine.high %v4022_v1, %v4038_v19 }
 0x433   : > { %v4094_v43 = vcombine.low %v4029_v15, %v4045_v21  ;;  %v4095_v52 = vcombine.high %v4029_v15, %v4045_v21  ;;  %v3775_v31 = vcombine.high %v15925_v47, %v3558_v16  ;;  %v3790_v2 = vcombine.low %v15927_v49, %v3590_v61 }
 0x434   : > { %v3791_v25 = vcombine.high %v15927_v49, %v3590_v61  ;;  %v16015_v11 = vrot.slane %v4078_v22, %v15491_v59  ;;  %v16018_v60 = vrot.slane %v4079_v26, %v15491_v59  ;;  %v3782_v47 = vrot.slane %v3774_v27, %v15487_v51 }
 0x435   : > { %v16021_v63 = vrot.slane %v4094_v43, %v15491_v59  ;;  %v16024_v10 = vrot.slane %v4095_v52, %v15491_v59  ;;  %v3789_v16 = vrot.slane %v3775_v31, %v15487_v51  ;;  %v3798_v49 = vrot.slane %v3790_v2, %v15487_v51 }
 0x436   : > { %v3805_v61 = vrot.slane %v3791_v25, %v15487_v51  ;;  %v4046_v28 = vcombine.low %v15950_v54, %v3559_v3  ;;  %v4047_v7 = vcombine.high %v15950_v54, %v3559_v3  ;;  %v4062_v13 = vcombine.low %v15952_v33, %v3591_v55 }
 0x437   : > { %v4063_v1 = vcombine.high %v15952_v33, %v3591_v55  ;;  %v3838_v15 = vcombine.low %v3782_v47, %v3798_v49  ;;  %v3839_v19 = vcombine.high %v3782_v47, %v3798_v49 }
 0x438   : > { %v3854_v21 = vcombine.low %v3789_v16, %v3805_v61  ;;  %v3855_v22 = vcombine.high %v3789_v16, %v3805_v61  ;;  %v16035_v26 = vrot.slane %v4046_v28, %v15487_v51  ;;  %v16038_v43 = vrot.slane %v4047_v7, %v15487_v51 }
 0x439   : > { %v16041_v52 = vrot.slane %v4062_v13, %v15487_v51  ;;  %v16044_v54 = vrot.slane %v4063_v1, %v15487_v51  ;;  %v3846_v33 = vrot.slane %v3838_v15, %v15491_v59  ;;  %v3853_v27 = vrot.slane %v3839_v19, %v15491_v59 }
 0x43a   : > { %v3862_v31 = vrot.slane %v3854_v21, %v15491_v59  ;;  %v3869_v2 = vrot.slane %v3855_v22, %v15491_v59 }
 0x43b   : > { %v3870_v16 = vcombine.low %v3814_v29, %v3846_v33  ;;  %v3871_v49 = vcombine.high %v3814_v29, %v3846_v33  ;;  %v3872_v61 = vcombine.low %v3821_v8, %v3853_v27  ;;  %v3873_v28 = vcombine.high %v3821_v8, %v3853_v27 }
 0x43c   : > { %v3874_v7 = vcombine.low %v3830_v34, %v3862_v31  ;;  %v3875_v13 = vcombine.high %v3830_v34, %v3862_v31  ;;  %v3876_v1 = vcombine.low %v3837_v14, %v3869_v2  ;;  %v3877_v15 = vcombine.high %v3837_v14, %v3869_v2 }
 0x43d   : > { %v13261_v19 = vpack.c.bf16 %v3870_v16, %v3870_v16  ;;  %v13263_v21 = vpack.c.bf16 %v3871_v49, %v3871_v49  ;;  %v13265_v22 = vpack.c.bf16 %v3872_v61, %v3872_v61  ;;  %v13267_v37 = vpack.c.bf16 %v3873_v28, %v3873_v28 }
 0x43e   : > { %v13269_v24 = vpack.c.bf16 %v3874_v7, %v3874_v7  ;;  %v13271_v53 = vpack.c.bf16 %v3875_v13, %v3875_v13  ;;  %v13273_v46 = vpack.c.bf16 %v3876_v1, %v3876_v1  ;;  %v16058_v3 = vpack.c.bf16 %v3877_v15, %v3877_v15 }
 0x43f   : > { %v4255_v55 = vshrl.u32 %v13261_v19, 16  ;;  %v4258_v25 = vshll.u32 %v13261_v19, 16  ;;  %v4272_v47 = vshrl.u32 %v13263_v21, 16  ;;  %v4275_v38 = vshll.u32 %v13263_v21, 16 }
 0x440   : > { %v4289_v29 = vshrl.u32 %v13265_v22, 16  ;;  %v4292_v33 = vshll.u32 %v13265_v22, 16  ;;  %v4306_v8 = vshrl.u32 %v13267_v37, 16  ;;  %v4309_v27 = vshll.u32 %v13267_v37, 16  ;;  %v4571_v22 = vld [vmem:[#allocation3 + $0x14] sm:$0x1] }
 0x441   : > { %v4257_v34 = vrot.slane %v4255_v55, 7  ;;  %v4274_v31 = vrot.slane %v4272_v47, 7  ;;  %v4323_v14 = vshrl.u32 %v13269_v24, 16  ;;  %v4326_v2 = vshll.u32 %v13269_v24, 16 }
 0x442   : > { %v19473_v16 = vmov 0  ;;  %v4291_v49 = vrot.slane %v4289_v29, 7  ;;  %v4308_v61 = vrot.slane %v4306_v8, 7  ;;  %v4340_v28 = vshrl.u32 %v13271_v53, 16  ;;  %v4585_v8 = vld [vmem:[#allocation3 + $0x2c] sm:$0x1] }
 0x443   : > { %v19474_v16 = vsel %vm16062_vm10, 4294967295, %v19473_v16  ;;  %v4343_v7 = vshll.u32 %v13271_v53, 16  ;;  %v4260_v13 = vor.u32 %v4258_v25, %v4257_v34  ;;  %v4262_v1 = vrot.slane %v4257_v34, 4 }
 0x444   : > { %19475 = vst [vmem:[#allocation8_spill] sm:$0xff] %v19474_v16  ;;  %v4277_v15 = vor.u32 %v4275_v38, %v4274_v31  ;;  %v4279_v19 = vrot.slane %v4274_v31, 4  ;;  %v4294_v21 = vor.u32 %v4292_v33, %v4291_v49  ;;  %v4296_v37 = vrot.slane %v4291_v49, 4  ;;  %v4578_v33 = vld [vmem:[#allocation3 + $0x20] sm:$0x1] }
 0x445   : > { %v4311_v55 = vor.u32 %v4309_v27, %v4308_v61  ;;  %v4313_v47 = vrot.slane %v4308_v61, 4  ;;  %v4261_v53 = vsel %vm16062_vm10, %v4253_v48, %v4260_v13  ;;  %v4325_v25 = vrot.slane %v4323_v14, 7 }
 0x446   : > { %v4278_v38 = vsel %vm16062_vm10, %v4270_v56, %v4277_v15  ;;  %v4342_v29 = vrot.slane %v4340_v28, 7  ;;  %v4295_v27 = vsel %vm16062_vm10, %v4287_v58, %v4294_v21  ;;  %v4357_v48 = vshrl.u32 %v13273_v46, 16  ;;  %4570 = vst.msk [vmem:[#allocation3 + $0x10] sm:$0xf] %vm855_vm2, %v4261_v53  ;;  %v4599_v56 = vld [vmem:[#allocation3 + $0x44] sm:$0x1] }
 0x447   : > { %v4312_v30 = vsel %vm16062_vm10, %v4304_v4, %v4311_v55  ;;  %v4360_v34 = vshll.u32 %v13273_v46, 16  ;;  %4577 = vst.msk [vmem:[#allocation3 + $0x1c] sm:$0xf] %vm855_vm2, %v4278_v38  ;;  %v4328_v31 = vor.u32 %v4326_v2, %v4325_v25  ;;  %v4330_v14 = vrot.slane %v4325_v25, 4  ;;  %4584 = vst.msk [vmem:[#allocation3 + $0x28] sm:$0xf] %vm855_vm2, %v4295_v27 }
 0x448   : > { %v4345_v49 = vor.u32 %v4343_v7, %v4342_v29  ;;  %v4347_v35 = vrot.slane %v4342_v29, 4  ;;  %4591 = vst.msk [vmem:[#allocation3 + $0x34] sm:$0xf] %vm855_vm2, %v4312_v30  ;;  %v4359_v58 = vrot.slane %v4357_v48, 7  ;;  %v4374_v4 = vshrl.u32 %v16058_v3, 16 }
 0x449   : > { %v4377_v46 = vshll.u32 %v16058_v3, 16  ;;  %v4572_v61 = vsel %vm16068_vm11, %v4262_v1, %v4571_v22  ;;  %v4613_v28 = vld [vmem:[#allocation3 + $0x5c] sm:$0x1]  ;;  %v4329_v2 = vsel %vm16062_vm10, %v4321_v17, %v4328_v31  ;;  %v19478_v7 = vrot.slane %v15853_v6, 4  ;;  %v4620_v6 = vld [vmem:[#allocation3 + $0x68] sm:$0x1] }
 0x44a   : > { %4573 = vst [vmem:[#allocation3 + $0x14] sm:$0x1] %v4572_v61  ;;  %v4579_v15 = vsel %vm16068_vm11, %v4279_v19, %v4578_v33  ;;  %v4586_v3 = vsel %vm16068_vm11, %v4296_v37, %v4585_v8  ;;  %v4362_v21 = vor.u32 %v4360_v34, %v4359_v58  ;;  %v4364_v1 = vrot.slane %v4359_v58, 4  ;;  %4598 = vst.msk [vmem:[#allocation3 + $0x40] sm:$0xf] %vm855_vm2, %v4329_v2 }
 0x44b   : > { %v4346_v13 = vsel %vm16062_vm10, %v19478_v7, %v4345_v49  ;;  %v4376_v55 = vrot.slane %v4374_v4, 7  ;;  %4580 = vst [vmem:[#allocation3 + $0x20] sm:$0x1] %v4579_v15  ;;  %4587 = vst [vmem:[#allocation3 + $0x2c] sm:$0x1] %v4586_v3  ;;  %v4593_v5 = vsel %vm16068_vm11, %v4313_v47, %v4592_v32  ;;  %v4600_v17 = vsel %vm16068_vm11, %v4330_v14, %v4599_v56 }
 0x44c   : > { %4605 = vst.msk [vmem:[#allocation3 + $0x4c] sm:$0xf] %vm855_vm2, %v4346_v13  ;;  %4594 = vst [vmem:[#allocation3 + $0x38] sm:$0x1] %v4593_v5  ;;  %v4607_v19 = vsel %vm16068_vm11, %v4347_v35, %v4606_v36  ;;  %v19479_v37 = vcombine.low %v16035_v26, %v16041_v52  ;;  %v19480_v47 = vcombine.high %v16035_v26, %v16041_v52  ;;  %v19481_v38 = vrot.slane %v15868_v18, 4 }
 0x44d   : > { %v4379_v29 = vor.u32 %v4377_v46, %v4376_v55  ;;  %v4381_v33 = vrot.slane %v4376_v55, 4  ;;  %4601 = vst [vmem:[#allocation3 + $0x44] sm:$0x1] %v4600_v17  ;;  %4608 = vst [vmem:[#allocation3 + $0x50] sm:$0x1] %v4607_v19  ;;  %v4614_v8 = vsel %vm16068_vm11, %v4364_v1, %v4613_v28  ;;  %v19482_v26 = vcombine.low %v16038_v43, %v16044_v54  ;;  %v15140_v34 = vld [vmem:[#allocation3 + $0xc] sm:$0xff]  }
 0x44e   : > { %v4118_v22 = vrot.slane %v19479_v37, %v15491_v59  ;;  %v4125_v53 = vrot.slane %v19480_v47, %v15491_v59  ;;  %v4363_v25 = vsel %vm16062_vm10, %v19481_v38, %v4362_v21  ;;  %4615 = vst [vmem:[#allocation3 + $0x5c] sm:$0x1] %v4614_v8  ;;  %v19483_v18 = vcombine.high %v16038_v43, %v16044_v54  ;;  %v15141_v35 = vld [vmem:[#allocation3 + $0x18] sm:$0xff]   ;;  %v15142_v43 = vld [vmem:[#allocation3 + $0x24] sm:$0xff]  }
 0x44f   : > { %4612 = vst.msk [vmem:[#allocation3 + $0x58] sm:$0xf] %vm855_vm2, %v4363_v25  ;;  %v4134_v52 = vrot.slane %v19482_v26, %v15491_v59  ;;  %v19484_v32 = vrot.slane %v15870_v23, 4  ;;  %v4621_v31 = vsel %vm16068_vm11, %v4381_v33, %v4620_v6  ;;  %13838 = vmatmul.mubr.msk.bf16.vlgmr.msra.gmra.mrb[4].mxu1 %vm4858_vm5, %v15140_v34  ;;  %14007 = vmatprep.mubr.msk.bf16.mxu0 %vm4858_vm5, %v15141_v35  ;;  %v4627_v26 = vld [vmem:[#allocation3 + $0x74] sm:$0x1]  ;;  %v19485_v34 = vrot.slane %v15929_v0, 4 }
 0x450   : > { %v4141_v27 = vrot.slane %v19483_v18, %v15491_v59  ;;  %v4142_v30 = vcombine.low %v16015_v11, %v4118_v22  ;;  %v4143_v48 = vcombine.high %v16015_v11, %v4118_v22  ;;  %v4144_v14 = vcombine.low %v16018_v60, %v4125_v53  ;;  %4622 = vst [vmem:[#allocation3 + $0x68] sm:$0x1] %v4621_v31 }
 0x451   : > { %v4380_v56 = vsel %vm16062_vm10, %v19484_v32, %v4379_v29  ;;  %v4145_v49 = vcombine.high %v16018_v60, %v4125_v53  ;;  %v4146_v11 = vcombine.low %v16021_v63, %v4134_v52  ;;  %v4147_v54 = vcombine.high %v16021_v63, %v4134_v52  ;;  %13841 = vmatprep.mubr.msk.bf16.mxu1 %vm4858_vm5, %v15141_v35  ;;  %v15143_v63 = vld [vmem:[#allocation3 + $0x30] sm:$0xff]   ;;  %v15144_v35 = vld [vmem:[#allocation3 + $0x3c] sm:$0xff]  }
 0x452   : > { %4619 = vst.msk [vmem:[#allocation3 + $0x64] sm:$0xf] %vm855_vm2, %v4380_v56  ;;  %v4148_v23 = vcombine.low %v16024_v10, %v4141_v27  ;;  %v4149_v36 = vcombine.high %v16024_v10, %v4141_v27  ;;  %v13277_v58 = vpack.c.bf16 %v4142_v30, %v4142_v30  ;;  %v13279_v4 = vpack.c.bf16 %v4143_v48, %v4143_v48  ;;  %v4634_v48 = vld [vmem:[#allocation3 + $0x80] sm:$0x1] }
 0x453   : > { %v13281_v46 = vpack.c.bf16 %v4144_v14, %v4144_v14  ;;  %v13283_v61 = vpack.c.bf16 %v4145_v49, %v4145_v49  ;;  %v13285_v60 = vpack.c.bf16 %v4146_v11, %v4146_v11  ;;  %v13287_v28 = vpack.c.bf16 %v4147_v54, %v4147_v54  ;;  %14008 = vmatmul.mubr.msk.bf16.vlgmr.msra.gmra.mrb[8].mxu0 %vm4858_vm5, %v15142_v43  ;;  %v4641_v11 = vld [vmem:[#allocation3 + $0x8c] sm:$0x1] }
 0x454   : > { %v16156_v2 = vpack.c.bf16 %v4148_v23, %v4148_v23  ;;  %v16158_v7 = vpack.c.bf16 %v4149_v36, %v4149_v36  ;;  %v4391_v13 = vshrl.u32 %v13277_v58, 16  ;;  %v4394_v15 = vshll.u32 %v13277_v58, 16  ;;  %14011 = vmatprep.mubr.msk.bf16.mxu0 %vm4858_vm5, %v15143_v63  ;;  %v15145_v58 = vld [vmem:[#allocation3 + $0x48] sm:$0xff]  }
 0x455   : > { %v4408_v10 = vshrl.u32 %v13279_v4, 16  ;;  %v4411_v3 = vshll.u32 %v13279_v4, 16  ;;  %v4425_v21 = vshrl.u32 %v13281_v46, 16  ;;  %v4428_v1 = vshll.u32 %v13281_v46, 16  ;;  %v4648_v4 = vld [vmem:[#allocation3 + $0x98] sm:$0x1] }
 0x456   : > { %v4442_v55 = vshrl.u32 %v13283_v61, 16  ;;  %v4445_v5 = vshll.u32 %v13283_v61, 16  ;;  %v4393_v6 = vrot.slane %v4391_v13, 7  ;;  %v4459_v19 = vshrl.u32 %v13285_v60, 16  ;;  %v4655_v46 = vld [vmem:[#allocation3 + $0xa4] sm:$0x1] }
 0x457   : > { %v4410_v17 = vrot.slane %v4408_v10, 7  ;;  %v4462_v37 = vshll.u32 %v13285_v60, 16  ;;  %v4427_v22 = vrot.slane %v4425_v21, 7  ;;  %v4476_v53 = vshrl.u32 %v13287_v28, 16  ;;  %13842 = vmatmul.mubr.msk.bf16.gmra.mrb[8].mxu1 %vm4858_vm5, %v15142_v43  ;;  %v1053_v10 = vpop.trf.xlu0 }
 0x458   : > { %v4444_v47 = vrot.slane %v4442_v55, 7  ;;  %v4479_v38 = vshll.u32 %v13287_v28, 16  ;;  %v4396_v25 = vor.u32 %v4394_v15, %v4393_v6  ;;  %v4398_v29 = vrot.slane %v4393_v6, 4  ;;  %13845 = vmatprep.mubr.msk.bf16.mxu1 %vm4858_vm5, %v15143_v63 }
 0x459   : > { %v4413_v33 = vor.u32 %v4411_v3, %v4410_v17  ;;  %v4415_v8 = vrot.slane %v4410_v17, 4  ;;  %v4430_v52 = vor.u32 %v4428_v1, %v4427_v22  ;;  %v4432_v18 = vrot.slane %v4427_v22, 4  ;;  %v4669_v3 = vld [vmem:[#allocation3 + $0xbc] sm:$0x1] }
 0x45a   : > { %v4447_v27 = vor.u32 %v4445_v5, %v4444_v47  ;;  %v4449_v30 = vrot.slane %v4444_v47, 4  ;;  %v4397_v32 = vsel %vm16062_vm10, %v19485_v34, %v4396_v25  ;;  %v19486_v56 = vrot.slane %v15931_v57, 4  ;;  %v4676_v47 = vld [vmem:[#allocation3 + $0xc8] sm:$0x1] }
 0x45b   : > { %v4461_v14 = vrot.slane %v4459_v19, 7  ;;  %v4478_v49 = vrot.slane %v4476_v53, 7  ;;  %v19487_v54 = vrot.slane %v15933_v9, 4  ;;  %v19488_v0 = vrot.slane %v15935_v62, 4  ;;  %4626 = vst.msk [vmem:[#allocation3 + $0x70] sm:$0xf] %vm855_vm2, %v4397_v32  ;;  %14012 = vmatmul.mubr.msk.bf16.gmra.mrb[12].mxu0 %vm4858_vm5, %v15144_v35 }
 0x45c   : > { %v4414_v31 = vsel %vm16062_vm10, %v19486_v56, %v4413_v33  ;;  %v4493_v57 = vshrl.u32 %v16156_v2, 16  ;;  %v4496_v36 = vshll.u32 %v16156_v2, 16  ;;  %v4662_v62 = vld [vmem:[#allocation3 + $0xb0] sm:$0x1]  ;;  %v4510_v2 = vshrl.u32 %v16158_v7, 16  ;;  %14015 = vmatprep.mubr.msk.bf16.mxu0 %vm4858_vm5, %v15145_v58 }
 0x45d   : > { %v4431_v43 = vsel %vm16062_vm10, %v19487_v54, %v4430_v52  ;;  %v4448_v23 = vsel %vm16062_vm10, %v19488_v0, %v4447_v27  ;;  %4633 = vst.msk [vmem:[#allocation3 + $0x7c] sm:$0xf] %vm855_vm2, %v4414_v31  ;;  %v4464_v9 = vor.u32 %v4462_v37, %v4461_v14  ;;  %v4466_v61 = vrot.slane %v4461_v14, 4 }
 0x45e   : > { %v4481_v60 = vor.u32 %v4479_v38, %v4478_v49  ;;  %v4483_v28 = vrot.slane %v4478_v49, 4  ;;  %4640 = vst.msk [vmem:[#allocation3 + $0x88] sm:$0xf] %vm855_vm2, %v4431_v43  ;;  %4647 = vst.msk [vmem:[#allocation3 + $0x94] sm:$0xf] %vm855_vm2, %v4448_v23  ;;  %v4495_v63 = vrot.slane %v4493_v57, 7  ;;  %v4628_v15 = vsel %vm16068_vm11, %v4398_v29, %v4627_v26 }
 0x45f   : > { %v4513_v13 = vshll.u32 %v16158_v7, 16  ;;  %v19489_v21 = vrot.slane %v15945_v50, 4  ;;  %v19490_v55 = vrot.slane %v15947_v45, 4  ;;  %4629 = vst [vmem:[#allocation3 + $0x74] sm:$0x1] %v4628_v15  ;;  %v4635_v7 = vsel %vm16068_vm11, %v4415_v8, %v4634_v48  ;;  %v1085_v45 = vpop.trf.xlu1  ;;  %13846 = vmatmul.mubr.msk.bf16.gmra.mrb[12].mxu1 %vm4858_vm5, %v15144_v35 }
 0x460   : > { %v4642_v6 = vsel %vm16068_vm11, %v4432_v18, %v4641_v11  ;;  %v4498_v17 = vor.u32 %v4496_v36, %v4495_v63  ;;  %v4500_v19 = vrot.slane %v4495_v63, 4  ;;  %v4512_v37 = vrot.slane %v4510_v2, 7  ;;  %4636 = vst [vmem:[#allocation3 + $0x80] sm:$0x1] %v4635_v7  ;;  %13849 = vmatprep.mubr.msk.bf16.mxu1 %vm4858_vm5, %v15145_v58  ;;  %v1054_v36 = vpop.trf.xlu0 }
 0x461   : > { %v4465_v1 = vsel %vm16062_vm10, %v19489_v21, %v4464_v9  ;;  %v4482_v5 = vsel %vm16062_vm10, %v19490_v55, %v4481_v60  ;;  %4643 = vst [vmem:[#allocation3 + $0x8c] sm:$0x1] %v4642_v6  ;;  %v4649_v50 = vsel %vm16068_vm11, %v4449_v30, %v4648_v4  ;;  %v4508_v22 = vrot.slane %v15966_v20, 4  ;;  %v15147_v30 = vld [vmem:[#allocation3 + $0x60] sm:$0xff]  }
 0x462   : > { %4654 = vst.msk [vmem:[#allocation3 + $0xa0] sm:$0xf] %vm855_vm2, %v4465_v1  ;;  %4661 = vst.msk [vmem:[#allocation3 + $0xac] sm:$0xf] %vm855_vm2, %v4482_v5  ;;  %v4656_v53 = vsel %vm16068_vm11, %v4466_v61, %v4655_v46  ;;  %v4663_v38 = vsel %vm16068_vm11, %v4483_v28, %v4662_v62  ;;  %v1101_v25 = vcombine.low %v15750_v39, %v1053_v10  ;;  %v19491_v29 = vrot.slane %v15964_v12, 4  ;;  %v15146_v12 = vld [vmem:[#allocation3 + $0x54] sm:$0xff]  }
 0x463   : > { %4650 = vst [vmem:[#allocation3 + $0x98] sm:$0x1] %v4649_v50  ;;  %v4515_v8 = vor.u32 %v4513_v13, %v4512_v37  ;;  %v4517_v26 = vrot.slane %v4512_v37, 4  ;;  %4657 = vst [vmem:[#allocation3 + $0xa4] sm:$0x1] %v4656_v53  ;;  %v4670_v20 = vsel %vm16068_vm11, %v4500_v19, %v4669_v3  ;;  %v1117_v52 = vcombine.low %v15752_v40, %v1085_v45  ;;  %v15148_v43 = vld [vmem:[#allocation3 + $0x6c] sm:$0xff]   ;;  %v1086_v0 = vpop.trf.xlu1 }
 0x464   : > { %v4499_v33 = vsel %vm16062_vm10, %v19491_v29, %v4498_v17  ;;  %4664 = vst [vmem:[#allocation3 + $0xb0] sm:$0x1] %v4663_v38  ;;  %4671 = vst [vmem:[#allocation3 + $0xbc] sm:$0x1] %v4670_v20  ;;  %v1109_v48 = vrot.slane %v1101_v25, %v15487_v51  ;;  %v1118_v34 = vcombine.high %v15752_v40, %v1085_v45  ;;  %14016 = vmatmul.mubr.msk.bf16.gmra.mrb[16].mxu0 %vm4858_vm5, %v15146_v12  ;;  %v19492_v40 = vmov 0.0  }
 0x465   : > { %4668 = vst.msk [vmem:[#allocation3 + $0xb8] sm:$0xf] %vm855_vm2, %v4499_v33  ;;  %v4516_v18 = vsel %vm16062_vm10, %v4508_v22, %v4515_v8  ;;  %v4677_v27 = vsel %vm16068_vm11, %v4517_v26, %v4676_v47  ;;  %v1125_v32 = vrot.slane %v1117_v52, %v15487_v51  ;;  %14019 = vmatprep.mubr.msk.bf16.mxu0 %vm4858_vm5, %v15147_v30  ;;  %v15150_v28 = vld [vmem:[#allocation3 + $0x84] sm:$0xff]   ;;  %v15151_v62 = vld [vmem:[#allocation3 + $0x90] sm:$0xff]   ;;  %v19493_v8 = vmov 0  }
 0x466   : > { %4675 = vst.msk [vmem:[#allocation3 + $0xc4] sm:$0xf] %vm855_vm2, %v4516_v18  ;;  %4678 = vst [vmem:[#allocation3 + $0xc8] sm:$0x1] %v4677_v27  ;;  %v1102_v56 = vcombine.high %v15750_v39, %v1053_v10  ;;  %v1132_v49 = vrot.slane %v1118_v34, %v15487_v51  ;;  %v15149_v39 = vld [vmem:[#allocation3 + $0x78] sm:$0xff]   ;;  %v1185_v58 = vcombine.low %v15756_v42, %v1086_v0 }
 0x467   : > { %v1133_v31 = vcombine.low %v1109_v48, %v1125_v32  ;;  %v1134_v14 = vcombine.high %v1109_v48, %v1125_v32  ;;  %13850 = vmatmul.mubr.msk.bf16.gmra.mrb[16].mxu1 %vm4858_vm5, %v15146_v12  ;;  %v1169_v46 = vcombine.low %v15754_v41, %v1054_v36  ;;  %v1186_v10 = vcombine.high %v15756_v42, %v1086_v0  ;;  %v4680_v29 = vld [vmem:[%s19368_s4 + $0x2] sm:$0x3]  ;;  %v16285_v26 = vld [vmem:[#allocation3 + $0x40] sm:$0xf]  ;;  %v16287_v20 = vld [vmem:[#allocation3 + $0x4c] sm:$0xf] }
 0x468   : > { %v1116_v11 = vrot.slane %v1102_v56, %v15487_v51  ;;  %13853 = vmatprep.mubr.msk.bf16.mxu1 %vm4858_vm5, %v15147_v30  ;;  %v1193_v60 = vrot.slane %v1185_v58, %v15487_v51  ;;  %v1170_v21 = vcombine.high %v15754_v41, %v1054_v36  ;;  %15011 = vmatprep.subr.msk.bf16.mxu0 %vm4907_vm4, %v4680_v29  ;;  %v7156_v33 = vsel %vm4907_vm4, %v4680_v29, 0  ;;  %v16289_v52 = vld [vmem:[#allocation3 + $0x44] sm:$0x1]  ;;  %v8570_v12 = vld [vmem:[#allocation3 + $0x3c] sm:$0xe] }
 0x469   : > { %v1141_v35 = vrot.slane %v1133_v31, %v15491_v59  ;;  %v1148_v23 = vrot.slane %v1134_v14, %v15491_v59  ;;  %v1177_v63 = vrot.slane %v1169_v46, %v15487_v51  ;;  %v15152_v55 = vld [vmem:[#allocation3 + $0x9c] sm:$0xff]   ;;  %v15153_v7 = vld [vmem:[#allocation3 + $0xa8] sm:$0xff]   ;;  %v1200_v6 = vrot.slane %v1186_v10, %v15487_v51  ;;  %14040 = vmatpush3.bf16.msra.mxu0 %v7156_v33  ;;  %v16291_v27 = vld [vmem:[#allocation3 + $0x50] sm:$0x1] }
 0x46a   : > { %v1149_v57 = vcombine.low %v1116_v11, %v1132_v49  ;;  %v1150_v61 = vcombine.high %v1116_v11, %v1132_v49  ;;  %v1184_v42 = vrot.slane %v1170_v21, %v15487_v51  ;;  %v8571_v18 = vld [vmem:[#allocation3 + $0x48] sm:$0xe]  ;;  %v16293_v30 = vld [vmem:[#allocation3 + $0x58] sm:$0xf]  ;;  %v8831_v48 = vrot.slane %v16285_v26, 5 }
 0x46b   : > { %1237 = vxpose.xlu0.b32.start.end [1/1] (short) (narrow) %v1141_v35, 16  ;;  %v1165_v54 = vcombine.high %v1141_v35, %v19492_v40  ;;  %v1166_v4 = vcombine.high %v1148_v23, %v19492_v40  ;;  %v1201_v15 = vcombine.low %v1177_v63, %v1193_v60  ;;  %v1202_v5 = vcombine.high %v1177_v63, %v1193_v60  ;;  %v16296_v34 = vld [vmem:[#allocation3 + $0x5c] sm:$0x1]  ;;  %v16298_v32 = vld [vmem:[#allocation3 + $0x64] sm:$0xf] }
 0x46c   : > { %14020 = vmatmul.mubr.msk.bf16.gmra.mrb[20].mxu0 %vm4858_vm5, %v15148_v43  ;;  %v1157_v9 = vrot.slane %v1149_v57, %v15491_v59  ;;  %v1164_v13 = vrot.slane %v1150_v61, %v15491_v59  ;;  %v1217_v19 = vcombine.low %v1184_v42, %v1200_v6  ;;  %v15154_v37 = vld [vmem:[#allocation3 + $0xb4] sm:$0xff]   ;;  %v1218_v47 = vcombine.high %v1184_v42, %v1200_v6  ;;  %v16305_v14 = vld [vmem:[#allocation3 + $0x68] sm:$0x1]  ;;  %v6265_v61 = vld [vmem:[#allocation3 + $0x7c] sm:$0xf] }
 0x46d   : > { %1269 = vxpose.xlu1.b32.start.end [1/1] (short) (narrow) %v1165_v54, 16  ;;  %14023 = vmatprep.mubr.msk.bf16.mxu0 %vm4858_vm5, %v15149_v39  ;;  %v1209_v1 = vrot.slane %v1201_v15, %v15491_v59  ;;  %v1216_v41 = vrot.slane %v1202_v5, %v15491_v59  ;;  %v15155_v45 = vld [vmem:[#allocation3 + $0xc0] sm:$0xff]   ;;  %19494 = vst [vmem:[#allocation9_spill] sm:$0xff] %v16296_v34  ;;  %v19495_v56 = vmov 0  ;;  %v8838_v31 = vrot.slane %v16287_v20, 5  ;;  %19498 = vst [vmem:[#allocation11_spill] sm:$0xff] %v16305_v14 }
 0x46e   : > { %v1167_v2 = vcombine.high %v1157_v9, %v19492_v40  ;;  %v1168_v3 = vcombine.high %v1164_v13, %v19492_v40  ;;  %v1225_v22 = vrot.slane %v1217_v19, %v15491_v59  ;;  %v1232_v38 = vrot.slane %v1218_v47, %v15491_v59  ;;  %v8572_v54 = vld [vmem:[#allocation3 + $0x54] sm:$0xe]  ;;  %v6263_v57 = vld [vmem:[#allocation3 + $0x74] sm:$0x1]  ;;  %v6266_v60 = vld [vmem:[#allocation3 + $0x80] sm:$0x1] }
 0x46f   : > { %13854 = vmatmul.mubr.msk.bf16.gmra.mrb[20].mxu1 %vm4858_vm5, %v15148_v43  ;;  %v1233_v17 = vcombine.high %v1209_v1, %v19492_v40  ;;  %v1234_v50 = vcombine.high %v1216_v41, %v19492_v40  ;;  %v19496_v56 = vsel %vm16300_vm14, 4294967295, %v19495_v56  ;;  %v12960_v49 = vrot.slane %v8570_v12, 9  ;;  %v6262_v43 = vld [vmem:[#allocation3 + $0x70] sm:$0xf]  ;;  %v8575_v21 = vld [vmem:[#allocation3 + $0x78] sm:$0xe] }
 0x470   : > { %1301 = vxpose.xlu0.b32.start.end [1/1] (short) (narrow) %v1148_v23, 16  ;;  %13857 = vmatprep.mubr.msk.bf16.mxu1 %vm4858_vm5, %v15149_v39  ;;  %v1235_v53 = vcombine.high %v1225_v22, %v19492_v40  ;;  %v1236_v25 = vcombine.high %v1232_v38, %v19492_v40  ;;  %19497 = vst [vmem:[#allocation10_spill] sm:$0xff] %v19496_v56  ;;  %v8833_v35 = vrot.slane %v8831_v48, 4  ;;  %v8834_v11 = vrot.slane %v16289_v52, 5  ;;  %v8573_v39 = vld [vmem:[#allocation3 + $0x60] sm:$0xe] }
 0x471   : > { %v12961_v40 = vrot.slane %v8571_v18, 9  ;;  %v8840_v0 = vrot.slane %v8838_v31, 4  ;;  %v8841_v23 = vrot.slane %v16291_v27, 5  ;;  %v8832_v36 = vsel %vm16300_vm14, %v12960_v49, %v8831_v48  ;;  %v6274_v48 = vld [vmem:[#allocation3 + $0xa0] sm:$0xf] }
 0x472   : > { %1333 = vxpose.xlu1.b32.start.end [1/1] (short) (narrow) %v1166_v4, 16  ;;  %v8835_v58 = vsel %vm16300_vm14, %v8833_v35, %v8834_v11  ;;  %v8845_v46 = vrot.slane %v16293_v30, 5  ;;  %v12962_v63 = vrot.slane %v8572_v54, 9  ;;  %v12963_v10 = vrot.slane %v8573_v39, 9  ;;  %v6275_v54 = vld [vmem:[#allocation3 + $0xa4] sm:$0x1] }
 0x473   : > { %v8839_v4 = vsel %vm16300_vm14, %v12961_v40, %v8838_v31  ;;  %v8855_v5 = vrot.slane %v16305_v14, 5  ;;  %v8859_v6 = vrot.slane %v6262_v43, 5  ;;  %v8862_v19 = vrot.slane %v6263_v57, 5  ;;  %v8577_v40 = vld [vmem:[#allocation3 + $0x90] sm:$0xe] }
 0x474   : > { %14024 = vmatmul.mubr.msk.bf16.gmra.mrb[24].mxu0 %vm4858_vm5, %v15150_v28  ;;  %v8847_v15 = vrot.slane %v8845_v46, 4  ;;  %v12965_v47 = vrot.slane %v8575_v21, 9  ;;  %v8869_v12 = vrot.slane %v6266_v60, 5  ;;  %v8578_v39 = vld [vmem:[#allocation3 + $0x9c] sm:$0xe] }
 0x475   : > { %1365 = vxpose.xlu0.b32.start.end [1/1] (short) (narrow) %v1157_v9, 16  ;;  %14027 = vmatprep.mubr.msk.bf16.mxu0 %vm4858_vm5, %v15151_v62  ;;  %v8574_v9 = vld [vmem:[#allocation3 + $0x6c] sm:$0xe] }
 0x476   : > { %v6277_v57 = vld [vmem:[#allocation3 + $0xac] sm:$0xf] }
 0x477   : > { %1397 = vxpose.xlu1.b32.start.end [1/1] (short) (narrow) %v1167_v2, 16  ;;  %13858 = vmatmul.mubr.msk.bf16.gmra.mrb[24].mxu1 %vm4858_vm5, %v15150_v28  ;;  %v16316_v28 = vcombine.low %v8832_v36, %v8835_v58  ;;  %v8848_v2 = vrot.slane %v16296_v34, 5  ;;  %v6278_v36 = vld [vmem:[#allocation3 + $0xb0] sm:$0x1] }
 0x478   : > { %13861 = vmatprep.mubr.msk.bf16.mxu1 %vm4858_vm5, %v15151_v62  ;;  %v8842_v62 = vsel %vm16300_vm14, %v8840_v0, %v8841_v23 }
 0x479   : > { %19499 = vst [vmem:[#allocation12_spill] sm:$0xff] %v16316_v28  ;;  %v8849_v42 = vsel %vm16300_vm14, %v8847_v15, %v8848_v2  ;;  %v8887_v2 = vrot.slane %v6274_v48, 5  ;;  %v8579_v15 = vld [vmem:[#allocation3 + $0xa8] sm:$0xe]  ;;  %v6237_v48 = vld [vmem:[#allocation3 + $0xc] sm:$0xf] }
 0x47a   : > { %1429 = vxpose.xlu0.b32.start.end [1/1] (short) (narrow) %v1164_v13, 16  ;;  %v16321_v13 = vcombine.low %v8839_v4, %v8842_v62 }
 0x47c   : > { %1461 = vxpose.xlu1.b32.start.end [1/1] (short) (narrow) %v1168_v3, 16  ;;  %14028 = vmatmul.mubr.msk.bf16.gmra.mrb[28].mxu0 %vm4858_vm5, %v15152_v55  ;;  %19500 = vst [vmem:[#allocation13_spill] sm:$0xff] %v16321_v13  ;;  %v8852_v3 = vrot.slane %v16298_v32, 5 }
 0x47d   : > { %14031 = vmatprep.mubr.msk.bf16.mxu0 %vm4858_vm5, %v15153_v7 }
 0x47f   : > { %1493 = vxpose.xlu0.b32.start.end [1/1] (short) (narrow) %v1209_v1, 16  ;;  %13862 = vmatmul.mubr.msk.bf16.gmra.mrb[28].mxu1 %vm4858_vm5, %v15152_v55  ;;  %v6268_v1 = vld [vmem:[#allocation3 + $0x88] sm:$0xf]  ;;  %v8846_v55 = vsel %vm16300_vm14, %v12962_v63, %v8845_v46  ;;  %v12967_v63 = vrot.slane %v8577_v40, 9 }
 0x480   : > { %13865 = vmatprep.mubr.msk.bf16.mxu1 %vm4858_vm5, %v15153_v7  ;;  %v12964_v7 = vrot.slane %v8574_v9, 9  ;;  %v8873_v18 = vrot.slane %v6268_v1, 5  ;;  %v6284_v40 = vld [vmem:[#allocation3 + $0xc8] sm:$0x1] }
 0x481   : > { %1525 = vxpose.xlu1.b32.start.end [1/1] (short) (narrow) %v1233_v17, 16  ;;  %v8853_v17 = vsel %vm16300_vm14, %v12963_v10, %v8852_v3  ;;  %v6281_v10 = vld [vmem:[#allocation3 + $0xbc] sm:$0x1] }
 0x482   : > { %v8860_v33 = vsel %vm16300_vm14, %v12964_v7, %v8859_v6  ;;  %v8875_v0 = vrot.slane %v8873_v18, 4  ;;  %v8889_v7 = vrot.slane %v8887_v2, 4 }
 0x484   : > { %1557 = vxpose.xlu0.b32.start.end [1/1] (short) (narrow) %v1216_v41, 16  ;;  %14032 = vmatmul.mubr.msk.bf16.gmra.mrb[32].mxu0 %vm4858_vm5, %v15154_v37  ;;  %v8854_v41 = vrot.slane %v8852_v3, 4 }
 0x485   : > { %14035 = vmatprep.mubr.msk.bf16.mxu0 %vm4858_vm5, %v15155_v45  ;;  %v16331_v45 = vcombine.low %v8846_v55, %v8849_v42  ;;  %v12968_v55 = vrot.slane %v8578_v39, 9  ;;  %v8894_v42 = vrot.slane %v6277_v57, 5  ;;  %v8581_v39 = vld [vmem:[#allocation3 + $0xc0] sm:$0xe] }
 0x486   : > { %1589 = vxpose.xlu1.b32.start.end [1/1] (short) (narrow) %v1234_v50, 16  ;;  %v6269_v50 = vld [vmem:[#allocation3 + $0x8c] sm:$0x1]  ;;  %v8856_v29 = vsel %vm16300_vm14, %v8854_v41, %v8855_v5  ;;  %v6283_v41 = vld [vmem:[#allocation3 + $0xc4] sm:$0xf] }
 0x487   : > { %13866 = vmatmul.mubr.msk.bf16.gmra.mrb[32].mxu1 %vm4858_vm5, %v15154_v37  ;;  %v8576_v37 = vld [vmem:[#allocation3 + $0x84] sm:$0xe]  ;;  %19501 = vst [vmem:[#allocation14_spill] sm:$0xff] %v16331_v45  ;;  %v16337_v31 = vcombine.low %v8853_v17, %v8856_v29  ;;  %v8876_v23 = vrot.slane %v6269_v50, 5  ;;  %v8580_v17 = vld [vmem:[#allocation3 + $0xb4] sm:$0xe] }
 0x488   : > { %v12966_v11 = vrot.slane %v8576_v37, 9  ;;  %v8888_v37 = vsel %vm16300_vm14, %v12968_v55, %v8887_v2  ;;  %v12969_v50 = vrot.slane %v8579_v15, 9 }
 0x489   : > { %1621 = vxpose.xlu0.b32.start.end [1/1] (short) (narrow) %v1225_v22, 16  ;;  %v8861_v22 = vrot.slane %v8859_v6, 4  ;;  %19502 = vst [vmem:[#allocation15_spill] sm:$0xff] %v16337_v31  ;;  %v8877_v62 = vsel %vm16300_vm14, %v8875_v0, %v8876_v23  ;;  %v8890_v6 = vrot.slane %v6275_v54, 5 }
 0x48a   : > { %v8874_v46 = vsel %vm16300_vm14, %v12966_v11, %v8873_v18  ;;  %v8904_v18 = vrot.slane %v6281_v10, 5  ;;  %v9505_v11 = vrot.slane %v6283_v41, 5  ;;  %v6239_v41 = vld [vmem:[#allocation3 + $0x14] sm:$0x1] }
 0x48b   : > { %1653 = vxpose.xlu1.b32.start.end [1/1] (short) (narrow) %v1235_v53, 16  ;;  %v8866_v53 = vrot.slane %v6265_v61, 5  ;;  %v8863_v49 = vsel %vm16300_vm14, %v8861_v22, %v8862_v19  ;;  %v6280_v61 = vld [vmem:[#allocation3 + $0xb8] sm:$0xf]  ;;  %v16353_v3 = vcombine.low %v8874_v46, %v8877_v62  ;;  %v6241_v46 = vld [vmem:[#allocation3 + $0x1c] sm:$0xf] }
 0x48c   : > { %v16341_v43 = vcombine.low %v8860_v33, %v8863_v49  ;;  %v8901_v22 = vrot.slane %v6280_v61, 5  ;;  %v12970_v33 = vrot.slane %v8580_v17, 9  ;;  %v8895_v49 = vsel %vm16300_vm14, %v12969_v50, %v8894_v42  ;;  %v6240_v17 = vld [vmem:[#allocation3 + $0x18] sm:$0xf]  ;;  %v6244_v50 = vld [vmem:[#allocation3 + $0x28] sm:$0xf] }
 0x48d   : > { %v8868_v35 = vrot.slane %v8866_v53, 4  ;;  %v8867_v58 = vsel %vm16300_vm14, %v12965_v47, %v8866_v53  ;;  %19505 = vst [vmem:[#allocation18_spill] sm:$0xff] %v16353_v3  ;;  %v8891_v53 = vsel %vm16300_vm14, %v8889_v7, %v8890_v6  ;;  %v9507_v61 = vrot.slane %v9505_v11, 4 }
 0x48e   : > { %1685 = vxpose.xlu0.b32.start.end [1/1] (short) (narrow) %v1232_v38, 16  ;;  %v6271_v38 = vld [vmem:[#allocation3 + $0x94] sm:$0xf]  ;;  %19503 = vst [vmem:[#allocation16_spill] sm:$0xff] %v16341_v43  ;;  %v16365_v29 = vcombine.low %v8888_v37, %v8891_v53  ;;  %v8902_v0 = vsel %vm16300_vm14, %v12970_v33, %v8901_v22  ;;  %v9508_v62 = vrot.slane %v6284_v40, 5  ;;  %v6727_v33 = vshll.u32 %v6240_v17, 16 }
 0x48f   : > { %v8870_v4 = vsel %vm16300_vm14, %v8868_v35, %v8869_v12  ;;  %v8880_v9 = vrot.slane %v6271_v38, 5  ;;  %v8896_v38 = vrot.slane %v8894_v42, 4  ;;  %v8903_v12 = vrot.slane %v8901_v22, 4  ;;  %v6242_v53 = vld [vmem:[#allocation3 + $0x20] sm:$0x1] }
 0x490   : > { %1717 = vxpose.xlu1.b32.start.end [1/1] (short) (narrow) %v1236_v25, 16  ;;  %v6272_v25 = vld [vmem:[#allocation3 + $0x98] sm:$0x1]  ;;  %v16349_v60 = vcombine.low %v8867_v58, %v8870_v4  ;;  %19507 = vst [vmem:[#allocation20_spill] sm:$0xff] %v16365_v29  ;;  %v6700_v58 = vshrl.u32 %v6237_v48, 16  ;;  %v6703_v4 = vshll.u32 %v6237_v48, 16  ;;  %v9509_v10 = vsel %vm16300_vm14, %v9507_v61, %v9508_v62 }
 0x491   : > { %v8882_v21 = vrot.slane %v8880_v9, 4  ;;  %v8883_v1 = vrot.slane %v6272_v25, 5  ;;  %v8881_v5 = vsel %vm16300_vm14, %v12967_v63, %v8880_v9  ;;  %v8897_v25 = vrot.slane %v6278_v36, 5  ;;  %v6238_v36 = vld [vmem:[#allocation3 + $0x10] sm:$0xf] }
 0x492   : > { %19504 = vst [vmem:[#allocation17_spill] sm:$0xff] %v16349_v60  ;;  %v8905_v23 = vsel %vm16300_vm14, %v8903_v12, %v8904_v18  ;;  %v13036_v9 = vrot.slane %v8581_v39, 9  ;;  %v6709_v63 = vshll.u32 %v6238_v36, 16  ;;  %v6713_v2 = vshrl.u32 %v6238_v36, 16  ;;  %v6246_v39 = vld [vmem:[#allocation3 + $0x30] sm:$0xf] }
 0x493   : > { %v8884_v19 = vsel %vm16300_vm14, %v8882_v21, %v8883_v1  ;;  %v8898_v35 = vsel %vm16300_vm14, %v8896_v38, %v8897_v25  ;;  %v16377_v57 = vcombine.low %v8902_v0, %v8905_v23  ;;  %v6733_v21 = vshll.u32 %v6241_v46, 16  ;;  %v6243_v38 = vld [vmem:[#allocation3 + $0x24] sm:$0xf] }
 0x494   : > { %v16361_v47 = vcombine.low %v8881_v5, %v8884_v19  ;;  %v16371_v54 = vcombine.low %v8895_v49, %v8898_v35  ;;  %v9506_v15 = vsel %vm16300_vm14, %v13036_v9, %v9505_v11  ;;  %v6737_v1 = vshrl.u32 %v6241_v46, 16  ;;  %v6247_v46 = vld [vmem:[#allocation3 + $0x34] sm:$0xf] }
 0x495   : > { %19509 = vst [vmem:[#allocation22_spill] sm:$0xff] %v16377_v57  ;;  %v16383_v55 = vcombine.low %v9506_v15, %v9509_v10  ;;  %v6702_v5 = vrot.slane %v6700_v58, 4  ;;  %v6705_v7 = vrot.slane %v6703_v4, 5  ;;  %v16385_v6 = vrot.slane %v6709_v63, 5  ;;  %v16397_v4 = vld [vmem:[#allocation3 + $0x2c] sm:$0x1] }
 0x496   : > { %19506 = vst [vmem:[#allocation19_spill] sm:$0xff] %v16361_v47  ;;  %19508 = vst [vmem:[#allocation21_spill] sm:$0xff] %v16371_v54  ;;  %v6715_v42 = vrot.slane %v6713_v2, 4  ;;  %v16387_v19 = vrot.slane %v6733_v21, 5  ;;  %v6739_v37 = vrot.slane %v6737_v1, 4  ;;  %v6724_v25 = vshrl.u32 %v6240_v17, 16 }
 0x497   : > { %19510 = vst [vmem:[#allocation23_spill] sm:$0xff] %v16383_v55  ;;  %v6706_v22 = vor.u32 %v6705_v7, %v6702_v5  ;;  %v6719_v18 = vshll.u32 %v6239_v41, 16  ;;  %v6757_v48 = vshll.u32 %v6244_v50, 16  ;;  %v6761_v49 = vshrl.u32 %v6244_v50, 16  ;;  %v4679_v41 = vld [vmem:[%s19368_s4] sm:$0x3] }
 0x498   : > { %v6716_v12 = vor.u32 %v6715_v42, %v16385_v6  ;;  %v6740_v35 = vor.u32 %v6739_v37, %v16387_v19  ;;  %v6743_v11 = vshll.u32 %v6242_v53, 16  ;;  %v6748_v40 = vshrl.u32 %v6243_v38, 16  ;;  %v15156_v37 = vld [vmem:[#allocation2] sm:$0xff]   ;;  %15006 = vmatprep.subr.msk.bf16.mxu1 %vm4907_vm4, %v4679_v41  ;;  %v6248_v57 = vld [vmem:[#allocation3 + $0x38] sm:$0x1] }
 0x499   : > { %v6751_v0 = vshll.u32 %v6243_v38, 16  ;;  %v16391_v23 = vrot.slane %v6706_v22, 4  ;;  %v16393_v36 = vrot.slane %v6724_v25, 4  ;;  %v16395_v58 = vrot.slane %v6727_v33, 5  ;;  %v15159_v50 = vld [vmem:[#allocation3 + $0xcc] sm:$0xff]   ;;  %13871 = vmatprep.mubr.msk.bf16.mxu1 %vm4858_vm5, %v15156_v37 }
 0x49a   : > { %v19511_v9 = vmov 0  ;;  %v16405_v61 = vrot.slane %v6716_v12, 4  ;;  %v16407_v62 = vrot.slane %v6719_v18, 5  ;;  %v16409_v63 = vrot.slane %v6757_v48, 5  ;;  %v6249_v25 = vld [vmem:[#allocation3 + $0x3c] sm:$0xf]  ;;  %14036 = vmatmul.mubr.msk.bf16.gmra.mrb[36].mxu0 %vm4858_vm5, %v15159_v50 }
 0x49b   : > { %v19512_v9 = vsel %vm16401_vm3, 4294967295, %v19511_v9  ;;  %v16411_v2 = vrot.slane %v6761_v49, 4  ;;  %v16413_v15 = vrot.slane %v6740_v35, 4  ;;  %v16415_v10 = vrot.slane %v6743_v11, 5  ;;  %v6180_v18 = vld [vmem:[#allocation2] sm:$0xf] }
 0x49c   : > { %19513 = vst [vmem:[#allocation24_spill] sm:$0xff] %v19512_v9  ;;  %v16417_v21 = vrot.slane %v6748_v40, 4  ;;  %v16419_v1 = vrot.slane %v6751_v0, 5  ;;  %v6772_v7 = vshrl.u32 %v6246_v39, 16  ;;  %v6781_v42 = vshll.u32 %v6247_v46, 16 }
 0x49d   : > { %v6785_v17 = vshrl.u32 %v6247_v46, 16  ;;  %v6730_v53 = vor.u32 %v16395_v58, %v16393_v36  ;;  %v6775_v38 = vshll.u32 %v6246_v39, 16  ;;  %v6805_v33 = vshll.u32 %v16285_v26, 16  ;;  %v6181_v48 = vld [vmem:[#allocation2 + $0x4] sm:$0xf] }
 0x49e   : > { %v5201_v12 = vsel %vm4907_vm4, %v4679_v41, 0  ;;  %v6722_v49 = vsel %vm16401_vm3, %v16405_v61, %v16407_v62  ;;  %v6764_v35 = vor.u32 %v16411_v2, %v16409_v63  ;;  %v6809_v11 = vshrl.u32 %v16285_v26, 16  ;;  %v6182_v40 = vld [vmem:[#allocation2 + $0x8] sm:$0x1]  ;;  %v16446_v61 = vld [vmem:[%s19369_s5 + $0x2] sm:$0x3] }
 0x49f   : > { %13870 = vmatpush3.bf16.msra.mxu1 %v5201_v12  ;;  %v6292_v0 = vshrl.u32 %v6180_v18, 16  ;;  %v6295_v39 = vshll.u32 %v6180_v18, 16  ;;  %v6301_v36 = vshll.u32 %v6181_v48, 16  ;;  %v6305_v58 = vshrl.u32 %v6181_v48, 16  ;;  %15012 = vmatprep.subr.msk.bf16.mxu0 %vm4907_vm4, %v16446_v61  ;;  %v6252_v18 = vld [vmem:[#allocation3 + $0x48] sm:$0xf] }
 0x4a0   : > { %v6311_v46 = vshll.u32 %v6182_v40, 16  ;;  %v6774_v62 = vrot.slane %v6772_v7, 4  ;;  %v16448_v2 = vrot.slane %v6781_v42, 5  ;;  %v6787_v26 = vrot.slane %v6785_v17, 4 }
 0x4a1   : > { %v6294_v41 = vrot.slane %v6292_v0, 4  ;;  %v6297_v12 = vrot.slane %v6295_v39, 5  ;;  %v6303_v37 = vrot.slane %v6301_v36, 5  ;;  %v6307_v5 = vrot.slane %v6305_v58, 4 }
 0x4a2   : > { %v6777_v50 = vrot.slane %v6775_v38, 5  ;;  %v6796_v40 = vshrl.u32 %v6249_v25, 16  ;;  %v6799_v22 = vshll.u32 %v6249_v25, 16  ;;  %v6313_v42 = vrot.slane %v6311_v46, 5 }
 0x4a3   : > { %v6298_v55 = vor.u32 %v6297_v12, %v6294_v41  ;;  %v6308_v7 = vor.u32 %v6307_v5, %v6303_v37  ;;  %v6811_v17 = vrot.slane %v6809_v11, 4  ;;  %v6754_v39 = vor.u32 %v16419_v1, %v16417_v21 }
 0x4a4   : > { %v6788_v36 = vor.u32 %v6787_v26, %v16448_v2  ;;  %v6820_v58 = vshrl.u32 %v6252_v18, 16  ;;  %v6823_v54 = vshll.u32 %v6252_v18, 16  ;;  %v6829_v25 = vshll.u32 %v16287_v20, 16 }
 0x4a5   : > { %v6299_v29 = vrot.slane %v6298_v55, 4  ;;  %v6309_v38 = vrot.slane %v6308_v7, 4  ;;  %v6765_v5 = vrot.slane %v6764_v35, 4  ;;  %v6791_v46 = vshll.u32 %v6248_v57, 16 }
 0x4a6   : > { %v6798_v11 = vrot.slane %v6796_v40, 4  ;;  %v6801_v12 = vrot.slane %v6799_v22, 5  ;;  %v6778_v1 = vor.u32 %v6777_v50, %v6774_v62  ;;  %v6789_v7 = vrot.slane %v6788_v36, 4 }
 0x4a7   : > { %v6304_v47 = vsel %vm16401_vm3, %v6299_v29, %v6303_v37  ;;  %v6314_v21 = vsel %vm16401_vm3, %v6309_v38, %v6313_v42  ;;  %v6825_v3 = vrot.slane %v6823_v54, 5  ;;  %v6731_v60 = vrot.slane %v6730_v53, 4 }
 0x4a8   : > { %v12807_v18 = vcombine.low %v6304_v47, %v6314_v21  ;;  %v6815_v57 = vshll.u32 %v16289_v52, 16  ;;  %v16473_v35 = vrot.slane %v6829_v25, 5  ;;  %v19515_v29 = vsel %vm16401_vm3, %v16391_v23, %v16385_v6  ;;  %v6255_v52 = vld [vmem:[#allocation3 + $0x54] sm:$0xf]  ;;  %v6258_v21 = vld [vmem:[#allocation3 + $0x60] sm:$0xf] }
 0x4a9   : > { %v16483_v62 = vcombine.low %v19515_v29, %v6722_v49  ;;  %v19517_v47 = vshll.u32 %v16397_v4, 16  ;;  %v6793_v53 = vrot.slane %v6791_v46, 5  ;;  %v6802_v37 = vor.u32 %v6801_v12, %v6798_v11 }
 0x4aa   : > { %19514 = vst [vmem:[#allocation25_spill] sm:$0xff] %v16473_v35  ;;  %14041 = vmatprep.mubr.msk.bf16.mxu0 %vm4858_vm5, %v12807_v18  ;;  %v6736_v50 = vsel %vm16401_vm3, %v6731_v60, %v16387_v19  ;;  %v6746_v42 = vsel %vm16401_vm3, %v16413_v15, %v16415_v10  ;;  %v6779_v4 = vrot.slane %v6778_v1, 4  ;;  %v6817_v38 = vrot.slane %v6815_v57, 5 }
 0x4ab   : > { %19516 = vst [vmem:[#allocation26_spill] sm:$0xff] %v16483_v62  ;;  %v6769_v54 = vrot.slane %v19517_v47, 5  ;;  %v6794_v49 = vsel %vm16401_vm3, %v6789_v7, %v6793_v53  ;;  %v6844_v60 = vshrl.u32 %v6255_v52, 16  ;;  %v6847_v19 = vshll.u32 %v6255_v52, 16 }
 0x4ac   : > { %v16501_v46 = vcombine.low %v6736_v50, %v6746_v42  ;;  %v6784_v10 = vsel %vm16401_vm3, %v6779_v4, %v16448_v2  ;;  %v6839_v12 = vshll.u32 %v16291_v27, 16  ;;  %v6853_v2 = vshll.u32 %v16293_v30, 16 }
 0x4ad   : > { %v6770_v23 = vsel %vm16401_vm3, %v6765_v5, %v6769_v54  ;;  %v6857_v18 = vshrl.u32 %v16293_v30, 16  ;;  %v16526_v57 = vrot.slane %v6844_v60, 4  ;;  %v6868_v54 = vshrl.u32 %v6258_v21, 16  ;;  %v16563_v60 = vld [vmem:[#allocation3 + $0x6c] sm:$0xf] }
 0x4ae   : > { %19518 = vst [vmem:[#allocation27_spill] sm:$0xff] %v16501_v46  ;;  %v16539_v53 = vrot.slane %v6839_v12, 5  ;;  %v6877_v52 = vshll.u32 %v16298_v32, 16  ;;  %19528 = vst [vmem:[#allocation37_spill] sm:$0xff] %v16563_v60  ;;  %v16587_v4 = vsel %vm4907_vm4, %v16446_v61, 0 }
 0x4af   : > { %19523 = vst [vmem:[#allocation32_spill] sm:$0xff] %v16526_v57 }
 0x4b0   : > { %19526 = vst [vmem:[#allocation35_spill] sm:$0xff] %v16539_v53 }
 0x4b7   : > { %15138 = vset.pattern.permute.xlu0 %v19493_v8  ;;  %v16454_v8 = vrot.slane %v6805_v33, 5  ;;  %v6833_v33 = vshrl.u32 %v16287_v20, 16  ;;  %v6822_v20 = vrot.slane %v6820_v58, 4 }
 0x4b9   : > { %v6812_v55 = vor.u32 %v6811_v17, %v16454_v8  ;;  %v6835_v22 = vrot.slane %v6833_v33, 4  ;;  %v6755_v17 = vrot.slane %v6754_v39, 4  ;;  %v6826_v58 = vor.u32 %v6825_v3, %v6822_v20 }
 0x4ba   : > { %v6803_v39 = vrot.slane %v6802_v37, 4  ;;  %v16511_v3 = vcombine.low %v6784_v10, %v6794_v49  ;;  %v6871_v37 = vshll.u32 %v6258_v21, 16  ;;  %v16568_v10 = vrot.slane %v6877_v52, 5 }
 0x4bb   : > { %v6813_v36 = vrot.slane %v6812_v55, 4  ;;  %v6836_v25 = vor.u32 %v6835_v22, %v16473_v35  ;;  %v6760_v15 = vsel %vm16401_vm3, %v6755_v17, %v16409_v63  ;;  %v16519_v55 = vrot.slane %v6826_v58, 4 }
 0x4bc   : > { %v16509_v5 = vcombine.low %v6760_v15, %v6770_v23  ;;  %19520 = vst [vmem:[#allocation29_spill] sm:$0xff] %v16511_v3  ;;  %v6808_v63 = vsel %vm16401_vm3, %v6803_v39, %v16454_v8  ;;  %v16528_v22 = vrot.slane %v6847_v19, 5  ;;  %v16545_v17 = vrot.slane %v6853_v2, 5 }
 0x4bd   : > { %v6818_v11 = vsel %vm16401_vm3, %v6813_v36, %v6817_v38  ;;  %19521 = vst [vmem:[#allocation30_spill] sm:$0xff] %v16519_v55  ;;  %v16524_v20 = vrot.slane %v6836_v25, 4  ;;  %v16547_v36 = vrot.slane %v6857_v18, 4  ;;  %v16561_v25 = vrot.slane %v6868_v54, 4 }
 0x4be   : > { %19519 = vst [vmem:[#allocation28_spill] sm:$0xff] %v16509_v5  ;;  %19524 = vst [vmem:[#allocation33_spill] sm:$0xff] %v16528_v22  ;;  %v16531_v47 = vcombine.low %v6808_v63, %v6818_v11  ;;  %v16566_v15 = vrot.slane %v6871_v37, 5  ;;  %v6881_v39 = vshrl.u32 %v16298_v32, 16 }
 0x4bf   : > { %19522 = vst [vmem:[#allocation31_spill] sm:$0xff] %v16524_v20  ;;  %19527 = vst [vmem:[#allocation36_spill] sm:$0xff] %v16561_v25  ;;  %v2722_v25 = vld [vmem:[#allocation2 + $0x14] sm:$0x1] }
 0x4c0   : > { %19525 = vst [vmem:[#allocation34_spill] sm:$0xff] %v16531_v47  ;;  %19529 = vst [vmem:[#allocation38_spill] sm:$0xff] %v16566_v15  ;;  %v16581_v52 = vrot.slane %v6881_v39, 4 }
 0x4eb   : > { %v16452_v48 = vpop.trf.xlu0 }
 0x4ed   : > { %v16456_v0 = vpop.trf.xlu1 }
 0x4ef   : > { %v16463_v41 = vpop.trf.xlu0 }
 0x4f1   : > { %v16470_v26 = vpop.trf.xlu1 }
 0x4f3   : > { %v16475_v40 = vpop.trf.xlu0 }
 0x4f4   : > { %v1749_v30 = vcombine.low %v16452_v48, %v16475_v40 }
 0x4f5   : > { %v1349_v6 = vpop.trf.xlu1 }
 0x4f6   : > { %v1765_v7 = vcombine.low %v16456_v0, %v1349_v6  ;;  %v1766_v27 = vcombine.high %v16456_v0, %v1349_v6  ;;  %v1750_v0 = vcombine.high %v16452_v48, %v16475_v40  ;;  %v1757_v19 = vrot.slane %v1749_v30, %v15487_v51 }
 0x4f7   : > { %v16499_v33 = vpop.trf.xlu0 }
 0x4f8   : > { %v1773_v6 = vrot.slane %v1765_v7, %v15487_v51  ;;  %v1780_v48 = vrot.slane %v1766_v27, %v15487_v51  ;;  %v2021_v40 = vcombine.low %v16463_v41, %v16499_v33  ;;  %v1764_v11 = vrot.slane %v1750_v0, %v15487_v51 }
 0x4f9   : > { %v1350_v1 = vpop.trf.xlu1  ;;  %v2022_v12 = vcombine.high %v16463_v41, %v16499_v33 }
 0x4fa   : > { %v2037_v50 = vcombine.low %v16470_v26, %v1350_v1  ;;  %v2038_v58 = vcombine.high %v16470_v26, %v1350_v1  ;;  %v1813_v63 = vcombine.low %v1757_v19, %v1773_v6  ;;  %v1814_v2 = vcombine.high %v1757_v19, %v1773_v6 }
 0x4fb   : > { %v1381_v29 = vpop.trf.xlu0  ;;  %v1829_v27 = vcombine.low %v1764_v11, %v1780_v48  ;;  %v1830_v54 = vcombine.high %v1764_v11, %v1780_v48  ;;  %v2029_v32 = vrot.slane %v2021_v40, %v15487_v51 }
 0x4fc   : > { %v2045_v26 = vrot.slane %v2037_v50, %v15487_v51  ;;  %v2052_v30 = vrot.slane %v2038_v58, %v15487_v51  ;;  %v2036_v50 = vrot.slane %v2022_v12, %v15487_v51  ;;  %v1821_v48 = vrot.slane %v1813_v63, %v15491_v59 }
 0x4fd   : > { %v1413_v42 = vpop.trf.xlu1  ;;  %v1828_v40 = vrot.slane %v1814_v2, %v15491_v59  ;;  %v1844_v39 = vrot.slane %v1830_v54, %v15491_v59 }
 0x4fe   : > { %v2085_v6 = vcombine.low %v2029_v32, %v2045_v26  ;;  %v2086_v19 = vcombine.high %v2029_v32, %v2045_v26  ;;  %v2102_v8 = vcombine.high %v2036_v50, %v2052_v30 }
 0x4ff   : > { %v1382_v38 = vpop.trf.xlu0 }
 0x500   : > { %v16598_v63 = vrot.slane %v2085_v6, %v15491_v59 }
 0x501   : > { %v1414_v21 = vpop.trf.xlu1 }
 0x503   : > { %v1445_v37 = vpop.trf.xlu0 }
 0x504   : > { %v1781_v41 = vcombine.low %v1381_v29, %v1445_v37  ;;  %v1782_v33 = vcombine.high %v1381_v29, %v1445_v37  ;;  %v1837_v29 = vrot.slane %v1829_v27, %v15491_v59  ;;  %v2101_v37 = vcombine.low %v2036_v50, %v2052_v30 }
 0x505   : > { %v1477_v18 = vpop.trf.xlu1 }
 0x506   : > { %v1797_v58 = vcombine.low %v1413_v42, %v1477_v18  ;;  %v1798_v11 = vcombine.high %v1413_v42, %v1477_v18  ;;  %v1789_v26 = vrot.slane %v1781_v41, %v15487_v51  ;;  %v1796_v32 = vrot.slane %v1782_v33, %v15487_v51 }
 0x507   : > { %v1446_v12 = vpop.trf.xlu0  ;;  %v16601_v42 = vrot.slane %v2086_v19, %v15491_v59  ;;  %v16604_v41 = vrot.slane %v2101_v37, %v15491_v59  ;;  %v16607_v33 = vrot.slane %v2102_v8, %v15491_v59 }
 0x508   : > { %v1805_v61 = vrot.slane %v1797_v58, %v15487_v51  ;;  %v1812_v23 = vrot.slane %v1798_v11, %v15487_v51  ;;  %v2053_v2 = vcombine.low %v1382_v38, %v1446_v12  ;;  %v2054_v18 = vcombine.high %v1382_v38, %v1446_v12 }
 0x509   : > { %v1478_v27 = vpop.trf.xlu1 }
 0x50a   : > { %v1845_v54 = vcombine.low %v1789_v26, %v1805_v61  ;;  %v1846_v30 = vcombine.high %v1789_v26, %v1805_v61  ;;  %v1861_v50 = vcombine.low %v1796_v32, %v1812_v23  ;;  %v1862_v49 = vcombine.high %v1796_v32, %v1812_v23 }
 0x50b   : > { %v2069_v58 = vcombine.low %v1414_v21, %v1478_v27  ;;  %v2070_v11 = vcombine.high %v1414_v21, %v1478_v27  ;;  %v16614_v12 = vrot.slane %v2053_v2, %v15487_v51  ;;  %v16617_v23 = vrot.slane %v2054_v18, %v15487_v51  ;;  %v16625_v21 = vpop.trf.xlu0 }
 0x50c   : > { %v1853_v6 = vrot.slane %v1845_v54, %v15491_v59  ;;  %v1860_v19 = vrot.slane %v1846_v30, %v15491_v59  ;;  %v1869_v0 = vrot.slane %v1861_v50, %v15491_v59  ;;  %v1876_v38 = vrot.slane %v1862_v49, %v15491_v59 }
 0x50d   : > { %v16620_v37 = vrot.slane %v2069_v58, %v15487_v51  ;;  %v16623_v8 = vrot.slane %v2070_v11, %v15487_v51  ;;  %v16627_v26 = vpop.trf.xlu1 }
 0x50e   : > { %v1877_v32 = vcombine.low %v1821_v48, %v1853_v6  ;;  %v1878_v61 = vcombine.high %v1821_v48, %v1853_v6  ;;  %v1879_v27 = vcombine.low %v1828_v40, %v1860_v19  ;;  %v1880_v49 = vcombine.high %v1828_v40, %v1860_v19 }
 0x50f   : > { %v1881_v54 = vcombine.low %v1837_v29, %v1869_v0  ;;  %v1882_v2 = vcombine.high %v1837_v29, %v1869_v0  ;;  %v1883_v30 = vcombine.low %v1844_v39, %v1876_v38  ;;  %v1884_v50 = vcombine.high %v1844_v39, %v1876_v38  ;;  %v16633_v29 = vpop.trf.xlu0 }
 0x510   : > { %v13228_v18 = vpack.c.bf16 %v1877_v32, %v1877_v32  ;;  %v13230_v7 = vpack.c.bf16 %v1878_v61, %v1878_v61  ;;  %v13232_v1 = vpack.c.bf16 %v1879_v27, %v1879_v27  ;;  %v13234_v58 = vpack.c.bf16 %v1880_v49, %v1880_v49 }
 0x511   : > { %v13236_v43 = vpack.c.bf16 %v1881_v54, %v1881_v54  ;;  %v13238_v31 = vpack.c.bf16 %v1882_v2, %v1882_v2  ;;  %v16629_v11 = vpack.c.bf16 %v1883_v30, %v1883_v30  ;;  %v16631_v45 = vpack.c.bf16 %v1884_v50, %v1884_v50  ;;  %v16635_v39 = vpop.trf.xlu1  ;;  %v2716_v30 = vld [vmem:[#allocation2 + $0xc] sm:$0xf] }
 0x512   : > { %v2393_v13 = vshrl.u32 %v13228_v18, 16  ;;  %v2396_v28 = vshll.u32 %v13228_v18, 16  ;;  %v2410_v47 = vshrl.u32 %v13230_v7, 16  ;;  %v2413_v48 = vshll.u32 %v13230_v7, 16  ;;  %v2746_v18 = vld [vmem:[#allocation2 + $0x3c] sm:$0xf] }
 0x513   : > { %v2427_v6 = vshrl.u32 %v13232_v1, 16  ;;  %v2430_v40 = vshll.u32 %v13232_v1, 16  ;;  %v2444_v19 = vshrl.u32 %v13234_v58, 16  ;;  %v2447_v0 = vshll.u32 %v13234_v58, 16  ;;  %v2725_v1 = vld [vmem:[#allocation2 + $0x18] sm:$0xf] }
 0x514   : > { %v16637_v38 = vrot.slane %v2393_v13, 7  ;;  %v16639_v32 = vrot.slane %v2410_v47, 7  ;;  %v2461_v61 = vshrl.u32 %v13236_v43, 16  ;;  %v2464_v27 = vshll.u32 %v13236_v43, 16  ;;  %v2732_v47 = vld [vmem:[#allocation2 + $0x24] sm:$0xf] }
 0x515   : > { %v16641_v49 = vrot.slane %v2427_v6, 7  ;;  %v16643_v54 = vrot.slane %v2444_v19, 7  ;;  %v2478_v2 = vshrl.u32 %v13238_v31, 16  ;;  %v2481_v7 = vshll.u32 %v13238_v31, 16  ;;  %v2739_v31 = vld [vmem:[#allocation2 + $0x30] sm:$0xf]  ;;  %v16665_v43 = vpop.trf.xlu1 }
 0x516   : > { %v2398_v50 = vor.u32 %v2396_v28, %v16637_v38  ;;  %v2415_v58 = vor.u32 %v2413_v48, %v16639_v32  ;;  %v16653_v5 = vrot.slane %v2461_v61, 7  ;;  %v2495_v28 = vshrl.u32 %v16629_v11, 16  ;;  %v2753_v13 = vld [vmem:[#allocation2 + $0x48] sm:$0xf]  ;;  %v1573_v61 = vpop.trf.xlu0 }
 0x517   : > { %v2432_v3 = vor.u32 %v2430_v40, %v16641_v49  ;;  %v2449_v6 = vor.u32 %v2447_v0, %v16643_v54  ;;  %v16655_v56 = vrot.slane %v2478_v2, 7  ;;  %v2498_v48 = vshll.u32 %v16629_v11, 16 }
 0x518   : > { %v2512_v46 = vshrl.u32 %v16631_v45, 16  ;;  %v2515_v40 = vshll.u32 %v16631_v45, 16  ;;  %v2717_v0 = vsel %vm15839_vm7, %v2398_v50, %v2716_v30  ;;  %v2726_v19 = vsel %vm15839_vm7, %v2415_v58, %v2725_v1  ;;  %v2760_v50 = vld [vmem:[#allocation2 + $0x54] sm:$0xf] }
 0x519   : > { %v2466_v2 = vor.u32 %v2464_v27, %v16653_v5  ;;  %v2483_v11 = vor.u32 %v2481_v7, %v16655_v56  ;;  %2718 = vst [vmem:[#allocation2 + $0xc] sm:$0xf] %v2717_v0  ;;  %2727 = vst [vmem:[#allocation2 + $0x18] sm:$0xf] %v2726_v19  ;;  %v16671_v45 = vrot.slane %v2495_v28, 7  ;;  %v2733_v30 = vsel %vm15839_vm7, %v2432_v3, %v2732_v47 }
 0x51a   : > { %v16673_v57 = vrot.slane %v2512_v46, 7  ;;  %v2740_v1 = vsel %vm15839_vm7, %v2449_v6, %v2739_v31  ;;  %v2767_v27 = vld [vmem:[#allocation2 + $0x60] sm:$0xf]  ;;  %2734 = vst [vmem:[#allocation2 + $0x24] sm:$0xf] %v2733_v30  ;;  %v2117_v46 = vcombine.low %v16614_v12, %v16620_v37  ;;  %v2118_v19 = vcombine.high %v16614_v12, %v16620_v37 }
 0x51b   : > { %2741 = vst [vmem:[#allocation2 + $0x30] sm:$0xf] %v2740_v1  ;;  %v2747_v7 = vsel %vm15839_vm7, %v2466_v2, %v2746_v18  ;;  %v2754_v58 = vsel %vm15839_vm7, %v2483_v11, %v2753_v13  ;;  %v2500_v3 = vor.u32 %v2498_v48, %v16671_v45  ;;  %v2133_v28 = vcombine.low %v16617_v23, %v16623_v8  ;;  %v16703_v2 = vpop.trf.xlu0  ;;  %v16705_v11 = vpop.trf.xlu1  ;;  %v2781_v47 = vld [vmem:[#allocation2 + $0x78] sm:$0xf] }
 0x51c   : > { %v2517_v6 = vor.u32 %v2515_v40, %v16673_v57  ;;  %2748 = vst [vmem:[#allocation2 + $0x3c] sm:$0xf] %v2747_v7  ;;  %2755 = vst [vmem:[#allocation2 + $0x48] sm:$0xf] %v2754_v58  ;;  %v2125_v18 = vrot.slane %v2117_v46, %v15491_v59  ;;  %v2132_v13 = vrot.slane %v2118_v19, %v15491_v59 }
 0x51d   : > { %v2134_v12 = vcombine.high %v16617_v23, %v16623_v8  ;;  %v2761_v37 = vsel %vm15839_vm7, %v2500_v3, %v2760_v50  ;;  %v1885_v40 = vcombine.low %v16625_v21, %v1573_v61  ;;  %v1886_v0 = vcombine.high %v16625_v21, %v1573_v61 }
 0x51e   : > { %v2768_v48 = vsel %vm15839_vm7, %v2517_v6, %v2767_v27  ;;  %2762 = vst [vmem:[#allocation2 + $0x54] sm:$0xf] %v2761_v37  ;;  %v2141_v30 = vrot.slane %v2133_v28, %v15491_v59  ;;  %v2149_v8 = vcombine.low %v16598_v63, %v2125_v18  ;;  %v2150_v1 = vcombine.high %v16598_v63, %v2125_v18 }
 0x51f   : > { %2769 = vst [vmem:[#allocation2 + $0x60] sm:$0xf] %v2768_v48  ;;  %v2148_v23 = vrot.slane %v2134_v12, %v15491_v59  ;;  %v2151_v50 = vcombine.low %v16601_v42, %v2132_v13  ;;  %v2152_v27 = vcombine.high %v16601_v42, %v2132_v13  ;;  %v16714_v21 = vrot.slane %v1885_v40, %v15487_v51  ;;  %v16727_v31 = vpop.trf.xlu0 }
 0x520   : > { %v16717_v61 = vrot.slane %v1886_v0, %v15487_v51  ;;  %v2153_v7 = vcombine.low %v16604_v41, %v2141_v30  ;;  %v2154_v58 = vcombine.high %v16604_v41, %v2141_v30  ;;  %v13244_v3 = vpack.c.bf16 %v2149_v8, %v2149_v8  ;;  %v16729_v41 = vpop.trf.xlu1 }
 0x521   : > { %v2155_v46 = vcombine.low %v16607_v33, %v2148_v23  ;;  %v2156_v19 = vcombine.high %v16607_v33, %v2148_v23  ;;  %v13246_v63 = vpack.c.bf16 %v2150_v1, %v2150_v1  ;;  %v13248_v6 = vpack.c.bf16 %v2151_v50, %v2151_v50 }
 0x522   : > { %v13250_v18 = vpack.c.bf16 %v2152_v27, %v2152_v27  ;;  %v13252_v28 = vpack.c.bf16 %v2153_v7, %v2153_v7  ;;  %v13254_v42 = vpack.c.bf16 %v2154_v58, %v2154_v58  ;;  %v2529_v37 = vshrl.u32 %v13244_v3, 16 }
 0x523   : > { %v16723_v13 = vpack.c.bf16 %v2155_v46, %v2155_v46  ;;  %v16725_v12 = vpack.c.bf16 %v2156_v19, %v2156_v19  ;;  %v2532_v48 = vshll.u32 %v13244_v3, 16  ;;  %v2546_v40 = vshrl.u32 %v13246_v63, 16 }
 0x524   : > { %v2549_v0 = vshll.u32 %v13246_v63, 16  ;;  %v2563_v30 = vshrl.u32 %v13248_v6, 16  ;;  %v2566_v33 = vshll.u32 %v13248_v6, 16  ;;  %v2580_v23 = vshrl.u32 %v13250_v18, 16  ;;  %v2774_v63 = vld [vmem:[#allocation2 + $0x6c] sm:$0xf] }
 0x525   : > { %v2583_v8 = vshll.u32 %v13250_v18, 16  ;;  %v16731_v1 = vrot.slane %v2529_v37, 7  ;;  %v16733_v50 = vrot.slane %v2546_v40, 7  ;;  %v2597_v27 = vshrl.u32 %v13252_v28, 16  ;;  %v2788_v40 = vld [vmem:[#allocation2 + $0x84] sm:$0xf] }
 0x526   : > { %v2600_v7 = vshll.u32 %v13252_v28, 16  ;;  %v16735_v58 = vrot.slane %v2563_v30, 7  ;;  %v16737_v46 = vrot.slane %v2580_v23, 7  ;;  %v2614_v19 = vshrl.u32 %v13254_v42, 16  ;;  %v16758_v28 = vpop.trf.xlu1  ;;  %v2809_v23 = vld [vmem:[#allocation2 + $0xa8] sm:$0xf] }
 0x527   : > { %v2617_v3 = vshll.u32 %v13254_v42, 16  ;;  %v2534_v14 = vor.u32 %v2532_v48, %v16731_v1  ;;  %v2551_v18 = vor.u32 %v2549_v0, %v16733_v50  ;;  %v4682_v42 = vld [vmem:[%s19368_s4 + $0x6] sm:$0x3]  ;;  %v2795_v48 = vld [vmem:[#allocation2 + $0x90] sm:$0xf]  ;;  %v16750_v22 = vrot.slane %v2597_v27, 7 }
 0x528   : > { %v2568_v62 = vor.u32 %v2566_v33, %v16735_v58  ;;  %v2585_v30 = vor.u32 %v2583_v8, %v16737_v46  ;;  %v16752_v6 = vrot.slane %v2614_v19, 7  ;;  %v2631_v0 = vshrl.u32 %v16723_v13, 16  ;;  %v16756_v33 = vpop.trf.xlu0  ;;  %15007 = vmatprep.subr.msk.bf16.mxu1 %vm4907_vm4, %v4682_v42  ;;  %v2802_v8 = vld [vmem:[#allocation2 + $0x9c] sm:$0xf] }
 0x529   : > { %v2634_v37 = vshll.u32 %v16723_v13, 16  ;;  %v2648_v35 = vshrl.u32 %v16725_v12, 16  ;;  %v2651_v55 = vshll.u32 %v16725_v12, 16  ;;  %v2775_v27 = vsel %vm15839_vm7, %v2534_v14, %v2774_v63  ;;  %v2816_v12 = vld [vmem:[#allocation2 + $0xb4] sm:$0xf] }
 0x52a   : > { %v2782_v19 = vsel %vm15839_vm7, %v2551_v18, %v2781_v47  ;;  %v2602_v13 = vor.u32 %v2600_v7, %v16750_v22  ;;  %v2619_v20 = vor.u32 %v2617_v3, %v16752_v6  ;;  %2776 = vst [vmem:[#allocation2 + $0x6c] sm:$0xf] %v2775_v27  ;;  %v16771_v34 = vrot.slane %v2631_v0, 7  ;;  %v2823_v7 = vld [vmem:[#allocation2 + $0xc0] sm:$0xf] }
 0x52b   : > { %2783 = vst [vmem:[#allocation2 + $0x78] sm:$0xf] %v2782_v19  ;;  %v16773_v60 = vrot.slane %v2648_v35, 7  ;;  %v2789_v14 = vsel %vm15839_vm7, %v2568_v62, %v2788_v40  ;;  %v2796_v47 = vsel %vm15839_vm7, %v2585_v30, %v2795_v48  ;;  %v1901_v35 = vcombine.low %v16627_v26, %v16665_v43 }
 0x52c   : > { %2790 = vst [vmem:[#allocation2 + $0x84] sm:$0xf] %v2789_v14  ;;  %2797 = vst [vmem:[#allocation2 + $0x90] sm:$0xf] %v2796_v47  ;;  %v2803_v3 = vsel %vm15839_vm7, %v2602_v13, %v2802_v8  ;;  %v2810_v63 = vsel %vm15839_vm7, %v2619_v20, %v2809_v23  ;;  %v1902_v18 = vcombine.high %v16627_v26, %v16665_v43  ;;  %v1701_v43 = vpop.trf.xlu0 }
 0x52d   : > { %v2636_v62 = vor.u32 %v2634_v37, %v16771_v34  ;;  %v2653_v30 = vor.u32 %v2651_v55, %v16773_v60  ;;  %2804 = vst [vmem:[#allocation2 + $0x9c] sm:$0xf] %v2803_v3  ;;  %2811 = vst [vmem:[#allocation2 + $0xa8] sm:$0xf] %v2810_v63  ;;  %v1909_v0 = vrot.slane %v1901_v35, %v15487_v51  ;;  %v1733_v37 = vpop.trf.xlu1 }
 0x52e   : > { %v1916_v20 = vrot.slane %v1902_v18, %v15487_v51  ;;  %v2157_v23 = vcombine.low %v16633_v29, %v16703_v2  ;;  %v2158_v26 = vcombine.high %v16633_v29, %v16703_v2  ;;  %v2173_v27 = vcombine.low %v16635_v39, %v16705_v11 }
 0x52f   : > { %v2817_v8 = vsel %vm15839_vm7, %v2636_v62, %v2816_v12  ;;  %v2824_v55 = vsel %vm15839_vm7, %v2653_v30, %v2823_v7  ;;  %v2174_v19 = vcombine.high %v16635_v39, %v16705_v11  ;;  %v1949_v13 = vcombine.low %v16714_v21, %v1909_v0 }
 0x530   : > { %2818 = vst [vmem:[#allocation2 + $0xb4] sm:$0xf] %v2817_v8  ;;  %2825 = vst [vmem:[#allocation2 + $0xc0] sm:$0xf] %v2824_v55  ;;  %v1950_v29 = vcombine.high %v16714_v21, %v1909_v0  ;;  %v1965_v2 = vcombine.low %v16717_v61, %v1916_v20  ;;  %v1966_v14 = vcombine.high %v16717_v61, %v1916_v20 }
 0x531   : > { %v2165_v47 = vrot.slane %v2157_v23, %v15487_v51  ;;  %v2172_v44 = vrot.slane %v2158_v26, %v15487_v51  ;;  %v2181_v12 = vrot.slane %v2173_v27, %v15487_v51  ;;  %v2188_v7 = vrot.slane %v2174_v19, %v15487_v51  ;;  %v1702_v23 = vpop.trf.xlu0  ;;  %v1734_v26 = vpop.trf.xlu1 }
 0x532   : > { %v1957_v39 = vrot.slane %v1949_v13, %v15491_v59  ;;  %v1964_v11 = vrot.slane %v1950_v29, %v15491_v59  ;;  %v1973_v3 = vrot.slane %v1965_v2, %v15491_v59  ;;  %v1980_v21 = vrot.slane %v1966_v14, %v15491_v59 }
 0x533   : > { %v2221_v63 = vcombine.low %v2165_v47, %v2181_v12  ;;  %v2222_v35 = vcombine.high %v2165_v47, %v2181_v12  ;;  %v2237_v18 = vcombine.low %v2172_v44, %v2188_v7  ;;  %v2238_v61 = vcombine.high %v2172_v44, %v2188_v7 }
 0x534   : > { %v1917_v62 = vcombine.low %v16727_v31, %v1701_v43  ;;  %v1918_v30 = vcombine.high %v16727_v31, %v1701_v43  ;;  %v1933_v0 = vcombine.low %v16729_v41, %v1733_v37  ;;  %v1934_v20 = vcombine.high %v16729_v41, %v1733_v37 }
 0x535   : > { %v16822_v8 = vrot.slane %v2221_v63, %v15491_v59  ;;  %v16825_v55 = vrot.slane %v2222_v35, %v15491_v59  ;;  %v16828_v27 = vrot.slane %v2237_v18, %v15491_v59  ;;  %v16831_v19 = vrot.slane %v2238_v61, %v15491_v59 }
 0x536   : > { %v1925_v31 = vrot.slane %v1917_v62, %v15487_v51  ;;  %v1932_v43 = vrot.slane %v1918_v30, %v15487_v51  ;;  %v1941_v41 = vrot.slane %v1933_v0, %v15487_v51  ;;  %v1948_v37 = vrot.slane %v1934_v20, %v15487_v51 }
 0x537   : > { %v2189_v13 = vcombine.low %v16756_v33, %v1702_v23  ;;  %v2190_v29 = vcombine.high %v16756_v33, %v1702_v23  ;;  %v2205_v2 = vcombine.low %v16758_v28, %v1734_v26  ;;  %v2206_v14 = vcombine.high %v16758_v28, %v1734_v26 }
 0x538   : > { %v1981_v47 = vcombine.low %v1925_v31, %v1941_v41  ;;  %v1982_v44 = vcombine.high %v1925_v31, %v1941_v41  ;;  %v1997_v12 = vcombine.low %v1932_v43, %v1948_v37  ;;  %v1998_v7 = vcombine.high %v1932_v43, %v1948_v37 }
 0x539   : > { %v16842_v63 = vrot.slane %v2189_v13, %v15487_v51  ;;  %v16845_v35 = vrot.slane %v2190_v29, %v15487_v51  ;;  %v16848_v18 = vrot.slane %v2205_v2, %v15487_v51  ;;  %v16851_v61 = vrot.slane %v2206_v14, %v15487_v51 }
 0x53a   : > { %v1989_v33 = vrot.slane %v1981_v47, %v15491_v59  ;;  %v1996_v28 = vrot.slane %v1982_v44, %v15491_v59  ;;  %v2005_v62 = vrot.slane %v1997_v12, %v15491_v59  ;;  %v2012_v30 = vrot.slane %v1998_v7, %v15491_v59 }
 0x53c   : > { %v2013_v26 = vcombine.low %v1957_v39, %v1989_v33  ;;  %v2014_v31 = vcombine.high %v1957_v39, %v1989_v33  ;;  %v2015_v43 = vcombine.low %v1964_v11, %v1996_v28  ;;  %v2016_v41 = vcombine.high %v1964_v11, %v1996_v28 }
 0x53d   : > { %v2017_v37 = vcombine.low %v1973_v3, %v2005_v62  ;;  %v2018_v13 = vcombine.high %v1973_v3, %v2005_v62  ;;  %v2019_v29 = vcombine.low %v1980_v21, %v2012_v30  ;;  %v2020_v2 = vcombine.high %v1980_v21, %v2012_v30 }
 0x53e   : > { %v13229_v14 = vpack.c.bf16 %v2013_v26, %v2013_v26  ;;  %v13231_v47 = vpack.c.bf16 %v2014_v31, %v2014_v31  ;;  %v13233_v44 = vpack.c.bf16 %v2015_v43, %v2015_v43  ;;  %v13235_v12 = vpack.c.bf16 %v2016_v41, %v2016_v41 }
 0x53f   : > { %v13237_v7 = vpack.c.bf16 %v2017_v37, %v2017_v37  ;;  %v13239_v48 = vpack.c.bf16 %v2018_v13, %v2018_v13  ;;  %v13241_v40 = vpack.c.bf16 %v2019_v29, %v2019_v29  ;;  %v16865_v42 = vpack.c.bf16 %v2020_v2, %v2020_v2 }
 0x540   : > { %v2401_v53 = vshrl.u32 %v13229_v14, 16  ;;  %v2404_v23 = vshll.u32 %v13229_v14, 16  ;;  %v2418_v51 = vshrl.u32 %v13231_v47, 16  ;;  %v2421_v20 = vshll.u32 %v13231_v47, 16 }
 0x541   : > { %v2435_v39 = vshrl.u32 %v13233_v44, 16  ;;  %v2438_v33 = vshll.u32 %v13233_v44, 16  ;;  %v2452_v11 = vshrl.u32 %v13235_v12, 16  ;;  %v2455_v28 = vshll.u32 %v13235_v12, 16 }
 0x542   : > { %v2403_v3 = vrot.slane %v2401_v53, 7  ;;  %v2420_v62 = vrot.slane %v2418_v51, 7  ;;  %v2469_v21 = vshrl.u32 %v13237_v7, 16  ;;  %v2472_v30 = vshll.u32 %v13237_v7, 16  ;;  %v2729_v7 = vld [vmem:[#allocation2 + $0x20] sm:$0x1] }
 0x543   : > { %v2437_v26 = vrot.slane %v2435_v39, 7  ;;  %v2454_v31 = vrot.slane %v2452_v11, 7  ;;  %v2486_v43 = vshrl.u32 %v13239_v48, 16  ;;  %v2489_v41 = vshll.u32 %v13239_v48, 16 }
 0x544   : > { %v2406_v37 = vor.u32 %v2404_v23, %v2403_v3  ;;  %v2408_v13 = vrot.slane %v2403_v3, 4  ;;  %v2423_v29 = vor.u32 %v2421_v20, %v2420_v62  ;;  %v2425_v2 = vrot.slane %v2420_v62, 4  ;;  %v2736_v20 = vld [vmem:[#allocation2 + $0x2c] sm:$0x1]  ;;  %v2750_v62 = vld [vmem:[#allocation2 + $0x44] sm:$0x1] }
 0x545   : > { %v2440_v0 = vor.u32 %v2438_v33, %v2437_v26  ;;  %v2442_v14 = vrot.slane %v2437_v26, 4  ;;  %v2457_v15 = vor.u32 %v2455_v28, %v2454_v31  ;;  %v2459_v47 = vrot.slane %v2454_v31, 4 }
 0x546   : > { %v19530_v44 = vrot.slane %v16637_v38, 4  ;;  %v19531_v51 = vrot.slane %v16639_v32, 4  ;;  %v2471_v48 = vrot.slane %v2469_v21, 7  ;;  %v2488_v23 = vrot.slane %v2486_v43, 7  ;;  %v2743_v32 = vld [vmem:[#allocation2 + $0x38] sm:$0x1] }
 0x547   : > { %v19532_v39 = vrot.slane %v16641_v49, 4  ;;  %v19533_v11 = vrot.slane %v16643_v54, 4  ;;  %v2503_v28 = vshrl.u32 %v13241_v40, 16  ;;  %v2506_v3 = vshll.u32 %v13241_v40, 16  ;;  %v2757_v54 = vld [vmem:[#allocation2 + $0x50] sm:$0x1] }
 0x548   : > { %v2407_v53 = vsel %vm16062_vm10, %v19530_v44, %v2406_v37  ;;  %v2424_v12 = vsel %vm16062_vm10, %v19531_v51, %v2423_v29  ;;  %v2474_v21 = vor.u32 %v2472_v30, %v2471_v48  ;;  %v2476_v26 = vrot.slane %v2471_v48, 4  ;;  %v2764_v37 = vld [vmem:[#allocation2 + $0x5c] sm:$0x1] }
 0x549   : > { %v2441_v33 = vsel %vm16062_vm10, %v19532_v39, %v2440_v0  ;;  %v2458_v38 = vsel %vm16062_vm10, %v19533_v11, %v2457_v15  ;;  %2719 = vst.msk [vmem:[#allocation2 + $0x10] sm:$0xf] %vm855_vm2, %v2407_v53  ;;  %2728 = vst.msk [vmem:[#allocation2 + $0x1c] sm:$0xf] %vm855_vm2, %v2424_v12  ;;  %v2491_v31 = vor.u32 %v2489_v41, %v2488_v23  ;;  %v2493_v49 = vrot.slane %v2488_v23, 4 }
 0x54a   : > { %2735 = vst.msk [vmem:[#allocation2 + $0x28] sm:$0xf] %vm855_vm2, %v2441_v33  ;;  %2742 = vst.msk [vmem:[#allocation2 + $0x34] sm:$0xf] %vm855_vm2, %v2458_v38  ;;  %v2505_v0 = vrot.slane %v2503_v28, 7  ;;  %v2520_v15 = vshrl.u32 %v16865_v42, 16  ;;  %v2723_v43 = vsel %vm16068_vm11, %v2408_v13, %v2722_v25  ;;  %v2730_v53 = vsel %vm16068_vm11, %v2425_v2, %v2729_v7 }
 0x54b   : > { %v2523_v40 = vshll.u32 %v16865_v42, 16  ;;  %v19534_v29 = vrot.slane %v16653_v5, 4  ;;  %v19535_v41 = vrot.slane %v16655_v56, 4  ;;  %2724 = vst [vmem:[#allocation2 + $0x14] sm:$0x1] %v2723_v43  ;;  %v2737_v42 = vsel %vm16068_vm11, %v2442_v14, %v2736_v20 }
 0x54c   : > { %v2508_v51 = vor.u32 %v2506_v3, %v2505_v0  ;;  %v2510_v25 = vrot.slane %v2505_v0, 4  ;;  %v2522_v13 = vrot.slane %v2520_v15, 7  ;;  %2731 = vst [vmem:[#allocation2 + $0x20] sm:$0x1] %v2730_v53  ;;  %2738 = vst [vmem:[#allocation2 + $0x2c] sm:$0x1] %v2737_v42  ;;  %v2744_v5 = vsel %vm16068_vm11, %v2459_v47, %v2743_v32 }
 0x54d   : > { %v2475_v30 = vsel %vm16062_vm10, %v19534_v29, %v2474_v21  ;;  %v2492_v44 = vsel %vm16062_vm10, %v19535_v41, %v2491_v31  ;;  %v2771_v56 = vld [vmem:[#allocation2 + $0x68] sm:$0x1]  ;;  %2745 = vst [vmem:[#allocation2 + $0x38] sm:$0x1] %v2744_v5  ;;  %v2751_v2 = vsel %vm16068_vm11, %v2476_v26, %v2750_v62  ;;  %v2758_v14 = vsel %vm16068_vm11, %v2493_v49, %v2757_v54 }
 0x54e   : > { %2749 = vst.msk [vmem:[#allocation2 + $0x40] sm:$0xf] %vm855_vm2, %v2475_v30  ;;  %2756 = vst.msk [vmem:[#allocation2 + $0x4c] sm:$0xf] %vm855_vm2, %v2492_v44  ;;  %v19536_v12 = vcombine.low %v16842_v63, %v16848_v18  ;;  %v19537_v47 = vcombine.high %v16842_v63, %v16848_v18  ;;  %v19538_v7 = vrot.slane %v16671_v45, 4  ;;  %v2525_v39 = vor.u32 %v2523_v40, %v2522_v13 }
 0x54f   : > { %v2527_v33 = vrot.slane %v2522_v13, 4  ;;  %2752 = vst [vmem:[#allocation2 + $0x44] sm:$0x1] %v2751_v2  ;;  %2759 = vst [vmem:[#allocation2 + $0x50] sm:$0x1] %v2758_v14  ;;  %v2765_v11 = vsel %vm16068_vm11, %v2510_v25, %v2764_v37  ;;  %v19539_v63 = vcombine.low %v16845_v35, %v16851_v61  ;;  %v19540_v45 = vcombine.high %v16845_v35, %v16851_v61 }
 0x550   : > { %v2261_v48 = vrot.slane %v19536_v12, %v15491_v59  ;;  %v2268_v23 = vrot.slane %v19537_v47, %v15491_v59  ;;  %v2509_v20 = vsel %vm16062_vm10, %v19538_v7, %v2508_v51  ;;  %2766 = vst [vmem:[#allocation2 + $0x5c] sm:$0x1] %v2765_v11  ;;  %v16936_v32 = vld [vmem:[#allocation2 + $0xc] sm:$0xff]   ;;  %v19541_v62 = vrot.slane %v16673_v57, 4  ;;  %v16946_v35 = vld [vmem:[#allocation2 + $0x18] sm:$0xff]  }
 0x551   : > { %2763 = vst.msk [vmem:[#allocation2 + $0x58] sm:$0xf] %vm855_vm2, %v2509_v20  ;;  %v2277_v18 = vrot.slane %v19539_v63, %v15491_v59  ;;  %v2284_v38 = vrot.slane %v19540_v45, %v15491_v59  ;;  %v2772_v26 = vsel %vm16068_vm11, %v2527_v33, %v2771_v56  ;;  %13872 = vmatmul.mubr.msk.bf16.vlgmr.msra.gmra.mrb[4].mxu1 %vm4858_vm5, %v16936_v32  ;;  %v16961_v47 = vld [vmem:[#allocation2 + $0x24] sm:$0xff]   ;;  %v16963_v33 = vld [vmem:[#allocation2 + $0x30] sm:$0xff]  }
 0x552   : > { %v2285_v28 = vcombine.low %v16822_v8, %v2261_v48  ;;  %v2286_v3 = vcombine.high %v16822_v8, %v2261_v48  ;;  %v2526_v21 = vsel %vm16062_vm10, %v19541_v62, %v2525_v39  ;;  %v2287_v31 = vcombine.low %v16825_v55, %v2268_v23  ;;  %2773 = vst [vmem:[#allocation2 + $0x68] sm:$0x1] %v2772_v26 }
 0x553   : > { %v2288_v49 = vcombine.high %v16825_v55, %v2268_v23  ;;  %2770 = vst.msk [vmem:[#allocation2 + $0x64] sm:$0xf] %vm855_vm2, %v2526_v21  ;;  %v2289_v59 = vcombine.low %v16828_v27, %v2277_v18  ;;  %v2290_v8 = vcombine.high %v16828_v27, %v2277_v18  ;;  %v2291_v57 = vcombine.low %v16831_v19, %v2284_v38 }
 0x554   : > { %v2292_v61 = vcombine.high %v16831_v19, %v2284_v38  ;;  %v13245_v54 = vpack.c.bf16 %v2285_v28, %v2285_v28  ;;  %v13247_v0 = vpack.c.bf16 %v2286_v3, %v2286_v3  ;;  %v13249_v15 = vpack.c.bf16 %v2287_v31, %v2287_v31  ;;  %13875 = vmatprep.mubr.msk.bf16.mxu1 %vm4858_vm5, %v16946_v35  ;;  %v2778_v38 = vld [vmem:[#allocation2 + $0x74] sm:$0x1]  ;;  %v2785_v28 = vld [vmem:[#allocation2 + $0x80] sm:$0x1] }
 0x555   : > { %v13251_v55 = vpack.c.bf16 %v2288_v49, %v2288_v49  ;;  %v13253_v40 = vpack.c.bf16 %v2289_v59, %v2289_v59  ;;  %v13255_v43 = vpack.c.bf16 %v2290_v8, %v2290_v8  ;;  %v16957_v37 = vpack.c.bf16 %v2291_v57, %v2291_v57  ;;  %v2792_v59 = vld [vmem:[#allocation2 + $0x8c] sm:$0x1]  ;;  %v2799_v8 = vld [vmem:[#allocation2 + $0x98] sm:$0x1] }
 0x556   : > { %v16959_v29 = vpack.c.bf16 %v2292_v61, %v2292_v61  ;;  %v2537_v27 = vshrl.u32 %v13245_v54, 16  ;;  %v2540_v30 = vshll.u32 %v13245_v54, 16  ;;  %v2554_v41 = vshrl.u32 %v13247_v0, 16 }
 0x557   : > { %v2557_v19 = vshll.u32 %v13247_v0, 16  ;;  %v2571_v44 = vshrl.u32 %v13249_v15, 16  ;;  %v2574_v53 = vshll.u32 %v13249_v15, 16  ;;  %v2588_v42 = vshrl.u32 %v13251_v55, 16  ;;  %v2806_v15 = vld [vmem:[#allocation2 + $0xa4] sm:$0x1] }
 0x558   : > { %v2591_v51 = vshll.u32 %v13251_v55, 16  ;;  %v2539_v25 = vrot.slane %v2537_v27, 7  ;;  %v2556_v13 = vrot.slane %v2554_v41, 7  ;;  %v2605_v5 = vshrl.u32 %v13253_v40, 16  ;;  %v2813_v55 = vld [vmem:[#allocation2 + $0xb0] sm:$0x1] }
 0x559   : > { %v2608_v56 = vshll.u32 %v13253_v40, 16  ;;  %v2573_v2 = vrot.slane %v2571_v44, 7  ;;  %v2590_v14 = vrot.slane %v2588_v42, 7  ;;  %v2622_v12 = vshrl.u32 %v13255_v43, 16  ;;  %13876 = vmatmul.mubr.msk.bf16.gmra.mrb[8].mxu1 %vm4858_vm5, %v16961_v47  ;;  %v2820_v44 = vld [vmem:[#allocation2 + $0xbc] sm:$0x1] }
 0x55a   : > { %v2625_v48 = vshll.u32 %v13255_v43, 16  ;;  %v2542_v23 = vor.u32 %v2540_v30, %v2539_v25  ;;  %v2544_v7 = vrot.slane %v2539_v25, 4  ;;  %v2559_v20 = vor.u32 %v2557_v19, %v2556_v13  ;;  %13879 = vmatprep.mubr.msk.bf16.mxu1 %vm4858_vm5, %v16963_v33  ;;  %v6183_v19 = vld [vmem:[#allocation2 + $0xc] sm:$0xf] }
 0x55b   : > { %v2561_v39 = vrot.slane %v2556_v13, 4  ;;  %v2576_v11 = vor.u32 %v2574_v53, %v2573_v2  ;;  %v2578_v63 = vrot.slane %v2573_v2, 4  ;;  %v2593_v18 = vor.u32 %v2591_v51, %v2590_v14  ;;  %v2827_v53 = vld [vmem:[#allocation2 + $0xc8] sm:$0x1] }
 0x55c   : > { %v2595_v45 = vrot.slane %v2590_v14, 4  ;;  %v19542_v3 = vrot.slane %v16731_v1, 4  ;;  %v19543_v21 = vrot.slane %v16733_v50, 4  ;;  %v2607_v31 = vrot.slane %v2605_v5, 7 }
 0x55d   : > { %v2624_v49 = vrot.slane %v2622_v12, 7  ;;  %v19544_v57 = vrot.slane %v16735_v58, 4  ;;  %v19545_v61 = vrot.slane %v16737_v46, 4  ;;  %v2639_v54 = vshrl.u32 %v16957_v37, 16 }
 0x55e   : > { %v2543_v62 = vsel %vm16062_vm10, %v19542_v3, %v2542_v23  ;;  %v2560_v26 = vsel %vm16062_vm10, %v19543_v21, %v2559_v20  ;;  %v2642_v0 = vshll.u32 %v16957_v37, 16  ;;  %v2610_v40 = vor.u32 %v2608_v56, %v2607_v31  ;;  %v6186_v56 = vld [vmem:[#allocation2 + $0x18] sm:$0xf]  ;;  %v6185_v20 = vld [vmem:[#allocation2 + $0x14] sm:$0x1] }
 0x55f   : > { %v2577_v1 = vsel %vm16062_vm10, %v19544_v57, %v2576_v11  ;;  %v2594_v50 = vsel %vm16062_vm10, %v19545_v61, %v2593_v18  ;;  %2777 = vst.msk [vmem:[#allocation2 + $0x70] sm:$0xf] %vm855_vm2, %v2543_v62  ;;  %2784 = vst.msk [vmem:[#allocation2 + $0x7c] sm:$0xf] %vm855_vm2, %v2560_v26  ;;  %v2612_v58 = vrot.slane %v2607_v31, 4  ;;  %v2627_v43 = vor.u32 %v2625_v48, %v2624_v49  ;;  %v17011_v48 = vld [vmem:[#allocation2 + $0x3c] sm:$0xff]  }
 0x560   : > { %v2629_v27 = vrot.slane %v2624_v49, 4  ;;  %2791 = vst.msk [vmem:[#allocation2 + $0x88] sm:$0xf] %vm855_vm2, %v2577_v1  ;;  %2798 = vst.msk [vmem:[#allocation2 + $0x94] sm:$0xf] %vm855_vm2, %v2594_v50  ;;  %v2641_v46 = vrot.slane %v2639_v54, 7  ;;  %v2779_v37 = vsel %vm16068_vm11, %v2544_v7, %v2778_v38  ;;  %v2793_v5 = vsel %vm16068_vm11, %v2578_v63, %v2792_v59 }
 0x561   : > { %v2656_v30 = vshrl.u32 %v16959_v29, 16  ;;  %v2659_v41 = vshll.u32 %v16959_v29, 16  ;;  %v19546_v42 = vrot.slane %v16750_v22, 4  ;;  %v19547_v25 = vrot.slane %v16752_v6, 4  ;;  %2780 = vst [vmem:[#allocation2 + $0x74] sm:$0x1] %v2779_v37  ;;  %13880 = vmatmul.mubr.msk.bf16.gmra.mrb[12].mxu1 %vm4858_vm5, %v17011_v48 }
 0x562   : > { %v2786_v29 = vsel %vm16068_vm11, %v2561_v39, %v2785_v28  ;;  %v2644_v2 = vor.u32 %v2642_v0, %v2641_v46  ;;  %v2646_v14 = vrot.slane %v2641_v46, 4  ;;  %2794 = vst [vmem:[#allocation2 + $0x8c] sm:$0x1] %v2793_v5  ;;  %v2800_v22 = vsel %vm16068_vm11, %v2595_v45, %v2799_v8  ;;  %v6184_v6 = vld [vmem:[#allocation2 + $0x10] sm:$0xf]  ;;  %v17017_v63 = vld [vmem:[#allocation2 + $0x48] sm:$0xff]  }
 0x563   : > { %v2611_v51 = vsel %vm16062_vm10, %v19546_v42, %v2610_v40  ;;  %v2628_v13 = vsel %vm16062_vm10, %v19547_v25, %v2627_v43  ;;  %v2658_v12 = vrot.slane %v2656_v30, 7  ;;  %2787 = vst [vmem:[#allocation2 + $0x80] sm:$0x1] %v2786_v29  ;;  %2801 = vst [vmem:[#allocation2 + $0x98] sm:$0x1] %v2800_v22  ;;  %v2807_v23 = vsel %vm16068_vm11, %v2612_v58, %v2806_v15  ;;  %v17037_v25 = vld [vmem:[#allocation2 + $0x54] sm:$0xff]  }
 0x564   : > { %2805 = vst.msk [vmem:[#allocation2 + $0xa0] sm:$0xf] %vm855_vm2, %v2611_v51  ;;  %2812 = vst.msk [vmem:[#allocation2 + $0xac] sm:$0xf] %vm855_vm2, %v2628_v13  ;;  %v2814_v7 = vsel %vm16068_vm11, %v2629_v27, %v2813_v55  ;;  %v6316_v39 = vshrl.u32 %v6183_v19, 16  ;;  %v6319_v11 = vshll.u32 %v6183_v19, 16  ;;  %v2821_v3 = vsel %vm16068_vm11, %v2646_v14, %v2820_v44  ;;  %13883 = vmatprep.mubr.msk.bf16.mxu1 %vm4858_vm5, %v17017_v63 }
 0x565   : > { %v19548_v18 = vrot.slane %v16771_v34, 4  ;;  %v2661_v38 = vor.u32 %v2659_v41, %v2658_v12  ;;  %v2663_v28 = vrot.slane %v2658_v12, 4  ;;  %2808 = vst [vmem:[#allocation2 + $0xa4] sm:$0x1] %v2807_v23  ;;  %2815 = vst [vmem:[#allocation2 + $0xb0] sm:$0x1] %v2814_v7 }
 0x566   : > { %v6187_v62 = vld [vmem:[#allocation2 + $0x1c] sm:$0xf]  ;;  %2822 = vst [vmem:[#allocation2 + $0xbc] sm:$0x1] %v2821_v3  ;;  %v6318_v21 = vrot.slane %v6316_v39, 4  ;;  %v6321_v26 = vrot.slane %v6319_v11, 5 }
 0x567   : > { %v2645_v45 = vsel %vm16062_vm10, %v19548_v18, %v2644_v2  ;;  %v6325_v34 = vshll.u32 %v6184_v6, 16  ;;  %v6329_v31 = vshrl.u32 %v6184_v6, 16  ;;  %v6189_v49 = vld [vmem:[#allocation2 + $0x24] sm:$0xf]  ;;  %v19549_v59 = vrot.slane %v16773_v60, 4 }
 0x568   : > { %2819 = vst.msk [vmem:[#allocation2 + $0xb8] sm:$0xf] %vm855_vm2, %v2645_v45  ;;  %v2828_v57 = vsel %vm16068_vm11, %v2663_v28, %v2827_v53  ;;  %v6335_v1 = vshll.u32 %v6185_v20, 16  ;;  %v6188_v61 = vld [vmem:[#allocation2 + $0x20] sm:$0x1]  ;;  %v6340_v50 = vshrl.u32 %v6186_v56, 16  ;;  %v6322_v54 = vor.u32 %v6321_v26, %v6318_v21 }
 0x569   : > { %v2662_v8 = vsel %vm16062_vm10, %v19549_v59, %v2661_v38  ;;  %2829 = vst [vmem:[#allocation2 + $0xc8] sm:$0x1] %v2828_v57  ;;  %v6327_v0 = vrot.slane %v6325_v34, 5  ;;  %v6331_v15 = vrot.slane %v6329_v31, 4  ;;  %v6343_v55 = vshll.u32 %v6186_v56, 16  ;;  %v17041_v14 = vld [vmem:[#allocation2 + $0x60] sm:$0xff]   ;;  %13884 = vmatmul.mubr.msk.bf16.gmra.mrb[16].mxu1 %vm4858_vm5, %v17037_v25 }
 0x56a   : > { %2826 = vst.msk [vmem:[#allocation2 + $0xc4] sm:$0xf] %vm855_vm2, %v2662_v8  ;;  %v6190_v40 = vld [vmem:[#allocation2 + $0x28] sm:$0xf]  ;;  %v6337_v58 = vrot.slane %v6335_v1, 5  ;;  %v6342_v43 = vrot.slane %v6340_v50, 4  ;;  %13887 = vmatprep.mubr.msk.bf16.mxu1 %vm4858_vm5, %v17041_v14 }
 0x56b   : > { %v6349_v60 = vshll.u32 %v6187_v62, 16  ;;  %v6353_v27 = vshrl.u32 %v6187_v62, 16  ;;  %v6323_v46 = vrot.slane %v6322_v54, 4  ;;  %v6332_v30 = vor.u32 %v6331_v15, %v6327_v0  ;;  %v6191_v37 = vld [vmem:[#allocation2 + $0x2c] sm:$0x1] }
 0x56c   : > { %v6345_v41 = vrot.slane %v6343_v55, 5  ;;  %v6359_v24 = vshll.u32 %v6188_v61, 16  ;;  %v6364_v53 = vshrl.u32 %v6189_v49, 16  ;;  %v6367_v42 = vshll.u32 %v6189_v49, 16  ;;  %v6192_v51 = vld [vmem:[#allocation2 + $0x30] sm:$0xf] }
 0x56d   : > { %v6351_v19 = vrot.slane %v6349_v60, 5  ;;  %v6355_v44 = vrot.slane %v6353_v27, 4  ;;  %v6328_v13 = vsel %vm16401_vm3, %v6323_v46, %v6327_v0  ;;  %v6333_v29 = vrot.slane %v6332_v30, 4  ;;  %v6193_v2 = vld [vmem:[#allocation2 + $0x34] sm:$0xf]  ;;  %v17069_v27 = vld [vmem:[#allocation2 + $0x6c] sm:$0xff]  }
 0x56e   : > { %v6346_v5 = vor.u32 %v6345_v41, %v6342_v43  ;;  %v6361_v56 = vrot.slane %v6359_v24, 5  ;;  %v6366_v22 = vrot.slane %v6364_v53, 4  ;;  %v6369_v6 = vrot.slane %v6367_v42, 5  ;;  %v17054_v3 = vld [vmem:[%s19368_s4 + $0x8] sm:$0x3]  ;;  %v17075_v24 = vld [vmem:[#allocation2 + $0x78] sm:$0xff]  }
 0x56f   : > { %v6356_v12 = vor.u32 %v6355_v44, %v6351_v19  ;;  %v6373_v23 = vshll.u32 %v6190_v40, 16  ;;  %v6338_v7 = vsel %vm16401_vm3, %v6333_v29, %v6337_v58  ;;  %v6377_v39 = vshrl.u32 %v6190_v40, 16  ;;  %v6194_v34 = vld [vmem:[#allocation2 + $0x38] sm:$0x1]  ;;  %v6195_v1 = vld [vmem:[#allocation2 + $0x3c] sm:$0xf] }
 0x570   : > { %v6347_v20 = vrot.slane %v6346_v5, 4  ;;  %v6383_v11 = vshll.u32 %v6191_v37, 16  ;;  %v17049_v18 = vcombine.low %v6328_v13, %v6338_v7  ;;  %v6370_v38 = vor.u32 %v6369_v6, %v6366_v22  ;;  %v17065_v15 = vld [vmem:[#allocation2 + $0x40] sm:$0xf]  ;;  %v6198_v60 = vld [vmem:[#allocation2 + $0x48] sm:$0xf] }
 0x571   : > { %v6357_v45 = vrot.slane %v6356_v12, 4  ;;  %v6375_v28 = vrot.slane %v6373_v23, 5  ;;  %v6379_v21 = vrot.slane %v6377_v39, 4  ;;  %v6388_v31 = vshrl.u32 %v6192_v51, 16  ;;  %v17077_v44 = vld [vmem:[#allocation2 + $0x44] sm:$0x1]  ;;  %13888 = vmatmul.mubr.msk.bf16.gmra.mrb[20].mxu1 %vm4858_vm5, %v17069_v27 }
 0x572   : > { %19550 = vst [vmem:[#allocation39_spill] sm:$0xff] %v17049_v18  ;;  %v6352_v62 = vsel %vm16401_vm3, %v6347_v20, %v6351_v19  ;;  %v6385_v26 = vrot.slane %v6383_v11, 5  ;;  %14042 = vmatmul.mubr.msk.bf16.vlgmr.msra.gmra.mrb[8].mxu0 %vm4858_vm5, %v17049_v18  ;;  %v6371_v59 = vrot.slane %v6370_v38, 4  ;;  %v6391_v8 = vshll.u32 %v6192_v51, 16  ;;  %13891 = vmatprep.mubr.msk.bf16.mxu1 %vm4858_vm5, %v17075_v24  ;;  %v17096_v38 = vld [vmem:[#allocation2 + $0x50] sm:$0x1] }
 0x573   : > { %v6362_v49 = vsel %vm16401_vm3, %v6357_v45, %v6361_v56  ;;  %v6397_v57 = vshll.u32 %v6193_v2, 16  ;;  %14074 = vmatpush3.bf16.msra.mxu0 %v16587_v4  ;;  %v6380_v50 = vor.u32 %v6379_v21, %v6375_v28  ;;  %v6390_v54 = vrot.slane %v6388_v31, 4  ;;  %v17085_v56 = vld [vmem:[#allocation2 + $0x4c] sm:$0xf]  ;;  %v6201_v21 = vld [vmem:[#allocation2 + $0x54] sm:$0xf] }
 0x574   : > { %v17063_v61 = vcombine.low %v6352_v62, %v6362_v49  ;;  %v6401_v0 = vshrl.u32 %v6193_v2, 16  ;;  %v6376_v55 = vsel %vm16401_vm3, %v6371_v59, %v6375_v28  ;;  %v6393_v40 = vrot.slane %v6391_v8, 5  ;;  %15013 = vmatprep.subr.msk.bf16.mxu0 %vm4907_vm4, %v17054_v3  ;;  %v17101_v59 = vld [vmem:[#allocation2 + $0x58] sm:$0xf] }
 0x575   : > { %v6399_v58 = vrot.slane %v6397_v57, 5  ;;  %v6407_v43 = vshll.u32 %v6194_v34, 16  ;;  %v6381_v4 = vrot.slane %v6380_v50, 4  ;;  %v6412_v30 = vshrl.u32 %v6195_v1, 16 }
 0x576   : > { %19551 = vst [vmem:[#allocation40_spill] sm:$0xff] %v17063_v61  ;;  %14045 = vmatprep.mubr.msk.bf16.mxu0 %vm4858_vm5, %v17063_v61  ;;  %v6403_v46 = vrot.slane %v6401_v0, 4  ;;  %v6415_v41 = vshll.u32 %v6195_v1, 16  ;;  %v6394_v37 = vor.u32 %v6393_v40, %v6390_v54  ;;  %v6421_v53 = vshll.u32 %v17065_v15, 16  ;;  %v17105_v54 = vld [vmem:[#allocation2 + $0x84] sm:$0xff]  }
 0x577   : > { %v6409_v19 = vrot.slane %v6407_v43, 5  ;;  %v6425_v42 = vshrl.u32 %v17065_v15, 16  ;;  %v6386_v51 = vsel %vm16401_vm3, %v6381_v4, %v6385_v26  ;;  %v6414_v29 = vrot.slane %v6412_v30, 4  ;;  %v17111_v43 = vld [vmem:[#allocation2 + $0x90] sm:$0xff]  }
 0x578   : > { %v6404_v13 = vor.u32 %v6403_v46, %v6399_v58  ;;  %v6417_v5 = vrot.slane %v6415_v41, 5  ;;  %v17089_v2 = vcombine.low %v6376_v55, %v6386_v51  ;;  %v6395_v12 = vrot.slane %v6394_v37, 4  ;;  %19554 = vst [vmem:[#allocation43_spill] sm:$0xff] %v17111_v43  ;;  %v17117_v46 = vld [vmem:[#allocation2 + $0x5c] sm:$0x1] }
 0x579   : > { %v6423_v22 = vrot.slane %v6421_v53, 5  ;;  %v6427_v6 = vrot.slane %v6425_v42, 4  ;;  %v6431_v20 = vshll.u32 %v17077_v44, 16  ;;  %v6436_v39 = vshrl.u32 %v6198_v60, 16  ;;  %v6204_v37 = vld [vmem:[#allocation2 + $0x60] sm:$0xf]  ;;  %13892 = vmatmul.mubr.msk.bf16.gmra.mrb[24].mxu1 %vm4858_vm5, %v17105_v54 }
 0x57a   : > { %19552 = vst [vmem:[#allocation41_spill] sm:$0xff] %v17089_v2  ;;  %v6405_v23 = vrot.slane %v6404_v13, 4  ;;  %v6418_v7 = vor.u32 %v6417_v5, %v6414_v29  ;;  %14046 = vmatmul.mubr.msk.bf16.gmra.mrb[12].mxu0 %vm4858_vm5, %v17089_v2  ;;  %v6400_v11 = vsel %vm16401_vm3, %v6395_v12, %v6399_v58  ;;  %v6439_v28 = vshll.u32 %v6198_v60, 16  ;;  %v17124_v13 = vld [vmem:[#allocation2 + $0x64] sm:$0xf]  ;;  %13895 = vmatprep.mubr.msk.bf16.mxu1 %vm4858_vm5, %v17111_v43 }
 0x57b   : > { %v6428_v45 = vor.u32 %v6427_v6, %v6423_v22  ;;  %v6445_v62 = vshll.u32 %v17085_v56, 16  ;;  %v6433_v31 = vrot.slane %v6431_v20, 5  ;;  %v6438_v49 = vrot.slane %v6436_v39, 4 }
 0x57c   : > { %v6410_v26 = vsel %vm16401_vm3, %v6405_v23, %v6409_v19  ;;  %v6419_v34 = vrot.slane %v6418_v7, 4  ;;  %v6441_v1 = vrot.slane %v6439_v28, 5  ;;  %v6449_v55 = vshrl.u32 %v17085_v56, 16  ;;  %v17134_v28 = vld [vmem:[#allocation2 + $0x68] sm:$0x1] }
 0x57d   : > { %v17103_v8 = vcombine.low %v6400_v11, %v6410_v26  ;;  %v6429_v57 = vrot.slane %v6428_v45, 4  ;;  %v6447_v50 = vrot.slane %v6445_v62, 5  ;;  %v6455_v40 = vshll.u32 %v17096_v38, 16 }
 0x57e   : > { %v6424_v0 = vsel %vm16401_vm3, %v6419_v34, %v6423_v22  ;;  %v6460_v58 = vshrl.u32 %v6201_v21, 16  ;;  %v6442_v4 = vor.u32 %v6441_v1, %v6438_v49  ;;  %v6463_v30 = vshll.u32 %v6201_v21, 16  ;;  %v6207_v21 = vld [vmem:[#allocation2 + $0x6c] sm:$0xf] }
 0x57f   : > { %19553 = vst [vmem:[#allocation42_spill] sm:$0xff] %v17103_v8  ;;  %14049 = vmatprep.mubr.msk.bf16.mxu0 %vm4858_vm5, %v17103_v8  ;;  %v6434_v60 = vsel %vm16401_vm3, %v6429_v57, %v6433_v31  ;;  %v6469_v41 = vshll.u32 %v17101_v59, 16  ;;  %v6451_v53 = vrot.slane %v6449_v55, 4  ;;  %v6457_v42 = vrot.slane %v6455_v40, 5  ;;  %v17138_v40 = vld [vmem:[#allocation2 + $0x9c] sm:$0xff]  }
 0x580   : > { %v17122_v19 = vcombine.low %v6424_v0, %v6434_v60  ;;  %v6462_v51 = vrot.slane %v6460_v58, 4  ;;  %v6443_v29 = vrot.slane %v6442_v4, 4  ;;  %v6465_v5 = vrot.slane %v6463_v30, 5  ;;  %19556 = vst [vmem:[#allocation45_spill] sm:$0xff] %v17138_v40  ;;  %v17143_v4 = vld [vmem:[#allocation2 + $0x70] sm:$0xf] }
 0x581   : > { %v6471_v12 = vrot.slane %v6469_v41, 5  ;;  %v6473_v22 = vshrl.u32 %v17101_v59, 16  ;;  %v6452_v6 = vor.u32 %v6451_v53, %v6447_v50  ;;  %v6479_v23 = vshll.u32 %v17117_v46, 16  ;;  %v17145_v41 = vld [vmem:[#allocation2 + $0xa8] sm:$0xff]   ;;  %13896 = vmatmul.mubr.msk.bf16.gmra.mrb[28].mxu1 %vm4858_vm5, %v17138_v40 }
 0x582   : > { %19555 = vst [vmem:[#allocation44_spill] sm:$0xff] %v17122_v19  ;;  %v6484_v7 = vshrl.u32 %v6204_v37, 16  ;;  %v6487_v20 = vshll.u32 %v6204_v37, 16  ;;  %14050 = vmatmul.mubr.msk.bf16.gmra.mrb[16].mxu0 %vm4858_vm5, %v17122_v19  ;;  %v6448_v39 = vsel %vm16401_vm3, %v6443_v29, %v6447_v50  ;;  %v6466_v11 = vor.u32 %v6465_v5, %v6462_v51  ;;  %19557 = vst [vmem:[#allocation46_spill] sm:$0xff] %v17145_v41  ;;  %v17151_v5 = vld [vmem:[#allocation2 + $0x74] sm:$0x1] }
 0x583   : > { %v6475_v45 = vrot.slane %v6473_v22, 4  ;;  %v6493_v62 = vshll.u32 %v17124_v13, 16  ;;  %v6453_v26 = vrot.slane %v6452_v6, 4  ;;  %v6481_v34 = vrot.slane %v6479_v23, 5  ;;  %13899 = vmatprep.mubr.msk.bf16.mxu1 %vm4858_vm5, %v17145_v41 }
 0x584   : > { %v6486_v31 = vrot.slane %v6484_v7, 4  ;;  %v6489_v49 = vrot.slane %v6487_v20, 5  ;;  %v6467_v57 = vrot.slane %v6466_v11, 4  ;;  %v6497_v55 = vshrl.u32 %v17124_v13, 16  ;;  %v6210_v7 = vld [vmem:[#allocation2 + $0x78] sm:$0xf] }
 0x585   : > { %v6476_v1 = vor.u32 %v6475_v45, %v6471_v12  ;;  %v6495_v0 = vrot.slane %v6493_v62, 5  ;;  %v6458_v50 = vsel %vm16401_vm3, %v6453_v26, %v6457_v42  ;;  %v6503_v60 = vshll.u32 %v17134_v28, 16  ;;  %v17163_v45 = vld [vmem:[#allocation2 + $0x7c] sm:$0xf] }
 0x586   : > { %v6490_v58 = vor.u32 %v6489_v49, %v6486_v31  ;;  %v6508_v30 = vshrl.u32 %v6207_v21, 16  ;;  %v17147_v37 = vcombine.low %v6448_v39, %v6458_v50  ;;  %v6472_v53 = vsel %vm16401_vm3, %v6467_v57, %v6471_v12 }
 0x587   : > { %v6477_v51 = vrot.slane %v6476_v1, 4  ;;  %v6499_v29 = vrot.slane %v6497_v55, 4  ;;  %v6505_v22 = vrot.slane %v6503_v60, 5  ;;  %v6511_v23 = vshll.u32 %v6207_v21, 16  ;;  %v17172_v60 = vld [vmem:[#allocation2 + $0x80] sm:$0x1] }
 0x588   : > { %19558 = vst [vmem:[#allocation47_spill] sm:$0xff] %v17147_v37  ;;  %v6491_v42 = vrot.slane %v6490_v58, 4  ;;  %v6510_v6 = vrot.slane %v6508_v30, 4  ;;  %14053 = vmatprep.mubr.msk.bf16.mxu0 %vm4858_vm5, %v17147_v37  ;;  %v6517_v39 = vshll.u32 %v17143_v4, 16  ;;  %v6521_v11 = vshrl.u32 %v17143_v4, 16 }
 0x589   : > { %v6482_v12 = vsel %vm16401_vm3, %v6477_v51, %v6481_v34  ;;  %v6500_v20 = vor.u32 %v6499_v29, %v6495_v0  ;;  %v6513_v26 = vrot.slane %v6511_v23, 5  ;;  %v6527_v31 = vshll.u32 %v17151_v5, 16  ;;  %v6213_v34 = vld [vmem:[#allocation2 + $0x84] sm:$0xf]  ;;  %v17178_v23 = vld [vmem:[#allocation2 + $0x88] sm:$0xf] }
 0x58a   : > { %v17165_v62 = vcombine.low %v6472_v53, %v6482_v12  ;;  %v6496_v21 = vsel %vm16401_vm3, %v6491_v42, %v6495_v0  ;;  %v6519_v57 = vrot.slane %v6517_v39, 5  ;;  %v6523_v1 = vrot.slane %v6521_v11, 4  ;;  %v17180_v12 = vld [vmem:[#allocation2 + $0xb4] sm:$0xff]  }
 0x58b   : > { %v6501_v49 = vrot.slane %v6500_v20, 4  ;;  %v6532_v55 = vshrl.u32 %v6210_v7, 16  ;;  %v6514_v50 = vor.u32 %v6513_v26, %v6510_v6  ;;  %v6529_v58 = vrot.slane %v6527_v31, 5  ;;  %19560 = vst [vmem:[#allocation49_spill] sm:$0xff] %v17180_v12  ;;  %13900 = vmatmul.mubr.msk.bf16.gmra.mrb[32].mxu1 %vm4858_vm5, %v17180_v12 }
 0x58c   : > { %19559 = vst [vmem:[#allocation48_spill] sm:$0xff] %v17165_v62  ;;  %14054 = vmatmul.mubr.msk.bf16.gmra.mrb[20].mxu0 %vm4858_vm5, %v17165_v62  ;;  %v6535_v30 = vshll.u32 %v6210_v7, 16  ;;  %v6541_v53 = vshll.u32 %v17163_v45, 16  ;;  %v6524_v51 = vor.u32 %v6523_v1, %v6519_v57  ;;  %v6545_v42 = vshrl.u32 %v17163_v45, 16  ;;  %13905 = vmatprep.mubr.msk.bf16.mxu1 %vm4858_vm5, %v16936_v32 }
 0x58d   : > { %v6506_v0 = vsel %vm16401_vm3, %v6501_v49, %v6505_v22  ;;  %v6534_v29 = vrot.slane %v6532_v55, 4  ;;  %v6515_v6 = vrot.slane %v6514_v50, 4  ;;  %v6551_v31 = vshll.u32 %v17172_v60, 16  ;;  %v6216_v50 = vld [vmem:[#allocation2 + $0x90] sm:$0xf] }
 0x58e   : > { %v17182_v20 = vcombine.low %v6496_v21, %v6506_v0  ;;  %v6537_v39 = vrot.slane %v6535_v30, 5  ;;  %v6543_v11 = vrot.slane %v6541_v53, 5  ;;  %v6525_v26 = vrot.slane %v6524_v51, 4  ;;  %v17191_v21 = vld [vmem:[#allocation2 + $0x8c] sm:$0x1] }
 0x58f   : > { %v6547_v7 = vrot.slane %v6545_v42, 4  ;;  %v6556_v16 = vshrl.u32 %v6213_v34, 16  ;;  %v6520_v22 = vsel %vm16401_vm3, %v6515_v6, %v6519_v57  ;;  %v6559_v1 = vshll.u32 %v6213_v34, 16  ;;  %v17198_v42 = vld [vmem:[#allocation2 + $0x94] sm:$0xf] }
 0x590   : > { %19561 = vst [vmem:[#allocation50_spill] sm:$0xff] %v17182_v20  ;;  %14057 = vmatprep.mubr.msk.bf16.mxu0 %vm4858_vm5, %v17182_v20  ;;  %v6538_v49 = vor.u32 %v6537_v39, %v6534_v29  ;;  %v6565_v55 = vshll.u32 %v17178_v23, 16  ;;  %v6530_v30 = vsel %vm16401_vm3, %v6525_v26, %v6529_v58  ;;  %v6553_v0 = vrot.slane %v6551_v31, 5  ;;  %v6219_v26 = vld [vmem:[#allocation2 + $0x9c] sm:$0xf] }
 0x591   : > { %v6548_v53 = vor.u32 %v6547_v7, %v6543_v11  ;;  %v6558_v51 = vrot.slane %v6556_v16, 4  ;;  %v17200_v20 = vcombine.low %v6520_v22, %v6530_v30  ;;  %v6561_v29 = vrot.slane %v6559_v1, 5  ;;  %v17207_v7 = vld [vmem:[#allocation3 + $0x70] sm:$0xf] }
 0x592   : > { %v6539_v57 = vrot.slane %v6538_v49, 4  ;;  %v6567_v6 = vrot.slane %v6565_v55, 5  ;;  %v6569_v39 = vshrl.u32 %v17178_v23, 16  ;;  %v6575_v62 = vshll.u32 %v17191_v21, 16  ;;  %v17214_v55 = vld [vmem:[#allocation2 + $0x98] sm:$0x1] }
 0x593   : > { %19562 = vst [vmem:[#allocation51_spill] sm:$0xff] %v17200_v20  ;;  %v6549_v34 = vrot.slane %v6548_v53, 4  ;;  %v6580_v37 = vshrl.u32 %v6216_v50, 16  ;;  %v6562_v32 = vor.u32 %v6561_v29, %v6558_v51  ;;  %v6583_v58 = vshll.u32 %v6216_v50, 16  ;;  %v17216_v53 = vld [vmem:[#allocation2 + $0xa0] sm:$0xf] }
 0x594   : > { %14058 = vmatmul.mubr.msk.bf16.gmra.mrb[24].mxu0 %vm4858_vm5, %v17200_v20  ;;  %v6589_v16 = vshll.u32 %v17198_v42, 16  ;;  %v6544_v22 = vsel %vm16401_vm3, %v6539_v57, %v6543_v11  ;;  %v6571_v1 = vrot.slane %v6569_v39, 4  ;;  %v6577_v29 = vrot.slane %v6575_v62, 5  ;;  %v6222_v11 = vld [vmem:[#allocation2 + $0xa8] sm:$0xf] }
 0x595   : > { %v6554_v49 = vsel %vm16401_vm3, %v6549_v34, %v6553_v0  ;;  %v6582_v30 = vrot.slane %v6580_v37, 4  ;;  %v6563_v51 = vrot.slane %v6562_v32, 4  ;;  %v6585_v20 = vrot.slane %v6583_v58, 5  ;;  %v17224_v37 = vld [vmem:[#allocation2 + $0xa4] sm:$0x1] }
 0x596   : > { %v17218_v50 = vcombine.low %v6544_v22, %v6554_v49  ;;  %v6572_v19 = vor.u32 %v6571_v1, %v6567_v6  ;;  %v6591_v8 = vrot.slane %v6589_v16, 5  ;;  %v6593_v31 = vshrl.u32 %v17198_v42, 16 }
 0x597   : > { %v6604_v2 = vshrl.u32 %v6219_v26, 16  ;;  %v6586_v0 = vor.u32 %v6585_v20, %v6582_v30  ;;  %v6599_v57 = vshll.u32 %v17214_v55, 16  ;;  %v6607_v34 = vshll.u32 %v6219_v26, 16  ;;  %v17233_v26 = vld [vmem:[#allocation2 + $0xac] sm:$0xf] }
 0x598   : > { %19563 = vst [vmem:[#allocation52_spill] sm:$0xff] %v17218_v50  ;;  %14061 = vmatprep.mubr.msk.bf16.mxu0 %vm4858_vm5, %v17218_v50  ;;  %v6613_v39 = vshll.u32 %v17216_v53, 16  ;;  %v6568_v62 = vsel %vm16401_vm3, %v6563_v51, %v6567_v6  ;;  %v6573_v32 = vrot.slane %v6572_v19, 4  ;;  %v6595_v58 = vrot.slane %v6593_v31, 4 }
 0x599   : > { %v6606_v16 = vrot.slane %v6604_v2, 4  ;;  %v6587_v22 = vrot.slane %v6586_v0, 4  ;;  %v6609_v49 = vrot.slane %v6607_v34, 5  ;;  %v6617_v61 = vshrl.u32 %v17216_v53, 16  ;;  %v6225_v2 = vld [vmem:[#allocation2 + $0xb4] sm:$0xf] }
 0x59a   : > { %v6615_v1 = vrot.slane %v6613_v39, 5  ;;  %v6578_v20 = vsel %vm16401_vm3, %v6573_v32, %v6577_v29  ;;  %v6596_v30 = vor.u32 %v6595_v58, %v6591_v8  ;;  %v6623_v50 = vshll.u32 %v17224_v37, 16  ;;  %v17239_v34 = vld [vmem:[#allocation2 + $0xb0] sm:$0x1] }
 0x59b   : > { %v6628_v18 = vshrl.u32 %v6222_v11, 16  ;;  %v17235_v12 = vcombine.low %v6568_v62, %v6578_v20  ;;  %v6601_v6 = vrot.slane %v6599_v57, 5  ;;  %v6610_v19 = vor.u32 %v6609_v49, %v6606_v16  ;;  %19565 = vst [vmem:[#allocation54_spill] sm:$0xff] %v17239_v34 }
 0x59c   : > { %v6619_v31 = vrot.slane %v6617_v61, 4  ;;  %v6592_v51 = vsel %vm16401_vm3, %v6587_v22, %v6591_v8  ;;  %v6597_v0 = vrot.slane %v6596_v30, 4  ;;  %v6631_v29 = vshll.u32 %v6222_v11, 16  ;;  %v4691_v61 = vld [vmem:[%s19369_s5 + $0x6] sm:$0x3] }
 0x59d   : > { %19564 = vst [vmem:[#allocation53_spill] sm:$0xff] %v17235_v12  ;;  %v6630_v39 = vrot.slane %v6628_v18, 4  ;;  %14062 = vmatmul.mubr.msk.bf16.gmra.mrb[28].mxu0 %vm4858_vm5, %v17235_v12  ;;  %v6625_v58 = vrot.slane %v6623_v50, 5  ;;  %v6637_v62 = vshll.u32 %v17233_v26, 16  ;;  %v6641_v57 = vshrl.u32 %v17233_v26, 16 }
 0x59e   : > { %v6620_v32 = vor.u32 %v6619_v31, %v6615_v1  ;;  %v6602_v8 = vsel %vm16401_vm3, %v6597_v0, %v6601_v6  ;;  %v6611_v16 = vrot.slane %v6610_v19, 4  ;;  %v6633_v22 = vrot.slane %v6631_v29, 5  ;;  %v15194_v18 = vld [vmem:[%s19368_s4 + $0x6] sm:$0x3]  ;;  %v17254_v50 = vld [vmem:[#allocation2 + $0xb8] sm:$0xf] }
 0x59f   : > { %v5373_v11 = vsel %vm4907_vm4, %v15194_v18, 0  ;;  %19566 = vst [vmem:[#allocation55_spill] sm:$0xff] %v17254_v50  ;;  %v17256_v49 = vcombine.low %v6592_v51, %v6602_v8  ;;  %v6639_v30 = vrot.slane %v6637_v62, 5  ;;  %v6647_v31 = vshll.u32 %v17239_v34, 16  ;;  %v17261_v29 = vld [vmem:[#allocation2 + $0xbc] sm:$0x1] }
 0x5a0   : > { %v6621_v20 = vrot.slane %v6620_v32, 4  ;;  %13904 = vmatpush3.bf16.msra.mxu1 %v5373_v11  ;;  %v6616_v6 = vsel %vm16401_vm3, %v6611_v16, %v6615_v1  ;;  %v6634_v19 = vor.u32 %v6633_v22, %v6630_v39  ;;  %v6643_v0 = vrot.slane %v6641_v57, 4  ;;  %19568 = vst [vmem:[#allocation57_spill] sm:$0xff] %v17261_v29  ;;  %v6234_v18 = vld [vmem:[#allocation3] sm:$0xf] }
 0x5a1   : > { %19567 = vst [vmem:[#allocation56_spill] sm:$0xff] %v17256_v49  ;;  %v6652_v12 = vshrl.u32 %v6225_v2, 16  ;;  %15008 = vmatprep.subr.msk.bf16.mxu1 %vm4907_vm4, %v4691_v61  ;;  %14065 = vmatprep.mubr.msk.bf16.mxu0 %vm4858_vm5, %v17256_v49  ;;  %v6655_v32 = vshll.u32 %v6225_v2, 16  ;;  %v6661_v62 = vshll.u32 %v17254_v50, 16  ;;  %v6665_v8 = vshrl.u32 %v17254_v50, 16 }
 0x5a2   : > { %v6626_v51 = vsel %vm16401_vm3, %v6621_v20, %v6625_v58  ;;  %v6635_v39 = vrot.slane %v6634_v19, 4  ;;  %v6644_v57 = vor.u32 %v6643_v0, %v6639_v30  ;;  %v6235_v22 = vld [vmem:[#allocation3 + $0x4] sm:$0xf]  ;;  %v6671_v20 = vshll.u32 %v17261_v29, 16  ;;  %v6236_v0 = vld [vmem:[#allocation3 + $0x8] sm:$0x1] }
 0x5a3   : > { %v17270_v1 = vcombine.low %v6616_v6, %v6626_v51  ;;  %13906 = vmatmul.mubr.msk.bf16.vlgmr.msra.gmra.mrb[4].mxu1 %vm4858_vm5, %v16946_v35  ;;  %v6654_v16 = vrot.slane %v6652_v12, 4  ;;  %v6657_v11 = vrot.slane %v6655_v32, 5  ;;  %v6663_v58 = vrot.slane %v6661_v62, 5 }
 0x5a4   : > { %13909 = vmatprep.mubr.msk.bf16.mxu1 %vm4858_vm5, %v16961_v47  ;;  %v6667_v2 = vrot.slane %v6665_v8, 4  ;;  %v6645_v49 = vrot.slane %v6644_v57, 4  ;;  %v6649_v41 = vrot.slane %v6647_v31, 5  ;;  %v6676_v40 = vshrl.u32 %v6234_v18, 16 }
 0x5a5   : > { %19569 = vst [vmem:[#allocation58_spill] sm:$0xff] %v17270_v1  ;;  %v6679_v6 = vshll.u32 %v6234_v18, 16  ;;  %14066 = vmatmul.mubr.msk.bf16.gmra.mrb[32].mxu0 %vm4858_vm5, %v17270_v1  ;;  %v6640_v35 = vsel %vm16401_vm3, %v6635_v39, %v6639_v30  ;;  %v6658_v12 = vor.u32 %v6657_v11, %v6654_v16  ;;  %v6685_v51 = vshll.u32 %v6235_v22, 16  ;;  %v17296_v39 = vld [vmem:[%s19368_s4 + $0xc] sm:$0x3] }
 0x5a6   : > { %v6668_v19 = vor.u32 %v6667_v2, %v6663_v58  ;;  %v6650_v47 = vsel %vm16401_vm3, %v6645_v49, %v6649_v41  ;;  %v6678_v32 = vrot.slane %v6676_v40, 4  ;;  %v6689_v8 = vshrl.u32 %v6235_v22, 16 }
 0x5a7   : > { %v6681_v62 = vrot.slane %v6679_v6, 5  ;;  %v17283_v57 = vcombine.low %v6640_v35, %v6650_v47  ;;  %v6673_v18 = vrot.slane %v6671_v20, 5  ;;  %v6687_v43 = vrot.slane %v6685_v51, 5  ;;  %v6264_v20 = vld [vmem:[#allocation3 + $0x78] sm:$0xf]  ;;  %v19571_v35 = vld [vmem:[#allocation36_spill] sm:$0xff] }
 0x5a8   : > { %v6669_v31 = vrot.slane %v6668_v19, 4  ;;  %v6659_v29 = vrot.slane %v6658_v12, 4  ;;  %v6691_v34 = vrot.slane %v6689_v8, 4  ;;  %v6695_v50 = vshll.u32 %v6236_v0, 16  ;;  %v19572_v12 = vld [vmem:[#allocation38_spill] sm:$0xff]  ;;  %v19577_v8 = vld [vmem:[#allocation9_spill] sm:$0xff] }
 0x5a9   : > { %v6682_v1 = vor.u32 %v6681_v62, %v6678_v32  ;;  %14069 = vmatprep.mubr.msk.bf16.mxu0 %vm4858_vm5, %v17283_v57  ;;  %v6884_v40 = vor.u32 %v16581_v52, %v16568_v10  ;;  %v6905_v41 = vshrl.u32 %v17207_v7, 16  ;;  %v5577_v49 = vsel %vm4907_vm4, %v4691_v61, 0 }
 0x5aa   : > { %v6674_v30 = vsel %vm16401_vm3, %v6669_v31, %v6673_v18  ;;  %v6664_v16 = vsel %vm16401_vm3, %v6659_v29, %v6663_v58  ;;  %v6692_v11 = vor.u32 %v6691_v34, %v6687_v43  ;;  %v6697_v2 = vrot.slane %v6695_v50, 5  ;;  %v19573_v29 = vld [vmem:[#allocation37_spill] sm:$0xff]  ;;  %13938 = vmatpush3.bf16.msra.mxu1 %v5577_v49 }
 0x5ab   : > { %13910 = vmatmul.mubr.msk.bf16.gmra.mrb[8].mxu1 %vm4858_vm5, %v16963_v33  ;;  %v6683_v22 = vrot.slane %v6682_v1, 4  ;;  %v17302_v52 = vcombine.low %v6664_v16, %v6674_v30  ;;  %v19570_v61 = vor.u32 %v16547_v36, %v16545_v17  ;;  %v6874_v19 = vor.u32 %v19572_v12, %v19571_v35  ;;  %15009 = vmatprep.subr.msk.bf16.mxu1 %vm4907_vm4, %v17296_v39  ;;  %v15195_v30 = vld [vmem:[#allocation3 + $0x7c] sm:$0xf]  ;;  %v19586_v12 = vld [vmem:[#allocation32_spill] sm:$0xff] }
 0x5ac   : > { %13913 = vmatprep.mubr.msk.bf16.mxu1 %vm4858_vm5, %v17011_v48  ;;  %v19574_v58 = vshrl.u32 %v19573_v29, 16  ;;  %v6693_v34 = vrot.slane %v6692_v11, 4  ;;  %v19575_v50 = vshll.u32 %v19573_v29, 16  ;;  %v19576_v48 = vshll.u32 %v17207_v7, 16  ;;  %v19580_v11 = vld [vmem:[#allocation35_spill] sm:$0xff] }
 0x5ad   : > { %v6861_v6 = vrot.slane %v19570_v61, 4  ;;  %v6688_v33 = vsel %vm16401_vm3, %v6683_v22, %v6687_v43  ;;  %14070 = vmatmul.mubr.msk.bf16.gmra.mrb[36].mxu0 %vm4858_vm5, %v17302_v52  ;;  %v6885_v36 = vrot.slane %v6884_v40, 4  ;;  %v6907_v47 = vrot.slane %v6905_v41, 4  ;;  %v19579_v22 = vld [vmem:[#allocation31_spill] sm:$0xff]  ;;  %v19582_v40 = vld [vmem:[#allocation30_spill] sm:$0xff]  ;;  %v19583_v41 = vld [vmem:[#allocation25_spill] sm:$0xff] }
 0x5ae   : > { %v6894_v0 = vrot.slane %v19574_v58, 4  ;;  %v6897_v1 = vrot.slane %v19575_v50, 5  ;;  %v17319_v51 = vrot.slane %v19576_v48, 5  ;;  %v6916_v32 = vshrl.u32 %v6264_v20, 16 }
 0x5af   : > { %v6919_v62 = vshll.u32 %v6264_v20, 16  ;;  %v6698_v43 = vsel %vm16401_vm3, %v6693_v34, %v6697_v2  ;;  %v19578_v31 = vshll.u32 %v19577_v8, 16  ;;  %v6925_v7 = vshll.u32 %v15195_v30, 16  ;;  %v19585_v2 = vld [vmem:[#allocation33_spill] sm:$0xff]  ;;  %v19588_v34 = vld [vmem:[#allocation11_spill] sm:$0xff] }
 0x5b0   : > { %v6929_v49 = vshrl.u32 %v15195_v30, 16  ;;  %v12839_v16 = vcombine.low %v6688_v33, %v6698_v43  ;;  %v19581_v61 = vsel %vm16401_vm3, %v19579_v22, %v19580_v11  ;;  %v19584_v20 = vsel %vm16401_vm3, %v19582_v40, %v19583_v41  ;;  %v6267_v33 = vld [vmem:[#allocation3 + $0x84] sm:$0xf]  ;;  %v15196_v30 = vld [vmem:[#allocation3 + $0x74] sm:$0x1] }
 0x5b1   : > { %v6865_v18 = vrot.slane %v19578_v31, 5  ;;  %v17339_v35 = vcombine.low %v19584_v20, %v19581_v61  ;;  %v19587_v29 = vor.u32 %v19585_v2, %v19586_v12  ;;  %v19589_v50 = vshll.u32 %v19588_v34, 16  ;;  %v19591_v34 = vld [vmem:[#allocation27_spill] sm:$0xff] }
 0x5b2   : > { %v6875_v8 = vrot.slane %v6874_v19, 4  ;;  %v6898_v31 = vor.u32 %v6897_v1, %v6894_v0  ;;  %v6911_v22 = vshll.u32 %v15196_v30, 16  ;;  %14075 = vmatprep.mubr.msk.bf16.mxu0 %vm4858_vm5, %v12839_v16  ;;  %v6908_v61 = vor.u32 %v6907_v47, %v17319_v51  ;;  %v15197_v47 = vld [vmem:[#allocation3 + $0x88] sm:$0xf]  ;;  %v19590_v16 = vld [vmem:[#allocation26_spill] sm:$0xff] }
 0x5b3   : > { %v6851_v58 = vrot.slane %v19587_v29, 4  ;;  %v6889_v48 = vrot.slane %v19589_v50, 5  ;;  %v6866_v43 = vsel %vm16401_vm3, %v6861_v6, %v6865_v18  ;;  %v17352_v40 = vrot.slane %v6916_v32, 4  ;;  %13914 = vmatmul.mubr.msk.bf16.gmra.mrb[12].mxu1 %vm4858_vm5, %v17017_v63  ;;  %v17369_v63 = vld [vmem:[#allocation3 + $0x90] sm:$0xf] }
 0x5b4   : > { %v17354_v41 = vrot.slane %v6919_v62, 5  ;;  %v17358_v20 = vrot.slane %v6925_v7, 5  ;;  %v17360_v6 = vrot.slane %v6929_v49, 4  ;;  %v6940_v19 = vshrl.u32 %v6267_v33, 16  ;;  %13917 = vmatprep.mubr.msk.bf16.mxu1 %vm4858_vm5, %v17037_v25  ;;  %v17383_v25 = vld [vmem:[%s19369_s5 + $0x8] sm:$0x3] }
 0x5b5   : > { %v6890_v11 = vsel %vm16401_vm3, %v6885_v36, %v6889_v48  ;;  %v6943_v0 = vshll.u32 %v6267_v33, 16  ;;  %v7698_v1 = vsel %vm4907_vm4, %v17054_v3, 0  ;;  %v6856_v36 = vsel %vm16401_vm3, %v6851_v58, %v16545_v17  ;;  %v8552_v17 = vld [vmem:[#allocation2 + $0x3c] sm:$0xe]  ;;  %14076 = vmatmul.mubr.msk.bf16.vlgmr.msra.gmra.mrb[8].mxu0 %vm4858_vm5, %v19590_v16  ;;  %v17393_v29 = vld [vmem:[#allocation3 + $0x80] sm:$0x1] }
 0x5b6   : > { %v6949_v32 = vshll.u32 %v15197_v47, 16  ;;  %v6953_v62 = vshrl.u32 %v15197_v47, 16  ;;  %v17371_v18 = vcombine.low %v6856_v36, %v6866_v43  ;;  %v6880_v7 = vsel %vm16401_vm3, %v6875_v8, %v16568_v10  ;;  %14108 = vmatpush3.bf16.msra.mxu0 %v7698_v1  ;;  %14079 = vmatprep.mubr.msk.bf16.mxu0 %vm4858_vm5, %v19591_v34  ;;  %v8553_v8 = vld [vmem:[#allocation2 + $0x48] sm:$0xe]  ;;  %v8555_v10 = vld [vmem:[#allocation2 + $0x60] sm:$0xe] }
 0x5b7   : > { %v17376_v49 = vrot.slane %v6898_v31, 4  ;;  %v17378_v3 = vrot.slane %v6911_v22, 5  ;;  %v17387_v2 = vcombine.low %v6880_v7, %v6890_v11  ;;  %v17389_v12 = vrot.slane %v6908_v61, 4  ;;  %15014 = vmatprep.subr.msk.bf16.mxu0 %vm4907_vm4, %v17383_v25  ;;  %v8554_v61 = vld [vmem:[#allocation2 + $0x54] sm:$0xe] }
 0x5b8   : > { %v17400_v48 = vrot.slane %v6940_v19, 4  ;;  %v17402_v33 = vrot.slane %v6943_v0, 5  ;;  %v8671_v43 = vrot.slane %v17065_v15, 5  ;;  %v17405_v31 = vrot.slane %v6949_v32, 5  ;;  %v17415_v15 = vld [vmem:[#allocation3 + $0x94] sm:$0xf] }
 0x5b9   : > { %v17407_v30 = vrot.slane %v6953_v62, 4  ;;  %v12944_v11 = vrot.slane %v8552_v17, 9  ;;  %v8674_v0 = vrot.slane %v17077_v44, 5  ;;  %v8678_v36 = vrot.slane %v17085_v56, 5  ;;  %v8556_v58 = vld [vmem:[#allocation2 + $0x6c] sm:$0xe] }
 0x5ba   : > { %v8673_v19 = vrot.slane %v8671_v43, 4  ;;  %v6973_v47 = vshll.u32 %v17415_v15, 16  ;;  %v12945_v7 = vrot.slane %v8553_v8, 9  ;;  %v8685_v22 = vrot.slane %v17101_v59, 5 }
 0x5bb   : > { %v8672_v62 = vsel %vm16300_vm14, %v12944_v11, %v8671_v43  ;;  %13918 = vmatmul.mubr.msk.bf16.gmra.mrb[16].mxu1 %vm4858_vm5, %v17041_v14  ;;  %v8680_v44 = vrot.slane %v8678_v36, 4  ;;  %v8681_v56 = vrot.slane %v17096_v38, 5  ;;  %v12946_v1 = vrot.slane %v8554_v61, 9 }
 0x5bc   : > { %v8675_v17 = vsel %vm16300_vm14, %v8673_v19, %v8674_v0  ;;  %13921 = vmatprep.mubr.msk.bf16.mxu1 %vm4858_vm5, %v17069_v27  ;;  %v8679_v59 = vsel %vm16300_vm14, %v12945_v7, %v8678_v36  ;;  %v8687_v43 = vrot.slane %v8685_v22, 4  ;;  %v8688_v8 = vrot.slane %v17117_v46, 5  ;;  %v19593_v19 = vld [vmem:[#allocation28_spill] sm:$0xff]  ;;  %v19594_v7 = vld [vmem:[#allocation29_spill] sm:$0xff] }
 0x5bd   : > { %v17428_v50 = vcombine.low %v8672_v62, %v8675_v17  ;;  %v8682_v14 = vsel %vm16300_vm14, %v8680_v44, %v8681_v56  ;;  %v8686_v11 = vsel %vm16300_vm14, %v12946_v1, %v8685_v22  ;;  %v12947_v38 = vrot.slane %v8555_v10, 9  ;;  %14080 = vmatmul.mubr.msk.bf16.gmra.mrb[12].mxu0 %vm4858_vm5, %v19593_v19  ;;  %v8557_v62 = vld [vmem:[#allocation2 + $0x78] sm:$0xe]  ;;  %v8558_v1 = vld [vmem:[#allocation2 + $0x84] sm:$0xe] }
 0x5be   : > { %v8692_v61 = vrot.slane %v17124_v13, 5  ;;  %v17440_v27 = vcombine.low %v8679_v59, %v8682_v14  ;;  %v8689_v0 = vsel %vm16300_vm14, %v8687_v43, %v8688_v8  ;;  %v12948_v36 = vrot.slane %v8556_v58, 9  ;;  %14083 = vmatprep.mubr.msk.bf16.mxu0 %vm4858_vm5, %v19594_v7 }
 0x5bf   : > { %v8699_v46 = vrot.slane %v17143_v4, 5  ;;  %v17447_v17 = vcombine.low %v8686_v11, %v8689_v0  ;;  %v8695_v22 = vrot.slane %v17134_v28, 5  ;;  %v8702_v58 = vrot.slane %v17151_v5, 5  ;;  %v8559_v0 = vld [vmem:[#allocation2 + $0x90] sm:$0xe] }
 0x5c0   : > { %v8693_v13 = vsel %vm16300_vm14, %v12947_v38, %v8692_v61  ;;  %v8694_v10 = vrot.slane %v8692_v61, 4  ;;  %v8706_v4 = vrot.slane %v17163_v45, 5  ;;  %v12949_v43 = vrot.slane %v8557_v62, 9 }
 0x5c1   : > { %v8700_v44 = vsel %vm16300_vm14, %v12948_v36, %v8699_v46  ;;  %v8701_v56 = vrot.slane %v8699_v46, 4  ;;  %v8709_v8 = vrot.slane %v17172_v60, 5  ;;  %v8713_v14 = vrot.slane %v17178_v23, 5  ;;  %v8560_v46 = vld [vmem:[#allocation2 + $0x9c] sm:$0xe] }
 0x5c2   : > { %v8696_v59 = vsel %vm16300_vm14, %v8694_v10, %v8695_v22  ;;  %v8708_v38 = vrot.slane %v8706_v4, 4  ;;  %v12950_v61 = vrot.slane %v8558_v1, 9  ;;  %v6977_v5 = vshrl.u32 %v17415_v15, 16 }
 0x5c3   : > { %v17460_v11 = vcombine.low %v8693_v13, %v8696_v59  ;;  %v8703_v28 = vsel %vm16300_vm14, %v8701_v56, %v8702_v58  ;;  %13922 = vmatmul.mubr.msk.bf16.gmra.mrb[20].mxu1 %vm4858_vm5, %v17075_v24  ;;  %v8715_v36 = vrot.slane %v8713_v14, 4  ;;  %v8716_v60 = vrot.slane %v17191_v21, 5 }
 0x5c4   : > { %v17467_v45 = vcombine.low %v8700_v44, %v8703_v28  ;;  %13925 = vmatprep.mubr.msk.bf16.mxu1 %vm4858_vm5, %v17105_v54  ;;  %v8707_v23 = vsel %vm16300_vm14, %v12949_v43, %v8706_v4  ;;  %v8710_v62 = vsel %vm16300_vm14, %v8708_v38, %v8709_v8  ;;  %v8714_v24 = vsel %vm16300_vm14, %v12950_v61, %v8713_v14  ;;  %v8561_v54 = vld [vmem:[#allocation2 + $0xa8] sm:$0xe]  ;;  %v19595_v44 = vld [vmem:[#allocation34_spill] sm:$0xff]  ;;  %v8562_v14 = vld [vmem:[#allocation2 + $0xb4] sm:$0xe] }
 0x5c5   : > { %v8720_v13 = vrot.slane %v17198_v42, 5  ;;  %v17479_v10 = vcombine.low %v8707_v23, %v8710_v62  ;;  %v8717_v21 = vsel %vm16300_vm14, %v8715_v36, %v8716_v60  ;;  %v12951_v22 = vrot.slane %v8559_v0, 9  ;;  %14084 = vmatmul.mubr.msk.bf16.gmra.mrb[16].mxu0 %vm4858_vm5, %v19595_v44  ;;  %v17495_v28 = vld [vmem:[#allocation2 + $0xc4] sm:$0xf]  ;;  %v19597_v23 = vld [vmem:[#allocation54_spill] sm:$0xff] }
 0x5c6   : > { %v8727_v1 = vrot.slane %v17216_v53, 5  ;;  %v17486_v56 = vcombine.low %v8714_v24, %v8717_v21  ;;  %v8723_v4 = vrot.slane %v17214_v55, 5  ;;  %v12952_v59 = vrot.slane %v8560_v46, 9  ;;  %14087 = vmatprep.mubr.msk.bf16.mxu0 %vm4858_vm5, %v17339_v35  ;;  %v19596_v0 = vld [vmem:[#allocation55_spill] sm:$0xff]  ;;  %v17507_v24 = vld [vmem:[#allocation2 + $0xc8] sm:$0x1] }
 0x5c7   : > { %v8722_v58 = vrot.slane %v8720_v13, 4  ;;  %v8721_v42 = vsel %vm16300_vm14, %v12951_v22, %v8720_v13  ;;  %v8730_v8 = vrot.slane %v17224_v37, 5  ;;  %v8734_v53 = vrot.slane %v17233_v26, 5  ;;  %v8563_v62 = vld [vmem:[#allocation2 + $0xc0] sm:$0xe] }
 0x5c8   : > { %v8729_v43 = vrot.slane %v8727_v1, 4  ;;  %v8728_v55 = vsel %vm16300_vm14, %v12952_v59, %v8727_v1  ;;  %v12953_v61 = vrot.slane %v8561_v54, 9  ;;  %v8741_v36 = vrot.slane %v19596_v0, 5  ;;  %v19599_v54 = vld [vmem:[#allocation43_spill] sm:$0xff] }
 0x5c9   : > { %v8724_v38 = vsel %vm16300_vm14, %v8722_v58, %v8723_v4  ;;  %v8736_v37 = vrot.slane %v8734_v53, 4  ;;  %v8737_v26 = vrot.slane %v19597_v23, 5  ;;  %v12954_v21 = vrot.slane %v8562_v14, 9  ;;  %v19598_v58 = vld [vmem:[#allocation57_spill] sm:$0xff] }
 0x5ca   : > { %v17502_v60 = vcombine.low %v8721_v42, %v8724_v38  ;;  %v8731_v46 = vsel %vm16300_vm14, %v8729_v43, %v8730_v8  ;;  %v8743_v22 = vrot.slane %v8741_v36, 4  ;;  %v8744_v1 = vrot.slane %v19598_v58, 5  ;;  %v19600_v8 = vld [vmem:[#allocation45_spill] sm:$0xff] }
 0x5cb   : > { %v17509_v13 = vcombine.low %v8728_v55, %v8731_v46  ;;  %13926 = vmatmul.mubr.msk.bf16.gmra.mrb[24].mxu1 %vm4858_vm5, %v19599_v54  ;;  %v17516_v4 = vrot.slane %v6973_v47, 5  ;;  %v8735_v59 = vsel %vm16300_vm14, %v12953_v61, %v8734_v53  ;;  %v8738_v42 = vsel %vm16300_vm14, %v8736_v37, %v8737_v26 }
 0x5cc   : > { %v9495_v43 = vrot.slane %v17495_v28, 5  ;;  %13929 = vmatprep.mubr.msk.bf16.mxu1 %vm4858_vm5, %v19600_v8  ;;  %v6979_v14 = vrot.slane %v6977_v5, 4  ;;  %v17525_v38 = vcombine.low %v8735_v59, %v8738_v42  ;;  %v8742_v55 = vsel %vm16300_vm14, %v12954_v21, %v8741_v36  ;;  %v15200_v21 = vld [vmem:[#allocation3 + $0x8c] sm:$0x1] }
 0x5cd   : > { %v8745_v15 = vsel %vm16300_vm14, %v8743_v22, %v8744_v1  ;;  %v13035_v53 = vrot.slane %v8563_v62, 9  ;;  %v9498_v0 = vrot.slane %v17507_v24, 5  ;;  %14088 = vmatmul.mubr.msk.bf16.gmra.mrb[20].mxu0 %vm4858_vm5, %v17371_v18  ;;  %v6904_v5 = vsel %vm16401_vm3, %v17376_v49, %v17319_v51 }
 0x5ce   : > { %v17531_v47 = vcombine.low %v8742_v55, %v8745_v15  ;;  %v9497_v61 = vrot.slane %v9495_v43, 4  ;;  %v6914_v36 = vsel %vm16401_vm3, %v17389_v12, %v17378_v3  ;;  %v19601_v46 = vor.u32 %v17360_v6, %v17358_v20  ;;  %14091 = vmatprep.mubr.msk.bf16.mxu0 %vm4858_vm5, %v17387_v2  ;;  %v6273_v55 = vld [vmem:[#allocation3 + $0x9c] sm:$0xf] }
 0x5cf   : > { %v19602_v23 = vshll.u32 %v17393_v29, 16  ;;  %v6956_v62 = vor.u32 %v17407_v30, %v17405_v31  ;;  %v6959_v51 = vshll.u32 %v15200_v21, 16  ;;  %v9496_v49 = vsel %vm16300_vm14, %v13035_v53, %v9495_v43  ;;  %v15201_v29 = vld [vmem:[#allocation3 + $0xa0] sm:$0xf] }
 0x5d0   : > { %v6933_v37 = vrot.slane %v19601_v46, 4  ;;  %v9499_v3 = vsel %vm16300_vm14, %v9497_v61, %v9498_v0  ;;  %v19603_v6 = vor.u32 %v17354_v41, %v17352_v40  ;;  %v6997_v22 = vshll.u32 %v15201_v29, 16  ;;  %v15202_v41 = vld [vmem:[#allocation3 + $0xac] sm:$0xf]  ;;  %v15203_v46 = vld [vmem:[#allocation3 + $0x98] sm:$0x1] }
 0x5d1   : > { %v6937_v26 = vrot.slane %v19602_v23, 5  ;;  %v7001_v58 = vshrl.u32 %v15201_v29, 16  ;;  %v17560_v1 = vcombine.low %v9496_v49, %v9499_v3  ;;  %v6946_v30 = vor.u32 %v17402_v33, %v17400_v48  ;;  %v19606_v33 = vld [vmem:[#allocation46_spill] sm:$0xff]  ;;  %v6276_v23 = vld [vmem:[#allocation3 + $0xa8] sm:$0xf] }
 0x5d2   : > { %v6923_v12 = vrot.slane %v19603_v6, 4  ;;  %v19604_v54 = vshrl.u32 %v17369_v63, 16  ;;  %v19605_v42 = vshll.u32 %v17369_v63, 16  ;;  %v6980_v8 = vor.u32 %v6979_v14, %v17516_v4 }
 0x5d3   : > { %v17569_v15 = vcombine.low %v6904_v5, %v6914_v36  ;;  %v6938_v40 = vsel %vm16401_vm3, %v6933_v37, %v6937_v26  ;;  %v7021_v53 = vshll.u32 %v15202_v41, 16  ;;  %v7025_v61 = vshrl.u32 %v15202_v41, 16  ;;  %13930 = vmatmul.mubr.msk.bf16.gmra.mrb[28].mxu1 %vm4858_vm5, %v19606_v33  ;;  %v19607_v5 = vld [vmem:[#allocation49_spill] sm:$0xff] }
 0x5d4   : > { %v6966_v59 = vrot.slane %v19604_v54, 4  ;;  %v6969_v43 = vrot.slane %v19605_v42, 5  ;;  %v6928_v48 = vsel %vm16401_vm3, %v6923_v12, %v17358_v20  ;;  %v6957_v63 = vrot.slane %v6956_v62, 4  ;;  %13933 = vmatprep.mubr.msk.bf16.mxu1 %vm4858_vm5, %v19607_v5 }
 0x5d5   : > { %v6961_v0 = vrot.slane %v6959_v51, 5  ;;  %v6983_v14 = vshll.u32 %v15203_v46, 16  ;;  %v6988_v36 = vshrl.u32 %v6273_v55, 16  ;;  %v6991_v37 = vshll.u32 %v6273_v55, 16  ;;  %14092 = vmatmul.mubr.msk.bf16.gmra.mrb[24].mxu0 %vm4858_vm5, %v17569_v15  ;;  %v17596_v55 = vld [vmem:[#allocation2 + $0xc0] sm:$0xff]  }
 0x5d6   : > { %v17580_v26 = vrot.slane %v6997_v22, 5  ;;  %v7003_v21 = vrot.slane %v7001_v58, 4  ;;  %v17582_v49 = vcombine.low %v6928_v48, %v6938_v40  ;;  %v6947_v3 = vrot.slane %v6946_v30, 4  ;;  %v15204_v40 = vld [vmem:[#allocation3 + $0xb8] sm:$0xf] }
 0x5d7   : > { %v6970_v20 = vor.u32 %v6969_v43, %v6966_v59  ;;  %v6981_v6 = vrot.slane %v6980_v8, 4  ;;  %v7012_v62 = vshrl.u32 %v6276_v23, 16  ;;  %v7015_v51 = vshll.u32 %v6276_v23, 16 }
 0x5d8   : > { %v7023_v12 = vrot.slane %v7021_v53, 5  ;;  %v7027_v29 = vrot.slane %v7025_v61, 4  ;;  %14095 = vmatprep.mubr.msk.bf16.mxu0 %vm4858_vm5, %v17582_v49  ;;  %v6952_v22 = vsel %vm16401_vm3, %v6947_v3, %v17405_v31  ;;  %v6985_v58 = vrot.slane %v6983_v14, 5  ;;  %v15205_v61 = vld [vmem:[#allocation3 + $0xa4] sm:$0x1] }
 0x5d9   : > { %v6962_v30 = vsel %vm16401_vm3, %v6957_v63, %v6961_v0  ;;  %v6990_v54 = vrot.slane %v6988_v36, 4  ;;  %v6993_v59 = vrot.slane %v6991_v37, 5  ;;  %v7004_v42 = vor.u32 %v7003_v21, %v17580_v26  ;;  %v6279_v14 = vld [vmem:[#allocation3 + $0xb4] sm:$0xf]  ;;  %v15206_v36 = vld [vmem:[#allocation3 + $0xc] sm:$0xff]  }
 0x5da   : > { %v6971_v43 = vrot.slane %v6970_v20, 4  ;;  %v6986_v8 = vsel %vm16401_vm3, %v6981_v6, %v6985_v58  ;;  %v7045_v41 = vshll.u32 %v15204_v40, 16  ;;  %v7049_v53 = vshrl.u32 %v15204_v40, 16  ;;  %v15207_v3 = vld [vmem:[#allocation3 + $0xb0] sm:$0x1] }
 0x5db   : > { %v7007_v48 = vshll.u32 %v15205_v61, 16  ;;  %v7014_v31 = vrot.slane %v7012_v62, 4  ;;  %v7017_v33 = vrot.slane %v7015_v51, 5  ;;  %v7028_v46 = vor.u32 %v7027_v29, %v7023_v12  ;;  %13934 = vmatmul.mubr.msk.bf16.gmra.mrb[32].mxu1 %vm4858_vm5, %v17596_v55 }
 0x5dc   : > { %v17598_v63 = vcombine.low %v6952_v22, %v6962_v30  ;;  %v6976_v0 = vsel %vm16401_vm3, %v6971_v43, %v17516_v4  ;;  %13939 = vmatprep.mubr.msk.bf16.mxu1 %vm4858_vm5, %v15206_v36  ;;  %v6994_v37 = vor.u32 %v6993_v59, %v6990_v54  ;;  %v7005_v21 = vrot.slane %v7004_v42, 4 }
 0x5dd   : > { %v17605_v23 = vcombine.low %v6976_v0, %v6986_v8  ;;  %v7031_v20 = vshll.u32 %v15207_v3, 16  ;;  %v7036_v6 = vshrl.u32 %v6279_v14, 16  ;;  %v7039_v62 = vshll.u32 %v6279_v14, 16  ;;  %v15210_v0 = vld [vmem:[#allocation3 + $0x24] sm:$0xff]  }
 0x5de   : > { %v7047_v51 = vrot.slane %v7045_v41, 5  ;;  %v7051_v29 = vrot.slane %v7049_v53, 4  ;;  %14096 = vmatmul.mubr.msk.bf16.gmra.mrb[28].mxu0 %vm4858_vm5, %v17598_v63  ;;  %v7009_v4 = vrot.slane %v7007_v48, 5  ;;  %v7018_v22 = vor.u32 %v7017_v33, %v7014_v31  ;;  %v15208_v48 = vld [vmem:[#allocation3 + $0x18] sm:$0xff]  }
 0x5df   : > { %v7029_v58 = vrot.slane %v7028_v46, 4  ;;  %14099 = vmatprep.mubr.msk.bf16.mxu0 %vm4858_vm5, %v17605_v23  ;;  %v6995_v30 = vrot.slane %v6994_v37, 4  ;;  %v7033_v59 = vrot.slane %v7031_v20, 5  ;;  %v7038_v42 = vrot.slane %v7036_v6, 4  ;;  %v15209_v31 = vld [vmem:[#allocation3 + $0xbc] sm:$0x1] }
 0x5e0   : > { %v7010_v54 = vsel %vm16401_vm3, %v7005_v21, %v7009_v4  ;;  %v7041_v43 = vrot.slane %v7039_v62, 5  ;;  %v7052_v8 = vor.u32 %v7051_v29, %v7047_v51  ;;  %v5781_v40 = vsel %vm4907_vm4, %v17296_v39, 0  ;;  %v15211_v20 = vld [vmem:[#allocation3 + $0x30] sm:$0xff]   ;;  %v15212_v62 = vld [vmem:[#allocation3 + $0x3c] sm:$0xff]   ;;  %v19608_v29 = vld [vmem:[#allocation39_spill] sm:$0xff] }
 0x5e1   : > { %v7019_v41 = vrot.slane %v7018_v22, 4  ;;  %v7034_v53 = vsel %vm16401_vm3, %v7029_v58, %v7033_v59  ;;  %v7000_v61 = vsel %vm16401_vm3, %v6995_v30, %v17580_v26  ;;  %v7055_v33 = vshll.u32 %v15209_v31, 16  ;;  %v15213_v4 = vld [vmem:[#allocation3 + $0x48] sm:$0xff]   ;;  %v15214_v22 = vld [vmem:[#allocation3 + $0x54] sm:$0xff]   ;;  %v15215_v59 = vld [vmem:[#allocation3 + $0x60] sm:$0xff]  }
 0x5e2   : > { %v17622_v46 = vcombine.low %v7000_v61, %v7010_v54  ;;  %v7042_v36 = vor.u32 %v7041_v43, %v7038_v42  ;;  %v7053_v37 = vrot.slane %v7052_v8, 4  ;;  %v17652_v58 = vld [vmem:[%s19368_s4 + $0xe] sm:$0x3]  ;;  %v19610_v54 = vld [vmem:[#allocation41_spill] sm:$0xff]  ;;  %v19611_v42 = vld [vmem:[#allocation42_spill] sm:$0xff]  ;;  %vm10409_vm2 = vcmask 60416  }
 0x5e3   : > { %13940 = vmatmul.mubr.msk.bf16.vlgmr.msra.gmra.mrb[4].mxu1 %vm4858_vm5, %v15208_v48  ;;  %v7024_v14 = vsel %vm16401_vm3, %v7019_v41, %v7023_v12  ;;  %v7057_v26 = vrot.slane %v7055_v33, 5  ;;  %v19609_v30 = vld [vmem:[#allocation40_spill] sm:$0xff]  ;;  %v15217_v8 = vld [vmem:[#allocation3 + $0x78] sm:$0xff]   ;;  %v19613_v41 = vld [vmem:[#allocation47_spill] sm:$0xff] }
 0x5e4   : > { %13943 = vmatprep.mubr.msk.bf16.mxu1 %vm4858_vm5, %v15210_v0  ;;  %13972 = vmatpush3.bf16.msra.mxu1 %v5781_v40  ;;  %v17627_v39 = vcombine.low %v7024_v14, %v7034_v53  ;;  %v7043_v21 = vrot.slane %v7042_v36, 4  ;;  %v19612_v43 = vld [vmem:[#allocation44_spill] sm:$0xff]  ;;  %v15218_v40 = vld [vmem:[#allocation3 + $0x84] sm:$0xff]   ;;  %v15220_v48 = vld [vmem:[#allocation3 + $0x9c] sm:$0xff]  }
 0x5e5   : > { %v7058_v3 = vsel %vm16401_vm3, %v7053_v37, %v7057_v26  ;;  %v19614_v53 = vld [vmem:[#allocation48_spill] sm:$0xff]  ;;  %v19615_v31 = vld [vmem:[#allocation50_spill] sm:$0xff]  ;;  %v19616_v33 = vld [vmem:[#allocation51_spill] sm:$0xff]  ;;  %v7653_v26 = vshll.u32 %v17495_v28, 16 }
 0x5e6   : > { %14100 = vmatmul.mubr.msk.bf16.gmra.mrb[32].mxu0 %vm4858_vm5, %v17622_v46  ;;  %v7048_v12 = vsel %vm16401_vm3, %v7043_v21, %v7047_v51  ;;  %v7900_v51 = vsel %vm4907_vm4, %v17383_v25, 0  ;;  %v15216_v25 = vld [vmem:[#allocation3 + $0x6c] sm:$0xff]   ;;  %v15222_v0 = vld [vmem:[#allocation3 + $0xb4] sm:$0xff]   ;;  %v7657_v21 = vshrl.u32 %v17495_v28, 16 }
 0x5e7   : > { %14103 = vmatprep.mubr.msk.bf16.mxu0 %vm4858_vm5, %v17627_v39  ;;  %v17638_v6 = vcombine.low %v7048_v12, %v7058_v3  ;;  %v15219_v61 = vld [vmem:[#allocation3 + $0x90] sm:$0xff]   ;;  %v15221_v14 = vld [vmem:[#allocation3 + $0xa8] sm:$0xff]   ;;  %v19618_v37 = vld [vmem:[#allocation53_spill] sm:$0xff] }
 0x5e8   : > { %v19617_v36 = vld [vmem:[#allocation52_spill] sm:$0xff]  ;;  %v6228_v3 = vld [vmem:[#allocation2 + $0xc0] sm:$0xf]  ;;  %v15223_v12 = vld [vmem:[#allocation3 + $0xc0] sm:$0xff]  }
 0x5eb   : > { %13944 = vmatmul.mubr.msk.bf16.gmra.mrb[8].mxu1 %vm4858_vm5, %v15211_v20  ;;  %v15224_v20 = vld [vmem:[#allocation2 + $0x18] sm:$0xff]  }
 0x5ec   : > { %13947 = vmatprep.mubr.msk.bf16.mxu1 %vm4858_vm5, %v15212_v62  ;;  %v7644_v62 = vshrl.u32 %v6228_v3, 16 }
 0x5ee   : > { %14104 = vmatmul.mubr.msk.bf16.gmra.mrb[36].mxu0 %vm4858_vm5, %v17638_v6 }
 0x5ef   : > { %14109 = vmatprep.mubr.msk.bf16.mxu0 %vm4858_vm5, %v19608_v29  ;;  %v7647_v29 = vshll.u32 %v6228_v3, 16 }
 0x5f3   : > { %13948 = vmatmul.mubr.msk.bf16.gmra.mrb[12].mxu1 %vm4858_vm5, %v15213_v4  ;;  %v7655_v4 = vrot.slane %v7653_v26, 5 }
 0x5f4   : > { %13951 = vmatprep.mubr.msk.bf16.mxu1 %vm4858_vm5, %v15214_v22  ;;  %v19619_v22 = vld [vmem:[#allocation56_spill] sm:$0xff] }
 0x5f6   : > { %14110 = vmatmul.mubr.msk.bf16.vlgmr.msra.gmra.mrb[8].mxu0 %vm4858_vm5, %v19609_v30 }
 0x5f7   : > { %14142 = vmatpush3.bf16.msra.mxu0 %v7900_v51  ;;  %14113 = vmatprep.mubr.msk.bf16.mxu0 %vm4858_vm5, %v19610_v54  ;;  %v7659_v51 = vrot.slane %v7657_v21, 4 }
 0x5f8   : > { %15015 = vmatprep.subr.msk.bf16.mxu0 %vm4907_vm4, %v17652_v58 }
 0x5f9   : > { %v7660_v28 = vor.u32 %v7659_v51, %v7655_v4  ;;  %v15230_v51 = vld [vmem:[#allocation2 + $0x60] sm:$0xff]  }
 0x5fb   : > { %13952 = vmatmul.mubr.msk.bf16.gmra.mrb[16].mxu1 %vm4858_vm5, %v15215_v59  ;;  %v19620_v59 = vld [vmem:[#allocation58_spill] sm:$0xff] }
 0x5fc   : > { %13955 = vmatprep.mubr.msk.bf16.mxu1 %vm4858_vm5, %v15216_v25  ;;  %v7646_v25 = vrot.slane %v7644_v62, 4  ;;  %v15228_v62 = vld [vmem:[#allocation2 + $0x48] sm:$0xff]  }
 0x5fe   : > { %14114 = vmatmul.mubr.msk.bf16.gmra.mrb[12].mxu0 %vm4858_vm5, %v19611_v42 }
 0x5ff   : > { %14117 = vmatprep.mubr.msk.bf16.mxu0 %vm4858_vm5, %v19612_v43 }
 0x603   : > { %13956 = vmatmul.mubr.msk.bf16.gmra.mrb[20].mxu1 %vm4858_vm5, %v15217_v8  ;;  %v7649_v8 = vrot.slane %v7647_v29, 5  ;;  %v15229_v29 = vld [vmem:[#allocation2 + $0x54] sm:$0xff]  }
 0x604   : > { %13959 = vmatprep.mubr.msk.bf16.mxu1 %vm4858_vm5, %v15218_v40  ;;  %v15225_v40 = vld [vmem:[#allocation2 + $0x24] sm:$0xff]  }
 0x606   : > { %14118 = vmatmul.mubr.msk.bf16.gmra.mrb[16].mxu0 %vm4858_vm5, %v19613_v41 }
 0x607   : > { %14121 = vmatprep.mubr.msk.bf16.mxu0 %vm4858_vm5, %v19614_v53 }
 0x60b   : > { %13960 = vmatmul.mubr.msk.bf16.gmra.mrb[24].mxu1 %vm4858_vm5, %v15219_v61  ;;  %v7663_v61 = vshll.u32 %v17507_v24, 16  ;;  %v15227_v24 = vld [vmem:[#allocation2 + $0x3c] sm:$0xff]  }
 0x60c   : > { %13963 = vmatprep.mubr.msk.bf16.mxu1 %vm4858_vm5, %v15220_v48  ;;  %v15226_v48 = vld [vmem:[#allocation2 + $0x30] sm:$0xff]  }
 0x60d   : > { %v7665_v26 = vrot.slane %v7663_v61, 5  ;;  %v15236_v61 = vld [vmem:[#allocation2 + $0xa8] sm:$0xff]  }
 0x60e   : > { %14122 = vmatmul.mubr.msk.bf16.gmra.mrb[20].mxu0 %vm4858_vm5, %v19615_v31 }
 0x60f   : > { %14125 = vmatprep.mubr.msk.bf16.mxu0 %vm4858_vm5, %v19616_v33 }
 0x613   : > { %13964 = vmatmul.mubr.msk.bf16.gmra.mrb[28].mxu1 %vm4858_vm5, %v15221_v14  ;;  %v7650_v14 = vor.u32 %v7649_v8, %v7646_v25  ;;  %v4695_v25 = vld [vmem:[%s19369_s5 + $0xe] sm:$0x3]  ;;  %v15233_v8 = vld [vmem:[#allocation2 + $0x84] sm:$0xff]  }
 0x614   : > { %13967 = vmatprep.mubr.msk.bf16.mxu1 %vm4858_vm5, %v15222_v0  ;;  %v7661_v0 = vrot.slane %v7660_v28, 4  ;;  %v15234_v28 = vld [vmem:[#allocation2 + $0x90] sm:$0xff]  }
 0x615   : > { %v7651_v21 = vrot.slane %v7650_v14, 4  ;;  %v15237_v14 = vld [vmem:[#allocation3 + $0xc4] sm:$0xf] }
 0x616   : > { %14126 = vmatmul.mubr.msk.bf16.gmra.mrb[24].mxu0 %vm4858_vm5, %v19617_v36  ;;  %v7666_v3 = vsel %vm16401_vm3, %v7661_v0, %v7665_v26  ;;  %v7677_v0 = vshll.u32 %v15237_v14, 16  ;;  %v7681_v26 = vshrl.u32 %v15237_v14, 16  ;;  %v8352_v14 = vsel %vm4907_vm4, %v4695_v25, 0 }
 0x617   : > { %14129 = vmatprep.mubr.msk.bf16.mxu0 %vm4858_vm5, %v19618_v37 }
 0x61b   : > { %13968 = vmatmul.mubr.msk.bf16.gmra.mrb[32].mxu1 %vm4858_vm5, %v15223_v12  ;;  %v7656_v12 = vsel %vm16401_vm3, %v7651_v21, %v7655_v4  ;;  %v8150_v4 = vsel %vm4907_vm4, %v17652_v58, 0  ;;  %v15232_v58 = vld [vmem:[#allocation2 + $0x78] sm:$0xff]  }
 0x61c   : > { %13973 = vmatprep.mubr.msk.bf16.mxu1 %vm4858_vm5, %v15224_v20  ;;  %v17704_v20 = vcombine.low %v7656_v12, %v7666_v3  ;;  %v6282_v21 = vld [vmem:[#allocation3 + $0xc0] sm:$0xf] }
 0x61d   : > { %v7668_v3 = vshrl.u32 %v6282_v21, 16  ;;  %v7671_v12 = vshll.u32 %v6282_v21, 16 }
 0x61e   : > { %14130 = vmatmul.mubr.msk.bf16.gmra.mrb[28].mxu0 %vm4858_vm5, %v19619_v22 }
 0x61f   : > { %14133 = vmatprep.mubr.msk.bf16.mxu0 %vm4858_vm5, %v19620_v59 }
 0x623   : > { %13974 = vmatmul.mubr.msk.bf16.vlgmr.msra.gmra.mrb[4].mxu1 %vm4858_vm5, %v15225_v40  ;;  %v15235_v40 = vld [vmem:[#allocation2 + $0x9c] sm:$0xff]  }
 0x624   : > { %13977 = vmatprep.mubr.msk.bf16.mxu1 %vm4858_vm5, %v15226_v48  ;;  %v15174_v48 = vld [vmem:[#allocation2 + $0xcc] sm:$0xff]  }
 0x626   : > { %14134 = vmatmul.mubr.msk.bf16.gmra.mrb[32].mxu0 %vm4858_vm5, %v17283_v57 }
 0x627   : > { %14137 = vmatprep.mubr.msk.bf16.mxu0 %vm4858_vm5, %v17302_v52 }
 0x62b   : > { %13978 = vmatmul.mubr.msk.bf16.gmra.mrb[8].mxu1 %vm4858_vm5, %v15227_v24  ;;  %v7679_v24 = vrot.slane %v7677_v0, 5  ;;  %v4681_v0 = vld [vmem:[%s19368_s4 + $0x4] sm:$0x3] }
 0x62c   : > { %13981 = vmatprep.mubr.msk.bf16.mxu1 %vm4858_vm5, %v15228_v62  ;;  %v7673_v62 = vrot.slane %v7671_v12, 5 }
 0x62e   : > { %14138 = vmatmul.mubr.msk.bf16.gmra.mrb[36].mxu0 %vm4858_vm5, %v17704_v20 }
 0x62f   : > { %14143 = vmatprep.mubr.msk.bf16.mxu0 %vm4858_vm5, %v19590_v16  ;;  %v15231_v16 = vld [vmem:[#allocation2 + $0x6c] sm:$0xff]  }
 0x633   : > { %13982 = vmatmul.mubr.msk.bf16.gmra.mrb[12].mxu1 %vm4858_vm5, %v15229_v29 }
 0x634   : > { %13985 = vmatprep.mubr.msk.bf16.mxu1 %vm4858_vm5, %v15230_v51 }
 0x636   : > { %14144 = vmatmul.mubr.msk.bf16.vlgmr.msra.gmra.mrb[8].mxu0 %vm4858_vm5, %v19591_v34 }
 0x637   : > { %14176 = vmatpush3.bf16.msra.mxu0 %v8150_v4  ;;  %14147 = vmatprep.mubr.msk.bf16.mxu0 %vm4858_vm5, %v19593_v19  ;;  %v15238_v4 = vld [vmem:[#allocation3 + $0xc8] sm:$0x1] }
 0x638   : > { %15016 = vmatprep.subr.msk.bf16.mxu0 %vm4907_vm4, %v4695_v25  ;;  %v7687_v51 = vshll.u32 %v15238_v4, 16  ;;  %v15239_v4 = vld [vmem:[#allocation2 + $0x4] sm:$0xf] }
 0x63b   : > { %13986 = vmatmul.mubr.msk.bf16.gmra.mrb[16].mxu1 %vm4858_vm5, %v15231_v16 }
 0x63c   : > { %13989 = vmatprep.mubr.msk.bf16.mxu1 %vm4858_vm5, %v15232_v58 }
 0x63e   : > { %14148 = vmatmul.mubr.msk.bf16.gmra.mrb[12].mxu0 %vm4858_vm5, %v19594_v7 }
 0x63f   : > { %14151 = vmatprep.mubr.msk.bf16.mxu0 %vm4858_vm5, %v19595_v44 }
 0x643   : > { %13990 = vmatmul.mubr.msk.bf16.gmra.mrb[20].mxu1 %vm4858_vm5, %v15233_v8  ;;  %v7689_v8 = vrot.slane %v7687_v51, 5  ;;  %v8636_v51 = vrot.slane %v15239_v4, 5 }
 0x644   : > { %13993 = vmatprep.mubr.msk.bf16.mxu1 %vm4858_vm5, %v15234_v28 }
 0x646   : > { %14152 = vmatmul.mubr.msk.bf16.gmra.mrb[16].mxu0 %vm4858_vm5, %v17339_v35 }
 0x647   : > { %14155 = vmatprep.mubr.msk.bf16.mxu0 %vm4858_vm5, %v17371_v18 }
 0x64b   : > { %13994 = vmatmul.mubr.msk.bf16.gmra.mrb[24].mxu1 %vm4858_vm5, %v15235_v40 }
 0x64c   : > { %13997 = vmatprep.mubr.msk.bf16.mxu1 %vm4858_vm5, %v15236_v61 }
 0x64e   : > { %14156 = vmatmul.mubr.msk.bf16.gmra.mrb[20].mxu0 %vm4858_vm5, %v17387_v2 }
 0x64f   : > { %14159 = vmatprep.mubr.msk.bf16.mxu0 %vm4858_vm5, %v17569_v15 }
 0x653   : > { %13998 = vmatmul.mubr.msk.bf16.gmra.mrb[28].mxu1 %vm4858_vm5, %v19607_v5  ;;  %v7683_v5 = vrot.slane %v7681_v26, 4 }
 0x654   : > { %14001 = vmatprep.mubr.msk.bf16.mxu1 %vm4858_vm5, %v17596_v55  ;;  %v7670_v55 = vrot.slane %v7668_v3, 4 }
 0x655   : > { %v7684_v29 = vor.u32 %v7683_v5, %v7679_v24 }
 0x656   : > { %14160 = vmatmul.mubr.msk.bf16.gmra.mrb[24].mxu0 %vm4858_vm5, %v17582_v49  ;;  %v7674_v16 = vor.u32 %v7673_v62, %v7670_v55  ;;  %v9003_v55 = vsel %vm4907_vm4, %v4681_v0, 0 }
 0x657   : > { %14163 = vmatprep.mubr.msk.bf16.mxu0 %vm4858_vm5, %v17598_v63  ;;  %v7685_v58 = vrot.slane %v7684_v29, 4 }
 0x658   : > { %v7675_v28 = vrot.slane %v7674_v16, 4  ;;  %v8547_v16 = vld [vmem:[#allocation2] sm:$0xe] }
 0x659   : > { %v7690_v40 = vsel %vm16401_vm3, %v7685_v58, %v7689_v8 }
 0x65a   : > { %v7680_v61 = vsel %vm16401_vm3, %v7675_v28, %v7679_v24 }
 0x65b   : > { %14002 = vmatmul.mubr.msk.bf16.gmra.mrb[32].mxu1 %vm4858_vm5, %v15174_v48  ;;  %v17762_v48 = vcombine.low %v7680_v61, %v7690_v40  ;;  %v12939_v40 = vrot.slane %v8547_v16, 9  ;;  %v8638_v61 = vrot.slane %v8636_v51, 4  ;;  %v8551_v16 = vld [vmem:[#allocation2 + $0x30] sm:$0xe] }
 0x65e   : > { %14164 = vmatmul.mubr.msk.bf16.gmra.mrb[28].mxu0 %vm4858_vm5, %v17605_v23 }
 0x65f   : > { %14167 = vmatprep.mubr.msk.bf16.mxu0 %vm4858_vm5, %v17622_v46 }
 0x666   : > { %14168 = vmatmul.mubr.msk.bf16.gmra.mrb[32].mxu0 %vm4858_vm5, %v17627_v39 }
 0x667   : > { %14171 = vmatprep.mubr.msk.bf16.mxu0 %vm4858_vm5, %v17638_v6 }
 0x66e   : > { %14172 = vmatmul.mubr.msk.bf16.gmra.mrb[36].mxu0 %vm4858_vm5, %v17762_v48 }
 0x66f   : > { %14177 = vmatprep.mubr.msk.bf16.mxu0 %vm4858_vm5, %v19609_v30  ;;  %v6231_v30 = vld [vmem:[#allocation2 + $0xcc] sm:$0xf] }
 0x676   : > { %14178 = vmatmul.mubr.msk.bf16.vlgmr.msra.gmra.mrb[8].mxu0 %vm4858_vm5, %v19610_v54  ;;  %v17789_v54 = vld [vmem:[#allocation2 + $0xd0] sm:$0xf] }
 0x677   : > { %14210 = vmatpush3.bf16.msra.mxu0 %v8352_v14  ;;  %14181 = vmatprep.mubr.msk.bf16.mxu0 %vm4858_vm5, %v19611_v42  ;;  %v8096_v42 = vshrl.u32 %v6231_v30, 16  ;;  %v15240_v14 = vld [vmem:[#allocation2 + $0x8] sm:$0x1] }
 0x678   : > { %15017 = vmatprep.subr.msk.bf16.mxu0 %vm4907_vm4, %v4681_v0  ;;  %v8639_v0 = vrot.slane %v15240_v14, 5 }
 0x67e   : > { %14182 = vmatmul.mubr.msk.bf16.gmra.mrb[12].mxu0 %vm4858_vm5, %v19612_v43  ;;  %v8099_v43 = vshll.u32 %v6231_v30, 16  ;;  %v8637_v30 = vsel %vm16300_vm14, %v12939_v40, %v8636_v51 }
 0x67f   : > { %14185 = vmatprep.mubr.msk.bf16.mxu0 %vm4858_vm5, %v19613_v41  ;;  %v8105_v41 = vshll.u32 %v17789_v54, 16 }
 0x681   : > { %v8107_v25 = vrot.slane %v8105_v41, 5 }
 0x686   : > { %14186 = vmatmul.mubr.msk.bf16.gmra.mrb[16].mxu0 %vm4858_vm5, %v19614_v53  ;;  %v8109_v53 = vshrl.u32 %v17789_v54, 16 }
 0x687   : > { %14189 = vmatprep.mubr.msk.bf16.mxu0 %vm4858_vm5, %v19615_v31  ;;  %v8098_v31 = vrot.slane %v8096_v42, 4  ;;  %v8640_v42 = vsel %vm16300_vm14, %v8638_v61, %v8639_v0 }
 0x688   : > { %v8111_v26 = vrot.slane %v8109_v53, 4 }
 0x68e   : > { %14190 = vmatmul.mubr.msk.bf16.gmra.mrb[20].mxu0 %vm4858_vm5, %v19616_v33  ;;  %v8101_v33 = vrot.slane %v8099_v43, 5  ;;  %v15241_v43 = vld [vmem:[#allocation2 + $0x10] sm:$0xf] }
 0x68f   : > { %14193 = vmatprep.mubr.msk.bf16.mxu0 %vm4858_vm5, %v19617_v36  ;;  %v17797_v36 = vld [vmem:[#allocation2 + $0xd4] sm:$0x1]  ;;  %v8643_v41 = vrot.slane %v15241_v43, 5 }
 0x690   : > { %v8115_v21 = vshll.u32 %v17797_v36, 16 }
 0x692   : > { %v8117_v24 = vrot.slane %v8115_v21, 5  ;;  %v8549_v21 = vld [vmem:[#allocation2 + $0x18] sm:$0xe] }
 0x696   : > { %14194 = vmatmul.mubr.msk.bf16.gmra.mrb[24].mxu0 %vm4858_vm5, %v19618_v37  ;;  %v8102_v37 = vor.u32 %v8101_v33, %v8098_v31  ;;  %v15242_v31 = vld [vmem:[#allocation2 + $0x1c] sm:$0xf]  ;;  %v12971_v33 = vcombine.low %v8637_v30, %v8640_v42 }
 0x697   : > { %14197 = vmatprep.mubr.msk.bf16.mxu0 %vm4858_vm5, %v19619_v22  ;;  %v8112_v22 = vor.u32 %v8111_v26, %v8107_v25 }
 0x698   : > { %v8103_v3 = vrot.slane %v8102_v37, 4  ;;  %v15243_v37 = vld [vmem:[#allocation2 + $0x14] sm:$0x1] }
 0x699   : > { %v8113_v12 = vrot.slane %v8112_v22, 4  ;;  %v8646_v22 = vrot.slane %v15243_v37, 5 }
 0x69a   : > { %v8108_v5 = vsel %vm16401_vm3, %v8103_v3, %v8107_v25  ;;  %v8645_v25 = vrot.slane %v8643_v41, 4  ;;  %v15244_v3 = vld [vmem:[#allocation2 + $0x20] sm:$0x1] }
 0x69e   : > { %14198 = vmatmul.mubr.msk.bf16.gmra.mrb[28].mxu0 %vm4858_vm5, %v19620_v59  ;;  %v8118_v59 = vsel %vm16401_vm3, %v8113_v12, %v8117_v24  ;;  %v8653_v12 = vrot.slane %v15244_v3, 5 }
 0x69f   : > { %14201 = vmatprep.mubr.msk.bf16.mxu0 %vm4858_vm5, %v17283_v57  ;;  %v12905_v57 = vcombine.low %v8108_v5, %v8118_v59  ;;  %v8647_v5 = vsel %vm16300_vm14, %v8645_v25, %v8646_v22  ;;  %v15245_v59 = vld [vmem:[#allocation2 + $0x28] sm:$0xf] }
 0x6a6   : > { %14202 = vmatmul.mubr.msk.bf16.gmra.mrb[32].mxu0 %vm4858_vm5, %v17302_v52  ;;  %v17819_v52 = vld [vmem:[%s19369_s5 + $0x4] sm:$0x3] }
 0x6a7   : > { %14205 = vmatprep.mubr.msk.bf16.mxu0 %vm4858_vm5, %v17704_v20 }
 0x6ae   : > { %14206 = vmatmul.mubr.msk.bf16.gmra.mrb[36].mxu0 %vm4858_vm5, %v12905_v57  ;;  %v8657_v57 = vrot.slane %v15245_v59, 5 }
 0x6af   : > { %14211 = vmatprep.mubr.msk.bf16.mxu0 %vm4858_vm5, %v19591_v34  ;;  %v6285_v34 = vld [vmem:[#allocation3 + $0xcc] sm:$0xf] }
 0x6b6   : > { %14212 = vmatmul.mubr.msk.bf16.vlgmr.msra.gmra.mrb[8].mxu0 %vm4858_vm5, %v19593_v19  ;;  %v17839_v19 = vld [vmem:[#allocation3 + $0xd0] sm:$0xf] }
 0x6b7   : > { %14244 = vmatpush3.bf16.msra.mxu0 %v9003_v55  ;;  %14215 = vmatprep.mubr.msk.bf16.mxu0 %vm4858_vm5, %v19594_v7  ;;  %v8129_v7 = vshll.u32 %v17839_v19, 16  ;;  %v12941_v55 = vrot.slane %v8549_v21, 9 }
 0x6b8   : > { %15018 = vmatprep.subr.msk.bf16.mxu0 %vm4907_vm4, %v17819_v52 }
 0x6b9   : > { %v8131_v20 = vrot.slane %v8129_v7, 5 }
 0x6be   : > { %14216 = vmatmul.mubr.msk.bf16.gmra.mrb[12].mxu0 %vm4858_vm5, %v19595_v44 }
 0x6bf   : > { %14219 = vmatprep.mubr.msk.bf16.mxu0 %vm4858_vm5, %v17339_v35  ;;  %v8120_v35 = vshrl.u32 %v6285_v34, 16 }
 0x6c1   : > { %v8122_v44 = vrot.slane %v8120_v35, 4  ;;  %v15246_v35 = vld [vmem:[#allocation2 + $0x34] sm:$0xf] }
 0x6c6   : > { %14220 = vmatmul.mubr.msk.bf16.gmra.mrb[16].mxu0 %vm4858_vm5, %v17371_v18  ;;  %v8123_v18 = vshll.u32 %v6285_v34, 16 }
 0x6c7   : > { %14223 = vmatprep.mubr.msk.bf16.mxu0 %vm4858_vm5, %v17387_v2  ;;  %v8133_v2 = vshrl.u32 %v17839_v19, 16 }
 0x6c9   : > { %v8135_v62 = vrot.slane %v8133_v2, 4 }
 0x6ce   : > { %14224 = vmatmul.mubr.msk.bf16.gmra.mrb[20].mxu0 %vm4858_vm5, %v17569_v15  ;;  %v8125_v15 = vrot.slane %v8123_v18, 5  ;;  %v8664_v18 = vrot.slane %v15246_v35, 5 }
 0x6cf   : > { %14227 = vmatprep.mubr.msk.bf16.mxu0 %vm4858_vm5, %v17582_v49  ;;  %v17847_v49 = vld [vmem:[#allocation3 + $0xd4] sm:$0x1] }
 0x6d0   : > { %v8139_v29 = vshll.u32 %v17847_v49, 16 }
 0x6d2   : > { %v8141_v28 = vrot.slane %v8139_v29, 5  ;;  %v8666_v29 = vrot.slane %v8664_v18, 4 }
 0x6d6   : > { %14228 = vmatmul.mubr.msk.bf16.gmra.mrb[24].mxu0 %vm4858_vm5, %v17598_v63  ;;  %v8126_v63 = vor.u32 %v8125_v15, %v8122_v44  ;;  %v9295_v44 = vsel %vm4907_vm4, %v17819_v52, 0  ;;  %v15247_v52 = vld [vmem:[#allocation2 + $0x2c] sm:$0x1] }
 0x6d7   : > { %14231 = vmatprep.mubr.msk.bf16.mxu0 %vm4858_vm5, %v17605_v23  ;;  %v8136_v23 = vor.u32 %v8135_v62, %v8131_v20  ;;  %v8659_v62 = vrot.slane %v8657_v57, 4  ;;  %v8660_v51 = vrot.slane %v15247_v52, 5 }
 0x6d8   : > { %v8127_v58 = vrot.slane %v8126_v63, 4  ;;  %v17885_v63 = vld [vmem:[%s19368_s4 + $0xa] sm:$0x3] }
 0x6d9   : > { %v8137_v8 = vrot.slane %v8136_v23, 4  ;;  %v8550_v23 = vld [vmem:[#allocation2 + $0x24] sm:$0xe]  ;;  %v8661_v14 = vsel %vm16300_vm14, %v8659_v62, %v8660_v51 }
 0x6da   : > { %v12942_v61 = vrot.slane %v8550_v23, 9 }
 0x6dc   : > { %v8658_v30 = vsel %vm16300_vm14, %v12942_v61, %v8657_v57 }
 0x6dd   : > { %v17907_v42 = vcombine.low %v8658_v30, %v8661_v14  ;;  %v15252_v30 = vld [vmem:[#allocation3 + $0x1c] sm:$0xf] }
 0x6de   : > { %14232 = vmatmul.mubr.msk.bf16.gmra.mrb[28].mxu0 %vm4858_vm5, %v17622_v46  ;;  %v8132_v46 = vsel %vm16401_vm3, %v8127_v58, %v8131_v20 }
 0x6df   : > { %14235 = vmatprep.mubr.msk.bf16.mxu0 %vm4858_vm5, %v17627_v39  ;;  %v8142_v39 = vsel %vm16401_vm3, %v8137_v8, %v8141_v28  ;;  %v15248_v8 = vld [vmem:[#allocation2 + $0x38] sm:$0x1] }
 0x6e0   : > { %v12922_v53 = vcombine.low %v8132_v46, %v8142_v39  ;;  %v8667_v28 = vrot.slane %v15248_v8, 5  ;;  %v12943_v46 = vrot.slane %v8551_v16, 9 }
 0x6e2   : > { %v8668_v39 = vsel %vm16300_vm14, %v8666_v29, %v8667_v28  ;;  %v8665_v43 = vsel %vm16300_vm14, %v12943_v46, %v8664_v18  ;;  %v15249_v18 = vld [vmem:[#allocation3 + $0x4] sm:$0xf]  ;;  %v15250_v29 = vld [vmem:[#allocation3 + $0x8] sm:$0x1]  ;;  %v15251_v46 = vld [vmem:[#allocation3 + $0x10] sm:$0xf] }
 0x6e3   : > { %v8799_v52 = vrot.slane %v15250_v29, 5  ;;  %v8566_v29 = vld [vmem:[#allocation3 + $0xc] sm:$0xe] }
 0x6e6   : > { %14236 = vmatmul.mubr.msk.bf16.gmra.mrb[32].mxu0 %vm4858_vm5, %v17638_v6  ;;  %v8650_v6 = vrot.slane %v15242_v31, 5 }
 0x6e7   : > { %14239 = vmatprep.mubr.msk.bf16.mxu0 %vm4858_vm5, %v17762_v48  ;;  %v8548_v48 = vld [vmem:[#allocation2 + $0xc] sm:$0xe] }
 0x6e8   : > { %v8652_v26 = vrot.slane %v8650_v6, 4  ;;  %v12940_v24 = vrot.slane %v8548_v48, 9  ;;  %v8651_v15 = vsel %vm16300_vm14, %v12941_v55, %v8650_v6 }
 0x6ea   : > { %v8654_v34 = vsel %vm16300_vm14, %v8652_v26, %v8653_v12  ;;  %v8644_v7 = vsel %vm16300_vm14, %v12940_v24, %v8643_v41  ;;  %v17911_v41 = vcombine.low %v8665_v43, %v8668_v39  ;;  %v8803_v39 = vrot.slane %v15251_v46, 5 }
 0x6eb   : > { %v17874_v2 = vcombine.low %v8644_v7, %v8647_v5  ;;  %v17880_v20 = vcombine.low %v8651_v15, %v8654_v34  ;;  %v8796_v7 = vrot.slane %v15249_v18, 5  ;;  %v8565_v15 = vld [vmem:[#allocation3] sm:$0xe]  ;;  %v8810_v43 = vrot.slane %v15252_v30, 5 }
 0x6ec   : > { %v12955_v62 = vrot.slane %v8565_v15, 9  ;;  %v8805_v15 = vrot.slane %v8803_v39, 4 }
 0x6ed   : > { %v8798_v23 = vrot.slane %v8796_v7, 4  ;;  %v8812_v9 = vrot.slane %v8810_v43, 4 }
 0x6ee   : > { %14240 = vmatmul.mubr.msk.bf16.gmra.mrb[36].mxu0 %vm4858_vm5, %v12922_v53  ;;  %v8797_v28 = vsel %vm16300_vm14, %v12955_v62, %v8796_v7  ;;  %v15253_v7 = vld [vmem:[#allocation3 + $0x14] sm:$0x1] }
 0x6ef   : > { %14245 = vmatprep.mubr.msk.bf16.mxu0 %vm4858_vm5, %v12971_v33  ;;  %v8800_v61 = vsel %vm16300_vm14, %v8798_v23, %v8799_v52  ;;  %v8806_v62 = vrot.slane %v15253_v7, 5  ;;  %v8567_v23 = vld [vmem:[#allocation3 + $0x18] sm:$0xe]  ;;  %v15256_v7 = vld [vmem:[#allocation3 + $0x34] sm:$0xf] }
 0x6f0   : > { %v13003_v18 = vcombine.low %v8797_v28, %v8800_v61  ;;  %v12956_v28 = vrot.slane %v8566_v29, 9  ;;  %v9517_v29 = vsel %vm4907_vm4, %v17885_v63, 0 }
 0x6f1   : > { %v8807_v61 = vsel %vm16300_vm14, %v8805_v15, %v8806_v62 }
 0x6f6   : > { %14246 = vmatmul.mubr.msk.bf16.vlgmr.msra.gmra.mrb[8].mxu0 %vm4858_vm5, %v17874_v2  ;;  %v17889_v4 = vpop.f32.mrb[4].mxu1 }
 0x6f7   : > { %14278 = vmatpush3.bf16.msra.mxu0 %v9295_v44  ;;  %14249 = vmatprep.mubr.msk.bf16.mxu0 %vm4858_vm5, %v17880_v20  ;;  %v17893_v58 = vpop.f32.mrb[5].mxu1 }
 0x6f8   : > { %v17895_v40 = vpop.f32.mrb[6].mxu1  ;;  %15019 = vmatprep.subr.msk.bf16.mxu0 %vm4907_vm4, %v17885_v63 }
 0x6f9   : > { %v17901_v0 = vpop.f32.mrb[7].mxu1 }
 0x6fe   : > { %14250 = vmatmul.mubr.msk.bf16.gmra.mrb[12].mxu0 %vm4858_vm5, %v17907_v42  ;;  %v17915_v53 = vpop.f32.mrb[8].mxu1 }
 0x6ff   : > { %14253 = vmatprep.mubr.msk.bf16.mxu0 %vm4858_vm5, %v17911_v41  ;;  %v17919_v31 = vpop.f32.mrb[9].mxu1 }
 0x700   : > { %v17921_v6 = vpop.f32.mrb[10].mxu1 }
 0x701   : > { %v17923_v33 = vpop.f32.mrb[11].mxu1 }
 0x706   : > { %14254 = vmatmul.mubr.msk.bf16.gmra.mrb[16].mxu0 %vm4858_vm5, %v17428_v50  ;;  %v17927_v25 = vpop.f32.mrb[12].mxu1 }
 0x707   : > { %14257 = vmatprep.mubr.msk.bf16.mxu0 %vm4858_vm5, %v17440_v27  ;;  %v17931_v48 = vpop.f32.mrb[13].mxu1 }
 0x708   : > { %v17933_v26 = vpop.f32.mrb[14].mxu1 }
 0x709   : > { %v17935_v37 = vpop.f32.mrb[15].mxu1 }
 0x70e   : > { %14258 = vmatmul.mubr.msk.bf16.gmra.mrb[20].mxu0 %vm4858_vm5, %v17447_v17  ;;  %v17939_v22 = vpop.f32.mrb[16].mxu1 }
 0x70f   : > { %14261 = vmatprep.mubr.msk.bf16.mxu0 %vm4858_vm5, %v17460_v11  ;;  %v17943_v21 = vpop.f32.mrb[17].mxu1 }
 0x710   : > { %v17945_v3 = vpop.f32.mrb[18].mxu1 }
 0x711   : > { %v17947_v12 = vpop.f32.mrb[19].mxu1 }
 0x716   : > { %14262 = vmatmul.mubr.msk.bf16.gmra.mrb[24].mxu0 %vm4858_vm5, %v17467_v45  ;;  %v17951_v24 = vpop.f32.mrb[20].mxu1 }
 0x717   : > { %14265 = vmatprep.mubr.msk.bf16.mxu0 %vm4858_vm5, %v17479_v10  ;;  %v17955_v5 = vpop.f32.mrb[21].mxu1 }
 0x718   : > { %v17957_v59 = vpop.f32.mrb[22].mxu1 }
 0x719   : > { %v17959_v57 = vpop.f32.mrb[23].mxu1 }
 0x71e   : > { %14266 = vmatmul.mubr.msk.bf16.gmra.mrb[28].mxu0 %vm4858_vm5, %v17486_v56  ;;  %v17963_v55 = vpop.f32.mrb[24].mxu1 }
 0x71f   : > { %14269 = vmatprep.mubr.msk.bf16.mxu0 %vm4858_vm5, %v17502_v60  ;;  %v17967_v34 = vpop.f32.mrb[25].mxu1 }
 0x720   : > { %v17969_v35 = vpop.f32.mrb[26].mxu1 }
 0x721   : > { %19621 = vst [vmem:[#allocation36_spill] sm:$0xff] %v17969_v35  ;;  %v17971_v44 = vpop.f32.mrb[27].mxu1  ;;  %v8824_v35 = vrot.slane %v15256_v7, 5 }
 0x722   : > { %19622 = vst [vmem:[#allocation38_spill] sm:$0xff] %v17971_v44 }
 0x726   : > { %14270 = vmatmul.mubr.msk.bf16.gmra.mrb[32].mxu0 %vm4858_vm5, %v17509_v13  ;;  %v17975_v51 = vpop.f32.mrb[28].mxu1 }
 0x727   : > { %19623 = vst [vmem:[#allocation37_spill] sm:$0xff] %v17975_v51  ;;  %14273 = vmatprep.mubr.msk.bf16.mxu0 %vm4858_vm5, %v17525_v38  ;;  %v17979_v16 = vpop.f32.mrb[29].mxu1  ;;  %v15255_v51 = vld [vmem:[#allocation3 + $0x28] sm:$0xf] }
 0x728   : > { %19624 = vst [vmem:[#allocation9_spill] sm:$0xff] %v17979_v16  ;;  %v17981_v8 = vpop.f32.mrb[30].mxu1  ;;  %v8817_v44 = vrot.slane %v15255_v51, 5  ;;  %v4693_v51 = vld [vmem:[%s19369_s5 + $0xa] sm:$0x3] }
 0x729   : > { %19625 = vst [vmem:[#allocation31_spill] sm:$0xff] %v17981_v8  ;;  %v17987_v14 = vpop.f32.mrb[31].mxu1 }
 0x72a   : > { %19626 = vst [vmem:[#allocation35_spill] sm:$0xff] %v17987_v14  ;;  %v15254_v14 = vld [vmem:[#allocation3 + $0x20] sm:$0x1] }
 0x72b   : > { %v8813_v46 = vrot.slane %v15254_v14, 5 }
 0x72e   : > { %14274 = vmatmul.mubr.msk.bf16.gmra.mrb[36].mxu0 %vm4858_vm5, %v17531_v47  ;;  %v17991_v8 = vpop.f32.mrb[32].mxu1 }
 0x72f   : > { %19627 = vst [vmem:[#allocation30_spill] sm:$0xff] %v17991_v8  ;;  %14279 = vmatprep.mubr.msk.bf16.mxu0 %vm4858_vm5, %v13003_v18  ;;  %v17994_v52 = vpop.f32.mrb[33].mxu1  ;;  %v12957_v8 = vrot.slane %v8567_v23, 9  ;;  %v8814_v18 = vsel %vm16300_vm14, %v8812_v9, %v8813_v46  ;;  %v8568_v9 = vld [vmem:[#allocation3 + $0x24] sm:$0xe]  ;;  %v8826_v23 = vrot.slane %v8824_v35, 4 }
 0x730   : > { %19628 = vst [vmem:[#allocation25_spill] sm:$0xff] %v17994_v52  ;;  %v17996_v16 = vpop.f32.mrb[34].mxu1  ;;  %v8804_v52 = vsel %vm16300_vm14, %v12956_v28, %v8803_v39  ;;  %v15257_v39 = vld [vmem:[#allocation3 + $0x2c] sm:$0x1]  ;;  %v15258_v46 = vld [vmem:[#allocation3 + $0x38] sm:$0x1] }
 0x731   : > { %v18000_v30 = vpop.f32.mrb[35].mxu1  ;;  %v13004_v14 = vcombine.low %v8804_v52, %v8807_v61  ;;  %v8811_v15 = vsel %vm16300_vm14, %v12957_v8, %v8810_v43  ;;  %v8820_v63 = vrot.slane %v15257_v39, 5  ;;  %v8569_v52 = vld [vmem:[#allocation3 + $0x30] sm:$0xe]  ;;  %v8827_v8 = vrot.slane %v15258_v46, 5  ;;  %v19637_v46 = vld [vmem:[#allocation19_spill] sm:$0xff] }
 0x732   : > { %19629 = vst [vmem:[#allocation33_spill] sm:$0xff] %v18000_v30  ;;  %v18010_v62 = vcombine.low %v8811_v15, %v8814_v18  ;;  %v8819_v30 = vrot.slane %v8817_v44, 4  ;;  %v12958_v43 = vrot.slane %v8568_v9, 9  ;;  %v12959_v61 = vrot.slane %v8569_v52, 9  ;;  %v19631_v9 = vld [vmem:[#allocation13_spill] sm:$0xff]  ;;  %v19636_v52 = vld [vmem:[#allocation18_spill] sm:$0xff] }
 0x733   : > { %v8828_v18 = vsel %vm16300_vm14, %v8826_v23, %v8827_v8  ;;  %v19633_v23 = vld [vmem:[#allocation15_spill] sm:$0xff]  ;;  %v19638_v8 = vld [vmem:[#allocation20_spill] sm:$0xff] }
 0x734   : > { %v8821_v28 = vsel %vm16300_vm14, %v8819_v30, %v8820_v63  ;;  %v8818_v7 = vsel %vm16300_vm14, %v12958_v43, %v8817_v44  ;;  %v8825_v15 = vsel %vm16300_vm14, %v12959_v61, %v8824_v35  ;;  %v19630_v30 = vld [vmem:[#allocation12_spill] sm:$0xff]  ;;  %v19632_v44 = vld [vmem:[#allocation14_spill] sm:$0xff]  ;;  %v19635_v63 = vld [vmem:[#allocation17_spill] sm:$0xff]  ;;  %v9719_v61 = vsel %vm4907_vm4, %v4693_v51, 0 }
 0x735   : > { %v18029_v39 = vcombine.low %v8825_v15, %v8828_v18  ;;  %v19634_v35 = vld [vmem:[#allocation16_spill] sm:$0xff]  ;;  %v19639_v43 = vld [vmem:[#allocation21_spill] sm:$0xff] }
 0x736   : > { %14280 = vmatmul.mubr.msk.bf16.vlgmr.msra.gmra.mrb[8].mxu0 %vm4858_vm5, %v13004_v14  ;;  %v4687_v18 = vld [vmem:[%s19368_s4 + $0x10] sm:$0x3] }
 0x737   : > { %14312 = vmatpush3.bf16.msra.mxu0 %v9517_v29  ;;  %14283 = vmatprep.mubr.msk.bf16.mxu0 %vm4858_vm5, %v18010_v62  ;;  %v18025_v29 = vcombine.low %v8818_v7, %v8821_v28  ;;  %v19640_v28 = vld [vmem:[#allocation22_spill] sm:$0xff] }
 0x738   : > { %15020 = vmatprep.subr.msk.bf16.mxu0 %vm4907_vm4, %v4693_v51  ;;  %v4696_v51 = vld [vmem:[%s19369_s5 + $0x10] sm:$0x3] }
 0x739   : > { %v10143_v7 = vsel %vm4907_vm4, %v4696_v51, 0 }
 0x73e   : > { %14284 = vmatmul.mubr.msk.bf16.gmra.mrb[12].mxu0 %vm4858_vm5, %v18025_v29 }
 0x73f   : > { %14287 = vmatprep.mubr.msk.bf16.mxu0 %vm4858_vm5, %v18029_v39 }
 0x746   : > { %14288 = vmatmul.mubr.msk.bf16.gmra.mrb[16].mxu0 %vm4858_vm5, %v19630_v30 }
 0x747   : > { %14291 = vmatprep.mubr.msk.bf16.mxu0 %vm4858_vm5, %v19631_v9 }
 0x74e   : > { %14292 = vmatmul.mubr.msk.bf16.gmra.mrb[20].mxu0 %vm4858_vm5, %v19632_v44 }
 0x74f   : > { %14295 = vmatprep.mubr.msk.bf16.mxu0 %vm4858_vm5, %v19633_v23 }
 0x756   : > { %14296 = vmatmul.mubr.msk.bf16.gmra.mrb[24].mxu0 %vm4858_vm5, %v19634_v35 }
 0x757   : > { %14299 = vmatprep.mubr.msk.bf16.mxu0 %vm4858_vm5, %v19635_v63 }
 0x75e   : > { %14300 = vmatmul.mubr.msk.bf16.gmra.mrb[28].mxu0 %vm4858_vm5, %v19636_v52 }
 0x75f   : > { %14303 = vmatprep.mubr.msk.bf16.mxu0 %vm4858_vm5, %v19637_v46 }
 0x766   : > { %14304 = vmatmul.mubr.msk.bf16.gmra.mrb[32].mxu0 %vm4858_vm5, %v19638_v8 }
 0x767   : > { %14307 = vmatprep.mubr.msk.bf16.mxu0 %vm4858_vm5, %v19639_v43 }
 0x76e   : > { %14308 = vmatmul.mubr.msk.bf16.gmra.mrb[36].mxu0 %vm4858_vm5, %v19640_v28 }
 0x76f   : > { %14313 = vmatprep.mubr.msk.bf16.mxu0 %vm4858_vm5, %v17874_v2  ;;  %v9941_v2 = vsel %vm4907_vm4, %v4687_v18, 0 }
 0x776   : > { %14314 = vmatmul.mubr.msk.bf16.vlgmr.msra.gmra.mrb[8].mxu0 %vm4858_vm5, %v17880_v20 }
 0x777   : > { %14346 = vmatpush3.bf16.msra.mxu0 %v9719_v61  ;;  %14317 = vmatprep.mubr.msk.bf16.mxu0 %vm4858_vm5, %v17907_v42 }
 0x778   : > { %15021 = vmatprep.subr.msk.bf16.mxu0 %vm4907_vm4, %v4687_v18 }
 0x77e   : > { %14318 = vmatmul.mubr.msk.bf16.gmra.mrb[12].mxu0 %vm4858_vm5, %v17911_v41 }
 0x77f   : > { %14321 = vmatprep.mubr.msk.bf16.mxu0 %vm4858_vm5, %v17428_v50 }
 0x786   : > { %14322 = vmatmul.mubr.msk.bf16.gmra.mrb[16].mxu0 %vm4858_vm5, %v17440_v27 }
 0x787   : > { %14325 = vmatprep.mubr.msk.bf16.mxu0 %vm4858_vm5, %v17447_v17 }
 0x78e   : > { %14326 = vmatmul.mubr.msk.bf16.gmra.mrb[20].mxu0 %vm4858_vm5, %v17460_v11 }
 0x78f   : > { %14329 = vmatprep.mubr.msk.bf16.mxu0 %vm4858_vm5, %v17467_v45 }
 0x796   : > { %14330 = vmatmul.mubr.msk.bf16.gmra.mrb[24].mxu0 %vm4858_vm5, %v17479_v10 }
 0x797   : > { %14333 = vmatprep.mubr.msk.bf16.mxu0 %vm4858_vm5, %v17486_v56 }
 0x79e   : > { %14334 = vmatmul.mubr.msk.bf16.gmra.mrb[28].mxu0 %vm4858_vm5, %v17502_v60 }
 0x79f   : > { %14337 = vmatprep.mubr.msk.bf16.mxu0 %vm4858_vm5, %v17509_v13 }
 0x7a6   : > { %14338 = vmatmul.mubr.msk.bf16.gmra.mrb[32].mxu0 %vm4858_vm5, %v17525_v38 }
 0x7a7   : > { %14341 = vmatprep.mubr.msk.bf16.mxu0 %vm4858_vm5, %v17531_v47 }
 0x7ae   : > { %14342 = vmatmul.mubr.msk.bf16.gmra.mrb[36].mxu0 %vm4858_vm5, %v17560_v1 }
 0x7af   : > { %14347 = vmatprep.mubr.msk.bf16.mxu0 %vm4858_vm5, %v13004_v14  ;;  %v19641_v14 = vld [vmem:[#allocation23_spill] sm:$0xff] }
 0x7b6   : > { %14348 = vmatmul.mubr.msk.bf16.vlgmr.msra.gmra.mrb[8].mxu0 %vm4858_vm5, %v18010_v62 }
 0x7b7   : > { %14380 = vmatpush3.bf16.msra.mxu0 %v9941_v2  ;;  %14351 = vmatprep.mubr.msk.bf16.mxu0 %vm4858_vm5, %v18025_v29 }
 0x7b8   : > { %15022 = vmatprep.subr.msk.bf16.mxu0 %vm4907_vm4, %v4696_v51  ;;  %vm10412_vm4 = vcmask 57344  }
 0x7b9   : > { %vm18342_vm7 = vmand %vm10412_vm4, %vm2389_vm8 }
 0x7be   : > { %14352 = vmatmul.mubr.msk.bf16.gmra.mrb[12].mxu0 %vm4858_vm5, %v18029_v39 }
 0x7bf   : > { %14355 = vmatprep.mubr.msk.bf16.mxu0 %vm4858_vm5, %v19630_v30 }
 0x7c6   : > { %14356 = vmatmul.mubr.msk.bf16.gmra.mrb[16].mxu0 %vm4858_vm5, %v19631_v9 }
 0x7c7   : > { %14359 = vmatprep.mubr.msk.bf16.mxu0 %vm4858_vm5, %v19632_v44 }
 0x7ce   : > { %14360 = vmatmul.mubr.msk.bf16.gmra.mrb[20].mxu0 %vm4858_vm5, %v19633_v23 }
 0x7cf   : > { %14363 = vmatprep.mubr.msk.bf16.mxu0 %vm4858_vm5, %v19634_v35 }
 0x7d6   : > { %14364 = vmatmul.mubr.msk.bf16.gmra.mrb[24].mxu0 %vm4858_vm5, %v19635_v63 }
 0x7d7   : > { %14367 = vmatprep.mubr.msk.bf16.mxu0 %vm4858_vm5, %v19636_v52 }
 0x7de   : > { %14368 = vmatmul.mubr.msk.bf16.gmra.mrb[28].mxu0 %vm4858_vm5, %v19637_v46 }
 0x7df   : > { %14371 = vmatprep.mubr.msk.bf16.mxu0 %vm4858_vm5, %v19638_v8 }
 0x7e6   : > { %14372 = vmatmul.mubr.msk.bf16.gmra.mrb[32].mxu0 %vm4858_vm5, %v19639_v43 }
 0x7e7   : > { %14375 = vmatprep.mubr.msk.bf16.mxu0 %vm4858_vm5, %v19640_v28 }
 0x7ee   : > { %14376 = vmatmul.mubr.msk.bf16.gmra.mrb[36].mxu0 %vm4858_vm5, %v19641_v14 }
 0x7ef   : > { %14381 = vmatprep.mubr.msk.bf16.mxu0 %vm4858_vm5, %v17880_v20 }
 0x7f6   : > { %14382 = vmatmul.mubr.msk.bf16.vlgmr.msra.gmra.mrb[8].mxu0 %vm4858_vm5, %v17907_v42 }
 0x7f7   : > { %14414 = vmatpush3.bf16.msra.mxu0 %v10143_v7  ;;  %14385 = vmatprep.mubr.msk.bf16.mxu0 %vm4858_vm5, %v17911_v41  ;;  %v18316_v41 = vld [vmem:[%s19370_s6] ss:$0 sm:$0xff] }
 0x7fe   : > { %14386 = vmatmul.mubr.msk.bf16.gmra.mrb[12].mxu0 %vm4858_vm5, %v17428_v50  ;;  %v9919_v50 = vrot.slane %v17789_v54, 5  ;;  %v9932_v54 = vrot.slane %v17847_v49, 5 }
 0x7ff   : > { %14389 = vmatprep.mubr.msk.bf16.mxu0 %vm4858_vm5, %v17440_v27  ;;  %v8564_v27 = vld [vmem:[#allocation2 + $0xcc] sm:$0xe] }
 0x806   : > { %14390 = vmatmul.mubr.msk.bf16.gmra.mrb[16].mxu0 %vm4858_vm5, %v17447_v17  ;;  %v13071_v17 = vrot.slane %v8564_v27, 9 }
 0x807   : > { %14393 = vmatprep.mubr.msk.bf16.mxu0 %vm4858_vm5, %v17460_v11  ;;  %v9921_v11 = vrot.slane %v9919_v50, 4 }
 0x80e   : > { %14394 = vmatmul.mubr.msk.bf16.gmra.mrb[20].mxu0 %vm4858_vm5, %v17467_v45  ;;  %v9922_v45 = vrot.slane %v17797_v36, 5 }
 0x80f   : > { %14397 = vmatprep.mubr.msk.bf16.mxu0 %vm4858_vm5, %v17479_v10  ;;  %v9920_v10 = vsel %vm16300_vm14, %v13071_v17, %v9919_v50 }
 0x816   : > { %14398 = vmatmul.mubr.msk.bf16.gmra.mrb[24].mxu0 %vm4858_vm5, %v17486_v56  ;;  %v9923_v56 = vsel %vm16300_vm14, %v9921_v11, %v9922_v45 }
 0x817   : > { %14401 = vmatprep.mubr.msk.bf16.mxu0 %vm4858_vm5, %v17502_v60  ;;  %v13073_v60 = vcombine.low %v9920_v10, %v9923_v56 }
 0x81e   : > { %14402 = vmatmul.mubr.msk.bf16.gmra.mrb[28].mxu0 %vm4858_vm5, %v17509_v13  ;;  %v9929_v13 = vrot.slane %v17839_v19, 5  ;;  %v19642_v19 = vmov 0  }
 0x81f   : > { %14405 = vmatprep.mubr.msk.bf16.mxu0 %vm4858_vm5, %v17525_v38  ;;  %v8582_v38 = vld [vmem:[#allocation3 + $0xcc] sm:$0xe]  ;;  %10417 = vst.msk [vmem:[#allocation4 + $0x18] sm:$0xf] %vm10409_vm2, %v19642_v19  ;;  %10410 = vst.msk [vmem:[#allocation4] sm:$0xf] %vm10409_vm2, %v19642_v19 }
 0x820   : > { %10411 = vst.msk [vmem:[#allocation4 + $0x4] sm:$0xf] %vm10409_vm2, %v19642_v19  ;;  %10414 = vst.msk [vmem:[#allocation4 + $0xc] sm:$0xf] %vm10409_vm2, %v19642_v19 }
 0x821   : > { %10415 = vst.msk [vmem:[#allocation4 + $0x10] sm:$0xf] %vm10409_vm2, %v19642_v19  ;;  %10418 = vst.msk [vmem:[#allocation4 + $0x1c] sm:$0xf] %vm10409_vm2, %v19642_v19 }
 0x822   : > { %10420 = vst.msk [vmem:[#allocation4 + $0x24] sm:$0xf] %vm10409_vm2, %v19642_v19  ;;  %10421 = vst.msk [vmem:[#allocation4 + $0x28] sm:$0xf] %vm10409_vm2, %v19642_v19 }
 0x823   : > { %10423 = vst.msk [vmem:[#allocation4 + $0x30] sm:$0xf] %vm10409_vm2, %v19642_v19  ;;  %10424 = vst.msk [vmem:[#allocation4 + $0x34] sm:$0xf] %vm10409_vm2, %v19642_v19 }
 0x824   : > { %10426 = vst.msk [vmem:[#allocation4 + $0x3c] sm:$0xf] %vm10409_vm2, %v19642_v19  ;;  %10427 = vst.msk [vmem:[#allocation4 + $0x40] sm:$0xf] %vm10409_vm2, %v19642_v19 }
 0x825   : > { %10429 = vst.msk [vmem:[#allocation4 + $0x48] sm:$0xf] %vm10409_vm2, %v19642_v19  ;;  %10430 = vst.msk [vmem:[#allocation4 + $0x4c] sm:$0xf] %vm10409_vm2, %v19642_v19 }
 0x826   : > { %14406 = vmatmul.mubr.msk.bf16.gmra.mrb[32].mxu0 %vm4858_vm5, %v17531_v47  ;;  %v13072_v47 = vrot.slane %v8582_v38, 9  ;;  %10432 = vst.msk [vmem:[#allocation4 + $0x54] sm:$0xf] %vm10409_vm2, %v19642_v19  ;;  %10433 = vst.msk [vmem:[#allocation4 + $0x58] sm:$0xf] %vm10409_vm2, %v19642_v19 }
 0x827   : > { %14409 = vmatprep.mubr.msk.bf16.mxu0 %vm4858_vm5, %v17560_v1  ;;  %v9931_v1 = vrot.slane %v9929_v13, 4  ;;  %10435 = vst.msk [vmem:[#allocation4 + $0x60] sm:$0xf] %vm10409_vm2, %v19642_v19  ;;  %10436 = vst.msk [vmem:[#allocation4 + $0x64] sm:$0xf] %vm10409_vm2, %v19642_v19 }
 0x828   : > { %v9930_v36 = vsel %vm16300_vm14, %v13072_v47, %v9929_v13  ;;  %10438 = vst.msk [vmem:[#allocation4 + $0x6c] sm:$0xf] %vm10409_vm2, %v19642_v19  ;;  %10439 = vst.msk [vmem:[#allocation4 + $0x70] sm:$0xf] %vm10409_vm2, %v19642_v19 }
 0x829   : > { %v9933_v20 = vsel %vm16300_vm14, %v9931_v1, %v9932_v54  ;;  %10441 = vst.msk [vmem:[#allocation4 + $0x78] sm:$0xf] %vm10409_vm2, %v19642_v19  ;;  %10442 = vst.msk [vmem:[#allocation4 + $0x7c] sm:$0xf] %vm10409_vm2, %v19642_v19 }
 0x82a   : > { %v13090_v42 = vcombine.low %v9930_v36, %v9933_v20  ;;  %10444 = vst.msk [vmem:[#allocation4 + $0x84] sm:$0xf] %vm10409_vm2, %v19642_v19  ;;  %10445 = vst.msk [vmem:[#allocation4 + $0x88] sm:$0xf] %vm10409_vm2, %v19642_v19 }
 0x82b   : > { %10447 = vst.msk [vmem:[#allocation4 + $0x90] sm:$0xf] %vm10409_vm2, %v19642_v19  ;;  %10448 = vst.msk [vmem:[#allocation4 + $0x94] sm:$0xf] %vm10409_vm2, %v19642_v19 }
 0x82c   : > { %10450 = vst.msk [vmem:[#allocation4 + $0x9c] sm:$0xf] %vm10409_vm2, %v19642_v19  ;;  %10451 = vst.msk [vmem:[#allocation4 + $0xa0] sm:$0xf] %vm10409_vm2, %v19642_v19 }
 0x82d   : > { %10453 = vst.msk [vmem:[#allocation4 + $0xa8] sm:$0xf] %vm10409_vm2, %v19642_v19  ;;  %10454 = vst.msk [vmem:[#allocation4 + $0xac] sm:$0xf] %vm10409_vm2, %v19642_v19 }
 0x82e   : > { %14410 = vmatmul.mubr.msk.bf16.gmra.mrb[36].mxu0 %vm4858_vm5, %v13073_v60  ;;  %10456 = vst.msk [vmem:[#allocation4 + $0xb4] sm:$0xf] %vm10409_vm2, %v19642_v19  ;;  %10457 = vst.msk [vmem:[#allocation4 + $0xb8] sm:$0xf] %vm10409_vm2, %v19642_v19 }
 0x82f   : > { %14415 = vmatprep.mubr.msk.bf16.mxu0 %vm4858_vm5, %v18010_v62  ;;  %10459 = vst.msk [vmem:[#allocation4 + $0xc0] sm:$0xf] %vm10409_vm2, %v19642_v19  ;;  %10460 = vst.msk [vmem:[#allocation4 + $0xc4] sm:$0xf] %vm10409_vm2, %v19642_v19 }
 0x830   : > { %10462 = vst.msk [vmem:[#allocation4 + $0xcc] sm:$0xf] %vm10409_vm2, %v19642_v19  ;;  %10463 = vst.msk [vmem:[#allocation4 + $0xd0] sm:$0xf] %vm10409_vm2, %v19642_v19 }
 0x831   : > { %10419 = vst.msk [vmem:[#allocation4 + $0x20] sm:$0x1] %vm10412_vm4, %v19642_v19  ;;  %10413 = vst.msk [vmem:[#allocation4 + $0x8] sm:$0x1] %vm10412_vm4, %v19642_v19 }
 0x832   : > { %10416 = vst.msk [vmem:[#allocation4 + $0x14] sm:$0x1] %vm10412_vm4, %v19642_v19  ;;  %10422 = vst.msk [vmem:[#allocation4 + $0x2c] sm:$0x1] %vm10412_vm4, %v19642_v19 }
 0x833   : > { %10425 = vst.msk [vmem:[#allocation4 + $0x38] sm:$0x1] %vm10412_vm4, %v19642_v19  ;;  %10428 = vst.msk [vmem:[#allocation4 + $0x44] sm:$0x1] %vm10412_vm4, %v19642_v19 }
 0x834   : > { %10431 = vst.msk [vmem:[#allocation4 + $0x50] sm:$0x1] %vm10412_vm4, %v19642_v19  ;;  %10434 = vst.msk [vmem:[#allocation4 + $0x5c] sm:$0x1] %vm10412_vm4, %v19642_v19 }
 0x835   : > { %10437 = vst.msk [vmem:[#allocation4 + $0x68] sm:$0x1] %vm10412_vm4, %v19642_v19  ;;  %10440 = vst.msk [vmem:[#allocation4 + $0x74] sm:$0x1] %vm10412_vm4, %v19642_v19 }
 0x836   : > { %14416 = vmatmul.mubr.msk.bf16.vlgmr.msra.gmra.mrb[8].mxu0 %vm4858_vm5, %v18025_v29  ;;  %10443 = vst.msk [vmem:[#allocation4 + $0x80] sm:$0x1] %vm10412_vm4, %v19642_v19  ;;  %10446 = vst.msk [vmem:[#allocation4 + $0x8c] sm:$0x1] %vm10412_vm4, %v19642_v19 }
 0x837   : > { %14419 = vmatprep.mubr.msk.bf16.mxu0 %vm4858_vm5, %v18029_v39  ;;  %10449 = vst.msk [vmem:[#allocation4 + $0x98] sm:$0x1] %vm10412_vm4, %v19642_v19  ;;  %10452 = vst.msk [vmem:[#allocation4 + $0xa4] sm:$0x1] %vm10412_vm4, %v19642_v19 }
 0x838   : > { %10455 = vst.msk [vmem:[#allocation4 + $0xb0] sm:$0x1] %vm10412_vm4, %v19642_v19  ;;  %10458 = vst.msk [vmem:[#allocation4 + $0xbc] sm:$0x1] %vm10412_vm4, %v19642_v19 }
 0x839   : > { %10461 = vst.msk [vmem:[#allocation4 + $0xc8] sm:$0x1] %vm10412_vm4, %v19642_v19  ;;  %10464 = vst.msk [vmem:[#allocation4 + $0xd4] sm:$0x1] %vm10412_vm4, %v19642_v19 }
 0x83e   : > { %14420 = vmatmul.mubr.msk.bf16.gmra.mrb[12].mxu0 %vm4858_vm5, %v19630_v30 }
 0x83f   : > { %14423 = vmatprep.mubr.msk.bf16.mxu0 %vm4858_vm5, %v19631_v9 }
 0x846   : > { %14424 = vmatmul.mubr.msk.bf16.gmra.mrb[16].mxu0 %vm4858_vm5, %v19632_v44 }
 0x847   : > { %14427 = vmatprep.mubr.msk.bf16.mxu0 %vm4858_vm5, %v19633_v23 }
 0x84e   : > { %14428 = vmatmul.mubr.msk.bf16.gmra.mrb[20].mxu0 %vm4858_vm5, %v19634_v35 }
 0x84f   : > { %14431 = vmatprep.mubr.msk.bf16.mxu0 %vm4858_vm5, %v19635_v63 }
 0x856   : > { %14432 = vmatmul.mubr.msk.bf16.gmra.mrb[24].mxu0 %vm4858_vm5, %v19636_v52 }
 0x857   : > { %14435 = vmatprep.mubr.msk.bf16.mxu0 %vm4858_vm5, %v19637_v46 }
 0x85e   : > { %14436 = vmatmul.mubr.msk.bf16.gmra.mrb[28].mxu0 %vm4858_vm5, %v19638_v8 }
 0x85f   : > { %14439 = vmatprep.mubr.msk.bf16.mxu0 %vm4858_vm5, %v19639_v43 }
 0x866   : > { %14440 = vmatmul.mubr.msk.bf16.gmra.mrb[32].mxu0 %vm4858_vm5, %v19640_v28 }
 0x867   : > { %14443 = vmatprep.mubr.msk.bf16.mxu0 %vm4858_vm5, %v19641_v14 }
 0x86e   : > { %14444 = vmatmul.mubr.msk.bf16.gmra.mrb[36].mxu0 %vm4858_vm5, %v13090_v42  ;;  %vm18335_vm5 = vmand %vm10409_vm2, %vm2714_vm6  ;;  %v10884_v42 = vld [vmem:[#allocation4 + $0xc] sm:$0xf] }
 0x909   : > { %v14417_v49 = vpop.f32.mrb[8].mxu0 }
 0x90a   : > { %v14461_v62 = vadd.f32 %v14417_v49, %v17889_v4  ;;  %v10179_v29 = vpop.f32.mrb[9].mxu0 }
 0x90b   : > { %v14462_v15 = vadd.f32 %v10179_v29, %v17893_v58  ;;  %v14418_v39 = vpop.f32.mrb[10].mxu0  ;;  %v4700_v58 = vld [vmem:[%s19371_s7 + $0xc] sm:$0xf] }
 0x90c   : > { %v10347_v30 = vadd.f32 %v14461_v62, %v18316_v41  ;;  %v14463_v9 = vadd.f32 %v14418_v39, %v17895_v40  ;;  %v10182_v44 = vpop.f32.mrb[11].mxu0  ;;  %13663 = vmatprep.mubr.msk.bf16.mxu1 %vm486_vm0, %v4700_v58  ;;  %v10897_v39 = vld [vmem:[#allocation4 + $0x20] sm:$0x1] }
 0x90d   : > { %v10345_v23 = vadd.f32 %v14462_v15, %v18316_v41  ;;  %v14464_v35 = vadd.f32 %v10182_v44, %v17901_v0 }
 0x90e   : > { %v10379_v63 = vmax.f32 %v10347_v30, 0.0  ;;  %v10348_v52 = vadd.f32 %v14463_v9, %v18316_v41 }
 0x90f   : > { %v10377_v46 = vmax.f32 %v10345_v23, 0.0  ;;  %v10346_v8 = vadd.f32 %v14464_v35, %v18316_v41 }
 0x910   : > { %v13294_v4 = vpack.c.bf16 %v10379_v63, %v10379_v63  ;;  %v10380_v43 = vmax.f32 %v10348_v52, 0.0  ;;  %v10890_v63 = vld [vmem:[#allocation4 + $0x14] sm:$0x1] }
 0x911   : > { %v13292_v28 = vpack.c.bf16 %v10377_v46, %v10377_v46  ;;  %v10378_v61 = vmax.f32 %v10346_v8, 0.0  ;;  %v14421_v40 = vpop.f32.mrb[12].mxu0 }
 0x912   : > { %v10579_v18 = vshrl.u32 %v13294_v4, 16  ;;  %v10582_v2 = vshll.u32 %v13294_v4, 16  ;;  %v13295_v0 = vpack.c.bf16 %v10380_v43, %v10380_v43  ;;  %v14465_v51 = vadd.f32 %v14421_v40, %v17915_v53  ;;  %v10195_v14 = vpop.f32.mrb[13].mxu0  ;;  %v10893_v53 = vld [vmem:[#allocation4 + $0x18] sm:$0xf] }
 0x913   : > { %v10562_v7 = vshrl.u32 %v13292_v28, 16  ;;  %v10565_v50 = vshll.u32 %v13292_v28, 16  ;;  %v13293_v27 = vpack.c.bf16 %v10378_v61, %v10378_v61  ;;  %v14466_v17 = vadd.f32 %v10195_v14, %v17919_v31  ;;  %v14422_v11 = vpop.f32.mrb[14].mxu0 }
 0x914   : > { %v10581_v45 = vrot.slane %v10579_v18, 7  ;;  %v10587_v10 = vshrl.u32 %v13295_v0, 16  ;;  %v10590_v56 = vshll.u32 %v13295_v0, 16  ;;  %v10351_v60 = vadd.f32 %v14465_v51, %v18316_v41  ;;  %v10198_v13 = vpop.f32.mrb[15].mxu0 }
 0x915   : > { %v10564_v47 = vrot.slane %v10562_v7, 7  ;;  %v10570_v1 = vshrl.u32 %v13293_v27, 16  ;;  %v10573_v54 = vshll.u32 %v13293_v27, 16  ;;  %v10349_v36 = vadd.f32 %v14466_v17, %v18316_v41 }
 0x916   : > { %v10584_v31 = vor.u32 %v10582_v2, %v10581_v45  ;;  %v10585_v20 = vrot.slane %v10581_v45, 4  ;;  %v10589_v19 = vrot.slane %v10587_v10, 7  ;;  %v10383_v49 = vmax.f32 %v10351_v60, 0.0 }
 0x917   : > { %v10567_v62 = vor.u32 %v10565_v50, %v10564_v47  ;;  %v10568_v29 = vrot.slane %v10564_v47, 4  ;;  %v10572_v30 = vrot.slane %v10570_v1, 7  ;;  %v10381_v9 = vmax.f32 %v10349_v36, 0.0 }
 0x918   : > { %v10894_v44 = vsel %vm18335_vm5, %v10584_v31, %v10893_v53  ;;  %v10592_v23 = vor.u32 %v10590_v56, %v10589_v19  ;;  %v10594_v35 = vrot.slane %v10589_v19, 4  ;;  %v13298_v52 = vpack.c.bf16 %v10383_v49, %v10383_v49  ;;  %v10907_v53 = vld [vmem:[#allocation4 + $0x30] sm:$0xf] }
 0x919   : > { %10895 = vst [vmem:[#allocation4 + $0x18] sm:$0xf] %v10894_v44  ;;  %v10885_v46 = vsel %vm18335_vm5, %v10567_v62, %v10884_v42  ;;  %v10575_v8 = vor.u32 %v10573_v54, %v10572_v30  ;;  %v10577_v4 = vrot.slane %v10572_v30, 4  ;;  %v13296_v43 = vpack.c.bf16 %v10381_v9, %v10381_v9  ;;  %v14425_v58 = vpop.f32.mrb[16].mxu0  ;;  %v10900_v42 = vld [vmem:[#allocation4 + $0x24] sm:$0xf] }
 0x91a   : > { %10886 = vst [vmem:[#allocation4 + $0xc] sm:$0xf] %v10885_v46  ;;  %v10593_v61 = vsel %vm16062_vm10, %v10585_v20, %v10592_v23  ;;  %v10898_v40 = vsel %vm18342_vm7, %v10594_v35, %v10897_v39  ;;  %v10613_v18 = vshrl.u32 %v13298_v52, 16  ;;  %v10616_v2 = vshll.u32 %v13298_v52, 16  ;;  %v10211_v0 = vpop.f32.mrb[17].mxu0 }
 0x91b   : > { %10896 = vst.msk [vmem:[#allocation4 + $0x1c] sm:$0xf] %vm10409_vm2, %v10593_v61  ;;  %10899 = vst [vmem:[#allocation4 + $0x20] sm:$0x1] %v10898_v40  ;;  %v10576_v51 = vsel %vm16062_vm10, %v10568_v29, %v10575_v8  ;;  %v10891_v14 = vsel %vm18342_vm7, %v10577_v4, %v10890_v63  ;;  %v10596_v7 = vshrl.u32 %v13296_v43, 16  ;;  %v10599_v50 = vshll.u32 %v13296_v43, 16 }
 0x91c   : > { %v14426_v27 = vpop.f32.mrb[18].mxu0  ;;  %10887 = vst.msk [vmem:[#allocation4 + $0x10] sm:$0xf] %vm10409_vm2, %v10576_v51  ;;  %10892 = vst [vmem:[#allocation4 + $0x14] sm:$0x1] %v10891_v14  ;;  %v18360_v17 = vrot.slane %v10613_v18, 7  ;;  %v14467_v45 = vadd.f32 %v14422_v11, %v17921_v6  ;;  %v14468_v10 = vadd.f32 %v10198_v13, %v17923_v33  ;;  %v14469_v56 = vadd.f32 %v14425_v58, %v17927_v25 }
 0x91d   : > { %v10214_v60 = vpop.f32.mrb[19].mxu0  ;;  %v18365_v47 = vrot.slane %v10596_v7, 7  ;;  %v14470_v1 = vadd.f32 %v10211_v0, %v17931_v48  ;;  %v14471_v54 = vadd.f32 %v14426_v27, %v17933_v26 }
 0x91e   : > { %v14472_v36 = vadd.f32 %v10214_v60, %v17935_v37  ;;  %v10618_v31 = vor.u32 %v10616_v2, %v18360_v17  ;;  %v10619_v20 = vrot.slane %v18360_v17, 4  ;;  %v10352_v6 = vadd.f32 %v14467_v45, %v18316_v41  ;;  %v10911_v17 = vld [vmem:[#allocation4 + $0x38] sm:$0x1] }
 0x91f   : > { %v10350_v33 = vadd.f32 %v14468_v10, %v18316_v41  ;;  %v10601_v25 = vor.u32 %v10599_v50, %v18365_v47  ;;  %v10602_v11 = vrot.slane %v18365_v47, 4  ;;  %v10355_v13 = vadd.f32 %v14469_v56, %v18316_v41  ;;  %v10904_v56 = vld [vmem:[#allocation4 + $0x2c] sm:$0x1] }
 0x920   : > { %v10353_v48 = vadd.f32 %v14470_v1, %v18316_v41  ;;  %v10908_v26 = vsel %vm18335_vm5, %v10618_v31, %v10907_v53  ;;  %v10384_v37 = vmax.f32 %v10352_v6, 0.0  ;;  %v10356_v49 = vadd.f32 %v14471_v54, %v18316_v41  ;;  %v10921_v53 = vld [vmem:[#allocation4 + $0x48] sm:$0xf]  ;;  %v10914_v6 = vld [vmem:[#allocation4 + $0x3c] sm:$0xf] }
 0x921   : > { %v10382_v19 = vmax.f32 %v10350_v33, 0.0  ;;  %10909 = vst [vmem:[#allocation4 + $0x30] sm:$0xf] %v10908_v26  ;;  %v10901_v62 = vsel %vm18335_vm5, %v10601_v25, %v10900_v42  ;;  %v10387_v29 = vmax.f32 %v10355_v13, 0.0  ;;  %v10354_v30 = vadd.f32 %v14472_v36, %v18316_v41  ;;  %v14429_v9 = vpop.f32.mrb[20].mxu0 }
 0x922   : > { %v10385_v39 = vmax.f32 %v10353_v48, 0.0  ;;  %10902 = vst [vmem:[#allocation4 + $0x24] sm:$0xf] %v10901_v62  ;;  %v13299_v44 = vpack.c.bf16 %v10384_v37, %v10384_v37  ;;  %v10388_v35 = vmax.f32 %v10356_v49, 0.0  ;;  %v14473_v63 = vadd.f32 %v14429_v9, %v17939_v22  ;;  %v10227_v52 = vpop.f32.mrb[21].mxu0 }
 0x923   : > { %v13297_v23 = vpack.c.bf16 %v10382_v19, %v10382_v19  ;;  %v13302_v46 = vpack.c.bf16 %v10387_v29, %v10387_v29  ;;  %v10386_v4 = vmax.f32 %v10354_v30, 0.0  ;;  %v14474_v43 = vadd.f32 %v10227_v52, %v17943_v21  ;;  %v14430_v58 = vpop.f32.mrb[22].mxu0 }
 0x924   : > { %v13300_v8 = vpack.c.bf16 %v10385_v39, %v10385_v39  ;;  %v10621_v61 = vshrl.u32 %v13299_v44, 16  ;;  %v10624_v40 = vshll.u32 %v13299_v44, 16  ;;  %v10230_v0 = vpop.f32.mrb[23].mxu0  ;;  %v13303_v22 = vpack.c.bf16 %v10388_v35, %v10388_v35 }
 0x925   : > { %v10604_v18 = vshrl.u32 %v13297_v23, 16  ;;  %v10607_v2 = vshll.u32 %v13297_v23, 16  ;;  %v10647_v51 = vshrl.u32 %v13302_v46, 16  ;;  %v10650_v14 = vshll.u32 %v13302_v46, 16 }
 0x926   : > { %v10630_v7 = vshrl.u32 %v13300_v8, 16  ;;  %v10633_v50 = vshll.u32 %v13300_v8, 16  ;;  %v10623_v27 = vrot.slane %v10621_v61, 7  ;;  %v13301_v10 = vpack.c.bf16 %v10386_v4, %v10386_v4  ;;  %v10925_v61 = vld [vmem:[#allocation4 + $0x50] sm:$0x1] }
 0x927   : > { %v10606_v45 = vrot.slane %v10604_v18, 7  ;;  %v10649_v60 = vrot.slane %v10647_v51, 7  ;;  %v10359_v21 = vadd.f32 %v14473_v63, %v18316_v41  ;;  %v10357_v1 = vadd.f32 %v14474_v43, %v18316_v41 }
 0x928   : > { %v10632_v47 = vrot.slane %v10630_v7, 7  ;;  %v10626_v54 = vor.u32 %v10624_v40, %v10623_v27  ;;  %v10628_v36 = vrot.slane %v10623_v27, 4  ;;  %v10655_v30 = vshrl.u32 %v13303_v22, 16 }
 0x929   : > { %v10609_v31 = vor.u32 %v10607_v2, %v10606_v45  ;;  %v10611_v42 = vrot.slane %v10606_v45, 4  ;;  %v10652_v33 = vor.u32 %v10650_v14, %v10649_v60  ;;  %v10653_v25 = vrot.slane %v10649_v60, 4  ;;  %v14433_v26 = vpop.f32.mrb[24].mxu0 }
 0x92a   : > { %v10635_v13 = vor.u32 %v10633_v50, %v10632_v47  ;;  %v10636_v48 = vrot.slane %v10632_v47, 4  ;;  %v10627_v37 = vsel %vm16062_vm10, %v10619_v20, %v10626_v54  ;;  %v10912_v19 = vsel %vm18342_vm7, %v10628_v36, %v10911_v17  ;;  %v10243_v29 = vpop.f32.mrb[25].mxu0  ;;  %v10918_v50 = vld [vmem:[#allocation4 + $0x44] sm:$0x1] }
 0x92b   : > { %v10610_v49 = vsel %vm16062_vm10, %v10602_v11, %v10609_v31  ;;  %v10905_v62 = vsel %vm18342_vm7, %v10611_v42, %v10904_v56  ;;  %10910 = vst.msk [vmem:[#allocation4 + $0x34] sm:$0xf] %vm10409_vm2, %v10627_v37  ;;  %10913 = vst [vmem:[#allocation4 + $0x38] sm:$0x1] %v10912_v19  ;;  %v10922_v39 = vsel %vm18335_vm5, %v10652_v33, %v10921_v53  ;;  %v10658_v9 = vshll.u32 %v13303_v22, 16  ;;  %v14434_v44 = vpop.f32.mrb[26].mxu0 }
 0x92c   : > { %10903 = vst.msk [vmem:[#allocation4 + $0x28] sm:$0xf] %vm10409_vm2, %v10610_v49  ;;  %10906 = vst [vmem:[#allocation4 + $0x2c] sm:$0x1] %v10905_v62  ;;  %v10915_v20 = vsel %vm18335_vm5, %v10635_v13, %v10914_v6  ;;  %v10638_v11 = vshrl.u32 %v13301_v10, 16  ;;  %v10641_v23 = vshll.u32 %v13301_v10, 16  ;;  %v14475_v8 = vadd.f32 %v14430_v58, %v17945_v3 }
 0x92d   : > { %10923 = vst [vmem:[#allocation4 + $0x48] sm:$0xf] %v10922_v39  ;;  %10916 = vst [vmem:[#allocation4 + $0x3c] sm:$0xf] %v10915_v20  ;;  %v10391_v35 = vmax.f32 %v10359_v21, 0.0  ;;  %v10389_v63 = vmax.f32 %v10357_v1, 0.0  ;;  %v14476_v4 = vadd.f32 %v10230_v0, %v17947_v12  ;;  %v14477_v43 = vadd.f32 %v14433_v26, %v17951_v24 }
 0x92e   : > { %v18402_v52 = vpop.f32.mrb[27].mxu0  ;;  %v10657_v46 = vrot.slane %v10655_v30, 7  ;;  %v10640_v40 = vrot.slane %v10638_v11, 7  ;;  %v14478_v51 = vadd.f32 %v10243_v29, %v17955_v5  ;;  %v10360_v27 = vadd.f32 %v14475_v8, %v18316_v41  ;;  %v10935_v0 = vld [vmem:[#allocation4 + $0x60] sm:$0xf] }
 0x92f   : > { %v13306_v18 = vpack.c.bf16 %v10391_v35, %v10391_v35  ;;  %v13304_v2 = vpack.c.bf16 %v10389_v63, %v10389_v63  ;;  %v10358_v17 = vadd.f32 %v14476_v4, %v18316_v41  ;;  %v10928_v21 = vld [vmem:[#allocation4 + $0x54] sm:$0xf]  ;;  %v10363_v42 = vadd.f32 %v14477_v43, %v18316_v41 }
 0x930   : > { %v10660_v14 = vor.u32 %v10658_v9, %v10657_v46  ;;  %v10662_v7 = vrot.slane %v10657_v46, 4  ;;  %v10643_v45 = vor.u32 %v10641_v23, %v10640_v40  ;;  %v10645_v22 = vrot.slane %v10640_v40, 4  ;;  %v10932_v46 = vld [vmem:[#allocation4 + $0x5c] sm:$0x1] }
 0x931   : > { %v10681_v3 = vshrl.u32 %v13306_v18, 16  ;;  %v10684_v58 = vshll.u32 %v13306_v18, 16  ;;  %v10664_v10 = vshrl.u32 %v13304_v2, 16  ;;  %v10667_v5 = vshll.u32 %v13304_v2, 16  ;;  %v14437_v56 = vpop.f32.mrb[28].mxu0 }
 0x932   : > { %v10661_v12 = vsel %vm16062_vm10, %v10653_v25, %v10660_v14  ;;  %v10926_v24 = vsel %vm18342_vm7, %v10662_v7, %v10925_v61  ;;  %v10644_v60 = vsel %vm16062_vm10, %v10636_v48, %v10643_v45  ;;  %v10919_v53 = vsel %vm18342_vm7, %v10645_v22, %v10918_v50  ;;  %v18419_v54 = vpop.f32.mrb[29].mxu0 }
 0x933   : > { %10924 = vst.msk [vmem:[#allocation4 + $0x4c] sm:$0xf] %vm10409_vm2, %v10661_v12  ;;  %10927 = vst [vmem:[#allocation4 + $0x50] sm:$0x1] %v10926_v24  ;;  %v10683_v47 = vrot.slane %v10681_v3, 7  ;;  %v10392_v1 = vmax.f32 %v10360_v27, 0.0  ;;  %v10361_v6 = vadd.f32 %v14478_v51, %v18316_v41  ;;  %v14479_v26 = vadd.f32 %v14434_v44, %v17957_v59 }
 0x934   : > { %10917 = vst.msk [vmem:[#allocation4 + $0x40] sm:$0xf] %vm10409_vm2, %v10644_v60  ;;  %10920 = vst [vmem:[#allocation4 + $0x44] sm:$0x1] %v10919_v53  ;;  %v10666_v36 = vrot.slane %v10664_v10, 7  ;;  %v10390_v31 = vmax.f32 %v10358_v17, 0.0  ;;  %v14480_v43 = vadd.f32 %v18402_v52, %v17959_v57  ;;  %v14481_v2 = vadd.f32 %v14437_v56, %v17963_v55 }
 0x935   : > { %v18424_v33 = vpop.f32.mrb[30].mxu0  ;;  %v10686_v25 = vor.u32 %v10684_v58, %v10683_v47  ;;  %v10687_v13 = vrot.slane %v10683_v47, 4  ;;  %v13307_v48 = vpack.c.bf16 %v10392_v1, %v10392_v1  ;;  %v10395_v29 = vmax.f32 %v10363_v42, 0.0  ;;  %v10939_v44 = vld [vmem:[#allocation4 + $0x68] sm:$0x1] }
 0x936   : > { %v18427_v37 = vpop.f32.mrb[31].mxu0  ;;  %v10669_v19 = vor.u32 %v10667_v5, %v10666_v36  ;;  %v10670_v49 = vrot.slane %v10666_v36, 4  ;;  %v13305_v62 = vpack.c.bf16 %v10390_v31, %v10390_v31  ;;  %v10393_v9 = vmax.f32 %v10361_v6, 0.0  ;;  %v10949_v55 = vld [vmem:[#allocation4 + $0x78] sm:$0xf] }
 0x937   : > { %v10936_v39 = vsel %vm18335_vm5, %v10686_v25, %v10935_v0  ;;  %v10689_v20 = vshrl.u32 %v13307_v48, 16  ;;  %v10692_v30 = vshll.u32 %v13307_v48, 16  ;;  %v13310_v63 = vpack.c.bf16 %v10395_v29, %v10395_v29  ;;  %v10942_v47 = vld [vmem:[#allocation4 + $0x6c] sm:$0xf] }
 0x938   : > { %10937 = vst [vmem:[#allocation4 + $0x60] sm:$0xf] %v10936_v39  ;;  %v10929_v11 = vsel %vm18335_vm5, %v10669_v19, %v10928_v21  ;;  %v10672_v23 = vshrl.u32 %v13305_v62, 16  ;;  %v10675_v35 = vshll.u32 %v13305_v62, 16  ;;  %v13308_v8 = vpack.c.bf16 %v10393_v9, %v10393_v9 }
 0x939   : > { %10930 = vst [vmem:[#allocation4 + $0x54] sm:$0xf] %v10929_v11  ;;  %v10691_v59 = vrot.slane %v10689_v20, 7  ;;  %v10364_v4 = vadd.f32 %v14479_v26, %v18316_v41  ;;  %v10715_v40 = vshrl.u32 %v13310_v63, 16  ;;  %v10718_v18 = vshll.u32 %v13310_v63, 16  ;;  %v14441_v51 = vpop.f32.mrb[32].mxu0 }
 0x93a   : > { %v10674_v61 = vrot.slane %v10672_v23, 7  ;;  %v10698_v50 = vshrl.u32 %v13308_v8, 16  ;;  %v10701_v27 = vshll.u32 %v13308_v8, 16  ;;  %v18437_v17 = vpop.f32.mrb[33].mxu0  ;;  %v10362_v0 = vadd.f32 %v14480_v43, %v18316_v41  ;;  %v19650_v23 = vld [vmem:[#allocation37_spill] sm:$0xff] }
 0x93b   : > { %v10694_v14 = vor.u32 %v10692_v30, %v10691_v59  ;;  %v10696_v7 = vrot.slane %v10691_v59, 4  ;;  %v10717_v3 = vrot.slane %v10715_v40, 7  ;;  %v10396_v58 = vmax.f32 %v10364_v4, 0.0  ;;  %v18439_v12 = vpop.f32.mrb[34].mxu0  ;;  %v19649_v30 = vld [vmem:[#allocation38_spill] sm:$0xff]  ;;  %v15184_v15 = vld [vmem:[#allocation4 + $0x3c] sm:$0xff]  }
 0x93c   : > { %v10677_v45 = vor.u32 %v10675_v35, %v10674_v61  ;;  %v10679_v22 = vrot.slane %v10674_v61, 4  ;;  %v18445_v24 = vrot.slane %v10698_v50, 7  ;;  %v18448_v10 = vpop.f32.mrb[35].mxu0  ;;  %v10394_v31 = vmax.f32 %v10362_v0, 0.0  ;;  %v10953_v59 = vld [vmem:[#allocation4 + $0x80] sm:$0x1] }
 0x93d   : > { %v10695_v57 = vsel %vm16062_vm10, %v10687_v13, %v10694_v14  ;;  %v10940_v52 = vsel %vm18342_vm7, %v10696_v7, %v10939_v44  ;;  %v10720_v60 = vor.u32 %v10718_v18, %v10717_v3  ;;  %v10721_v53 = vrot.slane %v10717_v3, 4  ;;  %v19648_v13 = vld [vmem:[#allocation36_spill] sm:$0xff]  ;;  %v10946_v14 = vld [vmem:[#allocation4 + $0x74] sm:$0x1] }
 0x93e   : > { %10938 = vst.msk [vmem:[#allocation4 + $0x64] sm:$0xf] %vm10409_vm2, %v10695_v57  ;;  %10941 = vst [vmem:[#allocation4 + $0x68] sm:$0x1] %v10940_v52  ;;  %v10678_v5 = vsel %vm16062_vm10, %v10670_v49, %v10677_v45  ;;  %v10933_v56 = vsel %vm18342_vm7, %v10679_v22, %v10932_v46  ;;  %v10703_v21 = vor.u32 %v10701_v27, %v18445_v24  ;;  %v10704_v1 = vrot.slane %v18445_v24, 4 }
 0x93f   : > { %10931 = vst.msk [vmem:[#allocation4 + $0x58] sm:$0xf] %vm10409_vm2, %v10678_v5  ;;  %10934 = vst [vmem:[#allocation4 + $0x5c] sm:$0x1] %v10933_v56  ;;  %v13311_v36 = vpack.c.bf16 %v10396_v58, %v10396_v58  ;;  %v10950_v42 = vsel %vm18335_vm5, %v10720_v60, %v10949_v55  ;;  %v10367_v6 = vadd.f32 %v14481_v2, %v18316_v41  ;;  %v10963_v56 = vld [vmem:[#allocation4 + $0x90] sm:$0xf] }
 0x940   : > { %v14482_v25 = vadd.f32 %v18419_v54, %v17967_v34  ;;  %v14483_v48 = vadd.f32 %v18424_v33, %v19648_v13  ;;  %10951 = vst [vmem:[#allocation4 + $0x78] sm:$0xf] %v10950_v42  ;;  %v10943_v26 = vsel %vm18335_vm5, %v10703_v21, %v10942_v47  ;;  %v13309_v62 = vpack.c.bf16 %v10394_v31, %v10394_v31  ;;  %v10956_v42 = vld [vmem:[#allocation4 + $0x84] sm:$0xf] }
 0x941   : > { %v10723_v19 = vshrl.u32 %v13311_v36, 16  ;;  %v10726_v49 = vshll.u32 %v13311_v36, 16  ;;  %10944 = vst [vmem:[#allocation4 + $0x6c] sm:$0xf] %v10943_v26  ;;  %v10399_v29 = vmax.f32 %v10367_v6, 0.0  ;;  %v14484_v9 = vadd.f32 %v18427_v37, %v19649_v30  ;;  %v18471_v34 = vpop.f32.mrb[36].mxu0 }
 0x942   : > { %v10365_v39 = vadd.f32 %v14482_v25, %v18316_v41  ;;  %v10368_v20 = vadd.f32 %v14483_v48, %v18316_v41  ;;  %v10706_v33 = vshrl.u32 %v13309_v62, 16  ;;  %v10709_v11 = vshll.u32 %v13309_v62, 16  ;;  %v18474_v63 = vpop.f32.mrb[37].mxu0  ;;  %v19651_v13 = vld [vmem:[#allocation9_spill] sm:$0xff] }
 0x943   : > { %v10725_v54 = vrot.slane %v10723_v19, 7  ;;  %v14485_v35 = vadd.f32 %v14441_v51, %v19650_v23  ;;  %v13314_v44 = vpack.c.bf16 %v10399_v29, %v10399_v29  ;;  %v10366_v4 = vadd.f32 %v14484_v9, %v18316_v41  ;;  %v18477_v43 = vpop.f32.mrb[38].mxu0 }
 0x944   : > { %v10397_v46 = vmax.f32 %v10365_v39, 0.0  ;;  %v10400_v8 = vmax.f32 %v10368_v20, 0.0  ;;  %v10708_v37 = vrot.slane %v10706_v33, 7  ;;  %v18480_v2 = vpop.f32.mrb[39].mxu0  ;;  %v14486_v48 = vadd.f32 %v18437_v17, %v19651_v13  ;;  %v10967_v39 = vld [vmem:[#allocation4 + $0x98] sm:$0x1] }
 0x945   : > { %v10728_v61 = vor.u32 %v10726_v49, %v10725_v54  ;;  %v10730_v40 = vrot.slane %v10725_v54, 4  ;;  %v10371_v18 = vadd.f32 %v14485_v35, %v18316_v41  ;;  %v10749_v7 = vshrl.u32 %v13314_v44, 16 }
 0x946   : > { %v10752_v51 = vshll.u32 %v13314_v44, 16  ;;  %v13312_v50 = vpack.c.bf16 %v10397_v46, %v10397_v46  ;;  %v13315_v27 = vpack.c.bf16 %v10400_v8, %v10400_v8  ;;  %v10711_v3 = vor.u32 %v10709_v11, %v10708_v37  ;;  %v10960_v46 = vld [vmem:[#allocation4 + $0x8c] sm:$0x1] }
 0x947   : > { %v10729_v45 = vsel %vm16062_vm10, %v10721_v53, %v10728_v61  ;;  %v10954_v22 = vsel %vm18342_vm7, %v10730_v40, %v10953_v59  ;;  %v10713_v58 = vrot.slane %v10708_v37, 4  ;;  %v10751_v57 = vrot.slane %v10749_v7, 7  ;;  %v19653_v61 = vld [vmem:[#allocation35_spill] sm:$0xff]  ;;  %v19654_v37 = vld [vmem:[#allocation30_spill] sm:$0xff] }
 0x948   : > { %10952 = vst.msk [vmem:[#allocation4 + $0x7c] sm:$0xf] %vm10409_vm2, %v10729_v45  ;;  %10955 = vst [vmem:[#allocation4 + $0x80] sm:$0x1] %v10954_v22  ;;  %v10732_v52 = vshrl.u32 %v13312_v50, 16  ;;  %v10735_v55 = vshll.u32 %v13312_v50, 16  ;;  %v10712_v0 = vsel %vm16062_vm10, %v10704_v1, %v10711_v3  ;;  %v14488_v40 = vadd.f32 %v18448_v10, %v19653_v61 }
 0x949   : > { %v10757_v24 = vshrl.u32 %v13315_v27, 16  ;;  %v10947_v5 = vsel %vm18342_vm7, %v10713_v58, %v10946_v14  ;;  %v10760_v60 = vshll.u32 %v13315_v27, 16  ;;  %v10398_v53 = vmax.f32 %v10366_v4, 0.0  ;;  %10945 = vst.msk [vmem:[#allocation4 + $0x70] sm:$0xf] %vm10409_vm2, %v10712_v0  ;;  %v19652_v1 = vld [vmem:[#allocation31_spill] sm:$0xff] }
 0x94a   : > { %10948 = vst [vmem:[#allocation4 + $0x74] sm:$0x1] %v10947_v5  ;;  %v10754_v47 = vor.u32 %v10752_v51, %v10751_v57  ;;  %v10755_v21 = vrot.slane %v10751_v57, 4  ;;  %v10734_v36 = vrot.slane %v10732_v52, 7  ;;  %v10403_v25 = vmax.f32 %v10371_v18, 0.0  ;;  %v19655_v50 = vld [vmem:[#allocation25_spill] sm:$0xff] }
 0x94b   : > { %v10759_v31 = vrot.slane %v10757_v24, 7  ;;  %v13313_v6 = vpack.c.bf16 %v10398_v53, %v10398_v53  ;;  %v14487_v26 = vadd.f32 %v18439_v12, %v19652_v1  ;;  %v10369_v12 = vadd.f32 %v14486_v48, %v18316_v41  ;;  %v10977_v22 = vld [vmem:[#allocation4 + $0xa8] sm:$0xf]  ;;  %v10970_v53 = vld [vmem:[#allocation4 + $0x9c] sm:$0xf] }
 0x94c   : > { %v10964_v19 = vsel %vm18335_vm5, %v10754_v47, %v10963_v56  ;;  %v10737_v49 = vor.u32 %v10735_v55, %v10734_v36  ;;  %v10738_v62 = vrot.slane %v10734_v36, 4  ;;  %v13318_v54 = vpack.c.bf16 %v10403_v25, %v10403_v25  ;;  %v19656_v25 = vld [vmem:[#allocation33_spill] sm:$0xff]  ;;  %v10981_v48 = vld [vmem:[#allocation4 + $0xb0] sm:$0x1] }
 0x94d   : > { %v10762_v29 = vor.u32 %v10760_v60, %v10759_v31  ;;  %10965 = vst [vmem:[#allocation4 + $0x90] sm:$0xf] %v10964_v19  ;;  %v10764_v20 = vrot.slane %v10759_v31, 4  ;;  %v10740_v30 = vshrl.u32 %v13313_v6, 16  ;;  %v10743_v9 = vshll.u32 %v13313_v6, 16 }
 0x94e   : > { %v10957_v33 = vsel %vm18335_vm5, %v10737_v49, %v10956_v42  ;;  %v10372_v11 = vadd.f32 %v14487_v26, %v18316_v41  ;;  %v10783_v59 = vshrl.u32 %v13318_v54, 16  ;;  %v10786_v44 = vshll.u32 %v13318_v54, 16 }
 0x94f   : > { %v10763_v17 = vsel %vm16062_vm10, %v10755_v21, %v10762_v29  ;;  %10958 = vst [vmem:[#allocation4 + $0x84] sm:$0xf] %v10957_v33  ;;  %v10968_v23 = vsel %vm18342_vm7, %v10764_v20, %v10967_v39  ;;  %v10742_v35 = vrot.slane %v10740_v30, 7  ;;  %v10401_v8 = vmax.f32 %v10369_v12, 0.0 }
 0x950   : > { %10966 = vst.msk [vmem:[#allocation4 + $0x94] sm:$0xf] %vm10409_vm2, %v10763_v17  ;;  %10969 = vst [vmem:[#allocation4 + $0x98] sm:$0x1] %v10968_v23  ;;  %v10404_v4 = vmax.f32 %v10372_v11, 0.0  ;;  %v14489_v18 = vadd.f32 %v18471_v34, %v19654_v37  ;;  %v10785_v51 = vrot.slane %v10783_v59, 7  ;;  %v14490_v27 = vadd.f32 %v18474_v63, %v19655_v50 }
 0x951   : > { %v10745_v14 = vor.u32 %v10743_v9, %v10742_v35  ;;  %v10747_v7 = vrot.slane %v10742_v35, 4  ;;  %v18513_v45 = vld [vmem:[#allocation4 + $0x6c] sm:$0xff]   ;;  %v13316_v3 = vpack.c.bf16 %v10401_v8, %v10401_v8  ;;  %v10370_v57 = vadd.f32 %v14488_v40, %v18316_v41  ;;  %v10991_v8 = vld [vmem:[#allocation4 + $0xc0] sm:$0xf] }
 0x952   : > { %v13319_v58 = vpack.c.bf16 %v10404_v4, %v10404_v4  ;;  %v10375_v52 = vadd.f32 %v14489_v18, %v18316_v41  ;;  %v10788_v55 = vor.u32 %v10786_v44, %v10785_v51  ;;  %15023 = vmatprep.subr.msk.bf16.mxu1 %vm486_vm0, %v18513_v45  ;;  %v15176_v63 = vld [vmem:[#allocation4 + $0xc] sm:$0xff]   ;;  %v10373_v36 = vadd.f32 %v14490_v27, %v18316_v41  ;;  %v15178_v44 = vld [vmem:[#allocation4 + $0x18] sm:$0xff]  }
 0x953   : > { %v10746_v10 = vsel %vm16062_vm10, %v10738_v62, %v10745_v14  ;;  %v10961_v34 = vsel %vm18342_vm7, %v10747_v7, %v10960_v46  ;;  %v10766_v24 = vshrl.u32 %v13316_v3, 16  ;;  %v10769_v0 = vshll.u32 %v13316_v3, 16  ;;  %v18534_v62 = vld [vmem:[#allocation4 + $0x78] sm:$0xff]   ;;  %v10974_v46 = vld [vmem:[#allocation4 + $0xa4] sm:$0x1] }
 0x954   : > { %10959 = vst.msk [vmem:[#allocation4 + $0x88] sm:$0xf] %vm10409_vm2, %v10746_v10  ;;  %10962 = vst [vmem:[#allocation4 + $0x8c] sm:$0x1] %v10961_v34  ;;  %v10791_v5 = vshrl.u32 %v13319_v58, 16  ;;  %v10794_v56 = vshll.u32 %v13319_v58, 16  ;;  %v10978_v60 = vsel %vm18335_vm5, %v10788_v55, %v10977_v22  ;;  %v14491_v6 = vadd.f32 %v18477_v43, %v17996_v16 }
 0x955   : > { %v10402_v47 = vmax.f32 %v10370_v57, 0.0  ;;  %v10407_v21 = vmax.f32 %v10375_v52, 0.0  ;;  %10979 = vst [vmem:[#allocation4 + $0xa8] sm:$0xf] %v10978_v60  ;;  %v10768_v31 = vrot.slane %v10766_v24, 7  ;;  %v14492_v13 = vadd.f32 %v18480_v2, %v19656_v25 }
 0x956   : > { %v10793_v42 = vrot.slane %v10791_v5, 7  ;;  %v10405_v19 = vmax.f32 %v10373_v36, 0.0  ;;  %v18532_v49 = vsel %vm486_vm0, %v15176_v63, 0  ;;  %v10789_v29 = vrot.slane %v10785_v51, 4  ;;  %v10984_v3 = vld [vmem:[#allocation4 + $0xb4] sm:$0xf] }
 0x957   : > { %v13317_v1 = vpack.c.bf16 %v10402_v47, %v10402_v47  ;;  %v13322_v26 = vpack.c.bf16 %v10407_v21, %v10407_v21  ;;  %v10771_v39 = vor.u32 %v10769_v0, %v10768_v31  ;;  %13648 = vmatpush3.bf16.xpose.msra.mxu1 %v18532_v49  ;;  %v10376_v35 = vadd.f32 %v14491_v6, %v18316_v41  ;;  %v15180_v0 = vld [vmem:[#allocation4 + $0x24] sm:$0xff]   ;;  %v18568_v38 = vld [vmem:[#allocation4 + $0x90] sm:$0xff]  }
 0x958   : > { %v10796_v20 = vor.u32 %v10794_v56, %v10793_v42  ;;  %v10798_v30 = vrot.slane %v10793_v42, 4  ;;  %15024 = vmatprep.subr.msk.bf16.mxu1 %vm486_vm0, %v18534_v62  ;;  %v13320_v12 = vpack.c.bf16 %v10405_v19, %v10405_v19  ;;  %v10374_v59 = vadd.f32 %v14492_v13, %v18316_v41  ;;  %v10995_v36 = vld [vmem:[#allocation4 + $0xc8] sm:$0x1] }
 0x959   : > { %v10774_v9 = vshrl.u32 %v13317_v1, 16  ;;  %v10777_v16 = vshll.u32 %v13317_v1, 16  ;;  %v10817_v43 = vshrl.u32 %v13322_v26, 16  ;;  %v10820_v54 = vshll.u32 %v13322_v26, 16 }
 0x95a   : > { %v10971_v2 = vsel %vm18335_vm5, %v10771_v39, %v10970_v53  ;;  %v10797_v33 = vsel %vm16062_vm10, %v10789_v29, %v10796_v20  ;;  %v10982_v17 = vsel %vm18342_vm7, %v10798_v30, %v10981_v48  ;;  %v10800_v4 = vshrl.u32 %v13320_v12, 16  ;;  %v15182_v39 = vld [vmem:[#allocation4 + $0x30] sm:$0xff]  }
 0x95b   : > { %10972 = vst [vmem:[#allocation4 + $0x9c] sm:$0xf] %v10971_v2  ;;  %10980 = vst.msk [vmem:[#allocation4 + $0xac] sm:$0xf] %vm10409_vm2, %v10797_v33  ;;  %v10776_v11 = vrot.slane %v10774_v9, 7  ;;  %v10819_v23 = vrot.slane %v10817_v43, 7 }
 0x95c   : > { %10983 = vst [vmem:[#allocation4 + $0xb0] sm:$0x1] %v10982_v17  ;;  %v10772_v61 = vrot.slane %v10768_v31, 4  ;;  %v10802_v14 = vrot.slane %v10800_v4, 7  ;;  %v10803_v7 = vshll.u32 %v13320_v12, 16  ;;  %v10408_v51 = vmax.f32 %v10376_v35, 0.0 }
 0x95d   : > { %v10779_v40 = vor.u32 %v10777_v16, %v10776_v11  ;;  %v10781_v37 = vrot.slane %v10776_v11, 4  ;;  %v10822_v18 = vor.u32 %v10820_v54, %v10819_v23  ;;  %v10406_v50 = vmax.f32 %v10374_v59, 0.0  ;;  %v18557_v57 = vld [vmem:[#allocation4 + $0x84] sm:$0xff]   ;;  %v10988_v31 = vld [vmem:[#allocation4 + $0xbc] sm:$0x1]  ;;  %v15188_v2 = vld [vmem:[#allocation4 + $0x54] sm:$0xff]  }
 0x95e   : > { %v18555_v58 = vsel %vm486_vm0, %v15178_v44, 0  ;;  %v10805_v52 = vor.u32 %v10803_v7, %v10802_v14  ;;  %v13323_v10 = vpack.c.bf16 %v10408_v51, %v10408_v51  ;;  %v10823_v47 = vrot.slane %v10819_v23, 4  ;;  %v15186_v16 = vld [vmem:[#allocation4 + $0x48] sm:$0xff]   ;;  %v15190_v12 = vld [vmem:[#allocation4 + $0x60] sm:$0xff]   ;;  %v18624_v59 = vld [vmem:[%s19371_s7] sm:$0xf] }
 0x95f   : > { %v10780_v27 = vsel %vm16062_vm10, %v10772_v61, %v10779_v40  ;;  %v10975_v22 = vsel %vm18342_vm7, %v10781_v37, %v10974_v46  ;;  %v10992_v41 = vsel %vm18335_vm5, %v10822_v18, %v10991_v8  ;;  %v13321_v34 = vpack.c.bf16 %v10406_v50, %v10406_v50  ;;  %13650 = vmatpush3.bf16.xpose.msra.mxu1 %v18555_v58  ;;  %v15191_v23 = vld [vmem:[#allocation4] sm:$0xff]   ;;  %v15259_v44 = vld [vmem:[%s19371_s7 + $0xc] sm:$0xf]  ;;  %v18643_v46 = vld [vmem:[#allocation4 + $0x88] sm:$0xf] }
 0x960   : > { %10973 = vst.msk [vmem:[#allocation4 + $0xa0] sm:$0xf] %vm10409_vm2, %v10780_v27  ;;  %10976 = vst [vmem:[#allocation4 + $0xa4] sm:$0x1] %v10975_v22  ;;  %15025 = vmatprep.subr.msk.bf16.mxu1 %vm486_vm0, %v18557_v57  ;;  %v10985_v55 = vsel %vm18335_vm5, %v10805_v52, %v10984_v3  ;;  %v10825_v63 = vshrl.u32 %v13323_v10, 16  ;;  %v10828_v56 = vshll.u32 %v13323_v10, 16 }
 0x961   : > { %10993 = vst [vmem:[#allocation4 + $0xc0] sm:$0xf] %v10992_v41  ;;  %v10808_v24 = vshrl.u32 %v13321_v34, 16  ;;  %10986 = vst [vmem:[#allocation4 + $0xb4] sm:$0xf] %v10985_v55  ;;  %v10811_v53 = vshll.u32 %v13321_v34, 16 }
 0x962   : > { %v10827_v5 = vrot.slane %v10825_v63, 7  ;;  %v10806_v21 = vrot.slane %v10802_v14, 4  ;;  %v18566_v48 = vsel %vm486_vm0, %v15180_v0, 0  ;;  %v18584_v20 = vsel %vm486_vm0, %v15182_v39, 0  ;;  %v18594_v9 = vld [vmem:[#allocation4 + $0xa8] sm:$0xff]  }
 0x963   : > { %v10810_v60 = vrot.slane %v10808_v24, 7  ;;  %v18592_v30 = vsel %vm486_vm0, %v15184_v15, 0  ;;  %v18600_v43 = vsel %vm486_vm0, %v15186_v16, 0  ;;  %v18608_v33 = vsel %vm486_vm0, %v15188_v2, 0  ;;  %v12055_v8 = vld [vmem:[#allocation4 + $0x84] sm:$0xe] }
 0x964   : > { %v10830_v42 = vor.u32 %v10828_v56, %v10827_v5  ;;  %v10832_v6 = vrot.slane %v10827_v5, 4  ;;  %v18616_v11 = vsel %vm486_vm0, %v15190_v12, 0  ;;  %v11215_v35 = vsel %vm486_vm0, %v15191_v23, 0  ;;  %v18650_v4 = vld [vmem:[#allocation4 + $0x28] sm:$0xf] }
 0x965   : > { %v10813_v25 = vor.u32 %v10811_v53, %v10810_v60  ;;  %v10815_v13 = vrot.slane %v10810_v60, 4  ;;  %v12189_v61 = vrot.slane %v18643_v46, 5  ;;  %v12047_v40 = vld [vmem:[#allocation4 + $0x24] sm:$0xe]  ;;  %v18653_v37 = vld [vmem:[#allocation4 + $0x2c] sm:$0x1] }
 0x966   : > { %v10831_v1 = vsel %vm16062_vm10, %v10823_v47, %v10830_v42  ;;  %v10996_v26 = vsel %vm18342_vm7, %v10832_v6, %v10995_v36  ;;  %v18655_v18 = vld [vmem:[#allocation4 + $0x94] sm:$0xf]  ;;  %v18657_v14 = vld [vmem:[#allocation4 + $0x98] sm:$0x1]  ;;  %v13193_v7 = vrot.slane %v12055_v8, 9  ;;  %v13185_v41 = vrot.slane %v12047_v40, 9 }
 0x967   : > { %v10814_v19 = vsel %vm16062_vm10, %v10806_v21, %v10813_v25  ;;  %v10989_v29 = vsel %vm18342_vm7, %v10815_v13, %v10988_v31  ;;  %13652 = vmatpush3.bf16.xpose.msra.mxu1 %v18566_v48  ;;  %10994 = vst.msk [vmem:[#allocation4 + $0xc4] sm:$0xf] %vm10409_vm2, %v10831_v1  ;;  %10997 = vst [vmem:[#allocation4 + $0xc8] sm:$0x1] %v10996_v26  ;;  %v18586_v28 = vld [vmem:[#allocation4 + $0x9c] sm:$0xff]   ;;  %v12191_v51 = vrot.slane %v12189_v61, 4 }
 0x968   : > { %10987 = vst.msk [vmem:[#allocation4 + $0xb8] sm:$0xf] %vm10409_vm2, %v10814_v19  ;;  %10990 = vst [vmem:[#allocation4 + $0xbc] sm:$0x1] %v10989_v29  ;;  %15026 = vmatprep.subr.msk.bf16.mxu1 %vm486_vm0, %v18568_v38  ;;  %v12056_v27 = vld [vmem:[#allocation4 + $0x90] sm:$0xe]  ;;  %v12190_v55 = vsel %vm16300_vm14, %v13193_v7, %v12189_v61 }
 0x969   : > { %v18660_v22 = vld [vmem:[#allocation4 + $0x34] sm:$0xf]  ;;  %v12133_v3 = vrot.slane %v18650_v4, 5  ;;  %v12048_v52 = vld [vmem:[#allocation4 + $0x30] sm:$0xe]  ;;  %v12136_v24 = vrot.slane %v18653_v37, 5 }
 0x96a   : > { %v18663_v10 = vld [vmem:[#allocation4 + $0x38] sm:$0x1]  ;;  %v18665_v34 = vld [vmem:[#allocation4 + $0xa0] sm:$0xf]  ;;  %v12196_v0 = vrot.slane %v18655_v18, 5  ;;  %v13194_v60 = vrot.slane %v12056_v27, 9 }
 0x96b   : > { %v12135_v56 = vrot.slane %v12133_v3, 4  ;;  %v12199_v53 = vrot.slane %v18657_v14, 5  ;;  %v12057_v47 = vld [vmem:[#allocation4 + $0x9c] sm:$0xe]  ;;  %v18677_v21 = vld [vmem:[#allocation4 + $0xa4] sm:$0x1]  ;;  %v18681_v36 = vsel %vm16300_vm14, %v13185_v41, %v12133_v3 }
 0x96c   : > { %19658 = vst [vmem:[#allocation11_spill] sm:$0xff] %v18681_v36  ;;  %v12198_v31 = vrot.slane %v12196_v0, 4  ;;  %v13186_v42 = vrot.slane %v12048_v52, 9  ;;  %v12140_v6 = vrot.slane %v18660_v22, 5  ;;  %v18686_v25 = vld [vmem:[#allocation4 + $0x40] sm:$0xf]  ;;  %v12197_v1 = vsel %vm16300_vm14, %v13194_v60, %v12196_v0 }
 0x96d   : > { %v18690_v13 = vsel %vm16300_vm14, %v12135_v56, %v12136_v24  ;;  %v12143_v26 = vrot.slane %v18663_v10, 5  ;;  %v12203_v19 = vrot.slane %v18665_v34, 5  ;;  %v18696_v29 = vld [vmem:[#allocation4 + $0xac] sm:$0xf]  ;;  %v13195_v2 = vrot.slane %v12057_v47, 9 }
 0x96e   : > { %v18610_v17 = vld [vmem:[#allocation4 + $0xc0] sm:$0xff]   ;;  %19659 = vst [vmem:[#allocation26_spill] sm:$0xff] %v18690_v13  ;;  %v12200_v15 = vsel %vm16300_vm14, %v12198_v31, %v12199_v53  ;;  %v12142_v16 = vrot.slane %v12140_v6, 4  ;;  %v12206_v8 = vrot.slane %v18677_v21, 5  ;;  %v12058_v61 = vld [vmem:[#allocation4 + $0xa8] sm:$0xe] }
 0x96f   : > { %13654 = vmatpush3.bf16.xpose.msra.mxu1 %v18584_v20  ;;  %v18602_v54 = vld [vmem:[#allocation4 + $0xb4] sm:$0xff]   ;;  %v18702_v23 = vld [vmem:[#allocation4 + $0x44] sm:$0x1]  ;;  %v18707_v40 = vld [vmem:[#allocation4 + $0xb0] sm:$0x1]  ;;  %v12204_v27 = vsel %vm16300_vm14, %v13195_v2, %v12203_v19  ;;  %v12147_v41 = vrot.slane %v18686_v25, 5 }
 0x970   : > { %15027 = vmatprep.subr.msk.bf16.mxu1 %vm486_vm0, %v18586_v28  ;;  %v18709_v7 = vld [vmem:[#allocation4 + $0x4c] sm:$0xf]  ;;  %v18722_v3 = vld [vmem:[#allocation4 + $0x50] sm:$0x1]  ;;  %v12210_v24 = vrot.slane %v18696_v29, 5  ;;  %v12150_v47 = vrot.slane %v18702_v23, 5 }
 0x971   : > { %v12050_v0 = vld [vmem:[#allocation4 + $0x48] sm:$0xe]  ;;  %v18729_v56 = vld [vmem:[#allocation4 + $0xb8] sm:$0xf]  ;;  %v12149_v53 = vrot.slane %v12147_v41, 4  ;;  %v13196_v31 = vrot.slane %v12058_v61, 9 }
 0x972   : > { %v12060_v52 = vld [vmem:[#allocation4 + $0xc0] sm:$0xe]  ;;  %v18765_v39 = vld [vmem:[#allocation4 + $0xc8] sm:$0x1]  ;;  %v18871_v36 = vld [vmem:[#allocation4 + $0x14] sm:$0x1] }
 0x973   : > { %v18748_v2 = vsel %vm16300_vm14, %v12149_v53, %v12150_v47  ;;  %v12157_v47 = vrot.slane %v18722_v3, 5  ;;  %19677 = vst [vmem:[#allocation48_spill] sm:$0xff] %v18871_v36 }
 0x974   : > { %19665 = vst [vmem:[#allocation54_spill] sm:$0xff] %v18748_v2 }
 0x977   : > { %13656 = vmatpush3.bf16.xpose.msra.mxu1 %v18592_v30 }
 0x978   : > { %15028 = vmatprep.subr.msk.bf16.mxu1 %vm486_vm0, %v18594_v9 }
 0x97f   : > { %13658 = vmatpush3.bf16.xpose.msra.mxu1 %v18600_v43 }
 0x980   : > { %15029 = vmatprep.subr.msk.bf16.mxu1 %vm486_vm0, %v18602_v54 }
 0x987   : > { %13660 = vmatpush3.bf16.xpose.msra.mxu1 %v18608_v33 }
 0x988   : > { %15030 = vmatprep.subr.msk.bf16.mxu1 %vm486_vm0, %v18610_v17 }
 0x98f   : > { %13662 = vmatpush3.bf16.xpose.msra.mxu1 %v18616_v11 }
 0x990   : > { %15031 = vmatprep.subr.msk.bf16.mxu1 %vm486_vm0, %v15190_v12  ;;  %v12049_v12 = vld [vmem:[#allocation4 + $0x3c] sm:$0xe] }
 0x996   : > { %13664 = vmatmul.mubr.msk.bf16.vlgmr.msra.gmra.mrb[36].mxu1 %vm486_vm0, %v15259_v44  ;;  %v12205_v44 = vrot.slane %v12203_v19, 4  ;;  %v18738_v19 = vld [vmem:[#allocation4 + $0xbc] sm:$0x1] }
 0x997   : > { %13666 = vmatpush3.bf16.xpose.msra.mxu1 %v11215_v35  ;;  %13681 = vmatprep.mubr.msk.bf16.mxu1 %vm486_vm0, %v18624_v59  ;;  %v18704_v35 = vcombine.low %v12197_v1, %v12200_v15  ;;  %v12213_v1 = vrot.slane %v18707_v40, 5  ;;  %v18740_v15 = vld [vmem:[#allocation4 + $0x5c] sm:$0x1] }
 0x998   : > { %15032 = vmatprep.subr.msk.bf16.mxu1 %vm486_vm0, %v18513_v45  ;;  %v12164_v2 = vrot.slane %v18740_v15, 5 }
 0x999   : > { %19660 = vst [vmem:[#allocation27_spill] sm:$0xff] %v18704_v35 }
 0x99f   : > { %13668 = vmatpush3.bf16.xpose.msra.mxu1 %v18532_v49  ;;  %v18648_v49 = vld [vmem:[#allocation4 + $0x8c] sm:$0x1] }
 0x9a0   : > { %15033 = vmatprep.subr.msk.bf16.mxu1 %vm486_vm0, %v18534_v62  ;;  %v12192_v50 = vrot.slane %v18648_v49, 5 }
 0x9a2   : > { %v12193_v63 = vsel %vm16300_vm14, %v12191_v51, %v12192_v50  ;;  %v18713_v51 = vsel %vm16300_vm14, %v13186_v42, %v12140_v6  ;;  %v18717_v50 = vsel %vm16300_vm14, %v12142_v16, %v12143_v26  ;;  %v18734_v42 = vld [vmem:[#allocation4 + $0x58] sm:$0xf]  ;;  %v12212_v6 = vrot.slane %v12210_v24, 4  ;;  %v12059_v26 = vld [vmem:[#allocation4 + $0xb4] sm:$0xe] }
 0x9a3   : > { %v18673_v5 = vcombine.low %v12190_v55, %v12193_v63  ;;  %19661 = vst [vmem:[#allocation28_spill] sm:$0xff] %v18713_v51  ;;  %19662 = vst [vmem:[#allocation29_spill] sm:$0xff] %v18717_v50  ;;  %v12207_v55 = vsel %vm16300_vm14, %v12205_v44, %v12206_v8  ;;  %v13187_v63 = vrot.slane %v12049_v12, 9  ;;  %v12211_v12 = vsel %vm16300_vm14, %v13196_v31, %v12210_v24  ;;  %v18755_v8 = vld [vmem:[#allocation4 + $0xc4] sm:$0xf] }
 0x9a4   : > { %v18731_v60 = vcombine.low %v12204_v27, %v12207_v55  ;;  %v12154_v44 = vrot.slane %v18709_v7, 5  ;;  %v12214_v27 = vsel %vm16300_vm14, %v12212_v6, %v12213_v1  ;;  %v12217_v55 = vrot.slane %v18729_v56, 5 }
 0x9a5   : > { %19657 = vst [vmem:[#allocation32_spill] sm:$0xff] %v18673_v5  ;;  %v18744_v16 = vsel %vm16300_vm14, %v13187_v63, %v12147_v41  ;;  %v13188_v41 = vrot.slane %v12050_v0, 9  ;;  %v12051_v63 = vld [vmem:[#allocation4 + $0x54] sm:$0xe]  ;;  %v18762_v53 = vcombine.low %v12211_v12, %v12214_v27  ;;  %v13197_v31 = vrot.slane %v12059_v26, 9 }
 0x9a6   : > { %19663 = vst [vmem:[#allocation34_spill] sm:$0xff] %v18731_v60  ;;  %19664 = vst [vmem:[#allocation55_spill] sm:$0xff] %v18744_v16  ;;  %v12156_v24 = vrot.slane %v12154_v44, 4  ;;  %v12219_v61 = vrot.slane %v12217_v55, 4  ;;  %v12220_v6 = vrot.slane %v18738_v19, 5  ;;  %v12161_v0 = vrot.slane %v18734_v42, 5 }
 0x9a7   : > { %13670 = vmatpush3.bf16.xpose.msra.mxu1 %v18555_v58  ;;  %19666 = vst [vmem:[#allocation57_spill] sm:$0xff] %v18762_v53  ;;  %v18769_v60 = vsel %vm16300_vm14, %v13188_v41, %v12154_v44  ;;  %v12218_v12 = vsel %vm16300_vm14, %v13197_v31, %v12217_v55  ;;  %v13189_v26 = vrot.slane %v12051_v63, 9  ;;  %v12369_v27 = vrot.slane %v18755_v8, 5 }
 0x9a8   : > { %15034 = vmatprep.subr.msk.bf16.mxu1 %vm486_vm0, %v18557_v57  ;;  %19667 = vst [vmem:[#allocation43_spill] sm:$0xff] %v18769_v60  ;;  %v18775_v1 = vsel %vm16300_vm14, %v12156_v24, %v12157_v47  ;;  %v12221_v44 = vsel %vm16300_vm14, %v12219_v61, %v12220_v6  ;;  %v12163_v41 = vrot.slane %v12161_v0, 4  ;;  %v13215_v50 = vrot.slane %v12060_v52, 9 }
 0x9a9   : > { %19668 = vst [vmem:[#allocation45_spill] sm:$0xff] %v18775_v1  ;;  %v18785_v16 = vcombine.low %v12218_v12, %v12221_v44  ;;  %v12371_v24 = vrot.slane %v12369_v27, 4  ;;  %v12372_v47 = vrot.slane %v18765_v39, 5  ;;  %v18790_v55 = vsel %vm16300_vm14, %v13189_v26, %v12161_v0  ;;  %v11339_v12 = vld [vmem:[#allocation4 + $0x6c] sm:$0xf] }
 0x9aa   : > { %19670 = vst [vmem:[#allocation49_spill] sm:$0xff] %v18790_v55  ;;  %v18794_v63 = vsel %vm16300_vm14, %v12163_v41, %v12164_v2  ;;  %v12370_v31 = vsel %vm16300_vm14, %v13215_v50, %v12369_v27  ;;  %v18810_v2 = vld [vmem:[%s19371_s7 + $0x18] sm:$0xf]  ;;  %v18835_v50 = vld [vmem:[#allocation4 + $0x4] sm:$0xf] }
 0x9ab   : > { %19669 = vst [vmem:[#allocation46_spill] sm:$0xff] %v18785_v16  ;;  %19671 = vst [vmem:[#allocation39_spill] sm:$0xff] %v18794_v63  ;;  %v12373_v52 = vsel %vm16300_vm14, %v12371_v24, %v12372_v47  ;;  %v11315_v26 = vld [vmem:[#allocation4 + $0xc] sm:$0xf]  ;;  %v18841_v27 = vld [vmem:[#allocation4 + $0x68] sm:$0x1] }
 0x9ac   : > { %v18805_v6 = vcombine.low %v12370_v31, %v12373_v52  ;;  %v11376_v41 = vshll.u32 %v18835_v50, 16  ;;  %v11380_v24 = vshrl.u32 %v18835_v50, 16  ;;  %v11394_v61 = vshll.u32 %v11315_v26, 16  ;;  %v18857_v55 = vld [vmem:[#allocation4 + $0x74] sm:$0x1] }
 0x9ad   : > { %19675 = vst [vmem:[#allocation44_spill] sm:$0xff] %v18857_v55  ;;  %v18860_v16 = vld [vmem:[#allocation4 + $0x8] sm:$0x1] }
 0x9ae   : > { %19672 = vst [vmem:[#allocation40_spill] sm:$0xff] %v18805_v6  ;;  %v18855_v6 = vrot.slane %v11376_v41, 5  ;;  %v11382_v63 = vrot.slane %v11380_v24, 4  ;;  %19676 = vst [vmem:[#allocation47_spill] sm:$0xff] %v18860_v16  ;;  %v11602_v41 = vshll.u32 %v18857_v55, 16 }
 0x9af   : > { %13672 = vmatpush3.bf16.xpose.msra.mxu1 %v18566_v48  ;;  %v18881_v55 = vld [vmem:[#allocation4 + $0x1c] sm:$0xf] }
 0x9b0   : > { %15035 = vmatprep.subr.msk.bf16.mxu1 %vm486_vm0, %v18568_v38 }
 0x9b7   : > { %13674 = vmatpush3.bf16.xpose.msra.mxu1 %v18584_v20 }
 0x9b8   : > { %15036 = vmatprep.subr.msk.bf16.mxu1 %vm486_vm0, %v18586_v28 }
 0x9bf   : > { %13676 = vmatpush3.bf16.xpose.msra.mxu1 %v18592_v30 }
 0x9c0   : > { %15037 = vmatprep.subr.msk.bf16.mxu1 %vm486_vm0, %v18594_v9 }
 0x9c7   : > { %13678 = vmatpush3.bf16.xpose.msra.mxu1 %v18600_v43 }
 0x9c8   : > { %15038 = vmatprep.subr.msk.bf16.mxu1 %vm486_vm0, %v18602_v54 }
 0x9cf   : > { %13680 = vmatpush3.bf16.xpose.msra.mxu1 %v18608_v33 }
 0x9d0   : > { %15039 = vmatprep.subr.msk.bf16.mxu1 %vm486_vm0, %v18534_v62  ;;  %v11336_v62 = vld [vmem:[#allocation4 + $0x60] sm:$0xf] }
 0x9d6   : > { %13682 = vmatmul.mubr.msk.bf16.vlgmr.msra.gmra.mrb[40].mxu1 %vm486_vm0, %v18624_v59  ;;  %v11562_v59 = vshll.u32 %v11336_v62, 16 }
 0x9d7   : > { %13684 = vmatpush3.bf16.xpose.msra.mxu1 %v18555_v58  ;;  %13699 = vmatprep.mubr.msk.bf16.mxu1 %vm486_vm0, %v18810_v2  ;;  %v11559_v58 = vshrl.u32 %v11336_v62, 16 }
 0x9d8   : > { %15040 = vmatprep.subr.msk.bf16.mxu1 %vm486_vm0, %v18557_v57  ;;  %v18829_v57 = vld [vmem:[#allocation4 + $0x64] sm:$0xf] }
 0x9df   : > { %13686 = vmatpush3.bf16.xpose.msra.mxu1 %v18566_v48  ;;  %v11561_v48 = vrot.slane %v11559_v58, 4  ;;  %v11583_v58 = vshrl.u32 %v11339_v12, 16 }
 0x9e0   : > { %15041 = vmatprep.subr.msk.bf16.mxu1 %vm486_vm0, %v18568_v38  ;;  %v11564_v38 = vrot.slane %v11562_v59, 5  ;;  %v11586_v59 = vshll.u32 %v11339_v12, 16 }
 0x9e2   : > { %v11565_v0 = vor.u32 %v11564_v38, %v11561_v48  ;;  %v11588_v51 = vrot.slane %v11586_v59, 5 }
 0x9e7   : > { %13688 = vmatpush3.bf16.xpose.msra.mxu1 %v18584_v20  ;;  %v11568_v20 = vshll.u32 %v18829_v57, 16 }
 0x9e8   : > { %15042 = vmatprep.subr.msk.bf16.mxu1 %vm486_vm0, %v18586_v28  ;;  %v11572_v28 = vshrl.u32 %v18829_v57, 16 }
 0x9e9   : > { %v18845_v47 = vrot.slane %v11568_v20, 5  ;;  %v11391_v20 = vshrl.u32 %v11315_v26, 16 }
 0x9ea   : > { %v11574_v31 = vrot.slane %v11572_v28, 4 }
 0x9eb   : > { %v11393_v24 = vrot.slane %v11391_v20, 4 }
 0x9ec   : > { %v11575_v12 = vor.u32 %v11574_v31, %v18845_v47  ;;  %v11383_v31 = vor.u32 %v11382_v63, %v18855_v6 }
 0x9ef   : > { %13690 = vmatpush3.bf16.xpose.msra.mxu1 %v18592_v30  ;;  %v11312_v30 = vld [vmem:[#allocation4] sm:$0xf] }
 0x9f0   : > { %15043 = vmatprep.subr.msk.bf16.mxu1 %vm486_vm0, %v18594_v9  ;;  %v18837_v9 = vld [vmem:[#allocation4 + $0x70] sm:$0xf]  ;;  %v11367_v44 = vshrl.u32 %v11312_v30, 16 }
 0x9f1   : > { %19673 = vst [vmem:[#allocation41_spill] sm:$0xff] %v18837_v9  ;;  %v11592_v52 = vshll.u32 %v18837_v9, 16  ;;  %v11596_v62 = vshrl.u32 %v18837_v9, 16 }
 0x9f2   : > { %v11369_v28 = vrot.slane %v11367_v44, 4  ;;  %v15192_v44 = vld [vmem:[#allocation4 + $0xcc] sm:$0xff]  }
 0x9f3   : > { %v18862_v1 = vrot.slane %v11592_v52, 5  ;;  %v11598_v60 = vrot.slane %v11596_v62, 4  ;;  %v11386_v52 = vshll.u32 %v18860_v16, 16  ;;  %v11396_v62 = vrot.slane %v11394_v61, 5 }
 0x9f4   : > { %v11604_v61 = vrot.slane %v11602_v41, 5 }
 0x9f5   : > { %v11599_v5 = vor.u32 %v11598_v60, %v18862_v1  ;;  %v11384_v60 = vrot.slane %v11383_v31, 4 }
 0x9f7   : > { %13692 = vmatpush3.bf16.xpose.msra.mxu1 %v18600_v43  ;;  %v18839_v43 = vld [vmem:[#allocation4 + $0x10] sm:$0xf] }
 0x9f8   : > { %15044 = vmatprep.subr.msk.bf16.mxu1 %vm486_vm0, %v18602_v54  ;;  %19674 = vst [vmem:[#allocation42_spill] sm:$0xff] %v18839_v43  ;;  %v11370_v54 = vshll.u32 %v11312_v30, 16  ;;  %v11400_v48 = vshll.u32 %v18839_v43, 16  ;;  %v11404_v38 = vshrl.u32 %v18839_v43, 16  ;;  %v11578_v30 = vshll.u32 %v18841_v27, 16 }
 0x9f9   : > { %v11410_v43 = vshll.u32 %v18871_v36, 16 }
 0x9fa   : > { %v11372_v53 = vrot.slane %v11370_v54, 5  ;;  %v18864_v35 = vrot.slane %v11400_v48, 5  ;;  %v11406_v26 = vrot.slane %v11404_v38, 4  ;;  %v11142_v54 = vsel %vm486_vm0, %v18513_v45, 0 }
 0x9fb   : > { %v11576_v38 = vrot.slane %v11575_v12, 4  ;;  %v11580_v45 = vrot.slane %v11578_v30, 5  ;;  %v11388_v12 = vrot.slane %v11386_v52, 5 }
 0x9fc   : > { %v11373_v13 = vor.u32 %v11372_v53, %v11369_v28  ;;  %v11407_v63 = vor.u32 %v11406_v26, %v18864_v35  ;;  %v11600_v26 = vrot.slane %v11599_v5, 4 }
 0x9fd   : > { %v11389_v5 = vsel %vm16401_vm3, %v11384_v60, %v11388_v12 }
 0x9fe   : > { %v11408_v9 = vrot.slane %v11407_v63, 4 }
 0x9ff   : > { %13694 = vmatpush3.bf16.xpose.msra.mxu1 %v18608_v33  ;;  %v11566_v33 = vrot.slane %v11565_v0, 4  ;;  %v11342_v0 = vld [vmem:[#allocation4 + $0x78] sm:$0xf] }
 0xa00   : > { %15045 = vmatprep.subr.msk.bf16.mxu1 %vm486_vm0, %v18610_v17  ;;  %v11585_v17 = vrot.slane %v11583_v58, 4  ;;  %v18873_v58 = vld [vmem:[#allocation4 + $0x7c] sm:$0xf]  ;;  %v11607_v20 = vshrl.u32 %v11342_v0, 16  ;;  %v11610_v28 = vshll.u32 %v11342_v0, 16  ;;  %v11424_v0 = vshll.u32 %v18881_v55, 16 }
 0xa01   : > { %19678 = vst [vmem:[#allocation50_spill] sm:$0xff] %v18873_v58  ;;  %v11571_v48 = vsel %vm16401_vm3, %v11566_v33, %v18845_v47  ;;  %v11616_v47 = vshll.u32 %v18873_v58, 16  ;;  %v11620_v30 = vshrl.u32 %v18873_v58, 16  ;;  %v11374_v33 = vrot.slane %v11373_v13, 4 }
 0xa02   : > { %v11589_v53 = vor.u32 %v11588_v51, %v11585_v17  ;;  %v11318_v51 = vld [vmem:[#allocation4 + $0x18] sm:$0xf]  ;;  %v11581_v17 = vsel %vm16401_vm3, %v11576_v38, %v11580_v45  ;;  %v11609_v36 = vrot.slane %v11607_v20, 4  ;;  %v11612_v32 = vrot.slane %v11610_v28, 5  ;;  %v11345_v20 = vld [vmem:[#allocation4 + $0x84] sm:$0xf] }
 0xa03   : > { %v18891_v16 = vrot.slane %v11616_v47, 5  ;;  %v11622_v58 = vrot.slane %v11620_v30, 4  ;;  %v11415_v13 = vshrl.u32 %v11318_v51, 16  ;;  %v11418_v31 = vshll.u32 %v11318_v51, 16  ;;  %v18909_v47 = vld [vmem:[#allocation4 + $0x80] sm:$0x1] }
 0xa04   : > { %v11590_v41 = vrot.slane %v11589_v53, 4  ;;  %v18898_v38 = vcombine.low %v11571_v48, %v11581_v17  ;;  %v11605_v45 = vsel %vm16401_vm3, %v11600_v26, %v11604_v61  ;;  %v18902_v53 = vrot.slane %v11424_v0, 5  ;;  %v11321_v51 = vld [vmem:[#allocation4 + $0x24] sm:$0xf] }
 0xa05   : > { %v11623_v61 = vor.u32 %v11622_v58, %v18891_v16  ;;  %v11417_v30 = vrot.slane %v11415_v13, 4  ;;  %v11634_v12 = vshll.u32 %v11345_v20, 16  ;;  %v11644_v58 = vshrl.u32 %v18643_v46, 16 }
 0xa06   : > { %v11595_v28 = vsel %vm16401_vm3, %v11590_v41, %v18862_v1  ;;  %v11448_v0 = vshll.u32 %v18650_v4, 16 }
 0xa07   : > { %13696 = vmatpush3.bf16.xpose.msra.mxu1 %v18616_v11  ;;  %v11397_v11 = vor.u32 %v11396_v62, %v11393_v24  ;;  %v11379_v24 = vsel %vm16401_vm3, %v11374_v33, %v18855_v6  ;;  %v11412_v62 = vrot.slane %v11410_v43, 5  ;;  %v11613_v43 = vor.u32 %v11612_v32, %v11609_v36 }
 0xa08   : > { %15046 = vmatprep.subr.msk.bf16.mxu1 %vm486_vm0, %v15192_v44  ;;  %v11428_v44 = vshrl.u32 %v18881_v55, 16  ;;  %v13161_v48 = vcombine.low %v11379_v24, %v11389_v5  ;;  %v11420_v33 = vrot.slane %v11418_v31, 5  ;;  %v18914_v60 = vcombine.low %v11595_v28, %v11605_v45  ;;  %v18932_v24 = vld [vmem:[%s19371_s7 + $0x4] sm:$0xf] }
 0xa09   : > { %v11398_v52 = vrot.slane %v11397_v11, 4  ;;  %v11413_v6 = vsel %vm16401_vm3, %v11408_v9, %v11412_v62  ;;  %v11631_v9 = vshrl.u32 %v11345_v20, 16  ;;  %v11626_v32 = vshll.u32 %v18909_v47, 16 }
 0xa0a   : > { %v11430_v63 = vrot.slane %v11428_v44, 4  ;;  %v11640_v11 = vshll.u32 %v18643_v46, 16  ;;  %v11614_v26 = vrot.slane %v11613_v43, 4  ;;  %v11452_v44 = vshrl.u32 %v18650_v4, 16  ;;  %v11348_v43 = vld [vmem:[#allocation4 + $0x90] sm:$0xf] }
 0xa0b   : > { %v11403_v1 = vsel %vm16401_vm3, %v11398_v52, %v18864_v35  ;;  %v11802_v35 = vsel %vm486_vm0, %v13161_v48, 0  ;;  %v11624_v41 = vrot.slane %v11623_v61, 4  ;;  %v11421_v13 = vor.u32 %v11420_v33, %v11417_v30 }
 0xa0c   : > { %v11431_v36 = vor.u32 %v11430_v63, %v18902_v53  ;;  %v13162_v17 = vcombine.low %v11403_v1, %v11413_v6  ;;  %v11633_v5 = vrot.slane %v11631_v9, 4  ;;  %v11636_v46 = vrot.slane %v11634_v12, 5 }
 0xa0d   : > { %v11439_v52 = vshrl.u32 %v11321_v51, 16  ;;  %v11442_v62 = vshll.u32 %v11321_v51, 16  ;;  %v11628_v45 = vrot.slane %v11626_v32, 5  ;;  %v18936_v63 = vrot.slane %v11640_v11, 5 }
 0xa0e   : > { %v11432_v4 = vrot.slane %v11431_v36, 4  ;;  %v11646_v20 = vrot.slane %v11644_v58, 4  ;;  %v18938_v28 = vrot.slane %v11448_v0, 5  ;;  %v11454_v6 = vrot.slane %v11452_v44, 4  ;;  %v11324_v44 = vld [vmem:[#allocation4 + $0x30] sm:$0xf] }
 0xa0f   : > { %13698 = vmatpush3.bf16.xpose.msra.mxu1 %v11142_v54  ;;  %v18919_v54 = vld [vmem:[#allocation4 + $0x20] sm:$0x1]  ;;  %v11664_v48 = vshll.u32 %v18655_v18, 16  ;;  %v11668_v61 = vshrl.u32 %v18655_v18, 16  ;;  %v11619_v30 = vsel %vm16401_vm3, %v11614_v26, %v18891_v16  ;;  %v11422_v33 = vrot.slane %v11421_v13, 4 }
 0xa10   : > { %15047 = vmatprep.subr.msk.bf16.mxu1 %vm486_vm0, %v18898_v38  ;;  %v11434_v31 = vshll.u32 %v18919_v54, 16  ;;  %v11629_v9 = vsel %vm16401_vm3, %v11624_v41, %v11628_v45  ;;  %v11637_v12 = vor.u32 %v11636_v46, %v11633_v5  ;;  %v11441_v18 = vrot.slane %v11439_v52, 4 }
 0xa11   : > { %v11444_v32 = vrot.slane %v11442_v62, 5  ;;  %v11647_v11 = vor.u32 %v11646_v20, %v18936_v63  ;;  %v11655_v58 = vshrl.u32 %v11348_v43, 16  ;;  %v11658_v51 = vshll.u32 %v11348_v43, 16 }
 0xa12   : > { %v11436_v1 = vrot.slane %v11434_v31, 5  ;;  %v11455_v0 = vor.u32 %v11454_v6, %v18938_v28  ;;  %v18959_v16 = vrot.slane %v11664_v48, 5  ;;  %v11670_v26 = vrot.slane %v11668_v61, 4 }
 0xa13   : > { %v11427_v41 = vsel %vm16401_vm3, %v11422_v33, %v18902_v53  ;;  %v11472_v13 = vshll.u32 %v18660_v22, 16  ;;  %v11476_v31 = vshrl.u32 %v18660_v22, 16  ;;  %v11638_v46 = vrot.slane %v11637_v12, 4 }
 0xa14   : > { %v11437_v36 = vsel %vm16401_vm3, %v11432_v4, %v11436_v1  ;;  %v11445_v52 = vor.u32 %v11444_v32, %v11441_v18  ;;  %v11648_v62 = vrot.slane %v11647_v11, 4  ;;  %v11657_v45 = vrot.slane %v11655_v58, 4 }
 0xa15   : > { %v13163_v5 = vcombine.low %v11427_v41, %v11437_v36  ;;  %v11660_v4 = vrot.slane %v11658_v51, 5  ;;  %v11463_v20 = vshrl.u32 %v11324_v44, 16  ;;  %v11456_v43 = vrot.slane %v11455_v0, 4  ;;  %v11327_v51 = vld [vmem:[#allocation4 + $0x3c] sm:$0xf] }
 0xa16   : > { %13700 = vmatmul.mubr.msk.bf16.vlgmr.msra.gmra.mrb[44].mxu1 %vm486_vm0, %v18810_v2  ;;  %v18947_v2 = vsel %vm486_vm0, %v13162_v17, 0  ;;  %v11650_v17 = vshll.u32 %v18648_v49, 16  ;;  %v11458_v49 = vshll.u32 %v18653_v37, 16  ;;  %v11671_v48 = vor.u32 %v11670_v26, %v18959_v16 }
 0xa17   : > { %13702 = vmatpush3.bf16.xpose.msra.mxu1 %v11802_v35  ;;  %13717 = vmatprep.mubr.msk.bf16.mxu1 %vm486_vm0, %v18932_v24  ;;  %v18961_v35 = vcombine.low %v11619_v30, %v11629_v9  ;;  %v11466_v53 = vshll.u32 %v11324_v44, 16  ;;  %v18973_v22 = vrot.slane %v11472_v13, 5  ;;  %v11478_v61 = vrot.slane %v11476_v31, 4  ;;  %v11351_v30 = vld [vmem:[#allocation4 + $0x9c] sm:$0xf] }
 0xa18   : > { %15048 = vmatprep.subr.msk.bf16.mxu1 %vm486_vm0, %v18914_v60  ;;  %v11652_v6 = vrot.slane %v11650_v17, 5  ;;  %v11688_v37 = vshll.u32 %v18665_v34, 16  ;;  %v11692_v33 = vshrl.u32 %v18665_v34, 16  ;;  %v18978_v1 = vsel %vm486_vm0, %v13163_v5, 0 }
 0xa19   : > { %v11643_v9 = vsel %vm16401_vm3, %v11638_v46, %v18936_v63  ;;  %v11446_v12 = vrot.slane %v11445_v52, 4  ;;  %v11460_v18 = vrot.slane %v11458_v49, 5  ;;  %v11661_v36 = vor.u32 %v11660_v4, %v11657_v45 }
 0xa1a   : > { %v11653_v32 = vsel %vm16401_vm3, %v11648_v62, %v11652_v6  ;;  %v11674_v11 = vshll.u32 %v18657_v14, 16  ;;  %v11465_v58 = vrot.slane %v11463_v20, 4  ;;  %v11468_v17 = vrot.slane %v11466_v53, 5 }
 0xa1b   : > { %v11461_v34 = vsel %vm16401_vm3, %v11456_v43, %v11460_v18  ;;  %v11679_v0 = vshrl.u32 %v11351_v30, 16  ;;  %v11682_v26 = vshll.u32 %v11351_v30, 16  ;;  %v11672_v44 = vrot.slane %v11671_v48, 4 }
 0xa1c   : > { %v11479_v41 = vor.u32 %v11478_v61, %v18973_v22  ;;  %v18989_v63 = vrot.slane %v11688_v37, 5  ;;  %v11694_v13 = vrot.slane %v11692_v33, 4  ;;  %v11487_v31 = vshrl.u32 %v11327_v51, 16 }
 0xa1d   : > { %v11490_v5 = vshll.u32 %v11327_v51, 16  ;;  %v11496_v46 = vshll.u32 %v18686_v25, 16  ;;  %v11500_v14 = vshrl.u32 %v18686_v25, 16  ;;  %v18993_v52 = vcombine.low %v11643_v9, %v11653_v32  ;;  %v11354_v9 = vld [vmem:[#allocation4 + $0xa8] sm:$0xf] }
 0xa1e   : > { %v11451_v49 = vsel %vm16401_vm3, %v11446_v12, %v18938_v28  ;;  %v11662_v62 = vrot.slane %v11661_v36, 4  ;;  %v11676_v45 = vrot.slane %v11674_v11, 5  ;;  %v11469_v4 = vor.u32 %v11468_v17, %v11465_v58 }
 0xa1f   : > { %13704 = vmatpush3.bf16.xpose.msra.mxu1 %v18947_v2  ;;  %v11482_v20 = vshll.u32 %v18663_v10, 16  ;;  %v11681_v6 = vrot.slane %v11679_v0, 4  ;;  %v11684_v43 = vrot.slane %v11682_v26, 5  ;;  %v13164_v48 = vcombine.low %v11451_v49, %v11461_v34 }
 0xa20   : > { %15049 = vmatprep.subr.msk.bf16.mxu1 %vm486_vm0, %v18961_v35  ;;  %v11677_v25 = vsel %vm16401_vm3, %v11672_v44, %v11676_v45  ;;  %v11480_v53 = vrot.slane %v11479_v41, 4  ;;  %v11695_v61 = vor.u32 %v11694_v13, %v18989_v63  ;;  %v11489_v28 = vrot.slane %v11487_v31, 4 }
 0xa21   : > { %v11492_v30 = vrot.slane %v11490_v5, 5  ;;  %v19005_v37 = vrot.slane %v11496_v46, 5  ;;  %v11502_v33 = vrot.slane %v11500_v14, 4  ;;  %v11667_v10 = vsel %vm16401_vm3, %v11662_v62, %v18959_v16 }
 0xa22   : > { %v11712_v12 = vshll.u32 %v18696_v29, 16  ;;  %v11716_v18 = vshrl.u32 %v18696_v29, 16  ;;  %v11470_v32 = vrot.slane %v11469_v4, 4  ;;  %v11484_v36 = vrot.slane %v11482_v20, 5  ;;  %v11330_v29 = vld [vmem:[#allocation4 + $0x48] sm:$0xf] }
 0xa23   : > { %v11685_v11 = vor.u32 %v11684_v43, %v11681_v6  ;;  %v11698_v58 = vshll.u32 %v18677_v21, 16  ;;  %v19014_v51 = vsel %vm486_vm0, %v13164_v48, 0  ;;  %v19016_v34 = vcombine.low %v11667_v10, %v11677_v25 }
 0xa24   : > { %v11703_v17 = vshrl.u32 %v11354_v9, 16  ;;  %v11706_v0 = vshll.u32 %v11354_v9, 16  ;;  %v11485_v26 = vsel %vm16401_vm3, %v11480_v53, %v11484_v36  ;;  %v11696_v16 = vrot.slane %v11695_v61, 4 }
 0xa25   : > { %v11493_v44 = vor.u32 %v11492_v30, %v11489_v28  ;;  %v11503_v41 = vor.u32 %v11502_v33, %v19005_v37  ;;  %v19021_v13 = vrot.slane %v11712_v12, 5  ;;  %v11718_v31 = vrot.slane %v11716_v18, 4  ;;  %v11357_v28 = vld [vmem:[#allocation4 + $0xb4] sm:$0xf] }
 0xa26   : > { %v11520_v21 = vshll.u32 %v18709_v7, 16  ;;  %v11524_v5 = vshrl.u32 %v18709_v7, 16  ;;  %v11475_v46 = vsel %vm16401_vm3, %v11470_v32, %v18973_v22  ;;  %v11686_v14 = vrot.slane %v11685_v11, 4 }
 0xa27   : > { %13706 = vmatpush3.bf16.xpose.msra.mxu1 %v18978_v1  ;;  %v11700_v49 = vrot.slane %v11698_v58, 5  ;;  %v11506_v62 = vshll.u32 %v18702_v23, 16  ;;  %v11705_v45 = vrot.slane %v11703_v17, 4  ;;  %v11708_v4 = vrot.slane %v11706_v0, 5 }
 0xa28   : > { %15050 = vmatprep.subr.msk.bf16.mxu1 %vm486_vm0, %v18993_v52  ;;  %v11511_v20 = vshrl.u32 %v11330_v29, 16  ;;  %v11514_v6 = vshll.u32 %v11330_v29, 16  ;;  %v13165_v43 = vcombine.low %v11475_v46, %v11485_v26  ;;  %v11494_v48 = vrot.slane %v11493_v44, 4 }
 0xa29   : > { %v11701_v7 = vsel %vm16401_vm3, %v11696_v16, %v11700_v49  ;;  %v11504_v25 = vrot.slane %v11503_v41, 4  ;;  %v11719_v53 = vor.u32 %v11718_v31, %v19021_v13  ;;  %v11522_v22 = vrot.slane %v11520_v21, 5  ;;  %v11333_v16 = vld [vmem:[#allocation4 + $0x54] sm:$0xf] }
 0xa2a   : > { %v11526_v61 = vrot.slane %v11524_v5, 4  ;;  %v11691_v23 = vsel %vm16401_vm3, %v11686_v14, %v18989_v63  ;;  %v11508_v30 = vrot.slane %v11506_v62, 5  ;;  %v11736_v33 = vshll.u32 %v18729_v56, 16 }
 0xa2b   : > { %v11740_v9 = vshrl.u32 %v18729_v56, 16  ;;  %v11709_v10 = vor.u32 %v11708_v4, %v11705_v45  ;;  %v11722_v12 = vshll.u32 %v18707_v40, 16  ;;  %v11513_v18 = vrot.slane %v11511_v20, 4 }
 0xa2c   : > { %v11516_v32 = vrot.slane %v11514_v6, 5  ;;  %v19042_v36 = vsel %vm486_vm0, %v13165_v43, 0  ;;  %v19044_v11 = vcombine.low %v11691_v23, %v11701_v7  ;;  %v11727_v58 = vshrl.u32 %v11357_v28, 16 }
 0xa2d   : > { %v11730_v17 = vshll.u32 %v11357_v28, 16  ;;  %v11499_v63 = vsel %vm16401_vm3, %v11494_v48, %v19005_v37  ;;  %v11509_v0 = vsel %vm16401_vm3, %v11504_v25, %v11508_v30  ;;  %v11720_v56 = vrot.slane %v11719_v53, 4 }
 0xa2e   : > { %v11527_v26 = vor.u32 %v11526_v61, %v11522_v22  ;;  %v11738_v40 = vrot.slane %v11736_v33, 5  ;;  %v11742_v44 = vrot.slane %v11740_v9, 4  ;;  %v11544_v41 = vshll.u32 %v18734_v42, 16 }
 0xa2f   : > { %13708 = vmatpush3.bf16.xpose.msra.mxu1 %v19014_v51  ;;  %v11548_v29 = vshrl.u32 %v18734_v42, 16  ;;  %v11710_v31 = vrot.slane %v11709_v10, 4  ;;  %v11724_v21 = vrot.slane %v11722_v12, 5  ;;  %v11517_v37 = vor.u32 %v11516_v32, %v11513_v18 }
 0xa30   : > { %15051 = vmatprep.subr.msk.bf16.mxu1 %vm486_vm0, %v19016_v34  ;;  %v11530_v5 = vshll.u32 %v18722_v3, 16  ;;  %v11729_v46 = vrot.slane %v11727_v58, 4  ;;  %v11732_v14 = vrot.slane %v11730_v17, 5  ;;  %v11535_v49 = vshrl.u32 %v11333_v16, 16 }
 0xa31   : > { %v11538_v62 = vshll.u32 %v11333_v16, 16  ;;  %v13166_v45 = vcombine.low %v11499_v63, %v11509_v0  ;;  %v11725_v4 = vsel %vm16401_vm3, %v11720_v56, %v11724_v21  ;;  %v11528_v20 = vrot.slane %v11527_v26, 4 }
 0xa32   : > { %v11743_v6 = vor.u32 %v11742_v44, %v11738_v40  ;;  %v11546_v43 = vrot.slane %v11544_v41, 5  ;;  %v11550_v42 = vrot.slane %v11548_v29, 4  ;;  %v11715_v7 = vsel %vm16401_vm3, %v11710_v31, %v19021_v13  ;;  %v4701_v29 = vld [vmem:[%s19371_s7 + $0x10] sm:$0xf] }
 0xa33   : > { %v11518_v48 = vrot.slane %v11517_v37, 4  ;;  %v11532_v25 = vrot.slane %v11530_v5, 5  ;;  %v11733_v53 = vor.u32 %v11732_v14, %v11729_v46  ;;  %v11746_v3 = vshll.u32 %v18738_v19, 16 }
 0xa34   : > { %v11537_v61 = vrot.slane %v11535_v49, 4  ;;  %v11540_v28 = vrot.slane %v11538_v62, 5  ;;  %v19064_v23 = vsel %vm486_vm0, %v13166_v45, 0  ;;  %v19066_v30 = vcombine.low %v11715_v7, %v11725_v4 }
 0xa35   : > { %v11533_v33 = vsel %vm16401_vm3, %v11528_v20, %v11532_v25  ;;  %v11744_v9 = vrot.slane %v11743_v6, 4  ;;  %v11551_v10 = vor.u32 %v11550_v42, %v11546_v43  ;;  %v11523_v19 = vsel %vm16401_vm3, %v11518_v48, %v11522_v22 }
 0xa36   : > { %v11734_v13 = vrot.slane %v11733_v53, 4  ;;  %v11748_v12 = vrot.slane %v11746_v3, 5  ;;  %v11541_v18 = vor.u32 %v11540_v28, %v11537_v61  ;;  %v11554_v32 = vshll.u32 %v18740_v15, 16  ;;  %v19138_v61 = vld [vmem:[%s19371_s7 + $0x1c] sm:$0xf] }
 0xa37   : > { %13710 = vmatpush3.bf16.xpose.msra.mxu1 %v19042_v36  ;;  %v13167_v58 = vcombine.low %v11523_v19, %v11533_v33  ;;  %v11552_v63 = vrot.slane %v11551_v10, 4  ;;  %v11902_v5 = vshll.u32 %v18755_v8, 16  ;;  %v11906_v46 = vshrl.u32 %v18755_v8, 16  ;;  %v11363_v10 = vld [vmem:[#allocation4 + $0xcc] sm:$0xf] }
 0xa38   : > { %15052 = vmatprep.subr.msk.bf16.mxu1 %vm486_vm0, %v19044_v11  ;;  %v11749_v17 = vsel %vm16401_vm3, %v11744_v9, %v11748_v12  ;;  %v11739_v0 = vsel %vm16401_vm3, %v11734_v13, %v11738_v40  ;;  %v11542_v56 = vrot.slane %v11541_v18, 4  ;;  %v11556_v26 = vrot.slane %v11554_v32, 5  ;;  %v19163_v32 = vld [vmem:[#allocation4 + $0xd4] sm:$0x1] }
 0xa39   : > { %v19081_v16 = vsel %vm486_vm0, %v13167_v58, 0  ;;  %v19083_v44 = vcombine.low %v11739_v0, %v11749_v17  ;;  %v11904_v62 = vrot.slane %v11902_v5, 5  ;;  %v11908_v45 = vrot.slane %v11906_v46, 4 }
 0xa3a   : > { %v11557_v15 = vsel %vm16401_vm3, %v11552_v63, %v11556_v26  ;;  %v11547_v22 = vsel %vm16401_vm3, %v11542_v56, %v11546_v43  ;;  %v11912_v42 = vshll.u32 %v18765_v39, 16  ;;  %v11826_v39 = vsel %vm486_vm0, %v18898_v38, 0 }
 0xa3b   : > { %v13168_v41 = vcombine.low %v11547_v22, %v11557_v15  ;;  %v11909_v6 = vor.u32 %v11908_v45, %v11904_v62  ;;  %v12112_v15 = vrot.slane %v18835_v50, 5  ;;  %v12044_v22 = vld [vmem:[#allocation4] sm:$0xe] }
 0xa3c   : > { %v11914_v48 = vrot.slane %v11912_v42, 5  ;;  %v19684_v42 = vld [vmem:[#allocation44_spill] sm:$0xff] }
 0xa3d   : > { %v19093_v40 = vsel %vm486_vm0, %v13168_v41, 0  ;;  %v11910_v7 = vrot.slane %v11909_v6, 4 }
 0xa3f   : > { %13712 = vmatpush3.bf16.xpose.msra.mxu1 %v19064_v23  ;;  %v11915_v25 = vsel %vm16401_vm3, %v11910_v7, %v11914_v48  ;;  %v12178_v7 = vrot.slane %v19684_v42, 5 }
 0xa40   : > { %15053 = vmatprep.subr.msk.bf16.mxu1 %vm486_vm0, %v19066_v30 }
 0xa47   : > { %13714 = vmatpush3.bf16.xpose.msra.mxu1 %v19081_v16 }
 0xa48   : > { %15054 = vmatprep.subr.msk.bf16.mxu1 %vm486_vm0, %v19083_v44 }
 0xa4f   : > { %13716 = vmatpush3.bf16.xpose.msra.mxu1 %v19093_v40 }
 0xa50   : > { %15055 = vmatprep.subr.msk.bf16.mxu1 %vm486_vm0, %v18914_v60 }
 0xa56   : > { %13718 = vmatmul.mubr.msk.bf16.vlgmr.msra.gmra.mrb[48].mxu1 %vm486_vm0, %v18932_v24 }
 0xa57   : > { %13720 = vmatpush3.bf16.xpose.msra.mxu1 %v18947_v2  ;;  %13735 = vmatprep.mubr.msk.bf16.mxu1 %vm486_vm0, %v4701_v29  ;;  %v11360_v2 = vld [vmem:[#allocation4 + $0xc0] sm:$0xf] }
 0xa58   : > { %15056 = vmatprep.subr.msk.bf16.mxu1 %vm486_vm0, %v18961_v35  ;;  %v11893_v14 = vshrl.u32 %v11360_v2, 16  ;;  %v11896_v49 = vshll.u32 %v11360_v2, 16 }
 0xa5a   : > { %v11895_v4 = vrot.slane %v11893_v14, 4  ;;  %v11898_v20 = vrot.slane %v11896_v49, 5 }
 0xa5c   : > { %v11899_v43 = vor.u32 %v11898_v20, %v11895_v4  ;;  %v19683_v4 = vld [vmem:[#allocation42_spill] sm:$0xff] }
 0xa5d   : > { %v12119_v20 = vrot.slane %v19683_v4, 5  ;;  %v19699_v4 = vld [vmem:[#allocation57_spill] sm:$0xff] }
 0xa5e   : > { %v11900_v8 = vrot.slane %v11899_v43, 4  ;;  %v12053_v43 = vld [vmem:[#allocation4 + $0x6c] sm:$0xe] }
 0xa5f   : > { %13722 = vmatpush3.bf16.xpose.msra.mxu1 %v18978_v1 }
 0xa60   : > { %15057 = vmatprep.subr.msk.bf16.mxu1 %vm486_vm0, %v18993_v52  ;;  %v11905_v53 = vsel %vm16401_vm3, %v11900_v8, %v11904_v62  ;;  %v13191_v8 = vrot.slane %v12053_v43, 9 }
 0xa61   : > { %v13178_v3 = vcombine.low %v11905_v53, %v11915_v25  ;;  %v12121_v25 = vrot.slane %v12119_v20, 4  ;;  %v19685_v53 = vld [vmem:[#allocation50_spill] sm:$0xff] }
 0xa67   : > { %13724 = vmatpush3.bf16.xpose.msra.mxu1 %v19014_v51 }
 0xa68   : > { %15058 = vmatprep.subr.msk.bf16.mxu1 %vm486_vm0, %v19016_v34 }
 0xa69   : > { %v11199_v31 = vpop.f32.mrb[36].mxu1 }
 0xa6a   : > { %v11201_v21 = vpop.f32.mrb[37].mxu1 }
 0xa6b   : > { %v11203_v24 = vpop.f32.mrb[38].mxu1 }
 0xa6c   : > { %v11204_v37 = vpop.f32.mrb[39].mxu1  ;;  %v19680_v24 = vld [vmem:[#allocation47_spill] sm:$0xff] }
 0xa6d   : > { %v12115_v37 = vrot.slane %v19680_v24, 5  ;;  %v19689_v24 = vld [vmem:[#allocation26_spill] sm:$0xff] }
 0xa6f   : > { %13726 = vmatpush3.bf16.xpose.msra.mxu1 %v19042_v36 }
 0xa70   : > { %15059 = vmatprep.subr.msk.bf16.mxu1 %vm486_vm0, %v19044_v11 }
 0xa77   : > { %13728 = vmatpush3.bf16.xpose.msra.mxu1 %v19064_v23 }
 0xa78   : > { %15060 = vmatprep.subr.msk.bf16.mxu1 %vm486_vm0, %v19066_v30 }
 0xa7f   : > { %13730 = vmatpush3.bf16.xpose.msra.mxu1 %v19081_v16 }
 0xa80   : > { %15061 = vmatprep.subr.msk.bf16.mxu1 %vm486_vm0, %v19083_v44 }
 0xa87   : > { %13732 = vmatpush3.bf16.xpose.msra.mxu1 %v19093_v40 }
 0xa88   : > { %15062 = vmatprep.subr.msk.bf16.mxu1 %vm486_vm0, %v13178_v3 }
 0xa8f   : > { %13734 = vmatpush3.bf16.xpose.msra.mxu1 %v11826_v39 }
 0xa90   : > { %15063 = vmatprep.subr.msk.bf16.mxu1 %vm486_vm0, %v18961_v35 }
 0xa96   : > { %13736 = vmatmul.mubr.msk.bf16.vlgmr.msra.gmra.mrb[52].mxu1 %vm486_vm0, %v4701_v29  ;;  %v12052_v29 = vld [vmem:[#allocation4 + $0x60] sm:$0xe] }
 0xa97   : > { %13738 = vmatpush3.bf16.xpose.msra.mxu1 %v18978_v1  ;;  %13753 = vmatprep.mubr.msk.bf16.mxu1 %vm486_vm0, %v19138_v61  ;;  %v13190_v2 = vrot.slane %v12052_v29, 9 }
 0xa98   : > { %15064 = vmatprep.subr.msk.bf16.mxu1 %vm486_vm0, %v18993_v52  ;;  %v19156_v52 = vld [vmem:[#allocation4 + $0xd0] sm:$0xf] }
 0xa9f   : > { %13740 = vmatpush3.bf16.xpose.msra.mxu1 %v19014_v51  ;;  %v11969_v51 = vshrl.u32 %v11363_v10, 16 }
 0xaa0   : > { %15065 = vmatprep.subr.msk.bf16.mxu1 %vm486_vm0, %v19016_v34  ;;  %v11972_v34 = vshll.u32 %v11363_v10, 16 }
 0xaa1   : > { %v11971_v19 = vrot.slane %v11969_v51, 4 }
 0xaa2   : > { %v11974_v13 = vrot.slane %v11972_v34, 5 }
 0xaa7   : > { %13742 = vmatpush3.bf16.xpose.msra.mxu1 %v19042_v36  ;;  %v11978_v36 = vshll.u32 %v19156_v52, 16 }
 0xaa8   : > { %15066 = vmatprep.subr.msk.bf16.mxu1 %vm486_vm0, %v19044_v11  ;;  %v11982_v11 = vshrl.u32 %v19156_v52, 16 }
 0xaa9   : > { %v11251_v38 = vpop.f32.mrb[40].mxu1  ;;  %v11980_v12 = vrot.slane %v11978_v36, 5 }
 0xaaa   : > { %v19152_v35 = vadd.f32 %v11251_v38, %v11199_v31  ;;  %v11253_v1 = vpop.f32.mrb[41].mxu1  ;;  %v11984_v18 = vrot.slane %v11982_v11, 4  ;;  %v13182_v31 = vrot.slane %v12044_v22, 9  ;;  %v4699_v38 = vld [vmem:[%s19371_s7 + $0x8] sm:$0xf]  ;;  %v12126_v11 = vrot.slane %v18881_v55, 5 }
 0xaab   : > { %v19154_v28 = vadd.f32 %v11253_v1, %v11201_v21  ;;  %v11255_v33 = vpop.f32.mrb[42].mxu1  ;;  %v12114_v21 = vrot.slane %v12112_v15, 4 }
 0xaac   : > { %v11256_v9 = vpop.f32.mrb[43].mxu1  ;;  %v11985_v58 = vor.u32 %v11984_v18, %v11980_v12  ;;  %v12113_v14 = vsel %vm16300_vm14, %v13182_v31, %v12112_v15  ;;  %v19686_v33 = vld [vmem:[#allocation48_spill] sm:$0xff] }
 0xaad   : > { %v12116_v49 = vsel %vm16300_vm14, %v12114_v21, %v12115_v37  ;;  %v12122_v9 = vrot.slane %v19686_v33, 5  ;;  %v19687_v15 = vld [vmem:[#allocation32_spill] sm:$0xff]  ;;  %v19688_v21 = vld [vmem:[#allocation11_spill] sm:$0xff] }
 0xaae   : > { %v11986_v63 = vrot.slane %v11985_v58, 4  ;;  %v13198_v6 = vcombine.low %v12113_v14, %v12116_v49  ;;  %v12128_v58 = vrot.slane %v12126_v11, 4  ;;  %v19690_v37 = vcombine.low %v19688_v21, %v19689_v24  ;;  %v19697_v49 = vld [vmem:[#allocation54_spill] sm:$0xff] }
 0xaaf   : > { %13744 = vmatpush3.bf16.xpose.msra.mxu1 %v19064_v23  ;;  %v11975_v23 = vor.u32 %v11974_v13, %v11971_v19  ;;  %v12123_v34 = vsel %vm16300_vm14, %v12121_v25, %v12122_v9  ;;  %v12054_v19 = vld [vmem:[#allocation4 + $0x78] sm:$0xe] }
 0xab0   : > { %15067 = vmatprep.subr.msk.bf16.mxu1 %vm486_vm0, %v19066_v30  ;;  %v11988_v30 = vshll.u32 %v19163_v32, 16  ;;  %v13192_v18 = vrot.slane %v12054_v19, 9 }
 0xab1   : > { %v11976_v17 = vrot.slane %v11975_v23, 4 }
 0xab2   : > { %v11990_v0 = vrot.slane %v11988_v30, 5  ;;  %v12046_v30 = vld [vmem:[#allocation4 + $0x18] sm:$0xe] }
 0xab3   : > { %v11981_v56 = vsel %vm16401_vm3, %v11976_v17, %v11980_v12  ;;  %v12129_v17 = vrot.slane %v18919_v54, 5 }
 0xab4   : > { %v11991_v26 = vsel %vm16401_vm3, %v11986_v63, %v11990_v0 }
 0xab7   : > { %13746 = vmatpush3.bf16.xpose.msra.mxu1 %v19081_v16  ;;  %v12168_v16 = vrot.slane %v18829_v57, 5  ;;  %v19682_v57 = vld [vmem:[#allocation41_spill] sm:$0xff] }
 0xab8   : > { %15068 = vmatprep.subr.msk.bf16.mxu1 %vm486_vm0, %v19083_v44  ;;  %v13180_v44 = vcombine.low %v11981_v56, %v11991_v26  ;;  %v12175_v46 = vrot.slane %v19682_v57, 5  ;;  %v13184_v56 = vrot.slane %v12046_v30, 9  ;;  %v19692_v57 = vld [vmem:[#allocation28_spill] sm:$0xff] }
 0xab9   : > { %v12170_v41 = vrot.slane %v12168_v16, 4  ;;  %v12169_v50 = vsel %vm16300_vm14, %v13190_v2, %v12168_v16  ;;  %v12283_v2 = vsel %vm486_vm0, %v19690_v37, 0 }
 0xaba   : > { %v12177_v45 = vrot.slane %v12175_v46, 4  ;;  %v12176_v1 = vsel %vm16300_vm14, %v13191_v8, %v12175_v46  ;;  %v12127_v26 = vsel %vm16300_vm14, %v13184_v56, %v12126_v11  ;;  %v19693_v46 = vld [vmem:[#allocation29_spill] sm:$0xff] }
 0xabb   : > { %v19704_v8 = vld [vmem:[#allocation49_spill] sm:$0xff] }
 0xabc   : > { %v12179_v48 = vsel %vm16300_vm14, %v12177_v45, %v12178_v7  ;;  %v19703_v7 = vld [vmem:[#allocation46_spill] sm:$0xff] }
 0xabd   : > { %v19209_v10 = vcombine.low %v12176_v1, %v12179_v48  ;;  %v19705_v48 = vld [vmem:[#allocation39_spill] sm:$0xff] }
 0xabe   : > { %v19706_v25 = vcombine.low %v19704_v8, %v19705_v48 }
 0xabf   : > { %13748 = vmatpush3.bf16.xpose.msra.mxu1 %v19093_v40  ;;  %v12171_v40 = vrot.slane %v18841_v27, 5  ;;  %v11829_v27 = vsel %vm486_vm0, %v18914_v60, 0  ;;  %v12182_v60 = vrot.slane %v19685_v53, 5 }
 0xac0   : > { %15069 = vmatprep.subr.msk.bf16.mxu1 %vm486_vm0, %v13178_v3  ;;  %v12274_v3 = vsel %vm486_vm0, %v13198_v6, 0  ;;  %v19701_v6 = vld [vmem:[#allocation45_spill] sm:$0xff]  ;;  %v12295_v53 = vsel %vm486_vm0, %v19706_v25, 0 }
 0xac1   : > { %v12172_v5 = vsel %vm16300_vm14, %v12170_v41, %v12171_v40  ;;  %v12184_v36 = vrot.slane %v12182_v60, 4  ;;  %v12183_v55 = vsel %vm16300_vm14, %v13192_v18, %v12182_v60  ;;  %v4702_v60 = vld [vmem:[%s19371_s7 + $0x14] sm:$0xf] }
 0xac2   : > { %v19191_v62 = vcombine.low %v12169_v50, %v12172_v5  ;;  %v19691_v5 = vld [vmem:[#allocation27_spill] sm:$0xff]  ;;  %v19694_v50 = vcombine.low %v19692_v57, %v19693_v46 }
 0xac4   : > { %v12286_v14 = vsel %vm486_vm0, %v19694_v50, 0 }
 0xac7   : > { %13750 = vmatpush3.bf16.xpose.msra.mxu1 %v11826_v39  ;;  %v12045_v39 = vld [vmem:[#allocation4 + $0xc] sm:$0xe] }
 0xac8   : > { %15070 = vmatprep.subr.msk.bf16.mxu1 %vm486_vm0, %v13180_v44  ;;  %v13183_v51 = vrot.slane %v12045_v39, 9 }
 0xaca   : > { %v12120_v13 = vsel %vm16300_vm14, %v13183_v51, %v12119_v20  ;;  %v19700_v20 = vld [vmem:[#allocation43_spill] sm:$0xff] }
 0xacb   : > { %v13199_v12 = vcombine.low %v12120_v13, %v12123_v34  ;;  %v19702_v43 = vcombine.low %v19700_v20, %v19701_v6  ;;  %v12298_v34 = vsel %vm486_vm0, %v19191_v62, 0 }
 0xacd   : > { %v12277_v63 = vsel %vm486_vm0, %v13199_v12, 0  ;;  %v12292_v42 = vsel %vm486_vm0, %v19702_v43, 0  ;;  %v12488_v12 = vld [vmem:[%s19372_s8] sm:$0xff] }
 0xace   : > { %12491 = vperm.xlu0 %15138, %v12488_v12  }
 0xacf   : > { %13752 = vmatpush3.bf16.xpose.msra.mxu1 %v11829_v27 }
 0xad0   : > { %15071 = vmatprep.subr.msk.bf16.mxu1 %vm486_vm0, %v19191_v62 }
 0xad6   : > { %13754 = vmatmul.mubr.msk.bf16.vlgmr.msra.gmra.mrb[56].mxu1 %vm486_vm0, %v19138_v61  ;;  %v12185_v61 = vrot.slane %v18909_v47, 5  ;;  %v12130_v47 = vsel %vm16300_vm14, %v12128_v58, %v12129_v17  ;;  %v12061_v58 = vld [vmem:[#allocation4 + $0xcc] sm:$0xe]  ;;  %v12434_v17 = vrot.slane %v19163_v32, 5 }
 0xad7   : > { %13756 = vmatpush3.bf16.xpose.msra.mxu1 %v12274_v3  ;;  %13771 = vmatprep.mubr.msk.bf16.mxu1 %vm486_vm0, %v4699_v38  ;;  %v13200_v16 = vcombine.low %v12127_v26, %v12130_v47  ;;  %v13218_v30 = vrot.slane %v12061_v58, 9 }
 0xad8   : > { %15072 = vmatprep.subr.msk.bf16.mxu1 %vm486_vm0, %v19209_v10  ;;  %v12186_v23 = vsel %vm16300_vm14, %v12184_v36, %v12185_v61  ;;  %v4705_v36 = vld [vmem:[%s19371_s7 + $0x20] sm:$0xf] }
 0xad9   : > { %v13208_v0 = vcombine.low %v12183_v55, %v12186_v23  ;;  %v12280_v44 = vsel %vm486_vm0, %v13200_v16, 0  ;;  %v12431_v23 = vrot.slane %v19156_v52, 5  ;;  %v12301_v52 = vsel %vm486_vm0, %v19209_v10, 0 }
 0xadb   : > { %v12433_v55 = vrot.slane %v12431_v23, 4 }
 0xadf   : > { %13758 = vmatpush3.bf16.xpose.msra.mxu1 %v12277_v63 }
 0xae0   : > { %15073 = vmatprep.subr.msk.bf16.mxu1 %vm486_vm0, %v13208_v0 }
 0xae7   : > { %13760 = vmatpush3.bf16.xpose.msra.mxu1 %v12280_v44 }
 0xae8   : > { %15074 = vmatprep.subr.msk.bf16.mxu1 %vm486_vm0, %v19687_v15 }
 0xae9   : > { %v11303_v54 = vpop.f32.mrb[44].mxu1 }
 0xaea   : > { %v11310_v22 = vadd.f32 %v11303_v54, %v19152_v35  ;;  %v11305_v41 = vpop.f32.mrb[45].mxu1  ;;  %v19695_v35 = vld [vmem:[#allocation34_spill] sm:$0xff] }
 0xaeb   : > { %v11311_v29 = vadd.f32 %v11305_v41, %v19154_v28  ;;  %v11307_v40 = vpop.f32.mrb[46].mxu1  ;;  %v19696_v28 = vld [vmem:[#allocation55_spill] sm:$0xff] }
 0xaec   : > { %v11308_v31 = vpop.f32.mrb[47].mxu1  ;;  %v19698_v27 = vcombine.low %v19696_v28, %v19697_v49 }
 0xaee   : > { %v12289_v45 = vsel %vm486_vm0, %v19698_v27, 0 }
 0xaef   : > { %13762 = vmatpush3.bf16.xpose.msra.mxu1 %v12283_v2 }
 0xaf0   : > { %15075 = vmatprep.subr.msk.bf16.mxu1 %vm486_vm0, %v19691_v5 }
 0xaf7   : > { %13764 = vmatpush3.bf16.xpose.msra.mxu1 %v12286_v14 }
 0xaf8   : > { %15076 = vmatprep.subr.msk.bf16.mxu1 %vm486_vm0, %v19695_v35 }
 0xaff   : > { %13766 = vmatpush3.bf16.xpose.msra.mxu1 %v12289_v45 }
 0xb00   : > { %15077 = vmatprep.subr.msk.bf16.mxu1 %vm486_vm0, %v19699_v4 }
 0xb07   : > { %13768 = vmatpush3.bf16.xpose.msra.mxu1 %v12292_v42 }
 0xb08   : > { %15078 = vmatprep.subr.msk.bf16.mxu1 %vm486_vm0, %v19703_v7 }
 0xb0f   : > { %13770 = vmatpush3.bf16.xpose.msra.mxu1 %v12295_v53 }
 0xb10   : > { %15079 = vmatprep.subr.msk.bf16.mxu1 %vm486_vm0, %v19209_v10 }
 0xb16   : > { %13772 = vmatmul.mubr.msk.bf16.vlgmr.msra.gmra.mrb[60].mxu1 %vm486_vm0, %v4699_v38  ;;  %v19707_v38 = vld [vmem:[#allocation40_spill] sm:$0xff] }
 0xb17   : > { %13774 = vmatpush3.bf16.xpose.msra.mxu1 %v12277_v63  ;;  %13789 = vmatprep.mubr.msk.bf16.mxu1 %vm486_vm0, %v4702_v60  ;;  %v12432_v63 = vsel %vm16300_vm14, %v13218_v30, %v12431_v23 }
 0xb18   : > { %15080 = vmatprep.subr.msk.bf16.mxu1 %vm486_vm0, %v13208_v0 }
 0xb1f   : > { %13776 = vmatpush3.bf16.xpose.msra.mxu1 %v12280_v44 }
 0xb20   : > { %15081 = vmatprep.subr.msk.bf16.mxu1 %vm486_vm0, %v19687_v15 }
 0xb27   : > { %13778 = vmatpush3.bf16.xpose.msra.mxu1 %v12283_v2 }
 0xb28   : > { %15082 = vmatprep.subr.msk.bf16.mxu1 %vm486_vm0, %v19691_v5 }
 0xb29   : > { %v11883_v3 = vpop.f32.mrb[48].mxu1 }
 0xb2a   : > { %v11890_v39 = vadd.f32 %v11883_v3, %v11310_v22  ;;  %v11885_v1 = vpop.f32.mrb[49].mxu1 }
 0xb2b   : > { %v11891_v33 = vadd.f32 %v11885_v1, %v11311_v29  ;;  %v11887_v9 = vpop.f32.mrb[50].mxu1 }
 0xb2c   : > { %v11888_v51 = vpop.f32.mrb[51].mxu1 }
 0xb2f   : > { %13780 = vmatpush3.bf16.xpose.msra.mxu1 %v12286_v14 }
 0xb30   : > { %15083 = vmatprep.subr.msk.bf16.mxu1 %vm486_vm0, %v19695_v35 }
 0xb37   : > { %13782 = vmatpush3.bf16.xpose.msra.mxu1 %v12289_v45 }
 0xb38   : > { %15084 = vmatprep.subr.msk.bf16.mxu1 %vm486_vm0, %v19699_v4 }
 0xb3f   : > { %13784 = vmatpush3.bf16.xpose.msra.mxu1 %v12292_v42 }
 0xb40   : > { %15085 = vmatprep.subr.msk.bf16.mxu1 %vm486_vm0, %v19703_v7 }
 0xb47   : > { %13786 = vmatpush3.bf16.xpose.msra.mxu1 %v12295_v53 }
 0xb48   : > { %15086 = vmatprep.subr.msk.bf16.mxu1 %vm486_vm0, %v19707_v38 }
 0xb4d   : > { %v12492_v57 = vpop.permute.xlu0 %12491 }
 0xb4f   : > { %13788 = vmatpush3.bf16.xpose.msra.mxu1 %v12298_v34 }
 0xb50   : > { %15087 = vmatprep.subr.msk.bf16.mxu1 %vm486_vm0, %v13208_v0  ;;  %v12435_v0 = vsel %vm16300_vm14, %v12433_v55, %v12434_v17 }
 0xb51   : > { %v13219_v56 = vcombine.low %v12432_v63, %v12435_v0 }
 0xb56   : > { %13790 = vmatmul.mubr.msk.bf16.vlgmr.msra.gmra.mrb[64].mxu1 %vm486_vm0, %v4702_v60 }
 0xb57   : > { %13792 = vmatpush3.bf16.xpose.msra.mxu1 %v12280_v44  ;;  %13807 = vmatprep.mubr.msk.bf16.mxu1 %vm486_vm0, %v4705_v36 }
 0xb58   : > { %15088 = vmatprep.subr.msk.bf16.mxu1 %vm486_vm0, %v19687_v15 }
 0xb5f   : > { %13794 = vmatpush3.bf16.xpose.msra.mxu1 %v12283_v2 }
 0xb60   : > { %15089 = vmatprep.subr.msk.bf16.mxu1 %vm486_vm0, %v19691_v5 }
 0xb67   : > { %13796 = vmatpush3.bf16.xpose.msra.mxu1 %v12286_v14 }
 0xb68   : > { %15090 = vmatprep.subr.msk.bf16.mxu1 %vm486_vm0, %v19695_v35 }
 0xb69   : > { %v11959_v62 = vpop.f32.mrb[52].mxu1 }
 0xb6a   : > { %v11966_v11 = vadd.f32 %v11959_v62, %v11890_v39  ;;  %v11961_v19 = vpop.f32.mrb[53].mxu1 }
 0xb6b   : > { %v11967_v13 = vadd.f32 %v11961_v19, %v11891_v33  ;;  %v11963_v61 = vpop.f32.mrb[54].mxu1 }
 0xb6c   : > { %v11964_v18 = vpop.f32.mrb[55].mxu1 }
 0xb6f   : > { %13798 = vmatpush3.bf16.xpose.msra.mxu1 %v12289_v45 }
 0xb70   : > { %15091 = vmatprep.subr.msk.bf16.mxu1 %vm486_vm0, %v19699_v4 }
 0xb77   : > { %13800 = vmatpush3.bf16.xpose.msra.mxu1 %v12292_v42 }
 0xb78   : > { %15092 = vmatprep.subr.msk.bf16.mxu1 %vm486_vm0, %v19703_v7 }
 0xb7f   : > { %13802 = vmatpush3.bf16.xpose.msra.mxu1 %v12295_v53 }
 0xb80   : > { %15093 = vmatprep.subr.msk.bf16.mxu1 %vm486_vm0, %v19707_v38 }
 0xb87   : > { %13804 = vmatpush3.bf16.xpose.msra.mxu1 %v12298_v34 }
 0xb88   : > { %15094 = vmatprep.subr.msk.bf16.mxu1 %vm486_vm0, %v13219_v56 }
 0xb8f   : > { %13806 = vmatpush3.bf16.xpose.msra.mxu1 %v12301_v52 }
 0xb96   : > { %13808 = vmatmul.mubr.msk.bf16.vlgmr.msra.gmra.mrb[68].mxu1 %vm486_vm0, %v4705_v36 }
 0xba9   : > { %v12035_v32 = vpop.f32.mrb[56].mxu1 }
 0xbaa   : > { %v12042_v47 = vadd.f32 %v12035_v32, %v11966_v11  ;;  %v12037_v26 = vpop.f32.mrb[57].mxu1 }
 0xbab   : > { %v12043_v16 = vadd.f32 %v12037_v26, %v11967_v13  ;;  %v12039_v44 = vpop.f32.mrb[58].mxu1 }
 0xbac   : > { %v12040_v15 = vpop.f32.mrb[59].mxu1 }
 0xbe9   : > { %v12355_v54 = vpop.f32.mrb[60].mxu1 }
 0xbea   : > { %v12362_v59 = vadd.f32 %v12355_v54, %v12042_v47  ;;  %v12357_v22 = vpop.f32.mrb[61].mxu1 }
 0xbeb   : > { %v12363_v41 = vadd.f32 %v12357_v22, %v12043_v16  ;;  %v12359_v29 = vpop.f32.mrb[62].mxu1 }
 0xbec   : > { %v12360_v40 = vpop.f32.mrb[63].mxu1 }
 0xc29   : > { %v12417_v31 = vpop.f32.mrb[64].mxu1 }
 0xc2a   : > { %v12424_v21 = vadd.f32 %v12417_v31, %v12362_v59  ;;  %v12419_v10 = vpop.f32.mrb[65].mxu1 }
 0xc2b   : > { %v12425_v24 = vadd.f32 %v12419_v10, %v12363_v41  ;;  %v12421_v37 = vpop.f32.mrb[66].mxu1 }
 0xc2c   : > { %v12422_v2 = vpop.f32.mrb[67].mxu1 }
 0xc69   : > { %v12479_v5 = vpop.f32.mrb[68].mxu1 }
 0xc6a   : > { %v12486_v46 = vadd.f32 %v12479_v5, %v12424_v21  ;;  %v12481_v50 = vpop.f32.mrb[69].mxu1 }
 0xc6b   : > { %v12487_v14 = vadd.f32 %v12481_v50, %v12425_v24  ;;  %v12483_v35 = vpop.f32.mrb[70].mxu1 }
 0xc6c   : > { %v12494_v28 = vadd.f32 %v12492_v57, %v12486_v46  ;;  %v12484_v49 = vpop.f32.mrb[71].mxu1 }
 0xc6d   : > { %v12495_v27 = vadd.f32 %v12492_v57, %v12487_v14 }
 0xc6e   : > { %v12496_v45 = vmax.f32 %v12494_v28, 0.0 }
 0xc6f   : > { %v12497_v4 = vmax.f32 %v12495_v27, 0.0 }
 0xc70   : > { %12498 = vst [vmem:[%s340_s16] sm:$0xff] %v12496_v45 }
 0xc71   : > { %12499 = vst [vmem:[%s340_s16 + $0x8] sm:$0xff] %v12497_v4 }
 0xc72   : > { %15273 = shalt.err (!%p15270_p3)
}
 0xc73   : > { %s15274_s28 = scalar_lea.hbm %s19322_s23, 256  ;;  %s15278_s16 = scalar_lea.hbm %s19373_s9, 512 }
 0xc74   : > { %p15275_p4 = scmp.ne.s32.totalorder %s19322_s23, %s15274_s28  ;;  %p15279_p9 = scmp.lt.u32.totalorder %s19322_s23, %s19373_s9 }
 0xc75   : > { %p15280_p10 = scmp.lt.u32.totalorder %s15278_s16, %s15274_s28  ;;  %p15282_p12 = scmp.lt.u32.totalorder %s15274_s28, %s19322_s23 }
 0xc76   : > { %p15276_p7 = pnand %p15275_p4, %p15417_p5 }
 0xc77   : > { %p15281_p11 = por %p15280_p10, %p15279_p9 }
 0xc78   : > { %p15277_p8 = pneg %p15276_p7 }
 0xc79   : > { %p15283_p13 = por %p15282_p12, %p15281_p11 }
 0xc7b   : > { %p15284_p0 = pnand %p15283_p13, %p15277_p8 }
 0xc7d   : > { %15287 = shalt.err (!%p15284_p0)
}
 0xc7e   : > { %15095 = dma.vmem_to_hbm [thread:$0]  (%p15417_p5), %s19324_s17, 256, %s19322_s23, %s12501_s24  }
 0xc7f PF: > { %p15101_p1 = scmp.ge.s32.totalorder %s15322_s12, 2  ;;  %s12527_s26 = sand.u32 1, %s15310_s30  }
 0xc80   : > { %s12528_s13 = scalar_lea.sflag [#allocation6], %s12527_s26 }
 0xc81   : > { %p15098_p2 = pnand %p15101_p1, %p15421_p6 }
 0xc83   : > { %15305 = dma.done.wait (!%p15098_p2), %s12528_s13, 256  }
 0xc84   : > { %15307 = vsyncadd (!%p15098_p2), %s12528_s13, 4294967040  ;;  %p19_p3 = scmp.ge.s32.totalorder %s15404_s15, 4   ;;  %s19708_s30 = smov %s15314_s10 }
 0xc85   : > { %s19709_s10 = smov %s15318_s11  ;;  %s19710_s11 = smov %s15415_s18 }
 0xc86   : > { %s19711_s12 = smov %s15404_s15  ;;  %21 = sbr.rel (!%p19_p3) target bundleno = 3 (0x3), region = 97 }
 0xc8d   :  { %12533 = vsyncpa [#allocation6], 1 }
 0xc8e   :  { %12535 = vsyncpa [#allocation6 + $0x1], 1 }

</bundles_post_ra>
